<compile_context>
chip_gen: v7x
topology: tpu7x:2x2x1
jax: 0.10.0
libtpu: 0.0.40
codegen_flags: <defaults>
</compile_context>

<pallas_src>
import numpy as np
import jax
import jax.numpy as jnp
from jax import lax
from jax.experimental import pallas as pl
from jax.experimental.pallas import tpu as pltpu

T_IN = 750                       # time samples
PAD1 = 25                        # first conv "same" padding
K1 = 51                          # first conv kernel width
T_P1 = T_IN + 2 * PAD1           # 800
T_POOL4 = (T_IN - 4) // 4 + 1    # 187  after AvgPool2d((1,4))
PAD2 = 7                         # separable conv padding
K2 = 15                          # separable conv kernel width
T_P2 = T_POOL4 + 2 * PAD2        # 201
T_POOL8 = (T_POOL4 - 8) // 8 + 1 # 23   after AvgPool2d((1,8))
FLAT = 32 * T_POOL8              # 736  -> Linear(736, 2)
B_BLK = 4                        # batch elements per grid step (M = 128 rows)


def _elu(x):
    # ELU(alpha=1): x if x > 0 else exp(x) - 1
    return jnp.where(x > 0, x, jnp.exp(jnp.minimum(x, 0.0)) - 1.0)


# --------------------------------- kernel -----------------------------------

def eegnet_kernel(x_ref, wf_ref, bf_ref, p4_ref, ws_ref, bs_ref, wp_ref,
                  bfc_ref, out_ref):
    b_blk = out_ref.shape[1]
    x = x_ref[...]                                   # (2*B_BLK, 800) f32

    # ---- fused first_conv + depthwise conv (+ folded BN1a, BN1b, BN2) ------
    # tap-major im2col: one lane-shifted slice per tap covers all
    # (batch, electrode-row) sublanes at once -> 51 slices total per step.
    h = jnp.concatenate([x[:, k:k + T_IN] for k in range(K1)], axis=0)
    h = h.astype(jnp.bfloat16)                       # (51*2*B_BLK, 750)
    z = jnp.dot(wf_ref[...], h, preferred_element_type=jnp.float32)
    z = _elu(z + bf_ref[...])                        # (32*B_BLK, 750) f32
    # Dropout(p=0.25): identity in eval mode.

    # ---- AvgPool2d((1,4)) fused with the zero pad of separable_conv --------
    zp = jnp.dot(z.astype(jnp.bfloat16), p4_ref[...],
                 preferred_element_type=jnp.float32)  # (32*B_BLK, 201)
    zp = zp.astype(jnp.bfloat16)

    # ---- separable_conv (+ folded BN3) as a single matmul ------------------
    hs = jnp.concatenate([zp[:, k:k + T_POOL4] for k in range(K2)], axis=0)
    u = jnp.dot(ws_ref[...], hs, preferred_element_type=jnp.float32)
    u = _elu(u + bs_ref[...])                        # (32*B_BLK, 187) f32
    # Dropout identity; AvgPool2d((1,8)) + Flatten + Linear folded into WP.

    # ---- classification epilogue (one tiny store per grid step) ------------
    cols = []
    for o in range(2):
        pr = (u * wp_ref[o]).reshape(b_blk, 32, T_POOL4)
        s = jnp.sum(pr, axis=2)                      # (B_BLK, 32)
        cols.append(jnp.sum(s, axis=1, keepdims=True))
    out_ref[0] = jnp.concatenate(cols, axis=1) + bfc_ref[...]   # (B_BLK, 2)


def eegnet_forward(x, p, b_blk=B_BLK):
    """x: NCHW (B, 1, 2, 750) float32 -> logits (B, 2).

    `p` must come from prepare_kernel_params(raw, b_blk) with the same b_blk.
    """
    B = x.shape[0]
    n_blk = -(-B // b_blk)
    b_pad = n_blk * b_blk
    x2 = x.reshape(B, 2, T_IN)
    x2 = jnp.pad(x2, ((0, b_pad - B), (0, 0), (PAD1, PAD1)))
    xrows = x2.reshape(b_pad * 2, T_P1)              # row = batch*2 + electrode

    def const_spec(arr):
        nd = arr.ndim
        return pl.BlockSpec(arr.shape, lambda i, _n=nd: (0,) * _n)

    out = pl.pallas_call(
        eegnet_kernel,
        out_shape=jax.ShapeDtypeStruct((n_blk, b_blk, 2), jnp.float32),
        grid_spec=pltpu.PrefetchScalarGridSpec(
            num_scalar_prefetch=0,
            grid=(n_blk,),
            in_specs=[
                pl.BlockSpec((b_blk * 2, T_P1), lambda i: (i, 0)),   # input rows
                const_spec(p["wf"]), const_spec(p["bf"]), const_spec(p["p4"]),
                const_spec(p["ws"]), const_spec(p["bs"]), const_spec(p["wp"]),
                const_spec(p["bfc"]),
            ],
            out_specs=pl.BlockSpec((1, b_blk, 2), lambda i: (i, 0, 0)),
        ),
        compiler_params=pltpu.CompilerParams(
            dimension_semantics=("parallel",)),
    )(xrows, p["wf"], p["bf"], p["p4"], p["ws"], p["bs"], p["wp"], p["bfc"])
    return out.reshape(b_pad, 2)[:B]


# ---------------- parameter construction (deterministic, in-script) ---------

def fold_bn(gamma, beta, mean, var, eps=1e-5):
    scale = gamma / jnp.sqrt(var + eps)
    shift = beta - mean * scale
    return scale, shift


def make_pool_matrices():
    # AvgPool2d((1,4)) over 750 -> 187, fused with zero-pad 7 for separable_conv
    P4 = np.zeros((T_IN, T_P2), np.float32)
    for j in range(T_POOL4):
        P4[4 * j:4 * j + 4, PAD2 + j] = 0.25
    # AvgPool2d((1,8)) over 187 -> 23
    P8 = np.zeros((T_POOL4, T_POOL8), np.float32)
    for j in range(T_POOL8):
        P8[8 * j:8 * j + 8, j] = 0.125
    return P4, P8


def make_params(key):
    ks = jax.random.split(key, 9)

    def bn_raw(k, c):
        kg, kb, km, kv = jax.random.split(k, 4)
        gamma = 1.0 + 0.1 * jax.random.normal(kg, (c,), jnp.float32)
        beta = 0.1 * jax.random.normal(kb, (c,), jnp.float32)
        mean = 0.1 * jax.random.normal(km, (c,), jnp.float32)
        var = 0.5 + jax.random.uniform(kv, (c,), jnp.float32)
        return gamma, beta, mean, var

    return dict(
        w1=0.1 * jax.random.normal(ks[0], (16, K1), jnp.float32),     # (16,1,1,51)
        bn1a=bn_raw(ks[1], 16),
        bn1b=bn_raw(ks[2], 16),
        wdw=0.2 * jax.random.normal(ks[3], (32, 2), jnp.float32),     # (32,1,2,1)
        bn2=bn_raw(ks[4], 32),
        wsep=0.1 * jax.random.normal(ks[5], (32, 32, K2), jnp.float32),  # (32,32,1,15)
        bn3=bn_raw(ks[6], 32),
        wfc=0.05 * jax.random.normal(ks[7], (2, FLAT), jnp.float32),
        bfc=0.1 * jax.random.normal(ks[8], (2,), jnp.float32),
    )


def prepare_kernel_params(raw, b_blk=B_BLK):
    s1a, t1a = fold_bn(*raw["bn1a"])
    s1b, t1b = fold_bn(*raw["bn1b"])
    s2, t2 = fold_bn(*raw["bn2"])
    s3, t3 = fold_bn(*raw["bn3"])
    sc1 = np.asarray(s1a * s1b)            # BN1a o BN1b combined scale
    tc1 = np.asarray(t1a * s1b + t1b)      # combined shift
    s2, t2 = np.asarray(s2), np.asarray(t2)
    s3, t3 = np.asarray(s3), np.asarray(t3)
    w1 = np.asarray(raw["w1"])             # (16, 51)
    wdw = np.asarray(raw["wdw"])           # (32, 2)
    wsep = np.asarray(raw["wsep"])         # (32, 32, 15)
    wfc = np.asarray(raw["wfc"])           # (2, 736)
    bfc = np.asarray(raw["bfc"])           # (2,)

    # fused front weight: conv1 * BN1 scale * depthwise mix * BN2 scale
    # columns are tap-major: [o, 2*k + r]
    wf_small = np.zeros((32, K1 * 2), np.float32)
    for o in range(32):
        g = o // 2
        for r in range(2):
            wf_small[o, r::2] = s2[o] * sc1[g] * wdw[o, r] * w1[g, :]
    grp = np.arange(32) // 2
    bfront = s2 * tc1[grp] * (wdw[:, 0] + wdw[:, 1]) + t2   # BN1 shift -> bias

    # separable weight with BN3 scale folded; columns [o, 32*k + c]
    ws_small = (s3[:, None, None] * np.transpose(wsep, (0, 2, 1))
                ).reshape(32, K2 * 32)

    # block-diagonal batched weights: batch b occupies output rows b*32+o and
    # the matching im2col row group inside each tap block.
    wf_big = np.zeros((32 * b_blk, K1 * 2 * b_blk), np.float32)
    ws_big = np.zeros((32 * b_blk, K2 * 32 * b_blk), np.float32)
    for b in range(b_blk):
        cols_f = (2 * b_blk * np.arange(K1)[:, None]
                  + 2 * b + np.arange(2)[None, :]).reshape(-1)
        wf_big[b * 32:(b + 1) * 32, cols_f] = wf_small
        cols_s = (32 * b_blk * np.arange(K2)[:, None]
                  + 32 * b + np.arange(32)[None, :]).reshape(-1)
        ws_big[b * 32:(b + 1) * 32, cols_s] = ws_small

    P4, P8 = make_pool_matrices()
    wfc3 = wfc.reshape(2, 32, T_POOL8)                 # flatten order = c*23 + t
    wp = np.einsum('ocj,tj->oct', wfc3, P8)            # pool8 + FC folded (2,32,187)

    return dict(
        wf=jnp.asarray(wf_big, jnp.bfloat16),
        bf=jnp.asarray(np.tile(bfront, b_blk).reshape(-1, 1), jnp.float32),
        p4=jnp.asarray(P4, jnp.bfloat16),
        ws=jnp.asarray(ws_big, jnp.bfloat16),
        bs=jnp.asarray(np.tile(t3, b_blk).reshape(-1, 1), jnp.float32),
        wp=jnp.asarray(np.tile(wp, (1, b_blk, 1)), jnp.float32),
        bfc=jnp.asarray(bfc.reshape(1, 2), jnp.float32),
    )


# ---------------- pure-JAX reference (for correctness check) ----------------

def reference_forward(x, raw):
    B = x.shape[0]
    dn = ("NCHW", "OIHW", "NCHW")
    hp = lax.Precision.HIGHEST

    def bn(t, p):
        gamma, beta, mean, var = p
        s = gamma / jnp.sqrt(var + 1e-5)
        sh = beta - mean * s
        return t * s[None, :, None, None] + sh[None, :, None, None]

    y = lax.conv_general_dilated(x, raw["w1"][:, None, None, :], (1, 1),
                                 ((0, 0), (PAD1, PAD1)),
                                 dimension_numbers=dn, precision=hp)
    y = bn(bn(y, raw["bn1a"]), raw["bn1b"])
    z = lax.conv_general_dilated(y, raw["wdw"].reshape(32, 1, 2, 1), (1, 1),
                                 ((0, 0), (0, 0)), dimension_numbers=dn,
                                 feature_group_count=16, precision=hp)
    z = jax.nn.elu(bn(z, raw["bn2"]))
    z = z[..., :4 * T_POOL4].reshape(B, 32, 1, T_POOL4, 4).mean(-1)
    u = lax.conv_general_dilated(z, raw["wsep"][:, :, None, :], (1, 1),
                                 ((0, 0), (PAD2, PAD2)), dimension_numbers=dn,
                                 precision=hp)
    u = jax.nn.elu(bn(u, raw["bn3"]))
    u = u[..., :8 * T_POOL8].reshape(B, 32, 1, T_POOL8, 8).mean(-1)
    flat = u.reshape(B, -1)
    return flat @ raw["wfc"].T + raw["bfc"][None, :]


if __name__ == "__main__":
    key = jax.random.PRNGKey(0)
    kx, kp = jax.random.split(key)
    # EEGNet input: NCHW (batch, 1 channel, 2 electrode rows, 750 time samples)
    B = 8
    x = jax.random.normal(kx, (B, 1, 2, T_IN), jnp.float32)
    raw = make_params(kp)
    kparams = prepare_kernel_params(raw, B_BLK)

    out = eegnet_forward(x, kparams)
    out = jax.block_until_ready(out)
    assert out.shape == (B, 2), out.shape

    ref = reference_forward(x, raw)
    np.testing.assert_allclose(np.asarray(out), np.asarray(ref),
                               atol=2e-2, rtol=2e-2)
    print("KERNEL_OK")
</pallas_src>

<mosaic_0001>
module attributes {stable_mosaic.version = 11 : i64} {
  func.func @eegnet_kernel(%arg0: i32, %arg1: memref<8x800xf32, #tpu.memory_space<vmem>>, %arg2: memref<128x408xbf16, #tpu.memory_space<vmem>>, %arg3: memref<128x1xf32, #tpu.memory_space<vmem>>, %arg4: memref<750x201xbf16, #tpu.memory_space<vmem>>, %arg5: memref<128x1920xbf16, #tpu.memory_space<vmem>>, %arg6: memref<128x1xf32, #tpu.memory_space<vmem>>, %arg7: memref<2x128x187xf32, #tpu.memory_space<vmem>>, %arg8: memref<1x2xf32, #tpu.memory_space<vmem>>, %arg9: memref<1x4x2xf32, #tpu.memory_space<vmem>>) attributes {dimension_semantics = [#tpu.dimension_semantics<parallel>], iteration_bounds = array<i64: 2>, scalar_prefetch = 0 : i64, scratch_operands = 0 : i64, tpu.core_type = #tpu.core_type<tc>, window_params = [{transform_indices = @transform_0, window_bounds = array<i64: 8, 800>}, {pipeline_mode = #tpu.pipeline_mode<synchronous>, transform_indices = @transform_1, window_bounds = array<i64: 128, 408>}, {pipeline_mode = #tpu.pipeline_mode<synchronous>, transform_indices = @transform_2, window_bounds = array<i64: 128, 1>}, {pipeline_mode = #tpu.pipeline_mode<synchronous>, transform_indices = @transform_3, window_bounds = array<i64: 750, 201>}, {pipeline_mode = #tpu.pipeline_mode<synchronous>, transform_indices = @transform_4, window_bounds = array<i64: 128, 1920>}, {pipeline_mode = #tpu.pipeline_mode<synchronous>, transform_indices = @transform_5, window_bounds = array<i64: 128, 1>}, {pipeline_mode = #tpu.pipeline_mode<synchronous>, transform_indices = @transform_6, window_bounds = array<i64: 2, 128, 187>}, {pipeline_mode = #tpu.pipeline_mode<synchronous>, transform_indices = @transform_7, window_bounds = array<i64: 1, 2>}, {transform_indices = @transform_8, window_bounds = array<i64: 1, 4, 2>}]} {
    %c0 = arith.constant 0 : index
    %c0_0 = arith.constant 0 : index
    %0 = vector.load %arg1[%c0, %c0_0] : memref<8x800xf32, #tpu.memory_space<vmem>>, vector<8x800xf32>
    %1 = vector.extract_strided_slice %0 {offsets = [0, 0], sizes = [8, 750], strides = [1, 1]} : vector<8x800xf32> to vector<8x750xf32>
    %2 = vector.extract_strided_slice %0 {offsets = [0, 1], sizes = [8, 750], strides = [1, 1]} : vector<8x800xf32> to vector<8x750xf32>
    %3 = vector.extract_strided_slice %0 {offsets = [0, 2], sizes = [8, 750], strides = [1, 1]} : vector<8x800xf32> to vector<8x750xf32>
    %4 = vector.extract_strided_slice %0 {offsets = [0, 3], sizes = [8, 750], strides = [1, 1]} : vector<8x800xf32> to vector<8x750xf32>
    %5 = vector.extract_strided_slice %0 {offsets = [0, 4], sizes = [8, 750], strides = [1, 1]} : vector<8x800xf32> to vector<8x750xf32>
    %6 = vector.extract_strided_slice %0 {offsets = [0, 5], sizes = [8, 750], strides = [1, 1]} : vector<8x800xf32> to vector<8x750xf32>
    %7 = vector.extract_strided_slice %0 {offsets = [0, 6], sizes = [8, 750], strides = [1, 1]} : vector<8x800xf32> to vector<8x750xf32>
    %8 = vector.extract_strided_slice %0 {offsets = [0, 7], sizes = [8, 750], strides = [1, 1]} : vector<8x800xf32> to vector<8x750xf32>
    %9 = vector.extract_strided_slice %0 {offsets = [0, 8], sizes = [8, 750], strides = [1, 1]} : vector<8x800xf32> to vector<8x750xf32>
    %10 = vector.extract_strided_slice %0 {offsets = [0, 9], sizes = [8, 750], strides = [1, 1]} : vector<8x800xf32> to vector<8x750xf32>
    %11 = vector.extract_strided_slice %0 {offsets = [0, 10], sizes = [8, 750], strides = [1, 1]} : vector<8x800xf32> to vector<8x750xf32>
    %12 = vector.extract_strided_slice %0 {offsets = [0, 11], sizes = [8, 750], strides = [1, 1]} : vector<8x800xf32> to vector<8x750xf32>
    %13 = vector.extract_strided_slice %0 {offsets = [0, 12], sizes = [8, 750], strides = [1, 1]} : vector<8x800xf32> to vector<8x750xf32>
    %14 = vector.extract_strided_slice %0 {offsets = [0, 13], sizes = [8, 750], strides = [1, 1]} : vector<8x800xf32> to vector<8x750xf32>
    %15 = vector.extract_strided_slice %0 {offsets = [0, 14], sizes = [8, 750], strides = [1, 1]} : vector<8x800xf32> to vector<8x750xf32>
    %16 = vector.extract_strided_slice %0 {offsets = [0, 15], sizes = [8, 750], strides = [1, 1]} : vector<8x800xf32> to vector<8x750xf32>
    %17 = vector.extract_strided_slice %0 {offsets = [0, 16], sizes = [8, 750], strides = [1, 1]} : vector<8x800xf32> to vector<8x750xf32>
    %18 = vector.extract_strided_slice %0 {offsets = [0, 17], sizes = [8, 750], strides = [1, 1]} : vector<8x800xf32> to vector<8x750xf32>
    %19 = vector.extract_strided_slice %0 {offsets = [0, 18], sizes = [8, 750], strides = [1, 1]} : vector<8x800xf32> to vector<8x750xf32>
    %20 = vector.extract_strided_slice %0 {offsets = [0, 19], sizes = [8, 750], strides = [1, 1]} : vector<8x800xf32> to vector<8x750xf32>
    %21 = vector.extract_strided_slice %0 {offsets = [0, 20], sizes = [8, 750], strides = [1, 1]} : vector<8x800xf32> to vector<8x750xf32>
    %22 = vector.extract_strided_slice %0 {offsets = [0, 21], sizes = [8, 750], strides = [1, 1]} : vector<8x800xf32> to vector<8x750xf32>
    %23 = vector.extract_strided_slice %0 {offsets = [0, 22], sizes = [8, 750], strides = [1, 1]} : vector<8x800xf32> to vector<8x750xf32>
    %24 = vector.extract_strided_slice %0 {offsets = [0, 23], sizes = [8, 750], strides = [1, 1]} : vector<8x800xf32> to vector<8x750xf32>
    %25 = vector.extract_strided_slice %0 {offsets = [0, 24], sizes = [8, 750], strides = [1, 1]} : vector<8x800xf32> to vector<8x750xf32>
    %26 = vector.extract_strided_slice %0 {offsets = [0, 25], sizes = [8, 750], strides = [1, 1]} : vector<8x800xf32> to vector<8x750xf32>
    %27 = vector.extract_strided_slice %0 {offsets = [0, 26], sizes = [8, 750], strides = [1, 1]} : vector<8x800xf32> to vector<8x750xf32>
    %28 = vector.extract_strided_slice %0 {offsets = [0, 27], sizes = [8, 750], strides = [1, 1]} : vector<8x800xf32> to vector<8x750xf32>
    %29 = vector.extract_strided_slice %0 {offsets = [0, 28], sizes = [8, 750], strides = [1, 1]} : vector<8x800xf32> to vector<8x750xf32>
    %30 = vector.extract_strided_slice %0 {offsets = [0, 29], sizes = [8, 750], strides = [1, 1]} : vector<8x800xf32> to vector<8x750xf32>
    %31 = vector.extract_strided_slice %0 {offsets = [0, 30], sizes = [8, 750], strides = [1, 1]} : vector<8x800xf32> to vector<8x750xf32>
    %32 = vector.extract_strided_slice %0 {offsets = [0, 31], sizes = [8, 750], strides = [1, 1]} : vector<8x800xf32> to vector<8x750xf32>
    %33 = vector.extract_strided_slice %0 {offsets = [0, 32], sizes = [8, 750], strides = [1, 1]} : vector<8x800xf32> to vector<8x750xf32>
    %34 = vector.extract_strided_slice %0 {offsets = [0, 33], sizes = [8, 750], strides = [1, 1]} : vector<8x800xf32> to vector<8x750xf32>
    %35 = vector.extract_strided_slice %0 {offsets = [0, 34], sizes = [8, 750], strides = [1, 1]} : vector<8x800xf32> to vector<8x750xf32>
    %36 = vector.extract_strided_slice %0 {offsets = [0, 35], sizes = [8, 750], strides = [1, 1]} : vector<8x800xf32> to vector<8x750xf32>
    %37 = vector.extract_strided_slice %0 {offsets = [0, 36], sizes = [8, 750], strides = [1, 1]} : vector<8x800xf32> to vector<8x750xf32>
    %38 = vector.extract_strided_slice %0 {offsets = [0, 37], sizes = [8, 750], strides = [1, 1]} : vector<8x800xf32> to vector<8x750xf32>
    %39 = vector.extract_strided_slice %0 {offsets = [0, 38], sizes = [8, 750], strides = [1, 1]} : vector<8x800xf32> to vector<8x750xf32>
    %40 = vector.extract_strided_slice %0 {offsets = [0, 39], sizes = [8, 750], strides = [1, 1]} : vector<8x800xf32> to vector<8x750xf32>
    %41 = vector.extract_strided_slice %0 {offsets = [0, 40], sizes = [8, 750], strides = [1, 1]} : vector<8x800xf32> to vector<8x750xf32>
    %42 = vector.extract_strided_slice %0 {offsets = [0, 41], sizes = [8, 750], strides = [1, 1]} : vector<8x800xf32> to vector<8x750xf32>
    %43 = vector.extract_strided_slice %0 {offsets = [0, 42], sizes = [8, 750], strides = [1, 1]} : vector<8x800xf32> to vector<8x750xf32>
    %44 = vector.extract_strided_slice %0 {offsets = [0, 43], sizes = [8, 750], strides = [1, 1]} : vector<8x800xf32> to vector<8x750xf32>
    %45 = vector.extract_strided_slice %0 {offsets = [0, 44], sizes = [8, 750], strides = [1, 1]} : vector<8x800xf32> to vector<8x750xf32>
    %46 = vector.extract_strided_slice %0 {offsets = [0, 45], sizes = [8, 750], strides = [1, 1]} : vector<8x800xf32> to vector<8x750xf32>
    %47 = vector.extract_strided_slice %0 {offsets = [0, 46], sizes = [8, 750], strides = [1, 1]} : vector<8x800xf32> to vector<8x750xf32>
    %48 = vector.extract_strided_slice %0 {offsets = [0, 47], sizes = [8, 750], strides = [1, 1]} : vector<8x800xf32> to vector<8x750xf32>
    %49 = vector.extract_strided_slice %0 {offsets = [0, 48], sizes = [8, 750], strides = [1, 1]} : vector<8x800xf32> to vector<8x750xf32>
    %50 = vector.extract_strided_slice %0 {offsets = [0, 49], sizes = [8, 750], strides = [1, 1]} : vector<8x800xf32> to vector<8x750xf32>
    %51 = vector.extract_strided_slice %0 {offsets = [0, 50], sizes = [8, 750], strides = [1, 1]} : vector<8x800xf32> to vector<8x750xf32>
    %52 = tpu.concatenate %1, %2, %3, %4, %5, %6, %7, %8, %9, %10, %11, %12, %13, %14, %15, %16 in 0 : vector<8x750xf32>, vector<8x750xf32>, vector<8x750xf32>, vector<8x750xf32>, vector<8x750xf32>, vector<8x750xf32>, vector<8x750xf32>, vector<8x750xf32>, vector<8x750xf32>, vector<8x750xf32>, vector<8x750xf32>, vector<8x750xf32>, vector<8x750xf32>, vector<8x750xf32>, vector<8x750xf32>, vector<8x750xf32> -> vector<128x750xf32>
    %53 = tpu.concatenate %17, %18, %19, %20, %21, %22, %23, %24, %25, %26, %27, %28, %29, %30, %31, %32 in 0 : vector<8x750xf32>, vector<8x750xf32>, vector<8x750xf32>, vector<8x750xf32>, vector<8x750xf32>, vector<8x750xf32>, vector<8x750xf32>, vector<8x750xf32>, vector<8x750xf32>, vector<8x750xf32>, vector<8x750xf32>, vector<8x750xf32>, vector<8x750xf32>, vector<8x750xf32>, vector<8x750xf32>, vector<8x750xf32> -> vector<128x750xf32>
    %54 = tpu.concatenate %33, %34, %35, %36, %37, %38, %39, %40, %41, %42, %43, %44, %45, %46, %47, %48 in 0 : vector<8x750xf32>, vector<8x750xf32>, vector<8x750xf32>, vector<8x750xf32>, vector<8x750xf32>, vector<8x750xf32>, vector<8x750xf32>, vector<8x750xf32>, vector<8x750xf32>, vector<8x750xf32>, vector<8x750xf32>, vector<8x750xf32>, vector<8x750xf32>, vector<8x750xf32>, vector<8x750xf32>, vector<8x750xf32> -> vector<128x750xf32>
    %55 = tpu.concatenate %49, %50, %51 in 0 : vector<8x750xf32>, vector<8x750xf32>, vector<8x750xf32> -> vector<24x750xf32>
    %56 = tpu.concatenate %52, %53, %54, %55 in 0 : vector<128x750xf32>, vector<128x750xf32>, vector<128x750xf32>, vector<24x750xf32> -> vector<408x750xf32>
    %57 = arith.truncf %56 : vector<408x750xf32> to vector<408x750xbf16>
    %c0_1 = arith.constant 0 : index
    %c0_2 = arith.constant 0 : index
    %58 = vector.load %arg2[%c0_1, %c0_2] : memref<128x408xbf16, #tpu.memory_space<vmem>>, vector<128x408xbf16>
    %cst = arith.constant dense<0.000000e+00> : vector<128x750xf32>
    %59 = tpu.matmul %58, %57, %cst {dimension_numbers = #tpu.dot_dimension_numbers<[1], [0], [0], [1], [0, 0, 1, 1], [], []>} : vector<128x408xbf16>, vector<408x750xbf16>, vector<128x750xf32> -> vector<128x750xf32>
    %c0_3 = arith.constant 0 : index
    %c0_4 = arith.constant 0 : index
    %60 = vector.load %arg3[%c0_3, %c0_4] : memref<128x1xf32, #tpu.memory_space<vmem>>, vector<128x1xf32>
    %61 = vector.broadcast %60 : vector<128x1xf32> to vector<128x750xf32>
    %62 = arith.addf %59, %61 : vector<128x750xf32>
    %cst_5 = arith.constant 0.000000e+00 : f32
    %63 = vector.broadcast %cst_5 : f32 to vector<128x750xf32>
    %64 = arith.cmpf ogt, %62, %63 : vector<128x750xf32>
    %cst_6 = arith.constant 0.000000e+00 : f32
    %65 = vector.broadcast %cst_6 : f32 to vector<128x750xf32>
    %66 = arith.minimumf %62, %65 : vector<128x750xf32>
    %67 = math.exp %66 : vector<128x750xf32>
    %cst_7 = arith.constant 1.000000e+00 : f32
    %68 = vector.broadcast %cst_7 : f32 to vector<128x750xf32>
    %69 = arith.subf %67, %68 : vector<128x750xf32>
    %70 = arith.select %64, %62, %69 : vector<128x750xi1>, vector<128x750xf32>
    %71 = arith.truncf %70 : vector<128x750xf32> to vector<128x750xbf16>
    %c0_8 = arith.constant 0 : index
    %c0_9 = arith.constant 0 : index
    %72 = vector.load %arg4[%c0_8, %c0_9] : memref<750x201xbf16, #tpu.memory_space<vmem>>, vector<750x201xbf16>
    %cst_10 = arith.constant dense<0.000000e+00> : vector<128x201xf32>
    %73 = tpu.matmul %71, %72, %cst_10 {dimension_numbers = #tpu.dot_dimension_numbers<[1], [0], [0], [1], [0, 0, 1, 1], [], []>} : vector<128x750xbf16>, vector<750x201xbf16>, vector<128x201xf32> -> vector<128x201xf32>
    %74 = arith.truncf %73 : vector<128x201xf32> to vector<128x201xbf16>
    %75 = vector.extract_strided_slice %74 {offsets = [0, 0], sizes = [128, 187], strides = [1, 1]} : vector<128x201xbf16> to vector<128x187xbf16>
    %76 = vector.extract_strided_slice %74 {offsets = [0, 1], sizes = [128, 187], strides = [1, 1]} : vector<128x201xbf16> to vector<128x187xbf16>
    %77 = vector.extract_strided_slice %74 {offsets = [0, 2], sizes = [128, 187], strides = [1, 1]} : vector<128x201xbf16> to vector<128x187xbf16>
    %78 = vector.extract_strided_slice %74 {offsets = [0, 3], sizes = [128, 187], strides = [1, 1]} : vector<128x201xbf16> to vector<128x187xbf16>
    %79 = vector.extract_strided_slice %74 {offsets = [0, 4], sizes = [128, 187], strides = [1, 1]} : vector<128x201xbf16> to vector<128x187xbf16>
    %80 = vector.extract_strided_slice %74 {offsets = [0, 5], sizes = [128, 187], strides = [1, 1]} : vector<128x201xbf16> to vector<128x187xbf16>
    %81 = vector.extract_strided_slice %74 {offsets = [0, 6], sizes = [128, 187], strides = [1, 1]} : vector<128x201xbf16> to vector<128x187xbf16>
    %82 = vector.extract_strided_slice %74 {offsets = [0, 7], sizes = [128, 187], strides = [1, 1]} : vector<128x201xbf16> to vector<128x187xbf16>
    %83 = vector.extract_strided_slice %74 {offsets = [0, 8], sizes = [128, 187], strides = [1, 1]} : vector<128x201xbf16> to vector<128x187xbf16>
    %84 = vector.extract_strided_slice %74 {offsets = [0, 9], sizes = [128, 187], strides = [1, 1]} : vector<128x201xbf16> to vector<128x187xbf16>
    %85 = vector.extract_strided_slice %74 {offsets = [0, 10], sizes = [128, 187], strides = [1, 1]} : vector<128x201xbf16> to vector<128x187xbf16>
    %86 = vector.extract_strided_slice %74 {offsets = [0, 11], sizes = [128, 187], strides = [1, 1]} : vector<128x201xbf16> to vector<128x187xbf16>
    %87 = vector.extract_strided_slice %74 {offsets = [0, 12], sizes = [128, 187], strides = [1, 1]} : vector<128x201xbf16> to vector<128x187xbf16>
    %88 = vector.extract_strided_slice %74 {offsets = [0, 13], sizes = [128, 187], strides = [1, 1]} : vector<128x201xbf16> to vector<128x187xbf16>
    %89 = vector.extract_strided_slice %74 {offsets = [0, 14], sizes = [128, 187], strides = [1, 1]} : vector<128x201xbf16> to vector<128x187xbf16>
    %90 = tpu.concatenate %75, %76, %77, %78, %79, %80, %81, %82, %83, %84, %85, %86, %87, %88, %89 in 0 : vector<128x187xbf16>, vector<128x187xbf16>, vector<128x187xbf16>, vector<128x187xbf16>, vector<128x187xbf16>, vector<128x187xbf16>, vector<128x187xbf16>, vector<128x187xbf16>, vector<128x187xbf16>, vector<128x187xbf16>, vector<128x187xbf16>, vector<128x187xbf16>, vector<128x187xbf16>, vector<128x187xbf16>, vector<128x187xbf16> -> vector<1920x187xbf16>
    %c0_11 = arith.constant 0 : index
    %c0_12 = arith.constant 0 : index
    %91 = vector.load %arg5[%c0_11, %c0_12] : memref<128x1920xbf16, #tpu.memory_space<vmem>>, vector<128x1920xbf16>
    %cst_13 = arith.constant dense<0.000000e+00> : vector<128x187xf32>
    %92 = tpu.matmul %91, %90, %cst_13 {dimension_numbers = #tpu.dot_dimension_numbers<[1], [0], [0], [1], [0, 0, 1, 1], [], []>} : vector<128x1920xbf16>, vector<1920x187xbf16>, vector<128x187xf32> -> vector<128x187xf32>
    %c0_14 = arith.constant 0 : index
    %c0_15 = arith.constant 0 : index
    %93 = vector.load %arg6[%c0_14, %c0_15] : memref<128x1xf32, #tpu.memory_space<vmem>>, vector<128x1xf32>
    %94 = vector.broadcast %93 : vector<128x1xf32> to vector<128x187xf32>
    %95 = arith.addf %92, %94 : vector<128x187xf32>
    %cst_16 = arith.constant 0.000000e+00 : f32
    %96 = vector.broadcast %cst_16 : f32 to vector<128x187xf32>
    %97 = arith.cmpf ogt, %95, %96 : vector<128x187xf32>
    %cst_17 = arith.constant 0.000000e+00 : f32
    %98 = vector.broadcast %cst_17 : f32 to vector<128x187xf32>
    %99 = arith.minimumf %95, %98 : vector<128x187xf32>
    %100 = math.exp %99 : vector<128x187xf32>
    %cst_18 = arith.constant 1.000000e+00 : f32
    %101 = vector.broadcast %cst_18 : f32 to vector<128x187xf32>
    %102 = arith.subf %100, %101 : vector<128x187xf32>
    %103 = arith.select %97, %95, %102 : vector<128x187xi1>, vector<128x187xf32>
    %c0_19 = arith.constant 0 : index
    %c0_20 = arith.constant 0 : index
    %c0_21 = arith.constant 0 : index
    %104 = vector.load %arg7[%c0_19, %c0_20, %c0_21] : memref<2x128x187xf32, #tpu.memory_space<vmem>>, vector<1x128x187xf32>
    %105 = vector.shape_cast %104 : vector<1x128x187xf32> to vector<128x187xf32>
    %106 = arith.mulf %103, %105 : vector<128x187xf32>
    %107 = vector.shape_cast %106 : vector<128x187xf32> to vector<4x32x187xf32>
    %cst_22 = arith.constant dense<0.000000e+00> : vector<4x32xf32>
    %108 = vector.multi_reduction <add>, %107, %cst_22 [2] : vector<4x32x187xf32> to vector<4x32xf32>
    %cst_23 = arith.constant dense<0.000000e+00> : vector<4xf32>
    %109 = vector.multi_reduction <add>, %108, %cst_23 [1] : vector<4x32xf32> to vector<4xf32>
    %110 = vector.shape_cast %109 : vector<4xf32> to vector<4x1xf32>
    %c1 = arith.constant 1 : index
    %c0_24 = arith.constant 0 : index
    %c0_25 = arith.constant 0 : index
    %111 = vector.load %arg7[%c1, %c0_24, %c0_25] : memref<2x128x187xf32, #tpu.memory_space<vmem>>, vector<1x128x187xf32>
    %112 = vector.shape_cast %111 : vector<1x128x187xf32> to vector<128x187xf32>
    %113 = arith.mulf %103, %112 : vector<128x187xf32>
    %114 = vector.shape_cast %113 : vector<128x187xf32> to vector<4x32x187xf32>
    %cst_26 = arith.constant dense<0.000000e+00> : vector<4x32xf32>
    %115 = vector.multi_reduction <add>, %114, %cst_26 [2] : vector<4x32x187xf32> to vector<4x32xf32>
    %cst_27 = arith.constant dense<0.000000e+00> : vector<4xf32>
    %116 = vector.multi_reduction <add>, %115, %cst_27 [1] : vector<4x32xf32> to vector<4xf32>
    %117 = vector.shape_cast %116 : vector<4xf32> to vector<4x1xf32>
    %118 = tpu.concatenate %110, %117 in 1 : vector<4x1xf32>, vector<4x1xf32> -> vector<4x2xf32>
    %c0_28 = arith.constant 0 : index
    %c0_29 = arith.constant 0 : index
    %119 = vector.load %arg8[%c0_28, %c0_29] : memref<1x2xf32, #tpu.memory_space<vmem>>, vector<1x2xf32>
    %120 = vector.broadcast %119 : vector<1x2xf32> to vector<4x2xf32>
    %121 = arith.addf %118, %120 : vector<4x2xf32>
    %c0_30 = arith.constant 0 : index
    %c0_31 = arith.constant 0 : index
    %c0_32 = arith.constant 0 : index
    %122 = vector.load %arg9[%c0_30, %c0_31, %c0_32] : memref<1x4x2xf32, #tpu.memory_space<vmem>>, vector<1x4x2xf32>
    %123 = vector.shape_cast %122 : vector<1x4x2xf32> to vector<4x2xf32>
    %124 = vector.shape_cast %121 : vector<4x2xf32> to vector<1x4x2xf32>
    tpu.vector_store %arg9[%c0_30, %c0_31, %c0_32], %124 {strides = array<i32>} : memref<1x4x2xf32, #tpu.memory_space<vmem>>, vector<1x4x2xf32>,
    return
  }
  func.func @transform_0(%arg0: i32) -> (i32, i32) {
    %c0_i32 = arith.constant 0 : i32
    %c0_i32_0 = arith.constant 0 : i32
    return %arg0, %c0_i32 : i32, i32
  }
  func.func @transform_1(%arg0: i32) -> (i32, i32) {
    %c0_i32 = arith.constant 0 : i32
    %c0_i32_0 = arith.constant 0 : i32
    %c0_i32_1 = arith.constant 0 : i32
    return %c0_i32, %c0_i32_0 : i32, i32
  }
  func.func @transform_2(%arg0: i32) -> (i32, i32) {
    %c0_i32 = arith.constant 0 : i32
    %c0_i32_0 = arith.constant 0 : i32
    %c0_i32_1 = arith.constant 0 : i32
    return %c0_i32, %c0_i32_0 : i32, i32
  }
  func.func @transform_3(%arg0: i32) -> (i32, i32) {
    %c0_i32 = arith.constant 0 : i32
    %c0_i32_0 = arith.constant 0 : i32
    %c0_i32_1 = arith.constant 0 : i32
    return %c0_i32, %c0_i32_0 : i32, i32
  }
  func.func @transform_4(%arg0: i32) -> (i32, i32) {
    %c0_i32 = arith.constant 0 : i32
    %c0_i32_0 = arith.constant 0 : i32
    %c0_i32_1 = arith.constant 0 : i32
    return %c0_i32, %c0_i32_0 : i32, i32
  }
  func.func @transform_5(%arg0: i32) -> (i32, i32) {
    %c0_i32 = arith.constant 0 : i32
    %c0_i32_0 = arith.constant 0 : i32
    %c0_i32_1 = arith.constant 0 : i32
    return %c0_i32, %c0_i32_0 : i32, i32
  }
  func.func @transform_6(%arg0: i32) -> (i32, i32, i32) {
    %c0_i32 = arith.constant 0 : i32
    %c0_i32_0 = arith.constant 0 : i32
    %c0_i32_1 = arith.constant 0 : i32
    %c0_i32_2 = arith.constant 0 : i32
    return %c0_i32, %c0_i32_0, %c0_i32_1 : i32, i32, i32
  }
  func.func @transform_7(%arg0: i32) -> (i32, i32) {
    %c0_i32 = arith.constant 0 : i32
    %c0_i32_0 = arith.constant 0 : i32
    %c0_i32_1 = arith.constant 0 : i32
    return %c0_i32, %c0_i32_0 : i32, i32
  }
  func.func @transform_8(%arg0: i32) -> (i32, i32, i32) {
    %c0_i32 = arith.constant 0 : i32
    %c0_i32_0 = arith.constant 0 : i32
    %c0_i32_1 = arith.constant 0 : i32
    return %arg0, %c0_i32, %c0_i32_0 : i32, i32, i32
  }
}

</mosaic_0001>

<bundles_post_ra>
// kernel: tpu_custom_call.1
= control target key start
LH: loop header
LB: loop body
LE: loop exit
PB: predicated region body
PF: predicated region fallthrough
CT: control target
= control target key end

     0   :  { %s10160_s27 = smov 0   ;;  %s15247_s0 = inlined_call_operand.vmem [shape: f32[16,800], index: 0, kind: input, shape index: {}]   ;;  %s15248_s1 = inlined_call_operand.vmem [shape: bf16[128,408], index: 1, kind: input, shape index: {}]   ;;  %s15249_s2 = inlined_call_operand.vmem [shape: f32[128,1], index: 2, kind: input, shape index: {}]   ;;  %s15250_s3 = inlined_call_operand.vmem [shape: bf16[750,201], index: 3, kind: input, shape index: {}]   ;;  %s15251_s4 = inlined_call_operand.vmem [shape: bf16[128,1920], index: 4, kind: input, shape index: {}]   ;;  %s15252_s5 = inlined_call_operand.vmem [shape: f32[128,1], index: 5, kind: input, shape index: {}]   ;;  %s15253_s6 = inlined_call_operand.vmem [shape: f32[2,128,187], index: 6, kind: input, shape index: {}]   ;;  %s15254_s7 = inlined_call_operand.vmem [shape: f32[1,2], index: 7, kind: input, shape index: {}]   ;;  %s15255_s8 = inlined_call_operand.vmem [shape: f32[2,4,2], index: 8, kind: output, shape index: {}]  }
   0x1 LB: > { %s7595_s28 = sadd.s32 4294967295, %s10094_s27   ;;  %p7599_p0 = scmp.ge.s32.totalorder %s10094_s27, 1  ;;  %s10094_s27 = sphi %s10160_s27, %s18_s27  }
   0x2   : > { %p262_p1 = scmp.lt.s32.totalorder %s10094_s27, 3 }
   0x4   : > { %p263_p2 = pnand %p7599_p0, %p262_p1 }
   0x6   : > { %266 = sbr.rel (%p263_p2) target bundleno = 2416 (0x970), region = 52 }
   0xd   : > { %p295_p3 = scmp.lt.s32.totalorder %s7595_s28, 1  ;;  %s10096_s11 = smov 126   ;;  %vm330_vm0 = vcmask 1039360   ;;  %vm354_vm1 = vcmask 1031168   ;;  %vm378_vm2 = vcmask 1022976   ;;  %vm402_vm3 = vcmask 1014784  }
   0xe   : > { %s10097_s12 = smov 127   ;;  %s10098_s13 = smov 125   ;;  %vm426_vm4 = vcmask 1006592   ;;  %vm450_vm5 = vcmask 998400   ;;  %vm15455_vm6 = vcmask 990208   ;;  %vm15356_vm7 = vcmask 982016  }
   0xf   : > { %s15833_s28 = smov (!%p295_p3, %s7595_s28), 1  ;;  %s10099_s14 = smov 124   ;;  %vm15446_vm8 = vcmask 973824   ;;  %vm15374_vm9 = vcmask 965632   ;;  %vm15444_vm10 = vcmask 957440   ;;  %vm15443_vm11 = vcmask 949248  }
  0x10   : > { %s8591_s29 = smul.u32 56, %s15833_s28  ;;  %s10100_s15 = smov 123   ;;  %vm15290_vm12 = vcmask 941056   ;;  %vm15454_vm13 = vcmask 932864   ;;  %vm15277_vm14 = vcmask 924672   ;;  %vm916_vm15 = vcmask 916480  }
  0x11   : > { %s10101_s16 = smov 122   ;;  %s10102_s17 = smov 121  }
  0x12   : > { %s10174_s10 = scalar_lea.vmem %s15247_s0, %s8591_s29  ;;  %s10103_s18 = smov 120  }
  0x13   : > { %v10177_v0 = vld [vmem:[%s10174_s10 + $0x8] sm:$0xff]  ;;  %v307_v1 = vld [vmem:[%s10174_s10 + $0x10] sm:$0xff]  ;;  %v10181_v2 = vld [vmem:[%s10174_s10] sm:$0xff]  ;;  %s15452_s19 = smov 119   ;;  %s15275_s20 = smov 118  }
  0x14   : > { %v8629_v3 = vpack.i.bf16 %v307_v1, %v10177_v0  ;;  %v308_v4 = vld [vmem:[%s10174_s10 + $0x18] sm:$0xff]  ;;  %s15450_s21 = smov 117   ;;  %s15448_s22 = smov 116  }
  0x15   : > { %v8634_v5 = vpack.i.bf16 %v10181_v2, %v308_v4  ;;  %s15416_s23 = smov 115   ;;  %s15296_s24 = smov 114  }
  0x16   : > { %8630 = vrot.lane.b32.xlu1 %v8629_v3, %s10096_s11  ;;  %8620 = vrot.lane.b32.xlu0 %v8629_v3, %s10097_s12  ;;  %s15298_s25 = smov 113   ;;  %s10111_s26 = smov 112  }
  0x17   : > { %s10112_s29 = smov 96   ;;  %s10113_s30 = smov 80  }
  0x18   : > { %s15553_s9 = smov 113  }
  0x1a   : > { %8635 = vrot.lane.b32.xlu1 %v8634_v5, %s10096_s11  ;;  %8625 = vrot.lane.b32.xlu0 %v8634_v5, %s10097_s12 }
  0x1e   : > { %8645 = vrot.lane.b32.xlu1 %v8634_v5, %s10098_s13  ;;  %8640 = vrot.lane.b32.xlu0 %v8629_v3, %s10098_s13 }
  0x22   : > { %8655 = vrot.lane.b32.xlu1 %v8634_v5, %s10099_s14  ;;  %8650 = vrot.lane.b32.xlu0 %v8629_v3, %s10099_s14 }
  0x26   : > { %8665 = vrot.lane.b32.xlu1 %v8634_v5, %s10100_s15  ;;  %8660 = vrot.lane.b32.xlu0 %v8629_v3, %s10100_s15 }
  0x2a   : > { %8675 = vrot.lane.b32.xlu1 %v8634_v5, %s10101_s16  ;;  %8670 = vrot.lane.b32.xlu0 %v8629_v3, %s10101_s16 }
  0x2e   : > { %8685 = vrot.lane.b32.xlu1 %v8634_v5, %s10102_s17  ;;  %8680 = vrot.lane.b32.xlu0 %v8629_v3, %s10102_s17 }
  0x32   : > { %8695 = vrot.lane.b32.xlu1 %v8634_v5, %s10103_s18  ;;  %8690 = vrot.lane.b32.xlu0 %v8629_v3, %s10103_s18 }
  0x36   : > { %8705 = vrot.lane.b32.xlu1 %v8634_v5, %s15452_s19  ;;  %8700 = vrot.lane.b32.xlu0 %v8629_v3, %s15452_s19 }
  0x3a   : > { %8715 = vrot.lane.b32.xlu1 %v8634_v5, %s15275_s20  ;;  %8710 = vrot.lane.b32.xlu0 %v8629_v3, %s15275_s20 }
  0x3e   : > { %8725 = vrot.lane.b32.xlu1 %v8634_v5, %s15450_s21  ;;  %8720 = vrot.lane.b32.xlu0 %v8629_v3, %s15450_s21 }
  0x42   : > { %8735 = vrot.lane.b32.xlu1 %v8634_v5, %s15448_s22  ;;  %8730 = vrot.lane.b32.xlu0 %v8629_v3, %s15448_s22 }
  0x46   : > { %8745 = vrot.lane.b32.xlu1 %v8634_v5, %s15416_s23  ;;  %8740 = vrot.lane.b32.xlu0 %v8629_v3, %s15416_s23 }
  0x4a   : > { %8755 = vrot.lane.b32.xlu1 %v8634_v5, %s15296_s24  ;;  %8750 = vrot.lane.b32.xlu0 %v8629_v3, %s15296_s24 }
  0x4e   : > { %8765 = vrot.lane.b32.xlu1 %v8634_v5, %s15298_s25  ;;  %8760 = vrot.lane.b32.xlu0 %v8629_v3, %s15298_s25 }
  0x52   : > { %8770 = vrot.lane.b32.xlu0 %v8629_v3, %s10111_s26 }
  0x56   : > { %8775 = vrot.lane.b32.xlu0 %v8629_v3, %s10112_s29 }
  0x88   : > { %v8631_v6 = vpop.permute.xlu1 %8630  ;;  %v8621_v7 = vpop.permute.xlu0 %8620 }
  0x89   : > { %v8623_v8 = vunpack.i.h.bf16 %v8621_v7  ;;  %v8622_v9 = vunpack.i.l.bf16 %v8621_v7  ;;  %v8633_v16 = vunpack.i.h.bf16 %v8631_v6  ;;  %v8632_v17 = vunpack.i.l.bf16 %v8631_v6 }
  0x8b   : > { %v332_v10 = vsel %vm330_vm0, %v8622_v9, %v8623_v8  ;;  %v10249_v31 = vsel %vm354_vm1, %v8632_v17, %v8633_v16 }
  0x8c   : > { %v10219_v11 = vpop.permute.xlu1 %8635  ;;  %v10221_v12 = vpop.permute.xlu0 %8625  ;;  %v1590_v13 = vpack.c.bf16 %v332_v10, %v10177_v0 }
  0x8d   : > { %v8628_v14 = vunpack.i.h.bf16 %v10221_v12  ;;  %v15268_v15 = vunpack.i.l.bf16 %v10221_v12  ;;  %v8638_v18 = vunpack.i.h.bf16 %v10219_v11  ;;  %v15265_v19 = vunpack.i.l.bf16 %v10219_v11 }
  0x8e   : > { %2069 = vmatprep.subr.bf16.mxu1 %v1590_v13 }
  0x8f   : > { %v10229_v20 = vsel %vm330_vm0, %v8628_v14, %v8622_v9  ;;  %v10234_v21 = vsel %vm330_vm0, %v8623_v8, %v15268_v15  ;;  %v10254_v32 = vsel %vm354_vm1, %v8633_v16, %v15265_v19  ;;  %v10257_v33 = vsel %vm354_vm1, %v8638_v18, %v8632_v17 }
  0x90   : > { %v10236_v22 = vpop.permute.xlu1 %8645  ;;  %v8641_v23 = vpop.permute.xlu0 %8640  ;;  %v8784_v24 = vpack.i.bf16 %v10229_v20, %v10181_v2  ;;  %v1589_v25 = vpack.c.bf16 %v10229_v20, %v10181_v2  ;;  %v10243_v26 = vpack.i.bf16 %v10234_v21, %v332_v10  ;;  %v10278_v45 = vpack.i.bf16 %v10254_v32, %v10249_v31 }
  0x91   : > { %v8648_v27 = vunpack.i.h.bf16 %v10236_v22  ;;  %v15266_v28 = vunpack.i.l.bf16 %v10236_v22  ;;  %v8643_v29 = vunpack.i.h.bf16 %v8641_v23  ;;  %v8642_v30 = vunpack.i.l.bf16 %v8641_v23 }
  0x92   : > { %8785 = vrot.lane.b32.xlu0 %v8784_v24, %s10111_s26  ;;  %2070 = vmatpush1.bf16.msra.mxu1 %v1589_v25 }
  0x93   : > { %8780 = vrot.lane.b32.xlu1 %v10243_v26, %s10111_s26  ;;  %v380_v34 = vsel %vm378_vm2, %v8642_v30, %v8643_v29  ;;  %v10265_v35 = vsel %vm378_vm2, %v8643_v29, %v15266_v28  ;;  %v379_v36 = vsel %vm378_vm2, %v8648_v27, %v8642_v30 }
  0x94   : > { %v10268_v37 = vpop.permute.xlu1 %8655  ;;  %v8651_v38 = vpop.permute.xlu0 %8650  ;;  %v10271_v39 = vpack.i.bf16 %v10265_v35, %v380_v34  ;;  %v1596_v40 = vpack.c.bf16 %v380_v34, %v10249_v31  ;;  %v1595_v41 = vpack.c.bf16 %v379_v36, %v10257_v33  ;;  %v10299_v53 = vpack.i.bf16 %v379_v36, %v10257_v33 }
  0x95   : > { %v15264_v42 = vunpack.i.l.bf16 %v10268_v37  ;;  %v8653_v43 = vunpack.i.h.bf16 %v8651_v38  ;;  %v8652_v44 = vunpack.i.l.bf16 %v8651_v38  ;;  %v8658_v47 = vunpack.i.h.bf16 %v10268_v37 }
  0x96   : > { %8795 = vrot.lane.b32.xlu0 %v10271_v39, %s10111_s26  ;;  %2071 = vmatprep.subr.bf16.mxu1 %v1596_v40 }
  0x97   : > { %8790 = vrot.lane.b32.xlu1 %v10278_v45, %s10111_s26  ;;  %2072 = vmatpush1.bf16.msra.mxu1 %v1595_v41  ;;  %v404_v48 = vsel %vm402_vm3, %v8652_v44, %v8653_v43  ;;  %v10291_v49 = vsel %vm402_vm3, %v8653_v43, %v15264_v42  ;;  %v403_v58 = vsel %vm402_vm3, %v8658_v47, %v8652_v44 }
  0x98   : > { %v10293_v50 = vpop.permute.xlu1 %8665  ;;  %v8661_v51 = vpop.permute.xlu0 %8660  ;;  %v10296_v52 = vpack.i.bf16 %v10291_v49, %v404_v48 }
  0x99   : > { %v8668_v54 = vunpack.i.h.bf16 %v10293_v50  ;;  %v15263_v55 = vunpack.i.l.bf16 %v10293_v50  ;;  %v8663_v56 = vunpack.i.h.bf16 %v8661_v51  ;;  %v8662_v57 = vunpack.i.l.bf16 %v8661_v51 }
  0x9a   : > { %8805 = vrot.lane.b32.xlu0 %v10296_v52, %s10111_s26 }
  0x9b   : > { %8800 = vrot.lane.b32.xlu1 %v10299_v53, %s10111_s26  ;;  %v427_v59 = vsel %vm426_vm4, %v8668_v54, %v8662_v57  ;;  %v428_v60 = vsel %vm426_vm4, %v8662_v57, %v8663_v56  ;;  %v10313_v61 = vsel %vm426_vm4, %v8663_v56, %v15263_v55 }
  0x9c   : > { %v10315_v62 = vpop.permute.xlu1 %8675  ;;  %v8671_v63 = vpop.permute.xlu0 %8670  ;;  %v10317_v0 = vpack.i.bf16 %v427_v59, %v403_v58  ;;  %v1602_v1 = vpack.c.bf16 %v428_v60, %v404_v48  ;;  %v10320_v2 = vpack.i.bf16 %v10313_v61, %v428_v60  ;;  %v1601_v3 = vpack.c.bf16 %v427_v59, %v403_v58 }
  0x9d   : > { %v15259_v4 = vunpack.i.l.bf16 %v10315_v62  ;;  %v8673_v5 = vunpack.i.h.bf16 %v8671_v63  ;;  %v8672_v6 = vunpack.i.l.bf16 %v8671_v63  ;;  %v8678_v7 = vunpack.i.h.bf16 %v10315_v62 }
  0x9e   : > { %8815 = vrot.lane.b32.xlu0 %v10317_v0, %s10111_s26  ;;  %2073 = vmatprep.subr.bf16.mxu1 %v1602_v1 }
  0x9f   : > { %8810 = vrot.lane.b32.xlu1 %v10320_v2, %s10111_s26  ;;  %2074 = vmatpush1.bf16.msra.mxu1 %v1601_v3  ;;  %v452_v8 = vsel %vm450_vm5, %v8672_v6, %v8673_v5  ;;  %v10332_v9 = vsel %vm450_vm5, %v8673_v5, %v15259_v4  ;;  %v451_v29 = vsel %vm450_vm5, %v8678_v7, %v8672_v6 }
  0xa0   : > { %v10334_v10 = vpop.permute.xlu1 %8685  ;;  %v8681_v13 = vpop.permute.xlu0 %8680  ;;  %v10337_v14 = vpack.i.bf16 %v10332_v9, %v452_v8 }
  0xa1   : > { %v8688_v17 = vunpack.i.h.bf16 %v10334_v10  ;;  %v15260_v18 = vunpack.i.l.bf16 %v10334_v10  ;;  %v8683_v23 = vunpack.i.h.bf16 %v8681_v13  ;;  %v8682_v24 = vunpack.i.l.bf16 %v8681_v13 }
  0xa3   : > { %8820 = vrot.lane.b32.xlu1 %v10337_v14, %s10111_s26  ;;  %v476_v25 = vsel %vm15455_vm6, %v8682_v24, %v8683_v23  ;;  %v10349_v27 = vsel %vm15455_vm6, %v8683_v23, %v15260_v18  ;;  %v475_v30 = vsel %vm15455_vm6, %v8688_v17, %v8682_v24 }
  0xa4   : > { %v10353_v34 = vpop.permute.xlu1 %8695  ;;  %v8691_v36 = vpop.permute.xlu0 %8690  ;;  %v10356_v38 = vpack.i.bf16 %v10349_v27, %v476_v25  ;;  %v1608_v40 = vpack.c.bf16 %v476_v25, %v452_v8  ;;  %v10358_v41 = vpack.i.bf16 %v475_v30, %v451_v29  ;;  %v1607_v43 = vpack.c.bf16 %v475_v30, %v451_v29 }
  0xa5   : > { %v15258_v44 = vunpack.i.l.bf16 %v10353_v34  ;;  %v8693_v47 = vunpack.i.h.bf16 %v8691_v36  ;;  %v8692_v48 = vunpack.i.l.bf16 %v8691_v36  ;;  %v8698_v54 = vunpack.i.h.bf16 %v10353_v34 }
  0xa6   : > { %8825 = vrot.lane.b32.xlu0 %v10356_v38, %s10111_s26  ;;  %2075 = vmatprep.subr.bf16.mxu1 %v1608_v40 }
  0xa7   : > { %8830 = vrot.lane.b32.xlu1 %v10358_v41, %s10111_s26  ;;  %2076 = vmatpush1.bf16.msra.mxu1 %v1607_v43  ;;  %v500_v56 = vsel %vm15356_vm7, %v8692_v48, %v8693_v47  ;;  %v10372_v57 = vsel %vm15356_vm7, %v8693_v47, %v15258_v44  ;;  %v499_v6 = vsel %vm15356_vm7, %v8698_v54, %v8692_v48 }
  0xa8   : > { %15456 = vst [vmem:[#allocation2_spill] sm:$0xff] %v10372_v57  ;;  %v10374_v58 = vpop.permute.xlu1 %8705  ;;  %v8701_v59 = vpop.permute.xlu0 %8700  ;;  %v10377_v60 = vpack.i.bf16 %v10372_v57, %v500_v56 }
  0xa9   : > { %v8708_v63 = vunpack.i.h.bf16 %v10374_v58  ;;  %v15257_v1 = vunpack.i.l.bf16 %v10374_v58  ;;  %v8703_v3 = vunpack.i.h.bf16 %v8701_v59  ;;  %v8702_v5 = vunpack.i.l.bf16 %v8701_v59 }
  0xaa   : > { %8835 = vrot.lane.b32.xlu0 %v10377_v60, %s10111_s26 }
  0xab   : > { %v523_v7 = vsel %vm15446_vm8, %v8708_v63, %v8702_v5  ;;  %v524_v8 = vsel %vm15446_vm8, %v8702_v5, %v8703_v3  ;;  %v10389_v13 = vsel %vm15446_vm8, %v8703_v3, %v15257_v1 }
  0xac   : > { %v10391_v17 = vpop.permute.xlu1 %8715  ;;  %v8711_v23 = vpop.permute.xlu0 %8710  ;;  %v10393_v24 = vpack.i.bf16 %v523_v7, %v499_v6  ;;  %v1614_v25 = vpack.c.bf16 %v524_v8, %v500_v56  ;;  %v10396_v29 = vpack.i.bf16 %v10389_v13, %v524_v8  ;;  %v1613_v30 = vpack.c.bf16 %v523_v7, %v499_v6 }
  0xad   : > { %v15256_v36 = vunpack.i.l.bf16 %v10391_v17  ;;  %v8713_v40 = vunpack.i.h.bf16 %v8711_v23  ;;  %v8712_v43 = vunpack.i.l.bf16 %v8711_v23  ;;  %v8718_v48 = vunpack.i.h.bf16 %v10391_v17 }
  0xae   : > { %8845 = vrot.lane.b32.xlu0 %v10393_v24, %s10111_s26  ;;  %2077 = vmatprep.subr.bf16.mxu1 %v1614_v25 }
  0xaf   : > { %8840 = vrot.lane.b32.xlu1 %v10396_v29, %s10111_s26  ;;  %2078 = vmatpush1.bf16.msra.mxu1 %v1613_v30  ;;  %v548_v54 = vsel %vm15374_vm9, %v8712_v43, %v8713_v40  ;;  %v10410_v56 = vsel %vm15374_vm9, %v8713_v40, %v15256_v36  ;;  %v547_v30 = vsel %vm15374_vm9, %v8718_v48, %v8712_v43 }
  0xb0   : > { %15457 = vst [vmem:[#allocation3_spill] sm:$0xff] %v10410_v56  ;;  %v10412_v59 = vpop.permute.xlu1 %8725  ;;  %v8721_v63 = vpop.permute.xlu0 %8720  ;;  %v10415_v3 = vpack.i.bf16 %v10410_v56, %v548_v54 }
  0xb1   : > { %v8728_v5 = vunpack.i.h.bf16 %v10412_v59  ;;  %v15262_v6 = vunpack.i.l.bf16 %v10412_v59  ;;  %v8723_v7 = vunpack.i.h.bf16 %v8721_v63  ;;  %v8722_v8 = vunpack.i.l.bf16 %v8721_v63 }
  0xb3   : > { %8850 = vrot.lane.b32.xlu1 %v10415_v3, %s10111_s26  ;;  %v572_v23 = vsel %vm15444_vm10, %v8722_v8, %v8723_v7  ;;  %v10425_v25 = vsel %vm15444_vm10, %v8723_v7, %v15262_v6  ;;  %v571_v40 = vsel %vm15444_vm10, %v8728_v5, %v8722_v8 }
  0xb4   : > { %15458 = vst [vmem:[#allocation4_spill] sm:$0xff] %v10425_v25  ;;  %v10429_v47 = vpop.permute.xlu1 %8735  ;;  %v8731_v51 = vpop.permute.xlu0 %8730  ;;  %v10432_v63 = vpack.i.bf16 %v10425_v25, %v572_v23  ;;  %v1620_v16 = vpack.c.bf16 %v572_v23, %v548_v54  ;;  %v10434_v36 = vpack.i.bf16 %v571_v40, %v547_v30  ;;  %v1619_v1 = vpack.c.bf16 %v571_v40, %v547_v30 }
  0xb5   : > { %v15261_v44 = vunpack.i.l.bf16 %v10429_v47  ;;  %v8733_v4 = vunpack.i.h.bf16 %v8731_v51  ;;  %v8732_v18 = vunpack.i.l.bf16 %v8731_v51  ;;  %v8738_v48 = vunpack.i.h.bf16 %v10429_v47 }
  0xb6   : > { %8855 = vrot.lane.b32.xlu0 %v10432_v63, %s10111_s26  ;;  %2079 = vmatprep.subr.bf16.mxu1 %v1620_v16 }
  0xb7   : > { %8860 = vrot.lane.b32.xlu1 %v10434_v36, %s10111_s26  ;;  %2080 = vmatpush1.bf16.msra.mxu1 %v1619_v1  ;;  %v596_v54 = vsel %vm15443_vm11, %v8732_v18, %v8733_v4  ;;  %v10448_v5 = vsel %vm15443_vm11, %v8733_v4, %v15261_v44  ;;  %v595_v4 = vsel %vm15443_vm11, %v8738_v48, %v8732_v18 }
  0xb8   : > { %15459 = vst [vmem:[#allocation5_spill] sm:$0xff] %v10448_v5  ;;  %v10450_v51 = vpop.permute.xlu1 %8745  ;;  %v8741_v7 = vpop.permute.xlu0 %8740  ;;  %v10453_v16 = vpack.i.bf16 %v10448_v5, %v596_v54 }
  0xb9   : > { %v8748_v8 = vunpack.i.h.bf16 %v10450_v51  ;;  %v15267_v23 = vunpack.i.l.bf16 %v10450_v51  ;;  %v8743_v30 = vunpack.i.h.bf16 %v8741_v7  ;;  %v8742_v1 = vunpack.i.l.bf16 %v8741_v7 }
  0xba   : > { %8865 = vrot.lane.b32.xlu0 %v10453_v16, %s10111_s26 }
  0xbb   : > { %v619_v40 = vsel %vm15290_vm12, %v8748_v8, %v8742_v1  ;;  %v620_v43 = vsel %vm15290_vm12, %v8742_v1, %v8743_v30  ;;  %v10465_v44 = vsel %vm15290_vm12, %v8743_v30, %v15267_v23  ;;  %vm1317_vm12 = vcmask 785408  }
  0xbc   : > { %15460 = vst [vmem:[#allocation6_spill] sm:$0xff] %v10465_v44  ;;  %v10467_v6 = vpop.permute.xlu1 %8755  ;;  %v8751_v55 = vpop.permute.xlu0 %8750  ;;  %v10469_v42 = vpack.i.bf16 %v619_v40, %v595_v4  ;;  %v1626_v7 = vpack.c.bf16 %v620_v43, %v596_v54  ;;  %v10472_v19 = vpack.i.bf16 %v10465_v44, %v620_v43  ;;  %v1625_v28 = vpack.c.bf16 %v619_v40, %v595_v4 }
  0xbd   : > { %v15269_v18 = vunpack.i.l.bf16 %v10467_v6  ;;  %v8753_v48 = vunpack.i.h.bf16 %v8751_v55  ;;  %v8752_v8 = vunpack.i.l.bf16 %v8751_v55  ;;  %v8758_v1 = vunpack.i.h.bf16 %v10467_v6 }
  0xbe   : > { %8875 = vrot.lane.b32.xlu0 %v10469_v42, %s10111_s26  ;;  %2081 = vmatprep.subr.bf16.mxu1 %v1626_v7 }
  0xbf   : > { %8870 = vrot.lane.b32.xlu1 %v10472_v19, %s10111_s26  ;;  %2082 = vmatpush1.bf16.msra.mxu1 %v1625_v28  ;;  %v644_v43 = vsel %vm15454_vm13, %v8752_v8, %v8753_v48  ;;  %v10486_v54 = vsel %vm15454_vm13, %v8753_v48, %v15269_v18  ;;  %v9416_v28 = vld [vmem:[%s15248_s1 + $0x4] ss:$16 sps:$4 sm:$0xff]   ;;  %v643_v46 = vsel %vm15454_vm13, %v8758_v1, %v8752_v8 }
  0xc0   : > { %v10488_v55 = vpop.permute.xlu1 %8765  ;;  %v8761_v4 = vpop.permute.xlu0 %8760  ;;  %v8879_v40 = vpack.i.bf16 %v10486_v54, %v644_v43  ;;  %2101 = vmatprep.mubr.bf16.mxu1 %v9416_v28 }
  0xc1   : > { %v8768_v7 = vunpack.i.h.bf16 %v10488_v55  ;;  %v15294_v30 = vunpack.i.l.bf16 %v10488_v55  ;;  %v8763_v23 = vunpack.i.h.bf16 %v8761_v4  ;;  %v8762_v15 = vunpack.i.l.bf16 %v8761_v4 }
  0xc3   : > { %8880 = vrot.lane.b32.xlu1 %v8879_v40, %s10111_s26  ;;  %v668_v48 = vsel %vm15277_vm14, %v8762_v15, %v8763_v23  ;;  %v10501_v18 = vsel %vm15277_vm14, %v8763_v23, %v15294_v30  ;;  %v667_v5 = vsel %vm15277_vm14, %v8768_v7, %v8762_v15  ;;  %v10037_v23 = vld [vmem:[%s10174_s10] sm:$0xff]  ;;  %vm2025_vm14 = vcmask 195584  }
  0xc4   : > { %v8884_v4 = vpack.i.bf16 %v10501_v18, %v668_v48  ;;  %v1632_v44 = vpack.c.bf16 %v668_v48, %v644_v43  ;;  %v8889_v56 = vpack.i.bf16 %v667_v5, %v643_v46  ;;  %v1631_v25 = vpack.c.bf16 %v667_v5, %v643_v46  ;;  %v310_v46 = vld [vmem:[%s10174_s10 + $0x28] sm:$0xff] }
  0xc5   : > { %v10512_v15 = vpack.i.bf16 %v10229_v20, %v10037_v23  ;;  %v10531_v20 = vld [vmem:[%s10174_s10 + $0x20] sm:$0xff] }
  0xc6   : > { %8885 = vrot.lane.b32.xlu0 %v8884_v4, %s10111_s26  ;;  %2083 = vmatprep.subr.bf16.mxu1 %v1632_v44 }
  0xc7   : > { %8890 = vrot.lane.b32.xlu1 %v8889_v56, %s10111_s26  ;;  %2084 = vmatpush1.bf16.msra.mxu1 %v1631_v25 }
  0xca   : > { %8900 = vrot.lane.b32.xlu0 %v10512_v15, %s10112_s29 }
  0xcb   : > { %8895 = vrot.lane.b32.xlu1 %v10243_v26, %s10112_s29 }
  0xce   : > { %8910 = vrot.lane.b32.xlu0 %v10271_v39, %s10112_s29  ;;  %v10539_v39 = vpack.i.bf16 %v310_v46, %v10531_v20 }
  0xcf   : > { %8905 = vrot.lane.b32.xlu1 %v10278_v45, %s10112_s29  ;;  %v10569_v45 = vpop.permute.xlu0 %8770 }
  0xd2   : > { %8920 = vrot.lane.b32.xlu0 %v10296_v52, %s10112_s29 }
  0xd3   : > { %8915 = vrot.lane.b32.xlu1 %v10299_v53, %s10112_s29  ;;  %v10576_v52 = vpop.permute.xlu0 %8775  ;;  %v8772_v53 = vunpack.i.l.bf16 %v10569_v45 }
  0xd4   : > { %15461 = vst [vmem:[#allocation7_spill] sm:$0xff] %v10576_v52 }
  0xd6   : > { %8930 = vrot.lane.b32.xlu0 %v10317_v0, %s10112_s29 }
  0xd7   : > { %8925 = vrot.lane.b32.xlu1 %v10320_v2, %s10112_s29 }
  0xda   : > { %8940 = vrot.lane.b32.xlu0 %v10356_v38, %s10112_s29 }
  0xdb   : > { %8935 = vrot.lane.b32.xlu1 %v10337_v14, %s10112_s29 }
  0xde   : > { %8950 = vrot.lane.b32.xlu0 %v10358_v41, %s10112_s29 }
  0xdf   : > { %8945 = vrot.lane.b32.xlu1 %v10539_v39, %s10097_s12 }
  0xe2   : > { %8960 = vrot.lane.b32.xlu0 %v10396_v29, %s10112_s29 }
  0xe3   : > { %8955 = vrot.lane.b32.xlu1 %v10377_v60, %s10112_s29  ;;  %v10038_v60 = vld [vmem:[%s10174_s10 + $0x8] sm:$0xff] }
  0xe6   : > { %8970 = vrot.lane.b32.xlu0 %v10539_v39, %s10098_s13 }
  0xe7   : > { %8965 = vrot.lane.b32.xlu1 %v10539_v39, %s10096_s11 }
  0xea   : > { %8980 = vrot.lane.b32.xlu0 %v10415_v3, %s10112_s29 }
  0xeb   : > { %8975 = vrot.lane.b32.xlu1 %v10393_v24, %s10112_s29  ;;  %v10597_v24 = vld [vmem:[%s10174_s10 + $0x10] sm:$0xff] }
  0xec   : > { %v9054_v29 = vpack.i.bf16 %v10597_v24, %v10038_v60 }
  0xee   : > { %8990 = vrot.lane.b32.xlu0 %v10539_v39, %s10099_s14 }
  0xef   : > { %8985 = vrot.lane.b32.xlu1 %v10432_v63, %s10112_s29 }
  0xf2   : > { %9000 = vrot.lane.b32.xlu0 %v10434_v36, %s10112_s29 }
  0xf3   : > { %8995 = vrot.lane.b32.xlu1 %v10539_v39, %s10100_s15 }
  0xf6   : > { %9010 = vrot.lane.b32.xlu0 %v10472_v19, %s10112_s29  ;;  %v15292_v19 = vunpack.i.h.bf16 %v10569_v45 }
  0xf7   : > { %9005 = vrot.lane.b32.xlu1 %v10453_v16, %s10112_s29 }
  0xf8   : > { %v918_v44 = vsel %vm916_vm15, %v8772_v53, %v15292_v19 }
  0xfa   : > { %9020 = vrot.lane.b32.xlu0 %v10539_v39, %s10102_s17 }
  0xfb   : > { %9015 = vrot.lane.b32.xlu1 %v10539_v39, %s10101_s16 }
  0xfe   : > { %9030 = vrot.lane.b32.xlu0 %v8879_v40, %s10112_s29 }
  0xff   : > { %9025 = vrot.lane.b32.xlu1 %v10469_v42, %s10112_s29 }
 0x102   : > { %9040 = vrot.lane.b32.xlu0 %v10539_v39, %s10103_s18 }
 0x103   : > { %9035 = vrot.lane.b32.xlu1 %v8884_v4, %s10112_s29 }
 0x104   : > { %v8786_v0 = vpop.permute.xlu0 %8785 }
 0x105   : > { %v8788_v2 = vunpack.i.h.bf16 %v8786_v0  ;;  %v8787_v14 = vunpack.i.l.bf16 %v8786_v0  ;;  %v10585_v38 = vpop.permute.xlu1 %8780 }
 0x106   : > { %v15291_v41 = vunpack.i.h.bf16 %v10585_v38  ;;  %v8782_v42 = vunpack.i.l.bf16 %v10585_v38  ;;  %9050 = vrot.lane.b32.xlu0 %v8889_v56, %s10112_s29 }
 0x107   : > { %9045 = vrot.lane.b32.xlu1 %v10539_v39, %s15452_s19  ;;  %v917_v36 = vsel %vm916_vm15, %v8787_v14, %v8772_v53 }
 0x108   : > { %v10601_v3 = vpop.permute.xlu0 %8795  ;;  %v923_v56 = vsel %vm916_vm15, %v8782_v42, %v15291_v41  ;;  %v922_v25 = vsel %vm916_vm15, %v8788_v2, %v8782_v42 }
 0x109   : > { %v15289_v63 = vunpack.i.h.bf16 %v10601_v3  ;;  %v8797_v5 = vunpack.i.l.bf16 %v10601_v3  ;;  %v10609_v16 = vpop.permute.xlu1 %8790  ;;  %v1638_v8 = vpack.c.bf16 %v923_v56, %v918_v44  ;;  %v1637_v1 = vpack.c.bf16 %v922_v25, %v917_v36 }
 0x10a   : > { %v15285_v43 = vunpack.i.h.bf16 %v10609_v16  ;;  %v8792_v40 = vunpack.i.l.bf16 %v10609_v16  ;;  %9060 = vrot.lane.b32.xlu0 %v10243_v26, %s10113_s30 }
 0x10b   : > { %9055 = vrot.lane.b32.xlu1 %v9054_v29, %s10113_s30  ;;  %2085 = vmatprep.subr.bf16.mxu1 %v1638_v8  ;;  %v933_v7 = vsel %vm916_vm15, %v8797_v5, %v15289_v63  ;;  %v15462_v8 = vpack.i.bf16 %v10249_v31, %v10257_v33  ;;  %v10653_v31 = vld [vmem:[%s15248_s1 + $0xc] ss:$16 sps:$4 sm:$0xff]  }
 0x10c   : > { %2086 = vmatpush1.bf16.msra.mxu1 %v1637_v1  ;;  %v10619_v28 = vpop.permute.xlu0 %8805  ;;  %v928_v48 = vsel %vm916_vm15, %v8792_v40, %v15285_v43  ;;  %7653 = vmatprep.mubr.msk.bf16.mxu0 %vm2025_vm14, %v10653_v31 }
 0x10d   : > { %v8801_v4 = vpop.permute.xlu1 %8800  ;;  %v1644_v23 = vpack.c.bf16 %v933_v7, %v928_v48  ;;  %v15284_v26 = vunpack.i.h.bf16 %v10619_v28  ;;  %v8807_v0 = vunpack.i.l.bf16 %v10619_v28 }
 0x10e   : > { %v8803_v46 = vunpack.i.h.bf16 %v8801_v4  ;;  %v8802_v53 = vunpack.i.l.bf16 %v8801_v4  ;;  %9070 = vrot.lane.b32.xlu0 %v10539_v39, %s15450_s21 }
 0x10f   : > { %9065 = vrot.lane.b32.xlu1 %v10539_v39, %s15275_s20  ;;  %2087 = vmatprep.subr.bf16.mxu1 %v1644_v23  ;;  %v938_v1 = vsel %vm916_vm15, %v8807_v0, %v15284_v26 }
 0x110   : > { %v8816_v2 = vpop.permute.xlu0 %8815  ;;  %v927_v14 = vsel %vm916_vm15, %v8802_v53, %v8792_v40  ;;  %v932_v42 = vsel %vm916_vm15, %v8803_v46, %v8797_v5 }
 0x111   : > { %v8818_v44 = vunpack.i.h.bf16 %v8816_v2  ;;  %v8817_v60 = vunpack.i.l.bf16 %v8816_v2  ;;  %v10632_v29 = vpop.permute.xlu1 %8810  ;;  %v1643_v36 = vpack.c.bf16 %v932_v42, %v927_v14 }
 0x112   : > { %v15282_v56 = vunpack.i.h.bf16 %v10632_v29  ;;  %v8812_v25 = vunpack.i.l.bf16 %v10632_v29  ;;  %9080 = vrot.lane.b32.xlu0 %v15462_v8, %s10113_s30 }
 0x113   : > { %9075 = vrot.lane.b32.xlu1 %v10512_v15, %s10113_s30  ;;  %2088 = vmatpush1.bf16.msra.mxu1 %v1643_v36  ;;  %v937_v5 = vsel %vm916_vm15, %v8817_v60, %v8807_v0 }
 0x114   : > { %v943_v40 = vsel %vm916_vm15, %v8812_v25, %v15282_v56  ;;  %v942_v7 = vsel %vm916_vm15, %v8818_v44, %v8812_v25  ;;  %v10672_v44 = vld [vmem:[%s10174_s10 + $0x18] sm:$0xff] }
 0x115   : > { %v10655_v33 = vpop.permute.xlu1 %8820  ;;  %v1650_v15 = vpack.c.bf16 %v943_v40, %v938_v1  ;;  %v1649_v48 = vpack.c.bf16 %v942_v7, %v937_v5  ;;  %v9104_v60 = vpack.i.bf16 %v10531_v20, %v10672_v44 }
 0x116   : > { %15463 = vst [vmem:[#allocation8_spill] sm:$0xff] %v10655_v33  ;;  %9085 = vrot.lane.b32.xlu0 %v10539_v39, %s15448_s22  ;;  %v15278_v4 = vunpack.i.h.bf16 %v10655_v33  ;;  %v8822_v23 = vunpack.i.l.bf16 %v10655_v33 }
 0x117   : > { %1542 = vrot.lane.b32.xlu1 %v10254_v32, %s10113_s30  ;;  %2089 = vmatprep.subr.bf16.mxu1 %v1650_v15 }
 0x118   : > { %2090 = vmatpush1.bf16.msra.mxu1 %v1649_v48  ;;  %v10665_v46 = vpop.permute.xlu0 %8825  ;;  %v948_v36 = vsel %vm916_vm15, %v8822_v23, %v15278_v4 }
 0x119   : > { %15464 = vst [vmem:[#allocation9_spill] sm:$0xff] %v10665_v46  ;;  %v15281_v53 = vunpack.i.h.bf16 %v10665_v46  ;;  %v8827_v0 = vunpack.i.l.bf16 %v10665_v46  ;;  %v8831_v2 = vpop.permute.xlu1 %8830 }
 0x11a   : > { %v8833_v14 = vunpack.i.h.bf16 %v8831_v2  ;;  %v8832_v42 = vunpack.i.l.bf16 %v8831_v2  ;;  %9095 = vrot.lane.b32.xlu0 %v10539_v39, %s15296_s24  ;;  %s15544_s24 = smov 118  }
 0x11b   : > { %9090 = vrot.lane.b32.xlu1 %v10539_v39, %s15416_s23  ;;  %v953_v25 = vsel %vm916_vm15, %v8827_v0, %v15281_v53 }
 0x11c   : > { %v10684_v8 = vpop.permute.xlu0 %8835  ;;  %v1656_v5 = vpack.c.bf16 %v953_v25, %v948_v36  ;;  %v947_v1 = vsel %vm916_vm15, %v8832_v42, %v8822_v23  ;;  %v952_v40 = vsel %vm916_vm15, %v8833_v14, %v8827_v0 }
 0x11d   : > { %15465 = vst [vmem:[#allocation10_spill] sm:$0xff] %v10684_v8  ;;  %v1655_v7 = vpack.c.bf16 %v952_v40, %v947_v1  ;;  %v15279_v20 = vunpack.i.h.bf16 %v10684_v8  ;;  %v8837_v15 = vunpack.i.l.bf16 %v10684_v8 }
 0x11e   : > { %9105 = vrot.lane.b32.xlu0 %v9104_v60, %s10111_s26  ;;  %2091 = vmatprep.subr.bf16.mxu1 %v1656_v5 }
 0x11f   : > { %9100 = vrot.lane.b32.xlu1 %v10539_v39, %s15298_s25  ;;  %2092 = vmatpush1.bf16.msra.mxu1 %v1655_v7  ;;  %v958_v39 = vsel %vm916_vm15, %v8837_v15, %v15279_v20  ;;  %s15554_s25 = smov 114  }
 0x120   : > { %v8846_v48 = vpop.permute.xlu0 %8845 }
 0x121   : > { %v8848_v2 = vunpack.i.h.bf16 %v8846_v48  ;;  %v8847_v4 = vunpack.i.l.bf16 %v8846_v48  ;;  %v10693_v36 = vpop.permute.xlu1 %8840 }
 0x122   : > { %15466 = vst [vmem:[#allocation11_spill] sm:$0xff] %v10693_v36  ;;  %v15280_v23 = vunpack.i.h.bf16 %v10693_v36  ;;  %v8842_v0 = vunpack.i.l.bf16 %v10693_v36 }
 0x123   : > { %v957_v14 = vsel %vm916_vm15, %v8847_v4, %v8837_v15 }
 0x124   : > { %v963_v42 = vsel %vm916_vm15, %v8842_v0, %v15280_v23  ;;  %v962_v60 = vsel %vm916_vm15, %v8848_v2, %v8842_v0 }
 0x125   : > { %v10705_v25 = vpop.permute.xlu1 %8850  ;;  %v1662_v5 = vpack.c.bf16 %v963_v42, %v958_v39  ;;  %v1661_v1 = vpack.c.bf16 %v962_v60, %v957_v14 }
 0x126   : > { %15467 = vst [vmem:[#allocation12_spill] sm:$0xff] %v10705_v25  ;;  %v15283_v40 = vunpack.i.h.bf16 %v10705_v25  ;;  %v8852_v7 = vunpack.i.l.bf16 %v10705_v25 }
 0x127   : > { %2093 = vmatprep.subr.bf16.mxu1 %v1662_v5 }
 0x128   : > { %2094 = vmatpush1.bf16.msra.mxu1 %v1661_v1  ;;  %v10709_v4 = vpop.permute.xlu0 %8855  ;;  %v968_v2 = vsel %vm916_vm15, %v8852_v7, %v15283_v40 }
 0x129   : > { %15468 = vst [vmem:[#allocation13_spill] sm:$0xff] %v10709_v4  ;;  %v15286_v15 = vunpack.i.h.bf16 %v10709_v4  ;;  %v8857_v48 = vunpack.i.l.bf16 %v10709_v4  ;;  %v8861_v20 = vpop.permute.xlu1 %8860 }
 0x12a   : > { %v8863_v23 = vunpack.i.h.bf16 %v8861_v20  ;;  %v8862_v53 = vunpack.i.l.bf16 %v8861_v20 }
 0x12b   : > { %v973_v0 = vsel %vm916_vm15, %v8857_v48, %v15286_v15 }
 0x12c   : > { %v10719_v14 = vpop.permute.xlu0 %8865  ;;  %v1668_v39 = vpack.c.bf16 %v973_v0, %v968_v2  ;;  %v967_v42 = vsel %vm916_vm15, %v8862_v53, %v8852_v7  ;;  %v972_v60 = vsel %vm916_vm15, %v8863_v23, %v8857_v48 }
 0x12d   : > { %15469 = vst [vmem:[#allocation14_spill] sm:$0xff] %v10719_v14  ;;  %v1667_v5 = vpack.c.bf16 %v972_v60, %v967_v42  ;;  %v15287_v20 = vunpack.i.h.bf16 %v10719_v14  ;;  %v8867_v1 = vunpack.i.l.bf16 %v10719_v14 }
 0x12e   : > { %2095 = vmatprep.subr.bf16.mxu1 %v1668_v39 }
 0x12f   : > { %2096 = vmatpush1.bf16.msra.mxu1 %v1667_v5  ;;  %v978_v23 = vsel %vm916_vm15, %v8867_v1, %v15287_v20 }
 0x130   : > { %v8876_v56 = vpop.permute.xlu0 %8875 }
 0x131   : > { %v8878_v40 = vunpack.i.h.bf16 %v8876_v56  ;;  %v8877_v26 = vunpack.i.l.bf16 %v8876_v56  ;;  %v10725_v43 = vpop.permute.xlu1 %8870 }
 0x132   : > { %15470 = vst [vmem:[#allocation15_spill] sm:$0xff] %v10725_v43  ;;  %v15288_v15 = vunpack.i.h.bf16 %v10725_v43  ;;  %v8872_v2 = vunpack.i.l.bf16 %v10725_v43 }
 0x133   : > { %v977_v53 = vsel %vm916_vm15, %v8877_v26, %v8867_v1 }
 0x134   : > { %v983_v7 = vsel %vm916_vm15, %v8872_v2, %v15288_v15  ;;  %v982_v48 = vsel %vm916_vm15, %v8878_v40, %v8872_v2  ;;  %v15302_v40 = vunpack.i.h.bf16 %v10576_v52 }
 0x135   : > { %v10737_v0 = vpop.permute.xlu1 %8880  ;;  %v1674_v56 = vpack.c.bf16 %v983_v7, %v978_v23  ;;  %v1673_v39 = vpack.c.bf16 %v982_v48, %v977_v53  ;;  %v8777_v23 = vunpack.i.l.bf16 %v10576_v52 }
 0x136   : > { %15471 = vst [vmem:[#allocation16_spill] sm:$0xff] %v10737_v0  ;;  %v15293_v42 = vunpack.i.h.bf16 %v10737_v0  ;;  %v8882_v60 = vunpack.i.l.bf16 %v10737_v0 }
 0x137   : > { %2097 = vmatprep.subr.bf16.mxu1 %v1674_v56 }
 0x138   : > { %2098 = vmatpush1.bf16.msra.mxu1 %v1673_v39  ;;  %v10741_v26 = vpop.permute.xlu0 %8885  ;;  %v988_v2 = vsel %vm916_vm15, %v8882_v60, %v15293_v42 }
 0x139   : > { %15472 = vst [vmem:[#allocation17_spill] sm:$0xff] %v10741_v26  ;;  %v15295_v5 = vunpack.i.h.bf16 %v10741_v26  ;;  %v8887_v1 = vunpack.i.l.bf16 %v10741_v26  ;;  %v8891_v20 = vpop.permute.xlu1 %8890 }
 0x13a   : > { %v8893_v15 = vunpack.i.h.bf16 %v8891_v20  ;;  %v8892_v63 = vunpack.i.l.bf16 %v8891_v20 }
 0x13b   : > { %v993_v53 = vsel %vm916_vm15, %v8887_v1, %v15295_v5  ;;  %v9418_v5 = vld [vmem:[%s15248_s1] ss:$16 sps:$4 sm:$0xff]  }
 0x13c   : > { %v8901_v7 = vpop.permute.xlu0 %8900  ;;  %v1680_v48 = vpack.c.bf16 %v993_v53, %v988_v2  ;;  %v987_v56 = vsel %vm916_vm15, %v8892_v63, %v8882_v60  ;;  %v992_v39 = vsel %vm916_vm15, %v8893_v15, %v8887_v1  ;;  %v9419_v63 = vld [vmem:[%s15248_s1 + $0x24] ss:$16 sps:$4 sm:$0xff]   ;;  %v1319_v1 = vsel %vm1317_vm12, %v8777_v23, %v15302_v40 }
 0x13d   : > { %v8903_v20 = vunpack.i.h.bf16 %v8901_v7  ;;  %v8902_v41 = vunpack.i.l.bf16 %v8901_v7  ;;  %v10755_v19 = vpop.permute.xlu1 %8895  ;;  %v1679_v57 = vpack.c.bf16 %v992_v39, %v987_v56 }
 0x13e   : > { %15473 = vst [vmem:[#allocation18_spill] sm:$0xff] %v10755_v19  ;;  %v15299_v42 = vunpack.i.h.bf16 %v10755_v19  ;;  %v8897_v30 = vunpack.i.l.bf16 %v10755_v19  ;;  %2099 = vmatprep.subr.bf16.mxu1 %v1680_v48 }
 0x13f   : > { %v1318_v2 = vsel %vm1317_vm12, %v8902_v41, %v8777_v23  ;;  %2100 = vmatpush1.bf16.msra.mxu1 %v1679_v57 }
 0x140   : > { %v1324_v15 = vsel %vm1317_vm12, %v8903_v20, %v8897_v30  ;;  %v10767_v60 = vpop.permute.xlu0 %8910  ;;  %v1325_v53 = vsel %vm1317_vm12, %v8897_v30, %v15299_v42 }
 0x141   : > { %15474 = vst [vmem:[#allocation19_spill] sm:$0xff] %v10767_v60  ;;  %v15300_v7 = vunpack.i.h.bf16 %v10767_v60  ;;  %v8912_v57 = vunpack.i.l.bf16 %v10767_v60  ;;  %v10777_v41 = vpop.permute.xlu1 %8905  ;;  %v1686_v48 = vpack.c.bf16 %v1325_v53, %v1319_v1  ;;  %v1685_v56 = vpack.c.bf16 %v1324_v15, %v1318_v2 }
 0x142   : > { %15475 = vst [vmem:[#allocation20_spill] sm:$0xff] %v10777_v41  ;;  %v15301_v39 = vunpack.i.h.bf16 %v10777_v41  ;;  %v8907_v20 = vunpack.i.l.bf16 %v10777_v41  ;;  %2102 = vmatmul.mubr.bf16.vlgmr.msra.gmra.mrb[0].mxu1 %v9418_v5  ;;  %v9421_v5 = vld [vmem:[%s15248_s1 + $0x20] ss:$16 sps:$4 sm:$0xff]  }
 0x143   : > { %2182 = vmatprep.subr.bf16.mxu1 %v1686_v48  ;;  %v1337_v23 = vsel %vm1317_vm12, %v8912_v57, %v15300_v7  ;;  %2111 = vmatprep.mubr.bf16.mxu1 %v9419_v63  ;;  %v9422_v63 = vld [vmem:[%s15248_s1 + $0x44] ss:$16 sps:$4 sm:$0xff]  }
 0x144   : > { %2183 = vmatpush1.bf16.msra.mxu1 %v1685_v56  ;;  %v10784_v30 = vpop.permute.xlu0 %8920  ;;  %v1331_v42 = vsel %vm1317_vm12, %v8907_v20, %v15301_v39 }
 0x145   : > { %15476 = vst [vmem:[#allocation21_spill] sm:$0xff] %v10784_v30  ;;  %v8916_v1 = vpop.permute.xlu1 %8915  ;;  %v1692_v2 = vpack.c.bf16 %v1337_v23, %v1331_v42  ;;  %v8922_v56 = vunpack.i.l.bf16 %v10784_v30 }
 0x146   : > { %v8918_v15 = vunpack.i.h.bf16 %v8916_v1  ;;  %v8917_v53 = vunpack.i.l.bf16 %v8916_v1 }
 0x147   : > { %2184 = vmatprep.subr.bf16.mxu1 %v1692_v2 }
 0x148   : > { %v1336_v7 = vsel %vm1317_vm12, %v8918_v15, %v8912_v57  ;;  %v1330_v39 = vsel %vm1317_vm12, %v8917_v53, %v8907_v20  ;;  %v8931_v42 = vpop.permute.xlu0 %8930  ;;  %v15479_v20 = vunpack.i.h.bf16 %v10784_v30 }
 0x149   : > { %v8933_v23 = vunpack.i.h.bf16 %v8931_v42  ;;  %v8932_v1 = vunpack.i.l.bf16 %v8931_v42  ;;  %v10799_v40 = vpop.permute.xlu1 %8925  ;;  %v1691_v60 = vpack.c.bf16 %v1336_v7, %v1330_v39 }
 0x14a   : > { %15477 = vst [vmem:[#allocation22_spill] sm:$0xff] %v10799_v40  ;;  %v15306_v2 = vunpack.i.h.bf16 %v10799_v40  ;;  %v8927_v41 = vunpack.i.l.bf16 %v10799_v40  ;;  %2112 = vmatmul.mubr.bf16.gmra.mrb[4].mxu1 %v9421_v5  ;;  %v1343_v15 = vsel %vm1317_vm12, %v8922_v56, %v15479_v20 }
 0x14b   : > { %v1342_v19 = vsel %vm1317_vm12, %v8932_v1, %v8922_v56  ;;  %2185 = vmatpush1.bf16.msra.mxu1 %v1691_v60  ;;  %2121 = vmatprep.mubr.bf16.mxu1 %v9422_v63  ;;  %v9424_v56 = vld [vmem:[%s15248_s1 + $0x40] ss:$16 sps:$4 sm:$0xff]   ;;  %v9425_v1 = vld [vmem:[%s15248_s1 + $0x64] ss:$16 sps:$4 sm:$0xff]  }
 0x14c   : > { %v1348_v48 = vsel %vm1317_vm12, %v8933_v23, %v8927_v41  ;;  %v10805_v57 = vpop.permute.xlu0 %8940  ;;  %v1349_v7 = vsel %vm1317_vm12, %v8927_v41, %v15306_v2 }
 0x14d   : > { %15478 = vst [vmem:[#allocation23_spill] sm:$0xff] %v10805_v57  ;;  %v15308_v39 = vunpack.i.h.bf16 %v10805_v57  ;;  %v8942_v53 = vunpack.i.l.bf16 %v10805_v57  ;;  %v10815_v5 = vpop.permute.xlu1 %8935  ;;  %v1698_v60 = vpack.c.bf16 %v1349_v7, %v1343_v15  ;;  %v1697_v63 = vpack.c.bf16 %v1348_v48, %v1342_v19 }
 0x14e   : > { %15480 = vst [vmem:[#allocation24_spill] sm:$0xff] %v10815_v5  ;;  %v15311_v42 = vunpack.i.h.bf16 %v10815_v5  ;;  %v8937_v23 = vunpack.i.l.bf16 %v10815_v5 }
 0x14f   : > { %2186 = vmatprep.subr.bf16.mxu1 %v1698_v60  ;;  %v1361_v41 = vsel %vm1317_vm12, %v8942_v53, %v15308_v39 }
 0x150   : > { %2187 = vmatpush1.bf16.msra.mxu1 %v1697_v63  ;;  %v8951_v20 = vpop.permute.xlu0 %8950  ;;  %v1355_v19 = vsel %vm1317_vm12, %v8937_v23, %v15311_v42  ;;  %v15482_v63 = vunpack.i.l.bf16 %v10221_v12 }
 0x151   : > { %v8953_v48 = vunpack.i.h.bf16 %v8951_v20  ;;  %v8952_v15 = vunpack.i.l.bf16 %v8951_v20  ;;  %v8946_v7 = vpop.permute.xlu1 %8945  ;;  %v1704_v2 = vpack.c.bf16 %v1361_v41, %v1355_v19 }
 0x152   : > { %v10831_v30 = vunpack.i.h.bf16 %v8946_v7  ;;  %v8947_v60 = vunpack.i.l.bf16 %v8946_v7  ;;  %2122 = vmatmul.mubr.bf16.gmra.mrb[8].mxu1 %v9424_v56 }
 0x153   : > { %v1354_v39 = vsel %vm1317_vm12, %v8952_v15, %v8937_v23  ;;  %v1360_v57 = vsel %vm1317_vm12, %v8953_v48, %v8942_v53  ;;  %2188 = vmatprep.subr.bf16.mxu1 %v1704_v2  ;;  %2131 = vmatprep.mubr.bf16.mxu1 %v9425_v1  ;;  %v9427_v1 = vld [vmem:[%s15248_s1 + $0x60] ss:$16 sps:$4 sm:$0xff]  }
 0x154   : > { %15481 = vst [vmem:[#allocation25_spill] sm:$0xff] %v10831_v30  ;;  %v10838_v5 = vsel %vm330_vm0, %v15482_v63, %v8947_v60  ;;  %v10842_v20 = vsel %vm330_vm0, %v8947_v60, %v10831_v30  ;;  %v10844_v41 = vpop.permute.xlu0 %8960  ;;  %v1703_v19 = vpack.c.bf16 %v1360_v57, %v1354_v39  ;;  %v9428_v39 = vld [vmem:[%s15248_s1 + $0x84] ss:$16 sps:$4 sm:$0xff]  }
 0x155   : > { %15483 = vst [vmem:[#allocation26_spill] sm:$0xff] %v10842_v20  ;;  %15484 = vst [vmem:[#allocation27_spill] sm:$0xff] %v10844_v41  ;;  %v15314_v56 = vunpack.i.h.bf16 %v10844_v41  ;;  %v8962_v23 = vunpack.i.l.bf16 %v10844_v41  ;;  %v10848_v15 = vpop.permute.xlu1 %8955  ;;  %v10852_v2 = vpack.i.bf16 %v10842_v20, %v10838_v5 }
 0x156   : > { %15485 = vst [vmem:[#allocation28_spill] sm:$0xff] %v10848_v15  ;;  %v15318_v12 = vunpack.i.h.bf16 %v10848_v15  ;;  %v8957_v53 = vunpack.i.l.bf16 %v10848_v15  ;;  %2189 = vmatpush1.bf16.msra.mxu1 %v1703_v19 }
 0x157   : > { %9110 = vrot.lane.b32.xlu1 %v10852_v2, %s10111_s26  ;;  %v1373_v57 = vsel %vm1317_vm12, %v8962_v23, %v15314_v56  ;;  %v15488_v56 = vunpack.i.l.bf16 %v10236_v22 }
 0x158   : > { %v8971_v48 = vpop.permute.xlu0 %8970  ;;  %v1367_v7 = vsel %vm1317_vm12, %v8957_v53, %v15318_v12  ;;  %v15490_v12 = vunpack.i.l.bf16 %v10219_v11 }
 0x159   : > { %v10870_v60 = vunpack.i.h.bf16 %v8971_v48  ;;  %v8972_v63 = vunpack.i.l.bf16 %v8971_v48  ;;  %v8966_v19 = vpop.permute.xlu1 %8965  ;;  %v1710_v42 = vpack.c.bf16 %v1373_v57, %v1367_v7  ;;  %v15495_v7 = vunpack.i.l.bf16 %v10268_v37 }
 0x15a   : > { %v10872_v20 = vunpack.i.h.bf16 %v8966_v19  ;;  %v8967_v40 = vunpack.i.l.bf16 %v8966_v19  ;;  %2132 = vmatmul.mubr.bf16.gmra.mrb[12].mxu1 %v9427_v1 }
 0x15b   : > { %15486 = vst [vmem:[#allocation29_spill] sm:$0xff] %v10870_v60  ;;  %v10877_v41 = vsel %vm378_vm2, %v15488_v56, %v8972_v63  ;;  %v10881_v30 = vsel %vm378_vm2, %v8972_v63, %v10870_v60  ;;  %2190 = vmatprep.subr.bf16.mxu1 %v1710_v42  ;;  %2141 = vmatprep.mubr.bf16.mxu1 %v9428_v39 }
 0x15c   : > { %15487 = vst [vmem:[#allocation30_spill] sm:$0xff] %v10872_v20  ;;  %15489 = vst [vmem:[#allocation31_spill] sm:$0xff] %v10881_v30  ;;  %v10886_v48 = vsel %vm354_vm1, %v15490_v12, %v8967_v40  ;;  %v10890_v57 = vsel %vm354_vm1, %v8967_v40, %v10872_v20  ;;  %v10892_v1 = vpop.permute.xlu0 %8980  ;;  %v10896_v22 = vpack.i.bf16 %v10881_v30, %v10877_v41  ;;  %v9430_v40 = vld [vmem:[%s15248_s1 + $0x80] ss:$16 sps:$4 sm:$0xff]   ;;  %v9431_v12 = vld [vmem:[%s15248_s1 + $0xa4] ss:$16 sps:$4 sm:$0xff]  }
 0x15d   : > { %15491 = vst [vmem:[#allocation32_spill] sm:$0xff] %v10890_v57  ;;  %15492 = vst [vmem:[#allocation33_spill] sm:$0xff] %v10892_v1  ;;  %v8976_v56 = vpop.permute.xlu1 %8975  ;;  %v10900_v42 = vpack.i.bf16 %v10890_v57, %v10886_v48  ;;  %v8982_v19 = vunpack.i.l.bf16 %v10892_v1 }
 0x15e   : > { %v8978_v39 = vunpack.i.h.bf16 %v8976_v56  ;;  %v8977_v11 = vunpack.i.l.bf16 %v8976_v56  ;;  %9120 = vrot.lane.b32.xlu1 %v10896_v22, %s10111_s26 }
 0x15f   : > { %9115 = vrot.lane.b32.xlu0 %v10900_v42, %s10111_s26 }
 0x160   : > { %v1372_v56 = vsel %vm1317_vm12, %v8978_v39, %v8962_v23  ;;  %v1366_v15 = vsel %vm1317_vm12, %v8977_v11, %v8957_v53  ;;  %v8991_v60 = vpop.permute.xlu0 %8990 }
 0x161   : > { %v10918_v20 = vunpack.i.h.bf16 %v8991_v60  ;;  %v8992_v52 = vunpack.i.l.bf16 %v8991_v60  ;;  %v10920_v26 = vpop.permute.xlu1 %8985  ;;  %v1709_v0 = vpack.c.bf16 %v1372_v56, %v1366_v15  ;;  %v15497_v60 = vunpack.i.h.bf16 %v10892_v1 }
 0x162   : > { %15494 = vst [vmem:[#allocation35_spill] sm:$0xff] %v10920_v26  ;;  %v15330_v43 = vunpack.i.h.bf16 %v10920_v26  ;;  %v8987_v14 = vunpack.i.l.bf16 %v10920_v26  ;;  %2142 = vmatmul.mubr.bf16.gmra.mrb[16].mxu1 %v9430_v40 }
 0x163   : > { %15493 = vst [vmem:[#allocation34_spill] sm:$0xff] %v10918_v20  ;;  %v10927_v63 = vsel %vm402_vm3, %v15495_v7, %v8992_v52  ;;  %v10931_v23 = vsel %vm402_vm3, %v8992_v52, %v10918_v20  ;;  %2191 = vmatpush1.bf16.msra.mxu1 %v1709_v0  ;;  %2151 = vmatprep.mubr.bf16.mxu1 %v9431_v12 }
 0x164   : > { %15496 = vst [vmem:[#allocation36_spill] sm:$0xff] %v10931_v23  ;;  %v9001_v53 = vpop.permute.xlu0 %9000  ;;  %v10935_v15 = vpack.i.bf16 %v10931_v23, %v10927_v63  ;;  %v1379_v39 = vsel %vm1317_vm12, %v8982_v19, %v15497_v60  ;;  %v1385_v37 = vsel %vm1317_vm12, %v8987_v14, %v15330_v43  ;;  %v9433_v60 = vld [vmem:[%s15248_s1 + $0xa0] ss:$16 sps:$4 sm:$0xff]   ;;  %v15499_v43 = vunpack.i.l.bf16 %v10293_v50 }
 0x165   : > { %v9003_v11 = vunpack.i.h.bf16 %v9001_v53  ;;  %v9002_v40 = vunpack.i.l.bf16 %v9001_v53  ;;  %v8996_v7 = vpop.permute.xlu1 %8995  ;;  %v1716_v52 = vpack.c.bf16 %v1385_v37, %v1379_v39 }
 0x166   : > { %v10943_v56 = vunpack.i.h.bf16 %v8996_v7  ;;  %v8997_v0 = vunpack.i.l.bf16 %v8996_v7  ;;  %9125 = vrot.lane.b32.xlu0 %v10935_v15, %s10111_s26 }
 0x167   : > { %v1378_v12 = vsel %vm1317_vm12, %v9002_v40, %v8982_v19  ;;  %v1384_v57 = vsel %vm1317_vm12, %v9003_v11, %v8987_v14  ;;  %2192 = vmatprep.subr.bf16.mxu1 %v1716_v52  ;;  %v9434_v14 = vld [vmem:[%s15248_s1 + $0xc4] ss:$16 sps:$4 sm:$0xff]  }
 0x168   : > { %15498 = vst [vmem:[#allocation37_spill] sm:$0xff] %v10943_v56  ;;  %v10955_v53 = vsel %vm426_vm4, %v15499_v43, %v8997_v0  ;;  %v10959_v39 = vsel %vm426_vm4, %v8997_v0, %v10943_v56  ;;  %v10961_v37 = vpop.permute.xlu0 %9010  ;;  %v1715_v7 = vpack.c.bf16 %v1384_v57, %v1378_v12 }
 0x169   : > { %15500 = vst [vmem:[#allocation38_spill] sm:$0xff] %v10959_v39  ;;  %15501 = vst [vmem:[#allocation39_spill] sm:$0xff] %v10961_v37  ;;  %v15340_v19 = vunpack.i.h.bf16 %v10961_v37  ;;  %v9012_v11 = vunpack.i.l.bf16 %v10961_v37  ;;  %v10968_v40 = vpop.permute.xlu1 %9005  ;;  %v10972_v50 = vpack.i.bf16 %v10959_v39, %v10955_v53  ;;  %v15505_v39 = vunpack.i.l.bf16 %v10334_v10 }
 0x16a   : > { %15502 = vst [vmem:[#allocation40_spill] sm:$0xff] %v10968_v40  ;;  %v15339_v43 = vunpack.i.h.bf16 %v10968_v40  ;;  %v9007_v52 = vunpack.i.l.bf16 %v10968_v40  ;;  %2193 = vmatpush1.bf16.msra.mxu1 %v1715_v7 }
 0x16b   : > { %9130 = vrot.lane.b32.xlu1 %v10972_v50, %s10111_s26  ;;  %v1397_v0 = vsel %vm1317_vm12, %v9012_v11, %v15340_v19  ;;  %2152 = vmatmul.mubr.bf16.gmra.mrb[20].mxu1 %v9433_v60 }
 0x16c   : > { %v9021_v12 = vpop.permute.xlu0 %9020  ;;  %v1391_v30 = vsel %vm1317_vm12, %v9007_v52, %v15339_v43  ;;  %2161 = vmatprep.mubr.bf16.mxu1 %v9434_v14  ;;  %v9436_v14 = vld [vmem:[%s15248_s1 + $0xc0] ss:$16 sps:$4 sm:$0xff]   ;;  %v15512_v43 = vunpack.i.l.bf16 %v10353_v34 }
 0x16d   : > { %v10986_v1 = vunpack.i.h.bf16 %v9021_v12  ;;  %v9022_v7 = vunpack.i.l.bf16 %v9021_v12  ;;  %v9016_v26 = vpop.permute.xlu1 %9015  ;;  %v1722_v20 = vpack.c.bf16 %v1397_v0, %v1391_v30  ;;  %v15507_v12 = vunpack.i.l.bf16 %v10315_v62 }
 0x16e   : > { %v10988_v57 = vunpack.i.h.bf16 %v9016_v26  ;;  %v9017_v23 = vunpack.i.l.bf16 %v9016_v26 }
 0x16f   : > { %15503 = vst [vmem:[#allocation41_spill] sm:$0xff] %v10986_v1  ;;  %v10993_v37 = vsel %vm15455_vm6, %v15505_v39, %v9022_v7  ;;  %v10997_v60 = vsel %vm15455_vm6, %v9022_v7, %v10986_v1  ;;  %2194 = vmatprep.subr.bf16.mxu1 %v1722_v20  ;;  %v9437_v20 = vld [vmem:[%s15248_s1 + $0xe4] ss:$16 sps:$4 sm:$0xff]  }
 0x170   : > { %15504 = vst [vmem:[#allocation42_spill] sm:$0xff] %v10988_v57  ;;  %15506 = vst [vmem:[#allocation43_spill] sm:$0xff] %v10997_v60  ;;  %v11005_v30 = vsel %vm450_vm5, %v15507_v12, %v9017_v23  ;;  %v11009_v10 = vsel %vm450_vm5, %v9017_v23, %v10988_v57  ;;  %v11011_v26 = vpop.permute.xlu0 %9030  ;;  %v11015_v39 = vpack.i.bf16 %v10997_v60, %v10993_v37 }
 0x171   : > { %15508 = vst [vmem:[#allocation44_spill] sm:$0xff] %v11009_v10  ;;  %15509 = vst [vmem:[#allocation45_spill] sm:$0xff] %v11011_v26  ;;  %v9026_v0 = vpop.permute.xlu1 %9025  ;;  %v11022_v62 = vpack.i.bf16 %v11009_v10, %v11005_v30  ;;  %v9032_v19 = vunpack.i.l.bf16 %v11011_v26 }
 0x172   : > { %v9028_v7 = vunpack.i.h.bf16 %v9026_v0  ;;  %v9027_v12 = vunpack.i.l.bf16 %v9026_v0  ;;  %9140 = vrot.lane.b32.xlu1 %v11015_v39, %s10111_s26 }
 0x173   : > { %9135 = vrot.lane.b32.xlu0 %v11022_v62, %s10111_s26  ;;  %2162 = vmatmul.mubr.bf16.gmra.mrb[24].mxu1 %v9436_v14 }
 0x174   : > { %v1396_v40 = vsel %vm1317_vm12, %v9028_v7, %v9012_v11  ;;  %v1390_v57 = vsel %vm1317_vm12, %v9027_v12, %v9007_v52  ;;  %v9041_v1 = vpop.permute.xlu0 %9040  ;;  %2171 = vmatprep.mubr.bf16.mxu1 %v9437_v20 }
 0x175   : > { %v11034_v0 = vunpack.i.h.bf16 %v9041_v1  ;;  %v9042_v56 = vunpack.i.l.bf16 %v9041_v1  ;;  %v11036_v25 = vpop.permute.xlu1 %9035  ;;  %v1721_v4 = vpack.c.bf16 %v1396_v40, %v1390_v57  ;;  %v9439_v1 = vld [vmem:[%s15248_s1 + $0xe0] ss:$16 sps:$4 sm:$0xff]   ;;  %v15514_v57 = vunpack.i.h.bf16 %v11011_v26 }
 0x176   : > { %15511 = vst [vmem:[#allocation47_spill] sm:$0xff] %v11036_v25  ;;  %v15355_v14 = vunpack.i.h.bf16 %v11036_v25  ;;  %v9037_v23 = vunpack.i.l.bf16 %v11036_v25 }
 0x177   : > { %15510 = vst [vmem:[#allocation46_spill] sm:$0xff] %v11034_v0  ;;  %v11043_v10 = vsel %vm15356_vm7, %v15512_v43, %v9042_v56  ;;  %v11047_v11 = vsel %vm15356_vm7, %v9042_v56, %v11034_v0  ;;  %2195 = vmatpush1.bf16.msra.mxu1 %v1721_v4  ;;  %v1403_v34 = vsel %vm1317_vm12, %v9032_v19, %v15514_v57  ;;  %v15516_v57 = vunpack.i.l.bf16 %v10374_v58 }
 0x178   : > { %15513 = vst [vmem:[#allocation48_spill] sm:$0xff] %v11047_v11  ;;  %v9051_v52 = vpop.permute.xlu0 %9050  ;;  %v11054_v40 = vpack.i.bf16 %v11047_v11, %v11043_v10  ;;  %v1409_v43 = vsel %vm1317_vm12, %v9037_v23, %v15355_v14  ;;  %vm15376_vm7 = vcmask 654336   ;;  %v15522_v11 = vunpack.i.l.bf16 %v10412_v59 }
 0x179   : > { %v9053_v56 = vunpack.i.h.bf16 %v9051_v52  ;;  %v9052_v20 = vunpack.i.l.bf16 %v9051_v52  ;;  %v9046_v4 = vpop.permute.xlu1 %9045  ;;  %v1728_v7 = vpack.c.bf16 %v1409_v43, %v1403_v34 }
 0x17a   : > { %v11062_v12 = vunpack.i.h.bf16 %v9046_v4  ;;  %v9047_v60 = vunpack.i.l.bf16 %v9046_v4  ;;  %9145 = vrot.lane.b32.xlu0 %v11054_v40, %s10111_s26 }
 0x17b   : > { %v1402_v0 = vsel %vm1317_vm12, %v9052_v20, %v9032_v19  ;;  %v1408_v26 = vsel %vm1317_vm12, %v9053_v56, %v9037_v23  ;;  %2196 = vmatprep.subr.bf16.mxu1 %v1728_v7  ;;  %2172 = vmatmul.mubr.bf16.gmra.mrb[28].mxu1 %v9439_v1 }
 0x17c   : > { %15515 = vst [vmem:[#allocation49_spill] sm:$0xff] %v11062_v12  ;;  %v11071_v14 = vsel %vm15446_vm8, %v15516_v57, %v9047_v60  ;;  %v11075_v52 = vsel %vm15446_vm8, %v9047_v60, %v11062_v12  ;;  %v11077_v34 = vpop.permute.xlu0 %9060  ;;  %v1727_v43 = vpack.c.bf16 %v1408_v26, %v1402_v0  ;;  %7635 = vmatprep.mubr.msk.bf16.mxu1 %vm2025_vm14, %v10653_v31 }
 0x17d   : > { %15517 = vst [vmem:[#allocation50_spill] sm:$0xff] %v11075_v52  ;;  %15518 = vst [vmem:[#allocation51_spill] sm:$0xff] %v11077_v34  ;;  %v15360_v19 = vunpack.i.h.bf16 %v11077_v34  ;;  %v9062_v23 = vunpack.i.l.bf16 %v11077_v34  ;;  %v11083_v1 = vpop.permute.xlu1 %9055  ;;  %v11087_v58 = vpack.i.bf16 %v11075_v52, %v11071_v14 }
 0x17e   : > { %15519 = vst [vmem:[#allocation52_spill] sm:$0xff] %v11083_v1  ;;  %v15361_v60 = vunpack.i.h.bf16 %v11083_v1  ;;  %v9057_v56 = vunpack.i.l.bf16 %v11083_v1  ;;  %2197 = vmatpush1.bf16.msra.mxu1 %v1727_v43 }
 0x17f   : > { %9150 = vrot.lane.b32.xlu1 %v11087_v58, %s10111_s26  ;;  %v1560_v31 = vsel %vm15376_vm7, %v9062_v23, %v15360_v19 }
 0x180   : > { %v9071_v0 = vpop.permute.xlu0 %9070  ;;  %v1554_v20 = vsel %vm15376_vm7, %v9057_v56, %v15361_v60  ;;  %v15523_v60 = vunpack.i.l.bf16 %v10391_v17 }
 0x181   : > { %v11101_v4 = vunpack.i.h.bf16 %v9071_v0  ;;  %v9072_v7 = vunpack.i.l.bf16 %v9071_v0  ;;  %v9066_v57 = vpop.permute.xlu1 %9065  ;;  %v1734_v43 = vpack.c.bf16 %v1560_v31, %v1554_v20 }
 0x182   : > { %v11103_v25 = vunpack.i.h.bf16 %v9066_v57  ;;  %v9067_v26 = vunpack.i.l.bf16 %v9066_v57 }
 0x183   : > { %15520 = vst [vmem:[#allocation53_spill] sm:$0xff] %v11101_v4  ;;  %v11108_v52 = vsel %vm15444_vm10, %v15522_v11, %v9072_v7  ;;  %v11112_v19 = vsel %vm15444_vm10, %v9072_v7, %v11101_v4  ;;  %2198 = vmatprep.subr.bf16.mxu1 %v1734_v43 }
 0x184   : > { %15521 = vst [vmem:[#allocation54_spill] sm:$0xff] %v11103_v25  ;;  %v11117_v1 = vsel %vm15374_vm9, %v15523_v60, %v9067_v26  ;;  %v11121_v31 = vsel %vm15374_vm9, %v9067_v26, %v11103_v25  ;;  %v9081_v0 = vpop.permute.xlu0 %9080  ;;  %v11125_v59 = vpack.i.bf16 %v11112_v19, %v11108_v52  ;;  %vm15375_vm9 = vcmask 1043456  }
 0x185   : > { %v9083_v11 = vunpack.i.h.bf16 %v9081_v0  ;;  %v9082_v20 = vunpack.i.l.bf16 %v9081_v0  ;;  %v9076_v57 = vpop.permute.xlu1 %9075  ;;  %v11129_v7 = vpack.i.bf16 %v11121_v31, %v11117_v1 }
 0x186   : > { %v9078_v17 = vunpack.i.h.bf16 %v9076_v57  ;;  %v9077_v43 = vunpack.i.l.bf16 %v9076_v57  ;;  %9160 = vrot.lane.b32.xlu1 %v11125_v59, %s10111_s26 }
 0x187   : > { %9155 = vrot.lane.b32.xlu0 %v11129_v7, %s10111_s26  ;;  %v1565_v60 = vsel %vm15376_vm7, %v9082_v20, %v9083_v11  ;;  %v15524_v20 = vunpack.i.l.bf16 %v10429_v47 }
 0x188   : > { %v1559_v0 = vsel %vm15376_vm7, %v9078_v17, %v9062_v23  ;;  %v1553_v34 = vsel %vm15376_vm7, %v9077_v43, %v9057_v56  ;;  %v9086_v25 = vpop.permute.xlu0 %9085  ;;  %v1739_v33 = vpack.c.bf16 %v1565_v60, %v1565_v60 }
 0x189   : > { %v11140_v4 = vunpack.i.h.bf16 %v9086_v25  ;;  %v9087_v12 = vunpack.i.l.bf16 %v9086_v25  ;;  %v11142_v57 = vpop.permute.xlu1 %1542  ;;  %v1733_v36 = vpack.c.bf16 %v1559_v0, %v1553_v34  ;;  %v15525_v0 = vunpack.i.l.bf16 %v10467_v6 }
 0x18a   : > { %v1566_v8 = vsel %vm15376_vm7, %v9083_v11, %v11142_v57 }
 0x18b   : > { %v11149_v46 = vsel %vm15443_vm11, %v15524_v20, %v9087_v12  ;;  %v11153_v23 = vsel %vm15443_vm11, %v9087_v12, %v11140_v4  ;;  %v1740_v56 = vpack.c.bf16 %v1566_v8, %v1566_v8  ;;  %2199 = vmatpush1.bf16.msra.mxu1 %v1733_v36  ;;  %v2052_v8 = vsel %vm15375_vm9, %v1739_v33, 0  ;;  %v11172_v12 = vld [vmem:[%s15248_s1 + $0x8] ss:$16 sps:$4 sm:$0xff]  }
 0x18c   : > { %v9096_v25 = vpop.permute.xlu0 %9095  ;;  %v11157_v34 = vpack.i.bf16 %v11153_v23, %v11149_v46  ;;  %v1592_v36 = vpack.c.bf16 %v10838_v5, %v10672_v44  ;;  %v15526_v33 = vunpack.i.l.bf16 %v10450_v51  ;;  %v1591_v51 = vpack.c.bf16 %v10234_v21, %v10597_v24 }
 0x18d   : > { %v11159_v17 = vunpack.i.h.bf16 %v9096_v25  ;;  %v9097_v11 = vunpack.i.l.bf16 %v9096_v25  ;;  %v9091_v43 = vpop.permute.xlu1 %9090  ;;  %7634 = vmatprep.subr.msk.bf16.mxu1 %vm15375_vm9, %v1740_v56  ;;  %vm15527_vm9 = vcmask 941056   ;;  %v15529_v24 = vunpack.i.l.bf16 %v10488_v55  ;;  %v15585_v55 = vld [vmem:[#allocation16_spill] sm:$0xff] }
 0x18e   : > { %v11162_v47 = vunpack.i.h.bf16 %v9091_v43  ;;  %v9092_v60 = vunpack.i.l.bf16 %v9091_v43  ;;  %9165 = vrot.lane.b32.xlu0 %v11157_v34, %s10111_s26  ;;  %vm15528_vm7 = vmmov %vm15527_vm9  ;;  %v11197_v43 = vld [vmem:[%s15248_s1 + $0x2c] ss:$16 sps:$4 sm:$0xff]   ;;  %v15586_v21 = vunpack.i.h.bf16 %v15585_v55 }
 0x18f   : > { %v11177_v20 = vsel %vm15454_vm13, %v15525_v0, %v9097_v11  ;;  %v11181_v56 = vsel %vm15454_vm13, %v9097_v11, %v11159_v17  ;;  %2201 = vmatpush1.bf16.msra.mxu1 %v2052_v8 }
 0x190   : > { %v622_v5 = vsel %vm15527_vm9, %v15526_v33, %v9092_v60  ;;  %v11188_v25 = vsel %vm15528_vm7, %v9092_v60, %v11162_v47  ;;  %2295 = vmatprep.subr.bf16.mxu1 %v1592_v36  ;;  %v11192_v6 = vpack.i.bf16 %v11181_v56, %v11177_v20  ;;  %v1598_v36 = vpack.c.bf16 %v10877_v41, %v10886_v48  ;;  %v11212_v33 = vld [vmem:[%s10174_s10 + $0x20] sm:$0xff] }
 0x191   : > { %v9101_v11 = vpop.permute.xlu1 %9100  ;;  %v11200_v8 = vpack.i.bf16 %v11188_v25, %v622_v5  ;;  %v11216_v26 = vpack.i.bf16 %v11212_v33, %v10672_v44  ;;  %vm15530_vm7 = vcmask 924672   ;;  %v1597_v48 = vpack.c.bf16 %v10265_v35, %v10254_v32  ;;  %v11252_v32 = vld [vmem:[%s15248_s1 + $0x4c] ss:$16 sps:$4 sm:$0xff]  }
 0x192   : > { %v11204_v0 = vunpack.i.h.bf16 %v9101_v11  ;;  %v9102_v60 = vunpack.i.l.bf16 %v9101_v11  ;;  %9175 = vrot.lane.b32.xlu0 %v11192_v6, %s10111_s26  ;;  %2215 = vmatmul.mubr.bf16.vlgmr.msra.gmra.mrb[0].mxu1 %v11172_v12  ;;  %vm15531_vm9 = vmmov %vm15530_vm7  ;;  %v1610_v35 = vpack.c.bf16 %v10993_v37, %v11005_v30  ;;  %v1616_v37 = vpack.c.bf16 %v11071_v14, %v11043_v10  ;;  %v11276_v30 = vld [vmem:[%s15248_s1 + $0x48] ss:$16 sps:$4 sm:$0xff]  }
 0x193   : > { %9170 = vrot.lane.b32.xlu1 %v11200_v8, %s10111_s26  ;;  %2296 = vmatpush1.bf16.msra.mxu1 %v1591_v51  ;;  %v1604_v51 = vpack.c.bf16 %v10955_v53, %v10927_v63  ;;  %v15532_v63 = vpack.c.bf16 %v10313_v61, %v10291_v49  ;;  %v11265_v53 = vld [vmem:[%s10174_s10 + $0x30] sm:$0xff]  ;;  %v15533_v49 = vpack.c.bf16 %v10349_v27, %v10332_v9  ;;  %v11286_v61 = vld [vmem:[%s15248_s1 + $0x6c] ss:$16 sps:$4 sm:$0xff]   ;;  %v15534_v9 = vld [vmem:[#allocation2_spill] sm:$0xff] }
 0x194   : > { %v670_v11 = vsel %vm15530_vm7, %v15529_v24, %v9102_v60  ;;  %v11227_v41 = vsel %vm15531_vm9, %v9102_v60, %v11204_v0  ;;  %2297 = vmatprep.subr.bf16.mxu1 %v1598_v36  ;;  %7636 = vmatprep.mubr.msk.bf16.mxu1 %vm2025_vm14, %v11197_v43  ;;  %v11245_v60 = vld [vmem:[%s15248_s1 + $0x28] ss:$16 sps:$4 sm:$0xff]   ;;  %v1622_v10 = vpack.c.bf16 %v11108_v52, %v11117_v1  ;;  %v11316_v52 = vld [vmem:[%s15248_s1 + $0x8c] ss:$16 sps:$4 sm:$0xff]   ;;  %v15539_v1 = vld [vmem:[#allocation6_spill] sm:$0xff]  ;;  %vm15636_vm7 = vcmask 982016  }
 0x195   : > { %v11232_v44 = vpack.i.bf16 %v11227_v41, %v670_v11  ;;  %v15535_v27 = vpack.c.bf16 %v10389_v13, %v15534_v9  ;;  %v15537_v13 = vld [vmem:[#allocation3_spill] sm:$0xff]  ;;  %vm15645_vm9 = vcmask 965632  }
 0x196   : > { %9185 = vrot.lane.b32.xlu0 %v11216_v26, %s10112_s29  ;;  %v11403_v24 = vld [vmem:[%s15248_s1 + $0xe8] ss:$16 sps:$4 sm:$0xff]  }
 0x197   : > { %9180 = vrot.lane.b32.xlu1 %v11232_v44, %s10111_s26  ;;  %2298 = vmatpush1.bf16.msra.mxu1 %v1597_v48 }
 0x198   : > { %2299 = vmatprep.subr.bf16.mxu1 %v1604_v51 }
 0x19a   : > { %9195 = vrot.lane.b32.xlu0 %v10900_v42, %s10112_s29  ;;  %2225 = vmatmul.mubr.bf16.gmra.mrb[4].mxu1 %v11245_v60 }
 0x19b   : > { %9190 = vrot.lane.b32.xlu1 %v10852_v2, %s10112_s29  ;;  %2300 = vmatpush1.bf16.msra.mxu1 %v15532_v63  ;;  %v15547_v63 = vunpack.i.h.bf16 %v10569_v45 }
 0x19c   : > { %2301 = vmatprep.subr.bf16.mxu1 %v1610_v35  ;;  %7637 = vmatprep.mubr.msk.bf16.mxu1 %vm2025_vm14, %v11252_v32  ;;  %v11423_v35 = vld [vmem:[%s15248_s1 + $0x4] ss:$16 sps:$4 sm:$0xff]  }
 0x19d   : > { %15546 = vst [vmem:[#allocation3_spill] sm:$0xff] %v11423_v35 }
 0x19e   : > { %718 = vrot.lane.b32.xlu0 %v11265_v53, %s10097_s12 }
 0x19f   : > { %9200 = vrot.lane.b32.xlu1 %v10896_v22, %s10112_s29  ;;  %2302 = vmatpush1.bf16.msra.mxu1 %v15533_v49  ;;  %v1628_v22 = vpack.c.bf16 %v622_v5, %v11149_v46  ;;  %v1634_v46 = vpack.c.bf16 %v670_v11, %v11177_v20  ;;  %v15540_v5 = vld [vmem:[#allocation5_spill] sm:$0xff] }
 0x1a0   : > { %2303 = vmatprep.subr.bf16.mxu1 %v1616_v37  ;;  %v15541_v36 = vpack.c.bf16 %v15539_v1, %v15540_v5  ;;  %v11344_v20 = vld [vmem:[%s15248_s1 + $0xac] ss:$16 sps:$4 sm:$0xff]   ;;  %v15548_v37 = vunpack.i.h.bf16 %v10585_v38  ;;  %v15552_v5 = vunpack.i.h.bf16 %v10609_v16  ;;  %v15377_v16 = vmov 0  }
 0x1a1   : > { %9414 = vset.pattern.permute.xlu1 %v15377_v16  ;;  %9415 = vset.pattern.permute.xlu0 %v15377_v16 }
 0x1a2   : > { %9210 = vrot.lane.b32.xlu0 %v10972_v50, %s10112_s29  ;;  %2235 = vmatmul.mubr.bf16.gmra.mrb[8].mxu1 %v11276_v30  ;;  %v11306_v50 = vld [vmem:[%s15248_s1 + $0x68] ss:$16 sps:$4 sm:$0xff]  }
 0x1a3   : > { %9205 = vrot.lane.b32.xlu1 %v10935_v15, %s10112_s29  ;;  %2304 = vmatpush1.bf16.msra.mxu1 %v15535_v27  ;;  %v15536_v15 = vld [vmem:[#allocation4_spill] sm:$0xff] }
 0x1a4   : > { %2305 = vmatprep.subr.bf16.mxu1 %v1622_v10  ;;  %7638 = vmatprep.mubr.msk.bf16.mxu1 %vm2025_vm14, %v11286_v61  ;;  %v15538_v14 = vpack.c.bf16 %v15536_v15, %v15537_v13 }
 0x1a6   : > { %721 = vrot.lane.b32.xlu0 %v11265_v53, %s10096_s11 }
 0x1a7   : > { %679 = vrot.lane.b32.xlu1 %v11265_v53, %s10098_s13  ;;  %2306 = vmatpush1.bf16.msra.mxu1 %v15538_v14  ;;  %v15551_v14 = vunpack.i.h.bf16 %v10601_v3  ;;  %v11466_v3 = vld [vmem:[%s10174_s10 + $0x28] sm:$0xff]  ;;  %s15767_s10 = smov 117  }
 0x1a8   : > { %2307 = vmatprep.subr.bf16.mxu1 %v1628_v22 }
 0x1aa   : > { %9220 = vrot.lane.b32.xlu0 %v11015_v39, %s10112_s29  ;;  %2245 = vmatmul.mubr.bf16.gmra.mrb[12].mxu1 %v11306_v50  ;;  %v11334_v39 = vld [vmem:[%s15248_s1 + $0x88] ss:$16 sps:$4 sm:$0xff]  }
 0x1ab   : > { %9215 = vrot.lane.b32.xlu1 %v11022_v62, %s10112_s29  ;;  %2308 = vmatpush1.bf16.msra.mxu1 %v15541_v36  ;;  %v15542_v62 = vpack.c.bf16 %v10501_v18, %v10486_v54  ;;  %v11358_v18 = vld [vmem:[%s15248_s1 + $0xa8] ss:$16 sps:$4 sm:$0xff]   ;;  %v11365_v54 = vld [vmem:[%s15248_s1 + $0xcc] ss:$16 sps:$4 sm:$0xff]  }
 0x1ac   : > { %2309 = vmatprep.subr.bf16.mxu1 %v1634_v46  ;;  %7639 = vmatprep.mubr.msk.bf16.mxu1 %vm2025_vm14, %v11316_v52 }
 0x1ae   : > { %685 = vrot.lane.b32.xlu0 %v11265_v53, %s10100_s15 }
 0x1af   : > { %682 = vrot.lane.b32.xlu1 %v11265_v53, %s10099_s14  ;;  %2310 = vmatpush1.bf16.msra.mxu1 %v15542_v62 }
 0x1b2   : > { %9230 = vrot.lane.b32.xlu0 %v11087_v58, %s10112_s29  ;;  %2255 = vmatmul.mubr.bf16.gmra.mrb[16].mxu1 %v11334_v39  ;;  %v11386_v58 = vld [vmem:[%s15248_s1 + $0xec] ss:$16 sps:$4 sm:$0xff]  }
 0x1b3   : > { %9225 = vrot.lane.b32.xlu1 %v11054_v40, %s10112_s29  ;;  %7640 = vmatprep.mubr.msk.bf16.mxu1 %vm2025_vm14, %v11344_v20  ;;  %v11379_v40 = vld [vmem:[%s15248_s1 + $0xc8] ss:$16 sps:$4 sm:$0xff]  }
 0x1b6   : > { %691 = vrot.lane.b32.xlu0 %v11265_v53, %s10102_s17 }
 0x1b7   : > { %688 = vrot.lane.b32.xlu1 %v11265_v53, %s10101_s16 }
 0x1ba   : > { %9240 = vrot.lane.b32.xlu0 %v11125_v59, %s10112_s29  ;;  %2265 = vmatmul.mubr.bf16.gmra.mrb[20].mxu1 %v11358_v18  ;;  %v11395_v59 = vpop.permute.xlu0 %9105 }
 0x1bb   : > { %9235 = vrot.lane.b32.xlu1 %v11129_v7, %s10112_s29  ;;  %7641 = vmatprep.mubr.msk.bf16.mxu1 %vm2025_vm14, %v11365_v54  ;;  %15543 = vst [vmem:[#allocation2_spill] sm:$0xff] %v11395_v59  ;;  %v15390_v7 = vunpack.i.h.bf16 %v11395_v59 }
 0x1be   : > { %697 = vrot.lane.b32.xlu0 %v11265_v53, %s15452_s19 }
 0x1bf   : > { %694 = vrot.lane.b32.xlu1 %v11265_v53, %s10103_s18 }
 0x1c2   : > { %9250 = vrot.lane.b32.xlu0 %v11200_v8, %s10112_s29  ;;  %2275 = vmatmul.mubr.bf16.gmra.mrb[24].mxu1 %v11379_v40 }
 0x1c3   : > { %9245 = vrot.lane.b32.xlu1 %v11157_v34, %s10112_s29  ;;  %7642 = vmatprep.mubr.msk.bf16.mxu1 %vm2025_vm14, %v11386_v58  ;;  %v9107_v34 = vunpack.i.l.bf16 %v11395_v59  ;;  %v15634_v59 = vld [vmem:[#allocation49_spill] sm:$0xff] }
 0x1c5   : > { %v920_v51 = vsel %vm916_vm15, %v9107_v34, %v15390_v7 }
 0x1c6   : > { %703 = vrot.lane.b32.xlu0 %v11265_v53, %s15450_s21 }
 0x1c7   : > { %700 = vrot.lane.b32.xlu1 %v11265_v53, %s15544_s24 }
 0x1c9   : > { %v11408_v8 = vpop.permute.xlu1 %9110 }
 0x1ca   : > { %15545 = vst [vmem:[#allocation4_spill] sm:$0xff] %v11408_v8  ;;  %v15389_v11 = vunpack.i.h.bf16 %v11408_v8  ;;  %v9112_v48 = vunpack.i.l.bf16 %v11408_v8  ;;  %9260 = vrot.lane.b32.xlu0 %v11232_v44, %s10112_s29  ;;  %2285 = vmatmul.mubr.bf16.gmra.mrb[28].mxu1 %v11403_v24  ;;  %v919_v44 = vsel %vm916_vm15, %v15547_v63, %v9107_v34  ;;  %v15627_v8 = vld [vmem:[#allocation42_spill] sm:$0xff] }
 0x1cb   : > { %9255 = vrot.lane.b32.xlu1 %v11192_v6, %s10112_s29  ;;  %2327 = vmatprep.mubr.bf16.mxu1 %v11423_v35  ;;  %v15644_v35 = vld [vmem:[#allocation54_spill] sm:$0xff] }
 0x1cc   : > { %v924_v49 = vsel %vm916_vm15, %v15548_v37, %v9112_v48  ;;  %v925_v10 = vsel %vm916_vm15, %v9112_v48, %v15389_v11 }
 0x1cd   : > { %v1640_v6 = vpack.c.bf16 %v925_v10, %v920_v51  ;;  %v1639_v9 = vpack.c.bf16 %v924_v49, %v919_v44  ;;  %v15557_v49 = vunpack.i.h.bf16 %v10619_v28 }
 0x1ce   : > { %709 = vrot.lane.b32.xlu0 %v11265_v53, %s15416_s23 }
 0x1cf   : > { %706 = vrot.lane.b32.xlu1 %v11265_v53, %s15448_s22  ;;  %2311 = vmatprep.subr.bf16.mxu1 %v1640_v6  ;;  %v15558_v6 = vunpack.i.h.bf16 %v10632_v29  ;;  %s15763_s22 = smov 119  }
 0x1d0   : > { %2312 = vmatpush1.bf16.msra.mxu1 %v1639_v9  ;;  %v11439_v45 = vpop.permute.xlu1 %9120 }
 0x1d1   : > { %15549 = vst [vmem:[#allocation6_spill] sm:$0xff] %v11439_v45  ;;  %v11441_v38 = vpop.permute.xlu0 %9115  ;;  %v15387_v27 = vunpack.i.h.bf16 %v11439_v45  ;;  %v9122_v22 = vunpack.i.l.bf16 %v11439_v45 }
 0x1d2   : > { %15550 = vst [vmem:[#allocation5_spill] sm:$0xff] %v11441_v38  ;;  %v15388_v15 = vunpack.i.h.bf16 %v11441_v38  ;;  %v9117_v13 = vunpack.i.l.bf16 %v11441_v38  ;;  %9270 = vrot.lane.b32.xlu0 %v10852_v2, %s10113_s30  ;;  %v15619_v38 = vld [vmem:[#allocation34_spill] sm:$0xff] }
 0x1d3   : > { %v934_v46 = vsel %vm916_vm15, %v15551_v14, %v9122_v22  ;;  %9265 = vrot.lane.b32.xlu1 %v11216_v26, %s10113_s30  ;;  %v935_v1 = vsel %vm916_vm15, %v9122_v22, %v15387_v27  ;;  %v11470_v26 = vpack.i.bf16 %v11265_v53, %v11466_v3 }
 0x1d4   : > { %v929_v36 = vsel %vm916_vm15, %v15552_v5, %v9117_v13  ;;  %v930_v62 = vsel %vm916_vm15, %v9117_v13, %v15388_v15 }
 0x1d5   : > { %v1646_v2 = vpack.c.bf16 %v935_v1, %v930_v62  ;;  %v1645_v34 = vpack.c.bf16 %v934_v46, %v929_v36  ;;  %v15561_v62 = vld [vmem:[#allocation9_spill] sm:$0xff] }
 0x1d6   : > { %715 = vrot.lane.b32.xlu0 %v11265_v53, %s15553_s9  ;;  %s7601_s9 = sshll.u32 %s15833_s28, 2 }
 0x1d7   : > { %712 = vrot.lane.b32.xlu1 %v11265_v53, %s15554_s25  ;;  %2313 = vmatprep.subr.bf16.mxu1 %v1646_v2  ;;  %v15562_v2 = vunpack.i.h.bf16 %v15561_v62 }
 0x1d8   : > { %2314 = vmatpush1.bf16.msra.mxu1 %v1645_v34  ;;  %v11475_v48 = vpop.permute.xlu0 %9125 }
 0x1d9   : > { %15555 = vst [vmem:[#allocation55_spill] sm:$0xff] %v11475_v48  ;;  %v15384_v51 = vunpack.i.h.bf16 %v11475_v48  ;;  %v9127_v63 = vunpack.i.l.bf16 %v11475_v48 }
 0x1da   : > { %9280 = vrot.lane.b32.xlu0 %v11470_v26, %s10112_s29 }
 0x1db   : > { %9275 = vrot.lane.b32.xlu1 %v10900_v42, %s10113_s30  ;;  %v939_v10 = vsel %vm916_vm15, %v15557_v49, %v9127_v63  ;;  %v940_v42 = vsel %vm916_vm15, %v9127_v63, %v15384_v51 }
 0x1dd   : > { %v11484_v53 = vpop.permute.xlu1 %9130 }
 0x1de   : > { %15556 = vst [vmem:[#allocation56_spill] sm:$0xff] %v11484_v53  ;;  %v15383_v44 = vunpack.i.h.bf16 %v11484_v53  ;;  %v9132_v37 = vunpack.i.l.bf16 %v11484_v53  ;;  %v15618_v53 = vld [vmem:[#allocation37_spill] sm:$0xff] }
 0x1e0   : > { %v944_v9 = vsel %vm916_vm15, %v15558_v6, %v9132_v37  ;;  %v945_v22 = vsel %vm916_vm15, %v9132_v37, %v15383_v44  ;;  %v15563_v37 = vld [vmem:[#allocation8_spill] sm:$0xff] }
 0x1e1   : > { %v1652_v13 = vpack.c.bf16 %v945_v22, %v940_v42  ;;  %v1651_v14 = vpack.c.bf16 %v944_v9, %v939_v10  ;;  %v15564_v49 = vunpack.i.h.bf16 %v15563_v37  ;;  %v15567_v37 = vld [vmem:[#allocation10_spill] sm:$0xff] }
 0x1e3   : > { %2315 = vmatprep.subr.bf16.mxu1 %v1652_v13 }
 0x1e4   : > { %2316 = vmatpush1.bf16.msra.mxu1 %v1651_v14  ;;  %v11500_v46 = vpop.permute.xlu1 %9140 }
 0x1e5   : > { %15559 = vst [vmem:[#allocation57_spill] sm:$0xff] %v11500_v46  ;;  %v11502_v28 = vpop.permute.xlu0 %9135  ;;  %v15379_v29 = vunpack.i.h.bf16 %v11500_v46  ;;  %v9142_v1 = vunpack.i.l.bf16 %v11500_v46  ;;  %v15609_v46 = vld [vmem:[#allocation29_spill] sm:$0xff] }
 0x1e6   : > { %15560 = vst [vmem:[#allocation58_spill] sm:$0xff] %v11502_v28  ;;  %v15381_v5 = vunpack.i.h.bf16 %v11502_v28  ;;  %v9137_v36 = vunpack.i.l.bf16 %v11502_v28 }
 0x1e7   : > { %v954_v34 = vsel %vm916_vm15, %v15562_v2, %v9142_v1  ;;  %v955_v63 = vsel %vm916_vm15, %v9142_v1, %v15379_v29 }
 0x1e8   : > { %v949_v10 = vsel %vm916_vm15, %v15564_v49, %v9137_v36  ;;  %v950_v6 = vsel %vm916_vm15, %v9137_v36, %v15381_v5  ;;  %v15568_v49 = vunpack.i.h.bf16 %v15567_v37 }
 0x1e9   : > { %v1658_v9 = vpack.c.bf16 %v955_v63, %v950_v6  ;;  %v1657_v42 = vpack.c.bf16 %v954_v34, %v949_v10  ;;  %v15569_v63 = vld [vmem:[#allocation11_spill] sm:$0xff] }
 0x1ea   : > { %v15570_v34 = vunpack.i.h.bf16 %v15569_v63 }
 0x1eb   : > { %2317 = vmatprep.subr.bf16.mxu1 %v1658_v9 }
 0x1ec   : > { %2318 = vmatpush1.bf16.msra.mxu1 %v1657_v42  ;;  %v11520_v22 = vpop.permute.xlu0 %9145 }
 0x1ed   : > { %15565 = vst [vmem:[#allocation9_spill] sm:$0xff] %v11520_v22  ;;  %v15380_v13 = vunpack.i.h.bf16 %v11520_v22  ;;  %v9147_v14 = vunpack.i.l.bf16 %v11520_v22 }
 0x1ef   : > { %v959_v36 = vsel %vm916_vm15, %v15568_v49, %v9147_v14  ;;  %v960_v6 = vsel %vm916_vm15, %v9147_v14, %v15380_v13  ;;  %v15573_v13 = vld [vmem:[#allocation13_spill] sm:$0xff] }
 0x1f0   : > { %v15574_v5 = vunpack.i.h.bf16 %v15573_v13 }
 0x1f1   : > { %v11524_v62 = vpop.permute.xlu1 %9150 }
 0x1f2   : > { %15566 = vst [vmem:[#allocation8_spill] sm:$0xff] %v11524_v62  ;;  %v15382_v1 = vunpack.i.h.bf16 %v11524_v62  ;;  %v9152_v2 = vunpack.i.l.bf16 %v11524_v62 }
 0x1f4   : > { %v964_v10 = vsel %vm916_vm15, %v15570_v34, %v9152_v2  ;;  %v965_v9 = vsel %vm916_vm15, %v9152_v2, %v15382_v1 }
 0x1f5   : > { %v1664_v42 = vpack.c.bf16 %v965_v9, %v960_v6  ;;  %v1663_v16 = vpack.c.bf16 %v964_v10, %v959_v36  ;;  %v15575_v36 = vld [vmem:[#allocation12_spill] sm:$0xff] }
 0x1f6   : > { %v15576_v10 = vunpack.i.h.bf16 %v15575_v36 }
 0x1f7   : > { %2319 = vmatprep.subr.bf16.mxu1 %v1664_v42 }
 0x1f8   : > { %2320 = vmatpush1.bf16.msra.mxu1 %v1663_v16  ;;  %v11540_v29 = vpop.permute.xlu1 %9160 }
 0x1f9   : > { %15571 = vst [vmem:[#allocation10_spill] sm:$0xff] %v11540_v29  ;;  %v11542_v37 = vpop.permute.xlu0 %9155  ;;  %v15385_v49 = vunpack.i.h.bf16 %v11540_v29  ;;  %v9162_v63 = vunpack.i.l.bf16 %v11540_v29 }
 0x1fa   : > { %15572 = vst [vmem:[#allocation11_spill] sm:$0xff] %v11542_v37  ;;  %v15386_v34 = vunpack.i.h.bf16 %v11542_v37  ;;  %v9157_v14 = vunpack.i.l.bf16 %v11542_v37  ;;  %v15608_v37 = vld [vmem:[#allocation30_spill] sm:$0xff] }
 0x1fb   : > { %v974_v2 = vsel %vm916_vm15, %v15574_v5, %v9162_v63  ;;  %v975_v16 = vsel %vm916_vm15, %v9162_v63, %v15385_v49  ;;  %v15580_v49 = vld [vmem:[#allocation14_spill] sm:$0xff] }
 0x1fc   : > { %v969_v6 = vsel %vm916_vm15, %v15576_v10, %v9157_v14  ;;  %v970_v9 = vsel %vm916_vm15, %v9157_v14, %v15386_v34  ;;  %v15581_v14 = vunpack.i.h.bf16 %v15580_v49 }
 0x1fd   : > { %v1670_v42 = vpack.c.bf16 %v975_v16, %v970_v9  ;;  %v1669_v1 = vpack.c.bf16 %v974_v2, %v969_v6  ;;  %v15582_v6 = vld [vmem:[#allocation15_spill] sm:$0xff] }
 0x1fe   : > { %v15583_v9 = vunpack.i.h.bf16 %v15582_v6 }
 0x1ff   : > { %2321 = vmatprep.subr.bf16.mxu1 %v1670_v42 }
 0x200   : > { %2322 = vmatpush1.bf16.msra.mxu1 %v1669_v1  ;;  %v11560_v44 = vpop.permute.xlu0 %9165 }
 0x201   : > { %15577 = vst [vmem:[#allocation13_spill] sm:$0xff] %v11560_v44  ;;  %v9167_v5 = vunpack.i.l.bf16 %v11560_v44  ;;  %v15391_v13 = vunpack.i.h.bf16 %v11560_v44 }
 0x203   : > { %v979_v2 = vsel %vm916_vm15, %v15581_v14, %v9167_v5  ;;  %v980_v27 = vsel %vm916_vm15, %v9167_v5, %v15391_v13  ;;  %v15587_v13 = vld [vmem:[#allocation17_spill] sm:$0xff] }
 0x204   : > { %v11564_v51 = vpop.permute.xlu0 %9175 }
 0x205   : > { %15578 = vst [vmem:[#allocation12_spill] sm:$0xff] %v11564_v51  ;;  %v11566_v63 = vpop.permute.xlu1 %9170  ;;  %v9177_v1 = vunpack.i.l.bf16 %v11564_v51 }
 0x206   : > { %15579 = vst [vmem:[#allocation59_spill] sm:$0xff] %v11566_v63  ;;  %v15393_v36 = vunpack.i.h.bf16 %v11566_v63  ;;  %v9172_v10 = vunpack.i.l.bf16 %v11566_v63  ;;  %v15588_v63 = vunpack.i.h.bf16 %v15587_v13 }
 0x207   : > { %v989_v16 = vsel %vm916_vm15, %v15586_v21, %v9177_v1 }
 0x208   : > { %v984_v42 = vsel %vm916_vm15, %v15583_v9, %v9172_v10  ;;  %v11578_v34 = vpop.permute.xlu0 %9185  ;;  %v985_v49 = vsel %vm916_vm15, %v9172_v10, %v15393_v36 }
 0x209   : > { %v11586_v15 = vpop.permute.xlu1 %9180  ;;  %v1676_v14 = vpack.c.bf16 %v985_v49, %v980_v27  ;;  %v1675_v11 = vpack.c.bf16 %v984_v42, %v979_v2  ;;  %v15396_v7 = vunpack.i.h.bf16 %v11578_v34  ;;  %v9187_v5 = vunpack.i.l.bf16 %v11578_v34 }
 0x20a   : > { %15584 = vst [vmem:[#allocation14_spill] sm:$0xff] %v11586_v15  ;;  %v15395_v6 = vunpack.i.h.bf16 %v11586_v15  ;;  %v9182_v9 = vunpack.i.l.bf16 %v11586_v15  ;;  %v15590_v2 = vunpack.i.h.bf16 %v11564_v51 }
 0x20b   : > { %2323 = vmatprep.subr.bf16.mxu1 %v1676_v14 }
 0x20c   : > { %v994_v10 = vsel %vm916_vm15, %v15588_v63, %v9182_v9  ;;  %2324 = vmatpush1.bf16.msra.mxu1 %v1675_v11  ;;  %v11598_v27 = vpop.permute.xlu0 %9195  ;;  %v990_v42 = vsel %vm916_vm15, %v9177_v1, %v15590_v2  ;;  %v995_v55 = vsel %vm916_vm15, %v9182_v9, %v15395_v6  ;;  %v1321_v11 = vsel %vm1317_vm12, %v9187_v5, %v15396_v7  ;;  %v15591_v1 = vld [vmem:[#allocation7_spill] sm:$0xff]  ;;  %v15593_v6 = vld [vmem:[#allocation18_spill] sm:$0xff]  ;;  %v15595_v7 = vld [vmem:[#allocation25_spill] sm:$0xff] }
 0x20d   : > { %15589 = vst [vmem:[#allocation15_spill] sm:$0xff] %v11598_v27  ;;  %v11606_v49 = vpop.permute.xlu1 %9190  ;;  %v1682_v21 = vpack.c.bf16 %v995_v55, %v990_v42  ;;  %v1681_v14 = vpack.c.bf16 %v994_v10, %v989_v16  ;;  %v9197_v63 = vunpack.i.l.bf16 %v11598_v27  ;;  %v15592_v2 = vunpack.i.h.bf16 %v15591_v1 }
 0x20e   : > { %v15399_v36 = vunpack.i.h.bf16 %v11606_v49  ;;  %v9192_v13 = vunpack.i.l.bf16 %v11606_v49  ;;  %v15594_v42 = vunpack.i.h.bf16 %v15593_v6 }
 0x20f   : > { %2325 = vmatprep.subr.bf16.mxu1 %v1682_v21  ;;  %v1320_v15 = vsel %vm1317_vm12, %v15592_v2, %v9187_v5 }
 0x210   : > { %v1326_v16 = vsel %vm1317_vm12, %v15594_v42, %v9192_v13  ;;  %2326 = vmatpush1.bf16.msra.mxu1 %v1681_v14  ;;  %v719_v10 = vpop.permute.xlu0 %718  ;;  %v1327_v55 = vsel %vm1317_vm12, %v9192_v13, %v15399_v36  ;;  %v15597_v42 = vld [vmem:[#allocation20_spill] sm:$0xff]  ;;  %v15599_v36 = vld [vmem:[#allocation19_spill] sm:$0xff] }
 0x211   : > { %v720_v51 = vsel %vm330_vm0, %v15595_v7, %v719_v10  ;;  %v11626_v21 = vpop.permute.xlu1 %9200  ;;  %v1688_v1 = vpack.c.bf16 %v1327_v55, %v1321_v11  ;;  %v1687_v44 = vpack.c.bf16 %v1326_v16, %v1320_v15  ;;  %v15598_v14 = vunpack.i.h.bf16 %v15597_v42  ;;  %v10044_v13 = vld [vmem:[%s15248_s1] ss:$16 sps:$4 sm:$0xff]   ;;  %v10045_v42 = vld [vmem:[%s15248_s1 + $0x24] ss:$16 sps:$4 sm:$0xff]  }
 0x212   : > { %15596 = vst [vmem:[#allocation16_spill] sm:$0xff] %v11626_v21  ;;  %v11628_v5 = vpack.i.bf16 %v719_v10, %v720_v51  ;;  %v15401_v2 = vunpack.i.h.bf16 %v11626_v21  ;;  %v9202_v6 = vunpack.i.l.bf16 %v11626_v21  ;;  %v15600_v29 = vunpack.i.h.bf16 %v15599_v36  ;;  %v15635_v21 = vld [vmem:[#allocation46_spill] sm:$0xff] }
 0x213   : > { %v1332_v9 = vsel %vm1317_vm12, %v15598_v14, %v9197_v63  ;;  %2408 = vmatprep.subr.bf16.mxu1 %v1688_v1  ;;  %2328 = vmatmul.mubr.bf16.vlgmr.msra.gmra.mrb[32].mxu1 %v10044_v13  ;;  %v15602_v11 = vunpack.i.h.bf16 %v11598_v27  ;;  %v15604_v13 = vld [vmem:[#allocation22_spill] sm:$0xff]  ;;  %v15643_v27 = vld [vmem:[#allocation53_spill] sm:$0xff] }
 0x214   : > { %v1338_v15 = vsel %vm1317_vm12, %v15600_v29, %v9202_v6  ;;  %2409 = vmatpush1.bf16.msra.mxu1 %v1687_v44  ;;  %v11641_v51 = vpop.permute.xlu0 %9210  ;;  %9285 = vrot.lane.b32.xlu1 %v11628_v5, %s10112_s29  ;;  %v1339_v10 = vsel %vm1317_vm12, %v9202_v6, %v15401_v2 }
 0x215   : > { %15601 = vst [vmem:[#allocation17_spill] sm:$0xff] %v11641_v51  ;;  %v1333_v16 = vsel %vm1317_vm12, %v9197_v63, %v15602_v11  ;;  %v15407_v55 = vunpack.i.h.bf16 %v11641_v51  ;;  %v9212_v36 = vunpack.i.l.bf16 %v11641_v51  ;;  %v11653_v1 = vpop.permute.xlu1 %9205  ;;  %v1693_v29 = vpack.c.bf16 %v1338_v15, %v1332_v9  ;;  %2337 = vmatprep.mubr.bf16.mxu1 %v10045_v42 }
 0x216   : > { %15603 = vst [vmem:[#allocation7_spill] sm:$0xff] %v11653_v1  ;;  %v1694_v44 = vpack.c.bf16 %v1339_v10, %v1333_v16  ;;  %v15406_v14 = vunpack.i.h.bf16 %v11653_v1  ;;  %v9207_v63 = vunpack.i.l.bf16 %v11653_v1  ;;  %v15605_v11 = vunpack.i.h.bf16 %v15604_v13  ;;  %v15606_v16 = vld [vmem:[#allocation21_spill] sm:$0xff] }
 0x217   : > { %v1351_v2 = vsel %vm1317_vm12, %v9212_v36, %v15407_v55  ;;  %v15607_v9 = vunpack.i.h.bf16 %v15606_v16  ;;  %v15626_v1 = vld [vmem:[#allocation41_spill] sm:$0xff] }
 0x218   : > { %v1350_v6 = vsel %vm1317_vm12, %v15605_v11, %v9212_v36  ;;  %2410 = vmatprep.subr.bf16.mxu1 %v1694_v44  ;;  %v722_v10 = vpop.permute.xlu0 %721  ;;  %v1345_v42 = vsel %vm1317_vm12, %v9207_v63, %v15406_v14  ;;  %v15616_v14 = vld [vmem:[#allocation24_spill] sm:$0xff] }
 0x219   : > { %v1344_v15 = vsel %vm1317_vm12, %v15607_v9, %v9207_v63  ;;  %2411 = vmatpush1.bf16.msra.mxu1 %v1693_v29  ;;  %v723_v13 = vsel %vm354_vm1, %v15608_v37, %v722_v10  ;;  %v680_v62 = vpop.permute.xlu1 %679  ;;  %v1700_v11 = vpack.c.bf16 %v1351_v2, %v1345_v42  ;;  %v11681_v29 = vld [vmem:[%s15248_s1 + $0x20] ss:$16 sps:$4 sm:$0xff]   ;;  %v11696_v9 = vld [vmem:[%s15248_s1 + $0x44] ss:$16 sps:$4 sm:$0xff]   ;;  %v9299_v42 = vpack.i.bf16 %v15595_v7, %v11466_v3 }
 0x21a   : > { %v1699_v44 = vpack.c.bf16 %v1350_v6, %v1344_v15  ;;  %v11674_v22 = vpack.i.bf16 %v722_v10, %v723_v13  ;;  %v681_v36 = vsel %vm378_vm2, %v15609_v46, %v680_v62  ;;  %15610 = vst [vmem:[#allocation18_spill] sm:$0xff] %v11681_v29  ;;  %15613 = vst [vmem:[#allocation19_spill] sm:$0xff] %v11696_v9  ;;  %v15614_v13 = vld [vmem:[#allocation23_spill] sm:$0xff]  ;;  %v15617_v55 = vunpack.i.h.bf16 %v15616_v14 }
 0x21b   : > { %v9294_v16 = vpack.i.bf16 %v680_v62, %v681_v36  ;;  %2412 = vmatprep.subr.bf16.mxu1 %v1700_v11  ;;  %2338 = vmatmul.mubr.bf16.gmra.mrb[36].mxu1 %v11681_v29  ;;  %v15615_v11 = vunpack.i.h.bf16 %v15614_v13 }
 0x21c   : > { %v11684_v63 = vpop.permute.xlu0 %9220  ;;  %9290 = vrot.lane.b32.xlu0 %v11674_v22, %s10112_s29  ;;  %2347 = vmatprep.mubr.bf16.mxu1 %v11696_v9 }
 0x21d   : > { %2413 = vmatpush1.bf16.msra.mxu1 %v1699_v44  ;;  %15611 = vst [vmem:[#allocation25_spill] sm:$0xff] %v11684_v63  ;;  %v15418_v2 = vunpack.i.h.bf16 %v11684_v63  ;;  %v9222_v6 = vunpack.i.l.bf16 %v11684_v63  ;;  %9295 = vrot.lane.b32.xlu1 %v9294_v16, %s10112_s29  ;;  %v11691_v62 = vpop.permute.xlu1 %9215 }
 0x21e   : > { %15612 = vst [vmem:[#allocation20_spill] sm:$0xff] %v11691_v62  ;;  %v15419_v15 = vunpack.i.h.bf16 %v11691_v62  ;;  %v9217_v10 = vunpack.i.l.bf16 %v11691_v62 }
 0x21f   : > { %v1362_v44 = vsel %vm1317_vm12, %v15615_v11, %v9222_v6  ;;  %v1363_v16 = vsel %vm1317_vm12, %v9222_v6, %v15418_v2 }
 0x220   : > { %v1356_v29 = vsel %vm1317_vm12, %v15617_v55, %v9217_v10  ;;  %v686_v9 = vpop.permute.xlu0 %685  ;;  %9300 = vrot.lane.b32.xlu0 %v9299_v42, %s10111_s26  ;;  %v1357_v28 = vsel %vm1317_vm12, %v9217_v10, %v15419_v15  ;;  %v10048_v55 = vld [vmem:[%s15248_s1 + $0x40] ss:$16 sps:$4 sm:$0xff]  }
 0x221   : > { %v687_v13 = vsel %vm426_vm4, %v15618_v53, %v686_v9  ;;  %v683_v48 = vpop.permute.xlu1 %682  ;;  %v1706_v11 = vpack.c.bf16 %v1363_v16, %v1357_v28  ;;  %v1705_v45 = vpack.c.bf16 %v1362_v44, %v1356_v29  ;;  %v9314_v44 = vpack.i.bf16 %v681_v36, %v15608_v37 }
 0x222   : > { %v9309_v63 = vpack.i.bf16 %v686_v9, %v687_v13  ;;  %v684_v6 = vsel %vm402_vm3, %v15619_v38, %v683_v48 }
 0x223   : > { %v9304_v14 = vpack.i.bf16 %v683_v48, %v684_v6  ;;  %2414 = vmatprep.subr.bf16.mxu1 %v1706_v11  ;;  %2348 = vmatmul.mubr.bf16.gmra.mrb[40].mxu1 %v10048_v55  ;;  %v10049_v48 = vld [vmem:[%s15248_s1 + $0x64] ss:$16 sps:$4 sm:$0xff]  }
 0x224   : > { %2415 = vmatpush1.bf16.msra.mxu1 %v1705_v45  ;;  %v11723_v42 = vpop.permute.xlu0 %9230  ;;  %9310 = vrot.lane.b32.xlu0 %v9309_v63, %s10112_s29  ;;  %v15622_v63 = vld [vmem:[#allocation27_spill] sm:$0xff]  ;;  %v15624_v55 = vld [vmem:[#allocation28_spill] sm:$0xff] }
 0x225   : > { %15620 = vst [vmem:[#allocation22_spill] sm:$0xff] %v11723_v42  ;;  %v15425_v10 = vunpack.i.h.bf16 %v11723_v42  ;;  %v9232_v28 = vunpack.i.l.bf16 %v11723_v42  ;;  %9305 = vrot.lane.b32.xlu1 %v9304_v14, %s10112_s29  ;;  %v11729_v29 = vpop.permute.xlu1 %9225  ;;  %2357 = vmatprep.mubr.bf16.mxu1 %v10049_v48  ;;  %v15623_v16 = vunpack.i.h.bf16 %v15622_v63  ;;  %v15625_v2 = vunpack.i.h.bf16 %v15624_v55 }
 0x226   : > { %15621 = vst [vmem:[#allocation21_spill] sm:$0xff] %v11729_v29  ;;  %v15426_v9 = vunpack.i.h.bf16 %v11729_v29  ;;  %v9227_v45 = vunpack.i.l.bf16 %v11729_v29 }
 0x227   : > { %v1374_v11 = vsel %vm1317_vm12, %v15623_v16, %v9232_v28  ;;  %v1375_v14 = vsel %vm1317_vm12, %v9232_v28, %v15425_v10  ;;  %v15632_v10 = vld [vmem:[#allocation33_spill] sm:$0xff] }
 0x228   : > { %v1368_v15 = vsel %vm1317_vm12, %v15625_v2, %v9227_v45  ;;  %v692_v62 = vpop.permute.xlu0 %691  ;;  %v1369_v48 = vsel %vm1317_vm12, %v9227_v45, %v15426_v9  ;;  %v10050_v2 = vld [vmem:[%s15248_s1 + $0x60] ss:$16 sps:$4 sm:$0xff]   ;;  %v15633_v9 = vunpack.i.h.bf16 %v15632_v10 }
 0x229   : > { %v693_v36 = vsel %vm15455_vm6, %v15626_v1, %v692_v62  ;;  %9315 = vrot.lane.b32.xlu1 %v9314_v44, %s10111_s26  ;;  %v689_v63 = vpop.permute.xlu1 %688  ;;  %v1712_v16 = vpack.c.bf16 %v1375_v14, %v1369_v48  ;;  %v1711_v51 = vpack.c.bf16 %v1374_v11, %v1368_v15  ;;  %v10051_v44 = vld [vmem:[%s15248_s1 + $0x84] ss:$16 sps:$4 sm:$0xff]   ;;  %v9329_v48 = vpack.i.bf16 %v687_v13, %v684_v6 }
 0x22a   : > { %v9324_v42 = vpack.i.bf16 %v692_v62, %v693_v36  ;;  %v690_v28 = vsel %vm450_vm5, %v15627_v8, %v689_v63 }
 0x22b   : > { %v9319_v55 = vpack.i.bf16 %v689_v63, %v690_v28  ;;  %2416 = vmatprep.subr.bf16.mxu1 %v1712_v16  ;;  %2358 = vmatmul.mubr.bf16.gmra.mrb[44].mxu1 %v10050_v2  ;;  %v15630_v63 = vld [vmem:[#allocation35_spill] sm:$0xff] }
 0x22c   : > { %2417 = vmatpush1.bf16.msra.mxu1 %v1711_v51  ;;  %v11757_v45 = vpop.permute.xlu0 %9240  ;;  %2367 = vmatprep.mubr.bf16.mxu1 %v10051_v44  ;;  %v15631_v16 = vunpack.i.h.bf16 %v15630_v63 }
 0x22d   : > { %15628 = vst [vmem:[#allocation30_spill] sm:$0xff] %v11757_v45  ;;  %v15431_v62 = vunpack.i.h.bf16 %v11757_v45  ;;  %v9242_v15 = vunpack.i.l.bf16 %v11757_v45  ;;  %9325 = vrot.lane.b32.xlu1 %v9324_v42, %s10112_s29  ;;  %9320 = vrot.lane.b32.xlu0 %v9319_v55, %s10112_s29  ;;  %v11766_v11 = vpop.permute.xlu1 %9235 }
 0x22e   : > { %15629 = vst [vmem:[#allocation29_spill] sm:$0xff] %v11766_v11  ;;  %v15432_v14 = vunpack.i.h.bf16 %v11766_v11  ;;  %v9237_v51 = vunpack.i.l.bf16 %v11766_v11 }
 0x22f   : > { %v1386_v2 = vsel %vm1317_vm12, %v15631_v16, %v9242_v15  ;;  %v1387_v44 = vsel %vm1317_vm12, %v9242_v15, %v15431_v62  ;;  %v15641_v62 = vld [vmem:[#allocation40_spill] sm:$0xff] }
 0x230   : > { %v1380_v42 = vsel %vm1317_vm12, %v15633_v9, %v9237_v51  ;;  %v698_v55 = vpop.permute.xlu0 %697  ;;  %v1381_v29 = vsel %vm1317_vm12, %v9237_v51, %v15432_v14  ;;  %v10052_v9 = vld [vmem:[%s15248_s1 + $0x80] ss:$16 sps:$4 sm:$0xff]   ;;  %v15642_v14 = vunpack.i.h.bf16 %v15641_v62 }
 0x231   : > { %v699_v13 = vsel %vm15446_vm8, %v15634_v59, %v698_v55  ;;  %9330 = vrot.lane.b32.xlu0 %v9329_v48, %s10111_s26  ;;  %v695_v6 = vpop.permute.xlu1 %694  ;;  %v1718_v63 = vpack.c.bf16 %v1387_v44, %v1381_v29  ;;  %v1717_v16 = vpack.c.bf16 %v1386_v2, %v1380_v42  ;;  %v10053_v48 = vld [vmem:[%s15248_s1 + $0xa4] ss:$16 sps:$4 sm:$0xff]   ;;  %vm15662_vm8 = vcmask 924672  }
 0x232   : > { %v9339_v45 = vpack.i.bf16 %v698_v55, %v699_v13  ;;  %v696_v15 = vsel %vm15636_vm7, %v15635_v21, %v695_v6  ;;  %vm15652_vm7 = vcmask 941056  }
 0x233   : > { %v9334_v10 = vpack.i.bf16 %v695_v6, %v696_v15  ;;  %2418 = vmatprep.subr.bf16.mxu1 %v1718_v63  ;;  %2368 = vmatmul.mubr.bf16.gmra.mrb[48].mxu1 %v10052_v9  ;;  %v9344_v6 = vpack.i.bf16 %v693_v36, %v690_v28  ;;  %v15639_v63 = vld [vmem:[#allocation39_spill] sm:$0xff] }
 0x234   : > { %2419 = vmatpush1.bf16.msra.mxu1 %v1717_v16  ;;  %v11790_v51 = vpop.permute.xlu0 %9250  ;;  %2377 = vmatprep.mubr.bf16.mxu1 %v10053_v48  ;;  %v15640_v16 = vunpack.i.h.bf16 %v15639_v63 }
 0x235   : > { %15637 = vst [vmem:[#allocation23_spill] sm:$0xff] %v11790_v51  ;;  %v15437_v29 = vunpack.i.h.bf16 %v11790_v51  ;;  %v9252_v2 = vunpack.i.l.bf16 %v11790_v51  ;;  %9340 = vrot.lane.b32.xlu0 %v9339_v45, %s10112_s29  ;;  %9335 = vrot.lane.b32.xlu1 %v9334_v10, %s10112_s29  ;;  %v11799_v44 = vpop.permute.xlu1 %9245 }
 0x236   : > { %15638 = vst [vmem:[#allocation24_spill] sm:$0xff] %v11799_v44  ;;  %v15438_v42 = vunpack.i.h.bf16 %v11799_v44  ;;  %v9247_v55 = vunpack.i.l.bf16 %v11799_v44 }
 0x237   : > { %v1398_v9 = vsel %vm1317_vm12, %v15640_v16, %v9252_v2  ;;  %v1399_v48 = vsel %vm1317_vm12, %v9252_v2, %v15437_v29  ;;  %v15650_v29 = vld [vmem:[#allocation45_spill] sm:$0xff] }
 0x238   : > { %v1392_v45 = vsel %vm1317_vm12, %v15642_v14, %v9247_v55  ;;  %v704_v10 = vpop.permute.xlu0 %703  ;;  %v1393_v11 = vsel %vm1317_vm12, %v9247_v55, %v15438_v42  ;;  %v10054_v14 = vld [vmem:[%s15248_s1 + $0xa0] ss:$16 sps:$4 sm:$0xff]   ;;  %v15651_v42 = vunpack.i.h.bf16 %v15650_v29 }
 0x239   : > { %v705_v36 = vsel %vm15444_vm10, %v15643_v27, %v704_v10  ;;  %9345 = vrot.lane.b32.xlu1 %v9344_v6, %s10111_s26  ;;  %v701_v28 = vpop.permute.xlu1 %700  ;;  %v1724_v63 = vpack.c.bf16 %v1399_v48, %v1393_v11  ;;  %v1723_v16 = vpack.c.bf16 %v1398_v9, %v1392_v45  ;;  %v10055_v6 = vld [vmem:[%s15248_s1 + $0xc4] ss:$16 sps:$4 sm:$0xff]  }
 0x23a   : > { %v9354_v51 = vpack.i.bf16 %v704_v10, %v705_v36  ;;  %v702_v2 = vsel %vm15645_vm9, %v15644_v35, %v701_v28  ;;  %vm15656_vm9 = vcmask 654336  }
 0x23b   : > { %v9349_v62 = vpack.i.bf16 %v701_v28, %v702_v2  ;;  %2420 = vmatprep.subr.bf16.mxu1 %v1724_v63  ;;  %2378 = vmatmul.mubr.bf16.gmra.mrb[52].mxu1 %v10054_v14  ;;  %v9359_v28 = vpack.i.bf16 %v699_v13, %v696_v15  ;;  %v15648_v63 = vld [vmem:[#allocation47_spill] sm:$0xff] }
 0x23c   : > { %2421 = vmatpush1.bf16.msra.mxu1 %v1723_v16  ;;  %v11823_v55 = vpop.permute.xlu0 %9260  ;;  %2387 = vmatprep.mubr.bf16.mxu1 %v10055_v6  ;;  %v15649_v16 = vunpack.i.h.bf16 %v15648_v63 }
 0x23d   : > { %15646 = vst [vmem:[#allocation37_spill] sm:$0xff] %v11823_v55  ;;  %v15441_v11 = vunpack.i.h.bf16 %v11823_v55  ;;  %v9262_v9 = vunpack.i.l.bf16 %v11823_v55  ;;  %9355 = vrot.lane.b32.xlu1 %v9354_v51, %s10112_s29  ;;  %9350 = vrot.lane.b32.xlu0 %v9349_v62, %s10112_s29  ;;  %v11832_v48 = vpop.permute.xlu1 %9255 }
 0x23e   : > { %15647 = vst [vmem:[#allocation34_spill] sm:$0xff] %v11832_v48  ;;  %v15442_v45 = vunpack.i.h.bf16 %v11832_v48  ;;  %v9257_v10 = vunpack.i.l.bf16 %v11832_v48 }
 0x23f   : > { %v1410_v14 = vsel %vm1317_vm12, %v15649_v16, %v9262_v9  ;;  %v1411_v6 = vsel %vm1317_vm12, %v9262_v9, %v15441_v11  ;;  %v15658_v11 = vld [vmem:[#allocation52_spill] sm:$0xff] }
 0x240   : > { %v1404_v51 = vsel %vm1317_vm12, %v15651_v42, %v9257_v10  ;;  %v710_v62 = vpop.permute.xlu0 %709  ;;  %v1405_v44 = vsel %vm1317_vm12, %v9257_v10, %v15442_v45  ;;  %v10056_v42 = vld [vmem:[%s15248_s1 + $0xc0] ss:$16 sps:$4 sm:$0xff]   ;;  %v15659_v45 = vunpack.i.h.bf16 %v15658_v11 }
 0x241   : > { %v711_v13 = vsel %vm15652_vm7, %v11162_v47, %v710_v62  ;;  %9360 = vrot.lane.b32.xlu0 %v9359_v28, %s10111_s26  ;;  %v707_v15 = vpop.permute.xlu1 %706  ;;  %v1730_v63 = vpack.c.bf16 %v1411_v6, %v1405_v44  ;;  %v1729_v16 = vpack.c.bf16 %v1410_v14, %v1404_v51  ;;  %v10057_v28 = vld [vmem:[%s15248_s1 + $0xe4] ss:$16 sps:$4 sm:$0xff]   ;;  %vm15657_vm7 = vmmov %vm15656_vm9 }
 0x242   : > { %v9369_v55 = vpack.i.bf16 %v710_v62, %v711_v13  ;;  %v708_v9 = vsel %vm15443_vm11, %v11140_v4, %v707_v15  ;;  %vm15660_vm11 = vmmov %vm15657_vm7 }
 0x243   : > { %v9364_v29 = vpack.i.bf16 %v707_v15, %v708_v9  ;;  %2422 = vmatprep.subr.bf16.mxu1 %v1730_v63  ;;  %2388 = vmatmul.mubr.bf16.gmra.mrb[56].mxu1 %v10056_v42  ;;  %v9374_v15 = vpack.i.bf16 %v705_v36, %v702_v2  ;;  %v15654_v63 = vld [vmem:[#allocation51_spill] sm:$0xff]  ;;  %vm15661_vm10 = vmmov %vm15657_vm7 }
 0x244   : > { %2423 = vmatpush1.bf16.msra.mxu1 %v1729_v16  ;;  %v11856_v10 = vpop.permute.xlu0 %9270  ;;  %2397 = vmatprep.mubr.bf16.mxu1 %v10057_v28  ;;  %v15655_v16 = vunpack.i.h.bf16 %v15654_v63 }
 0x245   : > { %15653 = vst [vmem:[#allocation27_spill] sm:$0xff] %v11856_v10  ;;  %v9273_v44 = vunpack.i.h.bf16 %v11856_v10  ;;  %v9272_v14 = vunpack.i.l.bf16 %v11856_v10  ;;  %9370 = vrot.lane.b32.xlu0 %v9369_v55, %s10112_s29  ;;  %9365 = vrot.lane.b32.xlu1 %v9364_v29, %s10112_s29  ;;  %v11865_v6 = vpop.permute.xlu1 %9265 }
 0x246   : > { %v9268_v51 = vunpack.i.h.bf16 %v11865_v6  ;;  %v9267_v62 = vunpack.i.l.bf16 %v11865_v6 }
 0x247   : > { %v1561_v42 = vsel %vm15656_vm9, %v15655_v16, %v9272_v14  ;;  %v1562_v28 = vsel %vm15657_vm7, %v9272_v14, %v9273_v44 }
 0x248   : > { %v1555_v55 = vsel %vm15660_vm11, %v15659_v45, %v9267_v62  ;;  %v716_v29 = vpop.permute.xlu0 %715  ;;  %v1556_v48 = vsel %vm15661_vm10, %v9267_v62, %v9268_v51  ;;  %v10058_v45 = vld [vmem:[%s15248_s1 + $0xe0] ss:$16 sps:$4 sm:$0xff]   ;;  %v10059_v62 = vld [vmem:[%s15248_s1 + $0xc] ss:$16 sps:$4 sm:$0xff]   ;;  %vm15664_vm10 = vmmov %vm15657_vm7  ;;  %vm15665_vm11 = vcmask 1043456  }
 0x249   : > { %v717_v36 = vsel %vm15662_vm8, %v11204_v0, %v716_v29  ;;  %9375 = vrot.lane.b32.xlu1 %v9374_v15, %s10111_s26  ;;  %v713_v2 = vpop.permute.xlu1 %712  ;;  %v1736_v63 = vpack.c.bf16 %v1562_v28, %v1556_v48  ;;  %v1735_v16 = vpack.c.bf16 %v1561_v42, %v1555_v55  ;;  %v9389_v28 = vpack.i.bf16 %v711_v13, %v708_v9  ;;  %vm15663_vm8 = vmmov %vm15657_vm7  ;;  %v1777_v9 = vld [vmem:[%s15249_s2] sm:$0xff] }
 0x24a   : > { %v9384_v10 = vpack.i.bf16 %v716_v29, %v717_v36  ;;  %v714_v14 = vsel %vm15454_vm13, %v11159_v17, %v713_v2  ;;  %vm15666_vm9 = vmmov %vm15665_vm11  ;;  %v1594_v13 = vpack.c.bf16 %v15595_v7, %v11466_v3  ;;  %v15668_v7 = vld [vmem:[#allocation31_spill] sm:$0xff]  ;;  %v15669_v3 = vld [vmem:[#allocation32_spill] sm:$0xff] }
 0x24b   : > { %v9379_v11 = vpack.i.bf16 %v713_v2, %v714_v14  ;;  %2424 = vmatprep.subr.bf16.mxu1 %v1736_v63  ;;  %2398 = vmatmul.mubr.bf16.gmra.mrb[60].mxu1 %v10058_v45  ;;  %v9404_v63 = vpack.i.bf16 %v717_v36, %v714_v14  ;;  %v1600_v36 = vpack.c.bf16 %v15609_v46, %v15608_v37  ;;  %v1780_v46 = vld [vmem:[%s15249_s2 + $0x18] sm:$0xff]  ;;  %v15671_v37 = vld [vmem:[#allocation38_spill] sm:$0xff]  ;;  %v15672_v14 = vld [vmem:[#allocation36_spill] sm:$0xff] }
 0x24c   : > { %2425 = vmatpush1.bf16.msra.mxu1 %v1735_v16  ;;  %7644 = vmatprep.mubr.msk.bf16.mxu1 %vm2025_vm14, %v10059_v62  ;;  %v15674_v45 = vld [vmem:[#allocation43_spill] sm:$0xff]  ;;  %v15675_v62 = vld [vmem:[#allocation44_spill] sm:$0xff] }
 0x24d   : > { %9385 = vrot.lane.b32.xlu1 %v9384_v10, %s10112_s29  ;;  %9380 = vrot.lane.b32.xlu0 %v9379_v11, %s10112_s29  ;;  %v11895_v48 = vpop.permute.xlu1 %9275  ;;  %v15673_v11 = vpack.c.bf16 %v15671_v37, %v15672_v14 }
 0x24e   : > { %v9278_v15 = vunpack.i.h.bf16 %v11895_v48  ;;  %v9277_v42 = vunpack.i.l.bf16 %v11895_v48  ;;  %v9467_v48 = vld [vmem:[%s15250_s3 + $0x10] ss:$8 sps:$4 sm:$0xff]  }
 0x250   : > { %v1568_v55 = vsel %vm15663_vm8, %v9277_v42, %v9278_v15  ;;  %v1567_v29 = vsel %vm15664_vm10, %v11142_v57, %v9277_v42  ;;  %v15667_v57 = vld [vmem:[#allocation26_spill] sm:$0xff]  ;;  %v15676_v42 = vpack.c.bf16 %v15674_v45, %v15675_v62  ;;  %vm15747_vm8 = vmmov %vm15657_vm7 }
 0x251   : > { %9395 = vrot.lane.b32.xlu1 %v11470_v26, %s10113_s30  ;;  %9390 = vrot.lane.b32.xlu0 %v9389_v28, %s10111_s26  ;;  %v1742_v10 = vpack.c.bf16 %v1568_v55, %v1568_v55  ;;  %v1741_v2 = vpack.c.bf16 %v1567_v29, %v1567_v29  ;;  %v1593_v26 = vpack.c.bf16 %v15667_v57, %v11212_v33  ;;  %v1779_v33 = vld [vmem:[%s15249_s2 + $0x10] sm:$0xff]  ;;  %v1785_v28 = vld [vmem:[%s15249_s2 + $0x40] sm:$0xff]  ;;  %vm15749_vm10 = vmmov %vm15657_vm7 }
 0x252   : > { %v1789_v57 = vld [vmem:[%s15249_s2 + $0x60] sm:$0xff] }
 0x253   : > { %7643 = vmatprep.subr.msk.bf16.mxu1 %vm15665_vm11, %v1742_v10  ;;  %v2058_v16 = vsel %vm15666_vm9, %v1741_v2, 0  ;;  %v1624_v2 = vpack.c.bf16 %v15643_v27, %v15644_v35  ;;  %v1788_v27 = vld [vmem:[%s15249_s2 + $0x58] sm:$0xff]  ;;  %vm15751_vm11 = vmmov %vm15657_vm7 }
 0x254   : > { %2427 = vmatpush1.bf16.msra.mxu1 %v2058_v16  ;;  %v1787_v16 = vld [vmem:[%s15249_s2 + $0x50] sm:$0xff] }
 0x255   : > { %9405 = vrot.lane.b32.xlu1 %v9404_v63, %s10111_s26  ;;  %9400 = vrot.lane.b32.xlu0 %v11628_v5, %s10113_s30  ;;  %v15670_v5 = vpack.c.bf16 %v15668_v7, %v15669_v3 }
 0x256   : > { %2521 = vmatprep.subr.bf16.mxu1 %v1594_v13  ;;  %v15680_v13 = vpack.c.bf16 %v11112_v19, %v11121_v31  ;;  %v1636_v31 = vpack.c.bf16 %v11204_v0, %v11159_v17  ;;  %v1792_v0 = vld [vmem:[%s15249_s2 + $0x78] sm:$0xff] }
 0x257   : > { %2441 = vmatmul.mubr.bf16.vlgmr.msra.gmra.mrb[32].mxu1 %v11172_v12  ;;  %v1778_v12 = vld [vmem:[%s15249_s2 + $0x8] sm:$0xff] }
 0x258   : > { %2522 = vmatpush1.bf16.msra.mxu1 %v1593_v26  ;;  %7645 = vmatprep.mubr.msk.bf16.mxu1 %vm2025_vm14, %v11197_v43  ;;  %v1606_v43 = vpack.c.bf16 %v15618_v53, %v15619_v38  ;;  %v1612_v38 = vpack.c.bf16 %v15626_v1, %v15627_v8  ;;  %v1782_v53 = vld [vmem:[%s15249_s2 + $0x28] sm:$0xff]  ;;  %v1618_v8 = vpack.c.bf16 %v15634_v59, %v15635_v21  ;;  %v1784_v1 = vld [vmem:[%s15249_s2 + $0x38] sm:$0xff]  ;;  %v15677_v59 = vld [vmem:[#allocation50_spill] sm:$0xff] }
 0x259   : > { %1795 = vperm.xlu1 %9414, %v1777_v9   ;;  %9410 = vrot.lane.b32.xlu0 %v11674_v22, %s10113_s30  ;;  %v1781_v22 = vld [vmem:[%s15249_s2 + $0x20] sm:$0xff]  ;;  %v15678_v21 = vld [vmem:[#allocation48_spill] sm:$0xff] }
 0x25a   : > { %2523 = vmatprep.subr.bf16.mxu1 %v1600_v36  ;;  %v15679_v10 = vpack.c.bf16 %v15677_v59, %v15678_v21 }
 0x25c   : > { %2524 = vmatpush1.bf16.msra.mxu1 %v15670_v5 }
 0x25d   : > { %1805 = vperm.xlu1 %9414, %v1779_v33   ;;  %1800 = vperm.xlu0 %9415, %v1778_v12   ;;  %v9281_v12 = vpop.permute.xlu0 %9280 }
 0x25e   : > { %2525 = vmatprep.subr.bf16.mxu1 %v1606_v43  ;;  %v9283_v7 = vunpack.i.h.bf16 %v9281_v12  ;;  %v9282_v3 = vunpack.i.l.bf16 %v9281_v12 }
 0x25f   : > { %2451 = vmatmul.mubr.bf16.gmra.mrb[36].mxu1 %v11245_v60  ;;  %v1783_v60 = vld [vmem:[%s15249_s2 + $0x30] sm:$0xff] }
 0x260   : > { %2526 = vmatpush1.bf16.msra.mxu1 %v15673_v11  ;;  %7646 = vmatprep.mubr.msk.bf16.mxu1 %vm2025_vm14, %v11252_v32  ;;  %v15683_v11 = vunpack.i.h.bf16 %v11578_v34 }
 0x261   : > { %1810 = vperm.xlu1 %9414, %v1780_v46   ;;  %1815 = vperm.xlu0 %9415, %v1781_v22  }
 0x262   : > { %2527 = vmatprep.subr.bf16.mxu1 %v1612_v38  ;;  %v1322_v38 = vsel %vm1317_vm12, %v15683_v11, %v9282_v3 }
 0x264   : > { %2528 = vmatpush1.bf16.msra.mxu1 %v15676_v42 }
 0x265   : > { %1820 = vperm.xlu1 %9414, %v1782_v53   ;;  %1825 = vperm.xlu0 %9415, %v1783_v60   ;;  %v11962_v32 = vpop.f32.mrb[0].mxu1  ;;  %v15684_v53 = vunpack.i.h.bf16 %v11606_v49 }
 0x266   : > { %2529 = vmatprep.subr.bf16.mxu1 %v1618_v8  ;;  %v11970_v55 = vpop.f32.mrb[1].mxu1 }
 0x267   : > { %2461 = vmatmul.mubr.bf16.gmra.mrb[40].mxu1 %v11276_v30  ;;  %v11973_v29 = vpop.f32.mrb[2].mxu1  ;;  %v1786_v30 = vld [vmem:[%s15249_s2 + $0x48] sm:$0xff] }
 0x268   : > { %2530 = vmatpush1.bf16.msra.mxu1 %v15679_v10  ;;  %7647 = vmatprep.mubr.msk.bf16.mxu1 %vm2025_vm14, %v11286_v61  ;;  %v11982_v63 = vpop.f32.mrb[3].mxu1  ;;  %v1630_v61 = vpack.c.bf16 %v11162_v47, %v11140_v4  ;;  %v15681_v4 = vpack.c.bf16 %v11188_v25, %v11153_v23  ;;  %v1791_v23 = vld [vmem:[%s15249_s2 + $0x70] sm:$0xff]  ;;  %v15682_v25 = vpack.c.bf16 %v11227_v41, %v11181_v56  ;;  %v15685_v10 = vld [vmem:[#allocation3_spill] sm:$0xff] }
 0x269   : > { %1830 = vperm.xlu1 %9414, %v1784_v1   ;;  %1835 = vperm.xlu0 %9415, %v1785_v28  }
 0x26a   : > { %2531 = vmatprep.subr.bf16.mxu1 %v1624_v2 }
 0x26c   : > { %2532 = vmatpush1.bf16.msra.mxu1 %v15680_v13 }
 0x26d   : > { %1840 = vperm.xlu1 %9414, %v1786_v30   ;;  %1845 = vperm.xlu0 %9415, %v1787_v16   ;;  %v11995_v35 = vpop.f32.mrb[4].mxu1  ;;  %v15686_v30 = vld [vmem:[#allocation15_spill] sm:$0xff] }
 0x26e   : > { %2533 = vmatprep.subr.bf16.mxu1 %v1630_v61  ;;  %v12003_v26 = vpop.f32.mrb[5].mxu1  ;;  %v15687_v16 = vunpack.i.h.bf16 %v15686_v30  ;;  %v15696_v30 = vld [vmem:[#allocation7_spill] sm:$0xff] }
 0x26f   : > { %2471 = vmatmul.mubr.bf16.gmra.mrb[44].mxu1 %v11306_v50  ;;  %v12006_v19 = vpop.f32.mrb[6].mxu1  ;;  %v1790_v50 = vld [vmem:[%s15249_s2 + $0x68] sm:$0xff] }
 0x270   : > { %2534 = vmatpush1.bf16.msra.mxu1 %v15681_v4  ;;  %7648 = vmatprep.mubr.msk.bf16.mxu1 %vm2025_vm14, %v11316_v52  ;;  %v12015_v47 = vpop.f32.mrb[7].mxu1 }
 0x271   : > { %1850 = vperm.xlu1 %9414, %v1788_v27   ;;  %1855 = vperm.xlu0 %9415, %v1789_v57   ;;  %v15688_v57 = vld [vmem:[#allocation16_spill] sm:$0xff] }
 0x272   : > { %2535 = vmatprep.subr.bf16.mxu1 %v1636_v31  ;;  %v15689_v4 = vunpack.i.h.bf16 %v15688_v57 }
 0x274   : > { %2536 = vmatpush1.bf16.msra.mxu1 %v15682_v25 }
 0x275   : > { %1860 = vperm.xlu1 %9414, %v1790_v50   ;;  %1865 = vperm.xlu0 %9415, %v1791_v23   ;;  %v12026_v17 = vpop.f32.mrb[8].mxu1 }
 0x276   : > { %v12031_v52 = vpop.f32.mrb[9].mxu1 }
 0x277   : > { %2481 = vmatmul.mubr.bf16.gmra.mrb[48].mxu1 %v11334_v39  ;;  %v12034_v9 = vpop.f32.mrb[10].mxu1 }
 0x278   : > { %7649 = vmatprep.mubr.msk.bf16.mxu1 %vm2025_vm14, %v11344_v20  ;;  %v12038_v36 = vpop.f32.mrb[11].mxu1 }
 0x279   : > { %1870 = vperm.xlu1 %9414, %v1792_v0   ;;  %v15690_v0 = vld [vmem:[#allocation2_spill] sm:$0xff] }
 0x27a   : > { %v15691_v12 = vunpack.i.h.bf16 %v15690_v0  ;;  %v15700_v0 = vld [vmem:[#allocation6_spill] sm:$0xff] }
 0x27d   : > { %v12040_v56 = vpop.f32.mrb[12].mxu1 }
 0x27e   : > { %v12042_v41 = vpop.f32.mrb[13].mxu1 }
 0x27f   : > { %2491 = vmatmul.mubr.bf16.gmra.mrb[52].mxu1 %v11358_v18  ;;  %v12045_v33 = vpop.f32.mrb[14].mxu1  ;;  %v1323_v18 = vsel %vm1317_vm12, %v9282_v3, %v9283_v7  ;;  %v15692_v3 = vld [vmem:[#allocation4_spill] sm:$0xff] }
 0x280   : > { %7650 = vmatprep.mubr.msk.bf16.mxu1 %vm2025_vm14, %v11365_v54  ;;  %v12049_v39 = vpop.f32.mrb[15].mxu1 }
 0x285   : > { %v12051_v20 = vpop.f32.mrb[16].mxu1 }
 0x286   : > { %v9286_v5 = vpop.permute.xlu1 %9285  ;;  %v12053_v43 = vpop.f32.mrb[17].mxu1 }
 0x287   : > { %v9288_v46 = vunpack.i.h.bf16 %v9286_v5  ;;  %v9287_v22 = vunpack.i.l.bf16 %v9286_v5  ;;  %2501 = vmatmul.mubr.bf16.gmra.mrb[56].mxu1 %v11379_v40  ;;  %v12057_v37 = vpop.f32.mrb[18].mxu1  ;;  %v15693_v5 = vunpack.i.h.bf16 %v15692_v3 }
 0x288   : > { %7651 = vmatprep.mubr.msk.bf16.mxu1 %vm2025_vm14, %v11386_v58  ;;  %v12061_v54 = vpop.f32.mrb[19].mxu1 }
 0x289   : > { %v1329_v14 = vsel %vm1317_vm12, %v9287_v22, %v9288_v46  ;;  %v1328_v60 = vsel %vm1317_vm12, %v15684_v53, %v9287_v22 }
 0x28a   : > { %v1690_v40 = vpack.c.bf16 %v1329_v14, %v1323_v18  ;;  %v1689_v45 = vpack.c.bf16 %v1328_v60, %v1322_v38 }
 0x28c   : > { %2634 = vmatprep.subr.bf16.mxu0 %v1690_v40 }
 0x28d   : > { %2635 = vmatpush1.bf16.msra.mxu0 %v1689_v45  ;;  %v12070_v62 = vpop.f32.mrb[20].mxu1 }
 0x28e   : > { %v9291_v42 = vpop.permute.xlu0 %9290  ;;  %v12072_v58 = vpop.f32.mrb[21].mxu1 }
 0x28f   : > { %v9293_v8 = vunpack.i.h.bf16 %v9291_v42  ;;  %v9292_v1 = vunpack.i.l.bf16 %v9291_v42  ;;  %v9296_v28 = vpop.permute.xlu1 %9295  ;;  %2511 = vmatmul.mubr.bf16.gmra.mrb[60].mxu1 %v11403_v24  ;;  %v12075_v34 = vpop.f32.mrb[22].mxu1 }
 0x290   : > { %v9298_v59 = vunpack.i.h.bf16 %v9296_v28  ;;  %v9297_v49 = vunpack.i.l.bf16 %v9296_v28  ;;  %v12077_v21 = vpop.f32.mrb[23].mxu1  ;;  %2553 = vmatprep.mubr.bf16.mxu1 %v15685_v10 }
 0x291   : > { %v1335_v2 = vsel %vm1317_vm12, %v9292_v1, %v9293_v8  ;;  %v1334_v13 = vsel %vm1317_vm12, %v15687_v16, %v9292_v1  ;;  %v15697_v16 = vunpack.i.h.bf16 %v15696_v30  ;;  %v15704_v30 = vld [vmem:[#allocation25_spill] sm:$0xff] }
 0x292   : > { %v9301_v61 = vpop.permute.xlu0 %9300  ;;  %v1341_v27 = vsel %vm1317_vm12, %v9297_v49, %v9298_v59  ;;  %v1340_v24 = vsel %vm1317_vm12, %v15689_v4, %v9297_v49  ;;  %v15694_v59 = vld [vmem:[#allocation17_spill] sm:$0xff] }
 0x293   : > { %v9303_v31 = vunpack.i.h.bf16 %v9301_v61  ;;  %v9302_v50 = vunpack.i.l.bf16 %v9301_v61  ;;  %v1696_v23 = vpack.c.bf16 %v1341_v27, %v1335_v2  ;;  %v1695_v25 = vpack.c.bf16 %v1340_v24, %v1334_v13 }
 0x294   : > { %v15695_v49 = vunpack.i.h.bf16 %v15694_v59 }
 0x295   : > { %v921_v7 = vsel %vm916_vm15, %v15691_v12, %v9302_v50  ;;  %v926_v46 = vsel %vm916_vm15, %v15693_v5, %v9303_v31  ;;  %2636 = vmatprep.subr.bf16.mxu0 %v1696_v23  ;;  %v1642_v22 = vpack.c.bf16 %v9303_v31, %v9302_v50  ;;  %v12094_v18 = vpop.f32.mrb[24].mxu1  ;;  %v15698_v50 = vld [vmem:[#allocation5_spill] sm:$0xff]  ;;  %v15701_v12 = vunpack.i.h.bf16 %v15700_v0  ;;  %v15708_v0 = vld [vmem:[#allocation56_spill] sm:$0xff] }
 0x296   : > { %2637 = vmatpush1.bf16.msra.mxu0 %v1695_v25  ;;  %v9311_v14 = vpop.permute.xlu0 %9310  ;;  %v1641_v11 = vpack.c.bf16 %v926_v46, %v921_v7  ;;  %v12096_v38 = vpop.f32.mrb[25].mxu1  ;;  %v15699_v23 = vunpack.i.h.bf16 %v15698_v50  ;;  %v15706_v50 = vld [vmem:[#allocation55_spill] sm:$0xff] }
 0x297   : > { %v9313_v53 = vunpack.i.h.bf16 %v9311_v14  ;;  %v9312_v60 = vunpack.i.l.bf16 %v9311_v14  ;;  %v9306_v40 = vpop.permute.xlu1 %9305  ;;  %2537 = vmatprep.subr.bf16.mxu1 %v1642_v22  ;;  %v12098_v45 = vpop.f32.mrb[26].mxu1 }
 0x298   : > { %v9308_v42 = vunpack.i.h.bf16 %v9306_v40  ;;  %v9307_v8 = vunpack.i.l.bf16 %v9306_v40  ;;  %2538 = vmatpush1.bf16.msra.mxu1 %v1641_v11  ;;  %v12100_v1 = vpop.f32.mrb[27].mxu1 }
 0x299   : > { %v1353_v28 = vsel %vm1317_vm12, %v9312_v60, %v9313_v53  ;;  %v1352_v10 = vsel %vm1317_vm12, %v15695_v49, %v9312_v60  ;;  %v15702_v49 = vld [vmem:[#allocation20_spill] sm:$0xff] }
 0x29a   : > { %v1347_v2 = vsel %vm1317_vm12, %v9307_v8, %v9308_v42  ;;  %v1346_v13 = vsel %vm1317_vm12, %v15697_v16, %v9307_v8  ;;  %v15705_v16 = vunpack.i.h.bf16 %v15704_v30  ;;  %v15712_v30 = vld [vmem:[#allocation22_spill] sm:$0xff] }
 0x29b   : > { %v9316_v61 = vpop.permute.xlu1 %9315  ;;  %v1702_v27 = vpack.c.bf16 %v1353_v28, %v1347_v2  ;;  %v1701_v57 = vpack.c.bf16 %v1352_v10, %v1346_v13  ;;  %v15703_v10 = vunpack.i.h.bf16 %v15702_v49  ;;  %v15710_v49 = vld [vmem:[#allocation21_spill] sm:$0xff] }
 0x29c   : > { %v9318_v4 = vunpack.i.h.bf16 %v9316_v61  ;;  %v9317_v24 = vunpack.i.l.bf16 %v9316_v61 }
 0x29d   : > { %2638 = vmatprep.subr.bf16.mxu0 %v1702_v27  ;;  %v12110_v31 = vpop.f32.mrb[28].mxu1 }
 0x29e   : > { %v931_v25 = vsel %vm916_vm15, %v15699_v23, %v9317_v24  ;;  %v936_v7 = vsel %vm916_vm15, %v15701_v12, %v9318_v4  ;;  %2639 = vmatpush1.bf16.msra.mxu0 %v1701_v57  ;;  %v1648_v3 = vpack.c.bf16 %v9318_v4, %v9317_v24  ;;  %v12118_v5 = vpop.f32.mrb[29].mxu1  ;;  %v15707_v23 = vunpack.i.h.bf16 %v15706_v50  ;;  %v15714_v50 = vld [vmem:[#allocation58_spill] sm:$0xff] }
 0x29f   : > { %v9321_v46 = vpop.permute.xlu0 %9320  ;;  %v9326_v22 = vpop.permute.xlu1 %9325  ;;  %v1647_v14 = vpack.c.bf16 %v936_v7, %v931_v25  ;;  %v15709_v12 = vunpack.i.h.bf16 %v15708_v0  ;;  %v15716_v0 = vld [vmem:[#allocation57_spill] sm:$0xff] }
 0x2a0   : > { %v9323_v11 = vunpack.i.h.bf16 %v9321_v46  ;;  %v9322_v53 = vunpack.i.l.bf16 %v9321_v46  ;;  %v9328_v60 = vunpack.i.h.bf16 %v9326_v22  ;;  %v9327_v40 = vunpack.i.l.bf16 %v9326_v22  ;;  %2539 = vmatprep.subr.bf16.mxu1 %v1648_v3  ;;  %v12120_v42 = vpop.f32.mrb[30].mxu1 }
 0x2a1   : > { %2540 = vmatpush1.bf16.msra.mxu1 %v1647_v14  ;;  %v12122_v8 = vpop.f32.mrb[31].mxu1 }
 0x2a2   : > { %v1359_v28 = vsel %vm1317_vm12, %v9322_v53, %v9323_v11  ;;  %v1365_v59 = vsel %vm1317_vm12, %v9327_v40, %v9328_v60  ;;  %v1358_v2 = vsel %vm1317_vm12, %v15703_v10, %v9322_v53  ;;  %v1364_v13 = vsel %vm1317_vm12, %v15705_v16, %v9327_v40 }
 0x2a3   : > { %v9331_v61 = vpop.permute.xlu0 %9330  ;;  %v1708_v27 = vpack.c.bf16 %v1365_v59, %v1359_v28  ;;  %v1707_v57 = vpack.c.bf16 %v1364_v13, %v1358_v2  ;;  %v15711_v10 = vunpack.i.h.bf16 %v15710_v49  ;;  %v15713_v16 = vunpack.i.h.bf16 %v15712_v30  ;;  %v15718_v49 = vld [vmem:[#allocation29_spill] sm:$0xff]  ;;  %v15720_v30 = vld [vmem:[#allocation30_spill] sm:$0xff] }
 0x2a4   : > { %v9333_v4 = vunpack.i.h.bf16 %v9331_v61  ;;  %v9332_v24 = vunpack.i.l.bf16 %v9331_v61 }
 0x2a5   : > { %2640 = vmatprep.subr.bf16.mxu0 %v1708_v27 }
 0x2a6   : > { %v941_v25 = vsel %vm916_vm15, %v15707_v23, %v9332_v24  ;;  %v946_v7 = vsel %vm916_vm15, %v15709_v12, %v9333_v4  ;;  %2641 = vmatpush1.bf16.msra.mxu0 %v1707_v57  ;;  %v1654_v3 = vpack.c.bf16 %v9333_v4, %v9332_v24  ;;  %v15715_v23 = vunpack.i.h.bf16 %v15714_v50  ;;  %v15722_v50 = vld [vmem:[#allocation9_spill] sm:$0xff] }
 0x2a7   : > { %v9341_v46 = vpop.permute.xlu0 %9340  ;;  %v9336_v22 = vpop.permute.xlu1 %9335  ;;  %v1653_v14 = vpack.c.bf16 %v946_v7, %v941_v25  ;;  %v15717_v12 = vunpack.i.h.bf16 %v15716_v0  ;;  %v15724_v0 = vld [vmem:[#allocation8_spill] sm:$0xff] }
 0x2a8   : > { %v9343_v11 = vunpack.i.h.bf16 %v9341_v46  ;;  %v9342_v53 = vunpack.i.l.bf16 %v9341_v46  ;;  %v9338_v60 = vunpack.i.h.bf16 %v9336_v22  ;;  %v9337_v40 = vunpack.i.l.bf16 %v9336_v22  ;;  %2541 = vmatprep.subr.bf16.mxu1 %v1654_v3 }
 0x2a9   : > { %2542 = vmatpush1.bf16.msra.mxu1 %v1653_v14 }
 0x2aa   : > { %v1371_v28 = vsel %vm1317_vm12, %v9337_v40, %v9338_v60  ;;  %v1377_v59 = vsel %vm1317_vm12, %v9342_v53, %v9343_v11  ;;  %v1370_v2 = vsel %vm1317_vm12, %v15711_v10, %v9337_v40  ;;  %v1376_v13 = vsel %vm1317_vm12, %v15713_v16, %v9342_v53 }
 0x2ab   : > { %v9346_v61 = vpop.permute.xlu1 %9345  ;;  %v1714_v27 = vpack.c.bf16 %v1377_v59, %v1371_v28  ;;  %v1713_v57 = vpack.c.bf16 %v1376_v13, %v1370_v2  ;;  %v15719_v10 = vunpack.i.h.bf16 %v15718_v49  ;;  %v15721_v16 = vunpack.i.h.bf16 %v15720_v30  ;;  %v15726_v49 = vld [vmem:[#allocation24_spill] sm:$0xff]  ;;  %v15728_v30 = vld [vmem:[#allocation23_spill] sm:$0xff] }
 0x2ac   : > { %v9348_v4 = vunpack.i.h.bf16 %v9346_v61  ;;  %v9347_v24 = vunpack.i.l.bf16 %v9346_v61 }
 0x2ad   : > { %2642 = vmatprep.subr.bf16.mxu0 %v1714_v27 }
 0x2ae   : > { %v951_v25 = vsel %vm916_vm15, %v15715_v23, %v9347_v24  ;;  %v956_v7 = vsel %vm916_vm15, %v15717_v12, %v9348_v4  ;;  %2643 = vmatpush1.bf16.msra.mxu0 %v1713_v57  ;;  %v1660_v3 = vpack.c.bf16 %v9348_v4, %v9347_v24  ;;  %v15723_v23 = vunpack.i.h.bf16 %v15722_v50  ;;  %v15730_v50 = vld [vmem:[#allocation11_spill] sm:$0xff] }
 0x2af   : > { %v9351_v46 = vpop.permute.xlu0 %9350  ;;  %v9356_v22 = vpop.permute.xlu1 %9355  ;;  %v1659_v14 = vpack.c.bf16 %v956_v7, %v951_v25  ;;  %v15725_v12 = vunpack.i.h.bf16 %v15724_v0  ;;  %v15732_v0 = vld [vmem:[#allocation10_spill] sm:$0xff] }
 0x2b0   : > { %v9353_v11 = vunpack.i.h.bf16 %v9351_v46  ;;  %v9352_v53 = vunpack.i.l.bf16 %v9351_v46  ;;  %v9358_v60 = vunpack.i.h.bf16 %v9356_v22  ;;  %v9357_v40 = vunpack.i.l.bf16 %v9356_v22  ;;  %2543 = vmatprep.subr.bf16.mxu1 %v1660_v3 }
 0x2b1   : > { %2544 = vmatpush1.bf16.msra.mxu1 %v1659_v14 }
 0x2b2   : > { %v1383_v28 = vsel %vm1317_vm12, %v9352_v53, %v9353_v11  ;;  %v1389_v59 = vsel %vm1317_vm12, %v9357_v40, %v9358_v60  ;;  %v1382_v2 = vsel %vm1317_vm12, %v15719_v10, %v9352_v53  ;;  %v1388_v13 = vsel %vm1317_vm12, %v15721_v16, %v9357_v40 }
 0x2b3   : > { %v9361_v61 = vpop.permute.xlu0 %9360  ;;  %v1720_v27 = vpack.c.bf16 %v1389_v59, %v1383_v28  ;;  %v1719_v57 = vpack.c.bf16 %v1388_v13, %v1382_v2  ;;  %v15727_v10 = vunpack.i.h.bf16 %v15726_v49  ;;  %v15729_v16 = vunpack.i.h.bf16 %v15728_v30  ;;  %v15734_v49 = vld [vmem:[#allocation34_spill] sm:$0xff]  ;;  %v15736_v30 = vld [vmem:[#allocation37_spill] sm:$0xff] }
 0x2b4   : > { %v9363_v4 = vunpack.i.h.bf16 %v9361_v61  ;;  %v9362_v24 = vunpack.i.l.bf16 %v9361_v61 }
 0x2b5   : > { %2644 = vmatprep.subr.bf16.mxu0 %v1720_v27 }
 0x2b6   : > { %v961_v25 = vsel %vm916_vm15, %v15723_v23, %v9362_v24  ;;  %v966_v7 = vsel %vm916_vm15, %v15725_v12, %v9363_v4  ;;  %2645 = vmatpush1.bf16.msra.mxu0 %v1719_v57  ;;  %v1666_v3 = vpack.c.bf16 %v9363_v4, %v9362_v24  ;;  %v15731_v23 = vunpack.i.h.bf16 %v15730_v50 }
 0x2b7   : > { %v9371_v46 = vpop.permute.xlu0 %9370  ;;  %v9366_v22 = vpop.permute.xlu1 %9365  ;;  %v1665_v14 = vpack.c.bf16 %v966_v7, %v961_v25  ;;  %v15733_v12 = vunpack.i.h.bf16 %v15732_v0  ;;  %v15738_v0 = vld [vmem:[#allocation13_spill] sm:$0xff] }
 0x2b8   : > { %v9373_v11 = vunpack.i.h.bf16 %v9371_v46  ;;  %v9372_v53 = vunpack.i.l.bf16 %v9371_v46  ;;  %v9368_v60 = vunpack.i.h.bf16 %v9366_v22  ;;  %v9367_v40 = vunpack.i.l.bf16 %v9366_v22  ;;  %2545 = vmatprep.subr.bf16.mxu1 %v1666_v3 }
 0x2b9   : > { %2546 = vmatpush1.bf16.msra.mxu1 %v1665_v14 }
 0x2ba   : > { %v1395_v28 = vsel %vm1317_vm12, %v9367_v40, %v9368_v60  ;;  %v1401_v59 = vsel %vm1317_vm12, %v9372_v53, %v9373_v11  ;;  %v1394_v2 = vsel %vm1317_vm12, %v15727_v10, %v9367_v40  ;;  %v1400_v13 = vsel %vm1317_vm12, %v15729_v16, %v9372_v53 }
 0x2bb   : > { %v9376_v61 = vpop.permute.xlu1 %9375  ;;  %v1726_v27 = vpack.c.bf16 %v1401_v59, %v1395_v28  ;;  %v1725_v57 = vpack.c.bf16 %v1400_v13, %v1394_v2  ;;  %v15735_v10 = vunpack.i.h.bf16 %v15734_v49  ;;  %v15737_v16 = vunpack.i.h.bf16 %v15736_v30 }
 0x2bc   : > { %v9378_v4 = vunpack.i.h.bf16 %v9376_v61  ;;  %v9377_v24 = vunpack.i.l.bf16 %v9376_v61 }
 0x2bd   : > { %2646 = vmatprep.subr.bf16.mxu0 %v1726_v27 }
 0x2be   : > { %v971_v25 = vsel %vm916_vm15, %v15731_v23, %v9377_v24  ;;  %v976_v7 = vsel %vm916_vm15, %v15733_v12, %v9378_v4  ;;  %2647 = vmatpush1.bf16.msra.mxu0 %v1725_v57  ;;  %v1672_v3 = vpack.c.bf16 %v9378_v4, %v9377_v24  ;;  %v15739_v12 = vunpack.i.h.bf16 %v15738_v0 }
 0x2bf   : > { %v9381_v46 = vpop.permute.xlu0 %9380  ;;  %v9386_v22 = vpop.permute.xlu1 %9385  ;;  %v1671_v14 = vpack.c.bf16 %v976_v7, %v971_v25 }
 0x2c0   : > { %v9383_v11 = vunpack.i.h.bf16 %v9381_v46  ;;  %v9382_v53 = vunpack.i.l.bf16 %v9381_v46  ;;  %v9388_v60 = vunpack.i.h.bf16 %v9386_v22  ;;  %v9387_v40 = vunpack.i.l.bf16 %v9386_v22  ;;  %2547 = vmatprep.subr.bf16.mxu1 %v1672_v3  ;;  %v15740_v3 = vld [vmem:[#allocation59_spill] sm:$0xff] }
 0x2c1   : > { %2548 = vmatpush1.bf16.msra.mxu1 %v1671_v14  ;;  %v15741_v46 = vunpack.i.h.bf16 %v15740_v3 }
 0x2c2   : > { %v1407_v28 = vsel %vm1317_vm12, %v9382_v53, %v9383_v11  ;;  %v1413_v59 = vsel %vm1317_vm12, %v9387_v40, %v9388_v60  ;;  %v1406_v2 = vsel %vm1317_vm12, %v15735_v10, %v9382_v53  ;;  %v1412_v13 = vsel %vm1317_vm12, %v15737_v16, %v9387_v40  ;;  %vm15742_vm12 = vmmov %vm15657_vm7 }
 0x2c3   : > { %v9391_v61 = vpop.permute.xlu0 %9390  ;;  %v9396_v27 = vpop.permute.xlu1 %9395  ;;  %v1732_v57 = vpack.c.bf16 %v1413_v59, %v1407_v28  ;;  %v1731_v4 = vpack.c.bf16 %v1412_v13, %v1406_v2  ;;  %v15743_v2 = vld [vmem:[#allocation12_spill] sm:$0xff]  ;;  %v15745_v13 = vld [vmem:[#allocation14_spill] sm:$0xff] }
 0x2c4   : > { %v9393_v24 = vunpack.i.h.bf16 %v9391_v61  ;;  %v9392_v50 = vunpack.i.l.bf16 %v9391_v61  ;;  %v9398_v23 = vunpack.i.h.bf16 %v9396_v27  ;;  %v9397_v25 = vunpack.i.l.bf16 %v9396_v27 }
 0x2c5   : > { %2648 = vmatprep.subr.bf16.mxu0 %v1732_v57  ;;  %v15744_v30 = vunpack.i.h.bf16 %v15743_v2  ;;  %v15746_v61 = vunpack.i.h.bf16 %v15745_v13  ;;  %v9475_v2 = vld [vmem:[%s15250_s3 + $0x34] ss:$8 sps:$4 sm:$0xff]  }
 0x2c6   : > { %v981_v7 = vsel %vm916_vm15, %v15739_v12, %v9392_v50  ;;  %v986_v22 = vsel %vm916_vm15, %v15741_v46, %v9393_v24  ;;  %2649 = vmatpush1.bf16.msra.mxu0 %v1731_v4  ;;  %v1678_v14 = vpack.c.bf16 %v9393_v24, %v9392_v50  ;;  %v1558_v40 = vsel %vm15742_vm12, %v9397_v25, %v9398_v23  ;;  %v9466_v24 = vld [vmem:[%s15250_s3 + $0x4] ss:$8 sps:$4 sm:$0xff]   ;;  %vm15752_vm12 = vmmov %vm15666_vm9 }
 0x2c7   : > { %v9401_v11 = vpop.permute.xlu0 %9400  ;;  %v9406_v53 = vpop.permute.xlu1 %9405  ;;  %v1677_v60 = vpack.c.bf16 %v986_v22, %v981_v7  ;;  %v1557_v12 = vsel %vm15747_vm8, %v9268_v51, %v9397_v25  ;;  %v9476_v7 = vld [vmem:[%s15250_s3 + $0x40] ss:$8 sps:$4 sm:$0xff]  }
 0x2c8   : > { %v9403_v28 = vunpack.i.h.bf16 %v9401_v11  ;;  %v9402_v59 = vunpack.i.l.bf16 %v9401_v11  ;;  %v9408_v49 = vunpack.i.h.bf16 %v9406_v53  ;;  %v9407_v10 = vunpack.i.l.bf16 %v9406_v53  ;;  %2549 = vmatprep.subr.bf16.mxu1 %v1678_v14  ;;  %v9464_v11 = vld [vmem:[%s15250_s3] ss:$8 sps:$4 sm:$0xff]  }
 0x2c9   : > { %2550 = vmatpush1.bf16.msra.mxu1 %v1677_v60  ;;  %v10060_v60 = vld [vmem:[%s15248_s1] ss:$16 sps:$4 sm:$0xff]  }
 0x2ca   : > { %v991_v16 = vsel %vm916_vm15, %v15744_v30, %v9407_v10  ;;  %v996_v27 = vsel %vm916_vm15, %v15746_v61, %v9408_v49  ;;  %v1684_v57 = vpack.c.bf16 %v9408_v49, %v9407_v10  ;;  %v1564_v4 = vsel %vm15657_vm7, %v9402_v59, %v9403_v28  ;;  %vm15750_vm15 = vmmov %vm15657_vm7  ;;  %v10061_v28 = vld [vmem:[%s15248_s1 + $0x24] ss:$16 sps:$4 sm:$0xff]   ;;  %v9470_v49 = vld [vmem:[%s15250_s3 + $0x20] ss:$8 sps:$4 sm:$0xff]  }
 0x2cb   : > { %v9411_v50 = vpop.permute.xlu0 %9410  ;;  %v1683_v23 = vpack.c.bf16 %v996_v27, %v991_v16  ;;  %v1738_v0 = vpack.c.bf16 %v1564_v4, %v1558_v40  ;;  %v1563_v3 = vsel %vm15749_vm10, %v9273_v44, %v9402_v59  ;;  %v9469_v44 = vld [vmem:[%s15250_s3 + $0x14] ss:$8 sps:$4 sm:$0xff]   ;;  %v10062_v59 = vld [vmem:[%s15248_s1 + $0x8] ss:$16 sps:$4 sm:$0xff]   ;;  %v15753_v16 = vld [vmem:[#allocation18_spill] sm:$0xff] }
 0x2cc   : > { %v9413_v46 = vunpack.i.h.bf16 %v9411_v50  ;;  %v9412_v22 = vunpack.i.l.bf16 %v9411_v50  ;;  %2551 = vmatprep.subr.bf16.mxu1 %v1684_v57  ;;  %v1737_v14 = vpack.c.bf16 %v1563_v3, %v1557_v12  ;;  %v10063_v10 = vld [vmem:[%s15248_s1 + $0x2c] ss:$16 sps:$4 sm:$0xff]   ;;  %v9473_v61 = vld [vmem:[%s15250_s3 + $0x30] ss:$8 sps:$4 sm:$0xff]  }
 0x2cd   : > { %2552 = vmatpush1.bf16.msra.mxu1 %v1683_v23  ;;  %2650 = vmatprep.subr.bf16.mxu0 %v1738_v0  ;;  %v15754_v27 = vld [vmem:[#allocation19_spill] sm:$0xff] }
 0x2ce   : > { %2651 = vmatpush1.bf16.msra.mxu0 %v1737_v14  ;;  %3965 = vmatprep.subr.bf16.mxu1 %v9466_v24  ;;  %v1570_v6 = vsel %vm15750_vm15, %v9412_v22, %v9413_v46  ;;  %v1569_v51 = vsel %vm15751_vm11, %v9278_v15, %v9412_v22  ;;  %v9472_v15 = vld [vmem:[%s15250_s3 + $0x24] ss:$8 sps:$4 sm:$0xff]   ;;  %v9481_v22 = vld [vmem:[%s15250_s3 + $0x54] ss:$8 sps:$4 sm:$0xff]  }
 0x2cf   : > { %v1744_v25 = vpack.c.bf16 %v1570_v6, %v1570_v6  ;;  %v1743_v53 = vpack.c.bf16 %v1569_v51, %v1569_v51  ;;  %v9478_v4 = vld [vmem:[%s15250_s3 + $0x44] ss:$8 sps:$4 sm:$0xff]  }
 0x2d0   : > { %2554 = vmatmul.mubr.bf16.vlgmr.msra.gmra.mrb[64].mxu1 %v10060_v60  ;;  %v10067_v60 = vld [vmem:[%s15248_s1 + $0x64] ss:$16 sps:$4 sm:$0xff]  }
 0x2d1   : > { %7652 = vmatprep.subr.msk.bf16.mxu0 %vm15666_vm9, %v1744_v25  ;;  %3966 = vmatpush1.bf16.msra.mxu1 %v9464_v11  ;;  %v2064_v40 = vsel %vm15752_vm12, %v1743_v53, 0  ;;  %v10066_v25 = vld [vmem:[%s15248_s1 + $0x40] ss:$16 sps:$4 sm:$0xff]  }
 0x2d2   : > { %2653 = vmatpush1.bf16.msra.mxu0 %v2064_v40  ;;  %3967 = vmatprep.subr.bf16.mxu1 %v9469_v44 }
 0x2d3   : > { %2563 = vmatprep.mubr.bf16.mxu1 %v10061_v28  ;;  %v9484_v28 = vld [vmem:[%s15250_s3 + $0x64] ss:$8 sps:$4 sm:$0xff]  }
 0x2d5   : > { %2667 = vmatmul.mubr.bf16.vlgmr.msra.gmra.mrb[0].mxu0 %v10062_v59  ;;  %3968 = vmatpush1.bf16.msra.mxu1 %v9467_v48 }
 0x2d6   : > { %3969 = vmatprep.subr.bf16.mxu1 %v9472_v15  ;;  %7654 = vmatprep.mubr.msk.bf16.mxu0 %vm2025_vm14, %v10063_v10 }
 0x2d8   : > { %v12248_v30 = vpop.permute.xlu1 %1795  ;;  %2564 = vmatmul.mubr.bf16.gmra.mrb[68].mxu1 %v15753_v16 }
 0x2d9   : > { %v12253_v13 = vadd.f32 %v11962_v32, %v12248_v30  ;;  %3970 = vmatpush1.bf16.msra.mxu1 %v9470_v49  ;;  %2573 = vmatprep.mubr.bf16.mxu1 %v15754_v27  ;;  %v12261_v57 = vadd.f32 %v11970_v55, %v12248_v30  ;;  %v10064_v55 = vld [vmem:[%s15248_s1 + $0x28] ss:$16 sps:$4 sm:$0xff]  }
 0x2da   : > { %3971 = vmatprep.subr.bf16.mxu1 %v9475_v2 }
 0x2db   : > { %v2843_v24 = vmin.f32 %v12253_v13, 0.0  ;;  %v2844_v32 = vmin.f32 %v12261_v57, 0.0  ;;  %vm2748_vm7 = vcmp.gt.f32.partialorder %v12261_v57, 0.0  ;;  %vm2747_vm8 = vcmp.gt.f32.partialorder %v12253_v13, 0.0 }
 0x2dc   : > { %v12268_v50 = vpop.permute.xlu0 %1800  ;;  %v12270_v23 = vpop.permute.xlu1 %1805 }
 0x2dd   : > { %v2939_v0 = vmul.f32 1.442695, %v2843_v24  ;;  %v12274_v12 = vadd.f32 %v11973_v29, %v12268_v50  ;;  %2677 = vmatmul.mubr.bf16.gmra.mrb[4].mxu0 %v10064_v55  ;;  %3972 = vmatpush1.bf16.msra.mxu1 %v9473_v61  ;;  %v12284_v3 = vadd.f32 %v11982_v63, %v12268_v50  ;;  %v2941_v46 = vmul.f32 1.442695, %v2844_v32  ;;  %v10065_v29 = vld [vmem:[%s15248_s1 + $0x4c] ss:$16 sps:$4 sm:$0xff]  }
 0x2de   : > { %3973 = vmatprep.subr.bf16.mxu1 %v9478_v4  ;;  %7655 = vmatprep.mubr.msk.bf16.mxu0 %vm2025_vm14, %v10065_v29  ;;  %v12295_v14 = vadd.f32 %v12003_v26, %v12270_v23  ;;  %v12299_v63 = vadd.f32 %v11995_v35, %v12270_v23  ;;  %v9479_v35 = vld [vmem:[%s15250_s3 + $0x50] ss:$8 sps:$4 sm:$0xff]   ;;  %v9487_v55 = vld [vmem:[%s15250_s3 + $0x74] ss:$8 sps:$4 sm:$0xff]  }
 0x2df   : > { %v2849_v11 = vmin.f32 %v12274_v12, 0.0  ;;  %v2850_v6 = vmin.f32 %v12284_v3, 0.0  ;;  %9781 = vpow2.f32 %v2941_v46  ;;  %v10068_v61 = vld [vmem:[%s15248_s1 + $0x48] ss:$16 sps:$4 sm:$0xff]   ;;  %vm2754_vm10 = vcmp.gt.f32.partialorder %v12284_v3, 0.0 }
 0x2e0   : > { %v12303_v51 = vpop.permute.xlu0 %1815  ;;  %v12305_v44 = vpop.permute.xlu1 %1810  ;;  %2574 = vmatmul.mubr.bf16.gmra.mrb[72].mxu1 %v10066_v25  ;;  %9783 = vpow2.f32 %v2939_v0  ;;  %v2856_v26 = vmin.f32 %v12295_v14, 0.0  ;;  %v2855_v49 = vmin.f32 %v12299_v63, 0.0  ;;  %v10069_v0 = vld [vmem:[%s15248_s1 + $0x6c] ss:$16 sps:$4 sm:$0xff]   ;;  %vm2753_vm15 = vcmp.gt.f32.partialorder %v12274_v12, 0.0 }
 0x2e1   : > { %v2951_v53 = vmul.f32 1.442695, %v2849_v11  ;;  %3974 = vmatpush1.bf16.msra.mxu1 %v9476_v7  ;;  %2583 = vmatprep.mubr.bf16.mxu1 %v10067_v60  ;;  %v2953_v40 = vmul.f32 1.442695, %v2850_v6  ;;  %v12319_v48 = vadd.f32 %v12015_v47, %v12305_v44  ;;  %v12323_v15 = vadd.f32 %v12006_v19, %v12305_v44  ;;  %v10070_v6 = vld [vmem:[%s15248_s1 + $0x60] ss:$16 sps:$4 sm:$0xff]  }
 0x2e2   : > { %3975 = vmatprep.subr.bf16.mxu1 %v9481_v22  ;;  %v2965_v59 = vmul.f32 1.442695, %v2856_v26  ;;  %v12331_v10 = vadd.f32 %v12031_v52, %v12303_v51  ;;  %v2963_v16 = vmul.f32 1.442695, %v2855_v49  ;;  %v9482_v52 = vld [vmem:[%s15250_s3 + $0x60] ss:$8 sps:$4 sm:$0xff]  }
 0x2e3   : > { %9785 = vpow2.f32 %v2953_v40  ;;  %v2862_v47 = vmin.f32 %v12319_v48, 0.0  ;;  %v2861_v19 = vmin.f32 %v12323_v15, 0.0  ;;  %v9485_v25 = vld [vmem:[%s15250_s3 + $0x70] ss:$8 sps:$4 sm:$0xff]   ;;  %v10071_v26 = vld [vmem:[%s15248_s1 + $0x84] ss:$16 sps:$4 sm:$0xff]  }
 0x2e4   : > { %v12334_v2 = vpop.permute.xlu1 %1820  ;;  %9787 = vpow2.f32 %v2951_v53  ;;  %v2868_v24 = vmin.f32 %v12331_v10, 0.0  ;;  %v12349_v32 = vpop.permute.xlu0 %1825  ;;  %vm2760_vm11 = vcmp.gt.f32.partialorder %v12295_v14, 0.0  ;;  %vm2766_vm9 = vcmp.gt.f32.partialorder %v12319_v48, 0.0 }
 0x2e5   : > { %2687 = vmatmul.mubr.bf16.gmra.mrb[8].mxu0 %v10068_v61  ;;  %3976 = vmatpush1.bf16.msra.mxu1 %v9479_v35  ;;  %9789 = vpow2.f32 %v2965_v59  ;;  %v2977_v27 = vmul.f32 1.442695, %v2862_v47  ;;  %v12346_v4 = vadd.f32 %v12038_v36, %v12334_v2  ;;  %v2975_v7 = vmul.f32 1.442695, %v2861_v19 }
 0x2e6   : > { %3977 = vmatprep.subr.bf16.mxu1 %v9484_v28  ;;  %7656 = vmatprep.mubr.msk.bf16.mxu0 %vm2025_vm14, %v10069_v0  ;;  %9791 = vpow2.f32 %v2963_v16  ;;  %v12360_v36 = vadd.f32 %v12026_v17, %v12303_v51  ;;  %v12364_v46 = vadd.f32 %v12034_v9, %v12334_v2  ;;  %v2989_v22 = vmul.f32 1.442695, %v2868_v24  ;;  %v9490_v28 = vld [vmem:[%s15250_s3 + $0x84] ss:$8 sps:$4 sm:$0xff]  }
 0x2e7   : > { %9793 = vpow2.f32 %v2977_v27  ;;  %v2874_v29 = vmin.f32 %v12346_v4, 0.0  ;;  %v12385_v60 = vadd.f32 %v12042_v41, %v12349_v32  ;;  %v12396_v19 = vadd.f32 %v12040_v56, %v12349_v32  ;;  %v9488_v56 = vld [vmem:[%s15250_s3 + $0x80] ss:$8 sps:$4 sm:$0xff]  }
 0x2e8   : > { %v12368_v11 = vpop.permute.xlu1 %1830  ;;  %2584 = vmatmul.mubr.bf16.gmra.mrb[76].mxu1 %v10070_v6  ;;  %9795 = vpow2.f32 %v2975_v7  ;;  %v2867_v17 = vmin.f32 %v12360_v36, 0.0  ;;  %v2873_v35 = vmin.f32 %v12364_v46, 0.0  ;;  %vm2759_vm12 = vcmp.gt.f32.partialorder %v12299_v63, 0.0  ;;  %v9493_v7 = vld [vmem:[%s15250_s3 + $0x94] ss:$8 sps:$4 sm:$0xff]  }
 0x2e9   : > { %v9782_v9 = vpop.eup %9781  ;;  %3978 = vmatpush1.bf16.msra.mxu1 %v9482_v52  ;;  %2593 = vmatprep.mubr.bf16.mxu1 %v10071_v26  ;;  %9797 = vpow2.f32 %v2989_v22  ;;  %v3001_v53 = vmul.f32 1.442695, %v2874_v29  ;;  %v12392_v47 = vadd.f32 %v12049_v39, %v12368_v11  ;;  %v2880_v61 = vmin.f32 %v12385_v60, 0.0  ;;  %v10072_v39 = vld [vmem:[%s15248_s1 + $0x68] ss:$16 sps:$4 sm:$0xff]  }
 0x2ea   : > { %v9784_v40 = vpop.eup %9783  ;;  %3979 = vmatprep.subr.bf16.mxu1 %v9487_v55  ;;  %v7662_v59 = vadd.f32 -1.0, %v9782_v9  ;;  %v2987_v49 = vmul.f32 1.442695, %v2867_v17  ;;  %v2999_v41 = vmul.f32 1.442695, %v2873_v35  ;;  %vm2765_vm13 = vcmp.gt.f32.partialorder %v12323_v15, 0.0 }
 0x2eb   : > { %v7661_v16 = vadd.f32 -1.0, %v9784_v40  ;;  %9799 = vpow2.f32 %v3001_v53  ;;  %v2886_v27 = vmin.f32 %v12392_v47, 0.0  ;;  %v12412_v24 = vadd.f32 %v12045_v33, %v12368_v11  ;;  %v10073_v55 = vld [vmem:[%s15248_s1 + $0x8c] ss:$16 sps:$4 sm:$0xff]   ;;  %v12434_v40 = vpop.permute.xlu0 %1835 }
 0x2ec   : > { %9801 = vpow2.f32 %v2987_v49  ;;  %v12424_v22 = vsel %vm2748_vm7, %v12261_v57, %v7662_v59  ;;  %v3013_v33 = vmul.f32 1.442695, %v2880_v61  ;;  %v2879_v6 = vmin.f32 %v12396_v19, 0.0  ;;  %v10074_v57 = vld [vmem:[%s15248_s1 + $0x80] ss:$16 sps:$4 sm:$0xff]  }
 0x2ed   : > { %v9786_v52 = vpop.eup %9785  ;;  %2697 = vmatmul.mubr.bf16.gmra.mrb[12].mxu0 %v10072_v39  ;;  %3980 = vmatpush1.bf16.msra.mxu1 %v9485_v25  ;;  %9803 = vpow2.f32 %v2999_v41  ;;  %v12430_v25 = vsel %vm2747_vm8, %v12253_v13, %v7661_v16  ;;  %vm2772_vm6 = vcmp.gt.f32.partialorder %v12331_v10, 0.0  ;;  %v3025_v26 = vmul.f32 1.442695, %v2886_v27  ;;  %v12444_v16 = vpop.permute.xlu1 %1840  ;;  %v9491_v41 = vld [vmem:[%s15250_s3 + $0x90] ss:$8 sps:$4 sm:$0xff]  }
 0x2ee   : > { %v9788_v0 = vpop.eup %9787  ;;  %3981 = vmatprep.subr.bf16.mxu1 %v9490_v28  ;;  %7657 = vmatprep.mubr.msk.bf16.mxu0 %vm2025_vm14, %v10073_v55  ;;  %v7668_v29 = vadd.f32 -1.0, %v9786_v52  ;;  %v2885_v53 = vmin.f32 %v12412_v24, 0.0  ;;  %9805 = vpow2.f32 %v3013_v33  ;;  %v3011_v59 = vmul.f32 1.442695, %v2879_v6  ;;  %v10075_v61 = vld [vmem:[%s15248_s1 + $0xa4] ss:$16 sps:$4 sm:$0xff]  }
 0x2ef   : > { %v9790_v17 = vpop.eup %9789  ;;  %v7667_v9 = vadd.f32 -1.0, %v9788_v0  ;;  %9807 = vpow2.f32 %v3025_v26  ;;  %v9496_v27 = vld [vmem:[%s15250_s3 + $0xa4] ss:$8 sps:$4 sm:$0xff]   ;;  %vm2778_vm7 = vcmp.gt.f32.partialorder %v12346_v4, 0.0  ;;  %v12481_v26 = vadd.f32 %v12061_v54, %v12444_v16 }
 0x2f0   : > { %v9792_v35 = vpop.eup %9791  ;;  %2594 = vmatmul.mubr.bf16.gmra.mrb[80].mxu1 %v10074_v57  ;;  %v12442_v28 = vsel %vm2754_vm10, %v12284_v3, %v7668_v29  ;;  %v7674_v13 = vadd.f32 -1.0, %v9790_v17  ;;  %9809 = vpow2.f32 %v3011_v59  ;;  %v3023_v6 = vmul.f32 1.442695, %v2885_v53  ;;  %v9499_v59 = vld [vmem:[%s15250_s3 + $0xb4] ss:$8 sps:$4 sm:$0xff]  }
 0x2f1   : > { %v9794_v49 = vpop.eup %9793  ;;  %3982 = vmatpush1.bf16.msra.mxu1 %v9488_v56  ;;  %2603 = vmatprep.mubr.bf16.mxu1 %v10075_v61  ;;  %v12457_v52 = vsel %vm2753_vm15, %v12274_v12, %v7667_v9  ;;  %v7673_v39 = vadd.f32 -1.0, %v9792_v35  ;;  %vm2777_vm8 = vcmp.gt.f32.partialorder %v12364_v46, 0.0  ;;  %vm2790_vm10 = vcmp.gt.f32.partialorder %v12392_v47, 0.0 }
 0x2f2   : > { %v9796_v56 = vpop.eup %9795  ;;  %3983 = vmatprep.subr.bf16.mxu1 %v9493_v7  ;;  %v7680_v55 = vadd.f32 -1.0, %v9794_v49  ;;  %v12468_v12 = vsel %vm2760_vm11, %v12295_v14, %v7674_v13  ;;  %v12472_v7 = vadd.f32 %v12053_v43, %v12434_v40  ;;  %v12485_v14 = vadd.f32 %v12051_v20, %v12434_v40  ;;  %v10076_v43 = vld [vmem:[%s15248_s1 + $0x88] ss:$16 sps:$4 sm:$0xff]   ;;  %v10077_v13 = vld [vmem:[%s15248_s1 + $0xac] ss:$16 sps:$4 sm:$0xff]  }
 0x2f3   : > { %v9798_v29 = vpop.eup %9797  ;;  %v7679_v33 = vadd.f32 -1.0, %v9796_v56  ;;  %v12498_v54 = vsel %vm2759_vm12, %v12299_v63, %v7673_v39  ;;  %9811 = vpow2.f32 %v3023_v6  ;;  %v2898_v56 = vmin.f32 %v12481_v26, 0.0 }
 0x2f4   : > { %v12477_v17 = vsel %vm2766_vm9, %v12319_v48, %v7680_v55  ;;  %v7686_v9 = vadd.f32 -1.0, %v9798_v29  ;;  %v9494_v48 = vld [vmem:[%s15250_s3 + $0xa0] ss:$8 sps:$4 sm:$0xff]   ;;  %v2892_v39 = vmin.f32 %v12472_v7, 0.0  ;;  %v12524_v55 = vpop.permute.xlu1 %1850  ;;  %vm2783_vm15 = vcmp.gt.f32.partialorder %v12396_v19, 0.0 }
 0x2f5   : > { %v9800_v35 = vpop.eup %9799  ;;  %2707 = vmatmul.mubr.bf16.gmra.mrb[16].mxu0 %v10076_v43  ;;  %3984 = vmatpush1.bf16.msra.mxu1 %v9491_v41  ;;  %v12503_v20 = vsel %vm2765_vm13, %v12323_v15, %v7679_v33  ;;  %vm2771_vm13 = vcmp.gt.f32.partialorder %v12360_v36, 0.0  ;;  %v12516_v41 = vpop.permute.xlu0 %1845  ;;  %v10078_v29 = vld [vmem:[%s15248_s1 + $0xa0] ss:$16 sps:$4 sm:$0xff]   ;;  %v2891_v43 = vmin.f32 %v12485_v14, 0.0  ;;  %vm2789_vm11 = vcmp.gt.f32.partialorder %v12412_v24, 0.0 }
 0x2f6   : > { %v9802_v57 = vpop.eup %9801  ;;  %3985 = vmatprep.subr.bf16.mxu1 %v9496_v27  ;;  %7658 = vmatprep.mubr.msk.bf16.mxu0 %vm2025_vm14, %v10077_v13  ;;  %v7692_v49 = vadd.f32 -1.0, %v9800_v35  ;;  %v12522_v27 = vadd.f32 %v12057_v37, %v12444_v16  ;;  %v9497_v33 = vld [vmem:[%s15250_s3 + $0xb0] ss:$8 sps:$4 sm:$0xff]   ;;  %v12535_v6 = vsel %vm2772_vm6, %v12331_v10, %v7686_v9  ;;  %vm2784_vm6 = vcmp.gt.f32.partialorder %v12385_v60, 0.0 }
 0x2f7   : > { %v9804_v15 = vpop.eup %9803  ;;  %v7685_v61 = vadd.f32 -1.0, %v9802_v57  ;;  %v10079_v57 = vld [vmem:[%s15248_s1 + $0xc4] ss:$16 sps:$4 sm:$0xff]   ;;  %v3037_v10 = vmul.f32 1.442695, %v2892_v39  ;;  %v12567_v13 = vadd.f32 %v12072_v58, %v12516_v41  ;;  %vm2796_vm9 = vcmp.gt.f32.partialorder %v12472_v7, 0.0 }
 0x2f8   : > { %2604 = vmatmul.mubr.bf16.gmra.mrb[84].mxu1 %v10078_v29  ;;  %v12540_v37 = vsel %vm2778_vm7, %v12346_v4, %v7692_v49  ;;  %v7691_v35 = vadd.f32 -1.0, %v9804_v15  ;;  %v3049_v9 = vmul.f32 1.442695, %v2898_v56  ;;  %v9806_v29 = vpop.eup %9805  ;;  %v9502_v4 = vld [vmem:[%s15250_s3 + $0xc4] ss:$8 sps:$4 sm:$0xff]   ;;  %v2897_v15 = vmin.f32 %v12522_v27, 0.0 }
 0x2f9   : > { %3986 = vmatpush1.bf16.msra.mxu1 %v9494_v48  ;;  %2613 = vmatprep.mubr.bf16.mxu1 %v10079_v57  ;;  %v12555_v48 = vsel %vm2771_vm13, %v12360_v36, %v7685_v61  ;;  %v3035_v39 = vmul.f32 1.442695, %v2891_v43  ;;  %v9808_v56 = vpop.eup %9807  ;;  %v7698_v57 = vadd.f32 -1.0, %v9806_v29  ;;  %9813 = vpow2.f32 %v3037_v10  ;;  %v10080_v43 = vld [vmem:[%s15248_s1 + $0xa8] ss:$16 sps:$4 sm:$0xff]  }
 0x2fa   : > { %3987 = vmatprep.subr.bf16.mxu1 %v9499_v59  ;;  %v12560_v49 = vsel %vm2777_vm8, %v12364_v46, %v7691_v35  ;;  %v9810_v36 = vpop.eup %9809  ;;  %v7704_v61 = vadd.f32 -1.0, %v9808_v56  ;;  %9815 = vpow2.f32 %v3049_v9  ;;  %v3047_v63 = vmul.f32 1.442695, %v2897_v15  ;;  %v12573_v35 = vpop.permute.xlu0 %1855  ;;  %v9500_v58 = vld [vmem:[%s15250_s3 + $0xc0] ss:$8 sps:$4 sm:$0xff]  }
 0x2fb   : > { %v12571_v46 = vadd.f32 %v12077_v21, %v12524_v55  ;;  %v12585_v10 = vsel %vm2784_vm6, %v12385_v60, %v7698_v57  ;;  %9817 = vpow2.f32 %v3035_v39  ;;  %v12587_v21 = vpop.permute.xlu1 %1860  ;;  %v10081_v9 = vld [vmem:[%s15248_s1 + $0xcc] ss:$16 sps:$4 sm:$0xff]   ;;  %v7697_v15 = vadd.f32 -1.0, %v9810_v36 }
 0x2fc   : > { %v12597_v29 = vsel %vm2790_vm10, %v12392_v47, %v7704_v61  ;;  %9819 = vpow2.f32 %v3047_v63  ;;  %v2904_v60 = vmin.f32 %v12567_v13, 0.0  ;;  %v12606_v57 = vadd.f32 %v12070_v62, %v12516_v41  ;;  %v10082_v47 = vld [vmem:[%s15248_s1 + $0xc0] ss:$16 sps:$4 sm:$0xff]  }
 0x2fd   : > { %2717 = vmatmul.mubr.bf16.gmra.mrb[20].mxu0 %v10080_v43  ;;  %3988 = vmatpush1.bf16.msra.mxu1 %v9497_v33  ;;  %v9505_v33 = vld [vmem:[%s15250_s3 + $0xd4] ss:$8 sps:$4 sm:$0xff]   ;;  %v9812_v39 = vpop.eup %9811  ;;  %v2910_v56 = vmin.f32 %v12571_v46, 0.0  ;;  %v12613_v61 = vadd.f32 %v12075_v34, %v12524_v55  ;;  %v12617_v43 = vadd.f32 %v12096_v38, %v12573_v35  ;;  %v9503_v62 = vld [vmem:[%s15250_s3 + $0xd0] ss:$8 sps:$4 sm:$0xff]   ;;  %vm2802_vm12 = vcmp.gt.f32.partialorder %v12481_v26, 0.0 }
 0x2fe   : > { %3989 = vmatprep.subr.bf16.mxu1 %v9502_v4  ;;  %7659 = vmatprep.mubr.msk.bf16.mxu0 %vm2025_vm14, %v10081_v9  ;;  %v7703_v63 = vadd.f32 -1.0, %v9812_v39  ;;  %v3061_v36 = vmul.f32 1.442695, %v2904_v60  ;;  %v10083_v9 = vld [vmem:[%s15248_s1 + $0xe4] ss:$16 sps:$4 sm:$0xff]   ;;  %v2903_v34 = vmin.f32 %v12606_v57, 0.0  ;;  %v12629_v39 = vadd.f32 %v12100_v1, %v12587_v21 }
 0x2ff   : > { %v3073_v60 = vmul.f32 1.442695, %v2910_v56  ;;  %v9508_v38 = vld [vmem:[%s15250_s3 + $0xe4] ss:$8 sps:$4 sm:$0xff]   ;;  %v2909_v56 = vmin.f32 %v12613_v61, 0.0  ;;  %v2916_v59 = vmin.f32 %v12617_v43, 0.0  ;;  %v12672_v0 = vpop.permute.xlu1 %1870 }
 0x300   : > { %2614 = vmatmul.mubr.bf16.gmra.mrb[88].mxu1 %v10082_v47  ;;  %v12640_v47 = vsel %vm2789_vm11, %v12412_v24, %v7703_v63  ;;  %9821 = vpow2.f32 %v3061_v36  ;;  %v10084_v24 = vld [vmem:[%s15248_s1 + $0xc8] ss:$16 sps:$4 sm:$0xff]   ;;  %v9511_v36 = vld [vmem:[%s15250_s3 + $0xf4] ss:$8 sps:$4 sm:$0xff]   ;;  %vm2795_vm7 = vcmp.gt.f32.partialorder %v12485_v14, 0.0  ;;  %vm2808_vm13 = vcmp.gt.f32.partialorder %v12567_v13, 0.0 }
 0x301   : > { %3990 = vmatpush1.bf16.msra.mxu1 %v9500_v58  ;;  %2623 = vmatprep.mubr.bf16.mxu1 %v10083_v9  ;;  %v12637_v58 = vsel %vm2783_vm15, %v12396_v19, %v7697_v15  ;;  %9823 = vpow2.f32 %v3073_v60  ;;  %v12645_v9 = vpop.permute.xlu0 %1865  ;;  %v3071_v4 = vmul.f32 1.442695, %v2909_v56  ;;  %v2922_v19 = vmin.f32 %v12629_v39, 0.0  ;;  %v9506_v63 = vld [vmem:[%s15250_s3 + $0xe0] ss:$8 sps:$4 sm:$0xff]  }
 0x302   : > { %3991 = vmatprep.subr.bf16.mxu1 %v9505_v33  ;;  %v3059_v33 = vmul.f32 1.442695, %v2903_v34  ;;  %v12662_v60 = vadd.f32 %v12094_v18, %v12573_v35  ;;  %v12666_v34 = vadd.f32 %v12098_v45, %v12587_v21  ;;  %v10085_v56 = vld [vmem:[%s15248_s1 + $0xec] ss:$16 sps:$4 sm:$0xff]   ;;  %v3085_v1 = vmul.f32 1.442695, %v2916_v59 }
 0x303   : > { %v9814_v15 = vpop.eup %9813  ;;  %vm2814_vm8 = vcmp.gt.f32.partialorder %v12571_v46, 0.0  ;;  %vm2807_vm6 = vcmp.gt.f32.partialorder %v12606_v57, 0.0  ;;  %vm2813_vm10 = vcmp.gt.f32.partialorder %v12613_v61, 0.0  ;;  %vm2820_vm15 = vcmp.gt.f32.partialorder %v12617_v43, 0.0 }
 0x304   : > { %9825 = vpow2.f32 %v3059_v33  ;;  %v3097_v33 = vmul.f32 1.442695, %v2922_v19  ;;  %v2915_v45 = vmin.f32 %v12662_v60, 0.0  ;;  %v2921_v19 = vmin.f32 %v12666_v34, 0.0 }
 0x305   : > { %2727 = vmatmul.mubr.bf16.gmra.mrb[24].mxu0 %v10084_v24  ;;  %3992 = vmatpush1.bf16.msra.mxu1 %v9503_v62  ;;  %v9816_v62 = vpop.eup %9815  ;;  %v7710_v24 = vadd.f32 -1.0, %v9814_v15  ;;  %9827 = vpow2.f32 %v3071_v4  ;;  %v10086_v15 = vld [vmem:[%s15248_s1 + $0xe0] ss:$16 sps:$4 sm:$0xff]   ;;  %vm2826_vm11 = vcmp.gt.f32.partialorder %v12629_v39, 0.0 }
 0x306   : > { %3993 = vmatprep.subr.bf16.mxu1 %v9508_v38  ;;  %7660 = vmatprep.mubr.msk.bf16.mxu0 %vm2025_vm14, %v10085_v56  ;;  %v9818_v53 = vpop.eup %9817  ;;  %v7716_v18 = vadd.f32 -1.0, %v9816_v62  ;;  %v12678_v38 = vadd.f32 %v12118_v5, %v12645_v9  ;;  %9829 = vpow2.f32 %v3085_v1  ;;  %v15755_v5 = vpack.c.bf16 %v12442_v28, %v12424_v22  ;;  %v9509_v62 = vld [vmem:[%s15250_s3 + $0xf0] ss:$8 sps:$4 sm:$0xff]   ;;  %v9514_v1 = vld [vmem:[%s15250_s3 + $0x104] ss:$8 sps:$4 sm:$0xff]  }
 0x307   : > { %v9820_v3 = vpop.eup %9819  ;;  %v12686_v59 = vsel %vm2796_vm9, %v12472_v7, %v7710_v24  ;;  %v7709_v4 = vadd.f32 -1.0, %v9818_v53  ;;  %9831 = vpow2.f32 %v3097_v33  ;;  %v3083_v53 = vmul.f32 1.442695, %v2915_v45  ;;  %v10087_v45 = vld [vmem:[%s15248_s1 + $0xe8] ss:$16 sps:$4 sm:$0xff]  }
 0x308   : > { %2624 = vmatmul.mubr.bf16.gmra.mrb[92].mxu1 %v10086_v15  ;;  %v12698_v56 = vsel %vm2802_vm12, %v12481_v26, %v7716_v18  ;;  %v7715_v7 = vadd.f32 -1.0, %v9820_v3  ;;  %vm2801_vm14 = vcmp.gt.f32.partialorder %v12522_v27, 0.0  ;;  %v3095_v28 = vmul.f32 1.442695, %v2921_v19 }
 0x309   : > { %3994 = vmatpush1.bf16.msra.mxu1 %v9506_v63  ;;  %3997 = vmatprep.mubr.bf16.mxu1 %v15755_v5  ;;  %v3348_v22 = vpack.c.bf16 %v12698_v56, %v12686_v59  ;;  %v12708_v63 = vadd.f32 %v12122_v8, %v12672_v0  ;;  %v12713_v3 = vsel %vm2795_vm7, %v12485_v14, %v7709_v4  ;;  %9833 = vpow2.f32 %v3083_v53  ;;  %v9512_v14 = vld [vmem:[%s15250_s3 + $0x100] ss:$8 sps:$4 sm:$0xff]   ;;  %v9517_v5 = vld [vmem:[%s15250_s3 + $0x114] ss:$8 sps:$4 sm:$0xff]  }
 0x30a   : > { %3995 = vmatprep.subr.bf16.mxu1 %v9511_v36  ;;  %v12716_v26 = vsel %vm2801_vm14, %v12522_v27, %v7715_v7  ;;  %v2928_v36 = vmin.f32 %v12678_v38, 0.0  ;;  %v9822_v24 = vpop.eup %9821  ;;  %9835 = vpow2.f32 %v3095_v28  ;;  %v12730_v4 = vadd.f32 %v12110_v31, %v12645_v9 }
 0x30b   : > { %v3347_v33 = vpack.c.bf16 %v12716_v26, %v12713_v3  ;;  %v2934_v18 = vmin.f32 %v12708_v63, 0.0  ;;  %v9824_v8 = vpop.eup %9823  ;;  %v7722_v27 = vadd.f32 -1.0, %v9822_v24  ;;  %v12734_v19 = vadd.f32 %v12120_v42, %v12672_v0  ;;  %v9544_v3 = vld [vmem:[%s15250_s3 + $0x1a4] ss:$8 sps:$4 sm:$0xff]  }
 0x30c   : > { %v3109_v15 = vmul.f32 1.442695, %v2928_v36  ;;  %v15756_v42 = vpack.c.bf16 %v12457_v52, %v12430_v25  ;;  %v2927_v24 = vmin.f32 %v12730_v4, 0.0  ;;  %vm2819_vm9 = vcmp.gt.f32.partialorder %v12662_v60, 0.0 }
 0x30d   : > { %2737 = vmatmul.mubr.bf16.gmra.mrb[28].mxu0 %v10087_v45  ;;  %3996 = vmatpush1.bf16.msra.mxu1 %v9509_v62  ;;  %v7728_v62 = vadd.f32 -1.0, %v9824_v8  ;;  %v3121_v7 = vmul.f32 1.442695, %v2934_v18  ;;  %v12742_v28 = vsel %vm2808_vm13, %v12567_v13, %v7722_v27  ;;  %v15757_v18 = vpack.c.bf16 %v12477_v17, %v12468_v12  ;;  %v9515_v13 = vld [vmem:[%s15250_s3 + $0x110] ss:$8 sps:$4 sm:$0xff]  }
 0x30e   : > { %4078 = vmatprep.subr.bf16.mxu1 %v9514_v1  ;;  %v9826_v53 = vpop.eup %9825  ;;  %9837 = vpow2.f32 %v3109_v15  ;;  %v9520_v45 = vld [vmem:[%s15250_s3 + $0x124] ss:$8 sps:$4 sm:$0xff]   ;;  %v3107_v12 = vmul.f32 1.442695, %v2927_v24  ;;  %vm2825_vm12 = vcmp.gt.f32.partialorder %v12666_v34, 0.0  ;;  %vm2832_vm7 = vcmp.gt.f32.partialorder %v12678_v38, 0.0 }
 0x30f   : > { %v9828_v31 = vpop.eup %9827  ;;  %v12748_v1 = vsel %vm2814_vm8, %v12571_v46, %v7728_v62  ;;  %v7721_v36 = vadd.f32 -1.0, %v9826_v53  ;;  %9839 = vpow2.f32 %v3121_v7  ;;  %v2933_v46 = vmin.f32 %v12734_v19, 0.0 }
 0x310   : > { %3998 = vmatmul.mubr.bf16.vlgmr.msra.gmra.mrb[96].mxu1 %v15756_v42  ;;  %v3354_v25 = vpack.c.bf16 %v12748_v1, %v12742_v28  ;;  %v7727_v52 = vadd.f32 -1.0, %v9828_v31  ;;  %v9830_v8 = vpop.eup %9829  ;;  %9841 = vpow2.f32 %v3107_v12  ;;  %v9518_v31 = vld [vmem:[%s15250_s3 + $0x120] ss:$8 sps:$4 sm:$0xff]   ;;  %vm2838_vm14 = vcmp.gt.f32.partialorder %v12708_v63, 0.0 }
 0x311   : > { %4007 = vmatprep.mubr.bf16.mxu1 %v15757_v18  ;;  %4079 = vmatpush1.bf16.msra.mxu1 %v9512_v14  ;;  %v9832_v17 = vpop.eup %9831  ;;  %v12766_v14 = vsel %vm2807_vm6, %v12606_v57, %v7721_v36  ;;  %v7734_v15 = vadd.f32 -1.0, %v9830_v8  ;;  %v3119_v62 = vmul.f32 1.442695, %v2933_v46  ;;  %vm2831_vm13 = vcmp.gt.f32.partialorder %v12730_v4, 0.0 }
 0x312   : > { %4080 = vmatprep.subr.bf16.mxu1 %v9517_v5  ;;  %v12769_v27 = vsel %vm2813_vm10, %v12613_v61, %v7727_v52  ;;  %v7740_v7 = vadd.f32 -1.0, %v9832_v17  ;;  %v9523_v61 = vld [vmem:[%s15250_s3 + $0x134] ss:$8 sps:$4 sm:$0xff]   ;;  %v15758_v52 = vpack.c.bf16 %v12503_v20, %v12498_v54  ;;  %vm2837_vm8 = vcmp.gt.f32.partialorder %v12734_v19, 0.0 }
 0x313   : > { %v3353_v5 = vpack.c.bf16 %v12769_v27, %v12766_v14  ;;  %v9834_v53 = vpop.eup %9833  ;;  %9843 = vpow2.f32 %v3119_v62  ;;  %v12782_v42 = vsel %vm2820_vm15, %v12617_v43, %v7734_v15  ;;  %v15759_v43 = vpack.c.bf16 %v12540_v37, %v12535_v6  ;;  %v9529_v62 = vld [vmem:[%s15250_s3 + $0x154] ss:$8 sps:$4 sm:$0xff]   ;;  %v9550_v14 = vld [vmem:[%s15250_s3 + $0x1c4] ss:$8 sps:$4 sm:$0xff]  }
 0x314   : > { %v9836_v57 = vpop.eup %9835  ;;  %v12785_v36 = vsel %vm2826_vm11, %v12629_v39, %v7740_v7  ;;  %v7733_v24 = vadd.f32 -1.0, %v9834_v53  ;;  %v9521_v39 = vld [vmem:[%s15250_s3 + $0x130] ss:$8 sps:$4 sm:$0xff]  }
 0x315   : > { %4081 = vmatpush1.bf16.msra.mxu1 %v9515_v13  ;;  %v3360_v18 = vpack.c.bf16 %v12785_v36, %v12782_v42  ;;  %v7739_v13 = vadd.f32 -1.0, %v9836_v57  ;;  %v15760_v57 = vpack.c.bf16 %v12560_v49, %v12555_v48  ;;  %v9532_v48 = vld [vmem:[%s15250_s3 + $0x164] ss:$8 sps:$4 sm:$0xff]  }
 0x316   : > { %4082 = vmatprep.subr.bf16.mxu1 %v9520_v45  ;;  %v12801_v8 = vsel %vm2819_vm9, %v12662_v60, %v7733_v24  ;;  %v9526_v45 = vld [vmem:[%s15250_s3 + $0x144] ss:$8 sps:$4 sm:$0xff]   ;;  %v9524_v60 = vld [vmem:[%s15250_s3 + $0x140] ss:$8 sps:$4 sm:$0xff]  }
 0x317   : > { %v12804_v54 = vsel %vm2825_vm12, %v12666_v34, %v7739_v13  ;;  %v9530_v24 = vld [vmem:[%s15250_s3 + $0x160] ss:$8 sps:$4 sm:$0xff]   ;;  %v9535_v13 = vld [vmem:[%s15250_s3 + $0x174] ss:$8 sps:$4 sm:$0xff]  }
 0x318   : > { %4008 = vmatmul.mubr.bf16.gmra.mrb[100].mxu1 %v15758_v52  ;;  %v9838_v46 = vpop.eup %9837  ;;  %v3359_v6 = vpack.c.bf16 %v12804_v54, %v12801_v8 }
 0x319   : > { %4017 = vmatprep.mubr.bf16.mxu1 %v15759_v43  ;;  %4083 = vmatpush1.bf16.msra.mxu1 %v9518_v31  ;;  %v9840_v20 = vpop.eup %9839  ;;  %v7746_v37 = vadd.f32 -1.0, %v9838_v46  ;;  %v9538_v46 = vld [vmem:[%s15250_s3 + $0x184] ss:$8 sps:$4 sm:$0xff]  }
 0x31a   : > { %4084 = vmatprep.subr.bf16.mxu1 %v9523_v61  ;;  %v7752_v12 = vadd.f32 -1.0, %v9840_v20  ;;  %v9842_v15 = vpop.eup %9841  ;;  %v9527_v61 = vld [vmem:[%s15250_s3 + $0x150] ss:$8 sps:$4 sm:$0xff]   ;;  %v9536_v20 = vld [vmem:[%s15250_s3 + $0x180] ss:$8 sps:$4 sm:$0xff]  }
 0x31b   : > { %v12817_v34 = vsel %vm2832_vm7, %v12678_v38, %v7746_v37  ;;  %v7745_v31 = vadd.f32 -1.0, %v9842_v15 }
 0x31c   : > { %v12820_v17 = vsel %vm2838_vm14, %v12708_v63, %v7752_v12  ;;  %v15761_v63 = vpack.c.bf16 %v12597_v29, %v12585_v10  ;;  %v9541_v12 = vld [vmem:[%s15250_s3 + $0x194] ss:$8 sps:$4 sm:$0xff]  }
 0x31d   : > { %4085 = vmatpush1.bf16.msra.mxu1 %v9521_v39  ;;  %v3366_v7 = vpack.c.bf16 %v12820_v17, %v12817_v34  ;;  %v9844_v53 = vpop.eup %9843  ;;  %v12842_v49 = vsel %vm2831_vm13, %v12730_v4, %v7745_v31  ;;  %v15762_v4 = vpack.c.bf16 %v12640_v47, %v12637_v58 }
 0x31e   : > { %4086 = vmatprep.subr.bf16.mxu1 %v9526_v45  ;;  %v7751_v38 = vadd.f32 -1.0, %v9844_v53 }
 0x320   : > { %4018 = vmatmul.mubr.bf16.gmra.mrb[104].mxu1 %v15760_v57  ;;  %v12845_v10 = vsel %vm2837_vm8, %v12734_v19, %v7751_v38  ;;  %v9533_v19 = vld [vmem:[%s15250_s3 + $0x170] ss:$8 sps:$4 sm:$0xff]  }
 0x321   : > { %4027 = vmatprep.mubr.bf16.mxu1 %v15761_v63  ;;  %4087 = vmatpush1.bf16.msra.mxu1 %v9524_v60  ;;  %v3365_v29 = vpack.c.bf16 %v12845_v10, %v12842_v49  ;;  %v9539_v57 = vld [vmem:[%s15250_s3 + $0x190] ss:$8 sps:$4 sm:$0xff]  }
 0x322   : > { %4088 = vmatprep.subr.bf16.mxu1 %v9529_v62 }
 0x325   : > { %4089 = vmatpush1.bf16.msra.mxu1 %v9527_v61 }
 0x326   : > { %4090 = vmatprep.subr.bf16.mxu1 %v9532_v48 }
 0x328   : > { %4028 = vmatmul.mubr.bf16.gmra.mrb[108].mxu1 %v15762_v4 }
 0x329   : > { %4037 = vmatprep.mubr.bf16.mxu1 %v3348_v22  ;;  %4091 = vmatpush1.bf16.msra.mxu1 %v9530_v24  ;;  %v9542_v24 = vld [vmem:[%s15250_s3 + $0x1a0] ss:$8 sps:$4 sm:$0xff]  }
 0x32a   : > { %v2442_v52 = vpop.f32.mrb[32].mxu1  ;;  %4092 = vmatprep.subr.bf16.mxu1 %v9535_v13 }
 0x32b   : > { %v12868_v43 = vadd.f32 %v2442_v52, %v12248_v30  ;;  %v2444_v58 = vpop.f32.mrb[33].mxu1 }
 0x32c   : > { %v12871_v47 = vadd.f32 %v2444_v58, %v12248_v30  ;;  %v2446_v59 = vpop.f32.mrb[34].mxu1 }
 0x32d   : > { %v2845_v56 = vmin.f32 %v12868_v43, 0.0  ;;  %v12875_v22 = vadd.f32 %v2446_v59, %v12268_v50  ;;  %v2448_v39 = vpop.f32.mrb[35].mxu1  ;;  %4093 = vmatpush1.bf16.msra.mxu1 %v9533_v19  ;;  %v9547_v19 = vld [vmem:[%s15250_s3 + $0x1b4] ss:$8 sps:$4 sm:$0xff]   ;;  %vm2749_vm6 = vcmp.gt.f32.partialorder %v12868_v43, 0.0 }
 0x32e   : > { %v2846_v45 = vmin.f32 %v12871_v47, 0.0  ;;  %v12882_v37 = vadd.f32 %v2448_v39, %v12268_v50  ;;  %4094 = vmatprep.subr.bf16.mxu1 %v9538_v46  ;;  %v9545_v39 = vld [vmem:[%s15250_s3 + $0x1b0] ss:$8 sps:$4 sm:$0xff]   ;;  %vm2750_vm10 = vcmp.gt.f32.partialorder %v12871_v47, 0.0 }
 0x32f   : > { %v2943_v60 = vmul.f32 1.442695, %v2845_v56  ;;  %v2851_v15 = vmin.f32 %v12875_v22, 0.0  ;;  %vm2755_vm15 = vcmp.gt.f32.partialorder %v12875_v22, 0.0 }
 0x330   : > { %v2945_v62 = vmul.f32 1.442695, %v2846_v45  ;;  %v2852_v53 = vmin.f32 %v12882_v37, 0.0  ;;  %4038 = vmatmul.mubr.bf16.gmra.mrb[112].mxu1 %v3347_v33  ;;  %vm2756_vm11 = vcmp.gt.f32.partialorder %v12882_v37, 0.0 }
 0x331   : > { %9845 = vpow2.f32 %v2943_v60  ;;  %v2955_v31 = vmul.f32 1.442695, %v2851_v15  ;;  %4047 = vmatprep.mubr.bf16.mxu1 %v3354_v25  ;;  %4095 = vmatpush1.bf16.msra.mxu1 %v9536_v20 }
 0x332   : > { %9847 = vpow2.f32 %v2945_v62  ;;  %v2957_v38 = vmul.f32 1.442695, %v2852_v53  ;;  %v2452_v63 = vpop.f32.mrb[36].mxu1  ;;  %4096 = vmatprep.subr.bf16.mxu1 %v9541_v12 }
 0x333   : > { %9849 = vpow2.f32 %v2955_v31  ;;  %v12902_v26 = vadd.f32 %v2452_v63, %v12270_v23  ;;  %v2454_v33 = vpop.f32.mrb[37].mxu1 }
 0x334   : > { %9851 = vpow2.f32 %v2957_v38  ;;  %v12905_v28 = vadd.f32 %v2454_v33, %v12270_v23  ;;  %v2456_v1 = vpop.f32.mrb[38].mxu1  ;;  %v9548_v38 = vld [vmem:[%s15250_s3 + $0x1c0] ss:$8 sps:$4 sm:$0xff]  }
 0x335   : > { %v2857_v25 = vmin.f32 %v12902_v26, 0.0  ;;  %v12909_v61 = vadd.f32 %v2456_v1, %v12305_v44  ;;  %v2458_v48 = vpop.f32.mrb[39].mxu1  ;;  %4097 = vmatpush1.bf16.msra.mxu1 %v9539_v57  ;;  %v9553_v1 = vld [vmem:[%s15250_s3 + $0x1d4] ss:$8 sps:$4 sm:$0xff]   ;;  %vm2761_vm9 = vcmp.gt.f32.partialorder %v12902_v26, 0.0 }
 0x336   : > { %v2858_v13 = vmin.f32 %v12905_v28, 0.0  ;;  %v12916_v4 = vadd.f32 %v2458_v48, %v12305_v44  ;;  %4098 = vmatprep.subr.bf16.mxu1 %v9544_v3  ;;  %vm2762_vm12 = vcmp.gt.f32.partialorder %v12905_v28, 0.0 }
 0x337   : > { %v2967_v52 = vmul.f32 1.442695, %v2857_v25  ;;  %v2863_v46 = vmin.f32 %v12909_v61, 0.0  ;;  %vm2767_vm7 = vcmp.gt.f32.partialorder %v12909_v61, 0.0 }
 0x338   : > { %v2969_v58 = vmul.f32 1.442695, %v2858_v13  ;;  %v2864_v59 = vmin.f32 %v12916_v4, 0.0  ;;  %4048 = vmatmul.mubr.bf16.gmra.mrb[116].mxu1 %v3353_v5  ;;  %vm2768_vm14 = vcmp.gt.f32.partialorder %v12916_v4, 0.0 }
 0x339   : > { %9853 = vpow2.f32 %v2967_v52  ;;  %v2979_v56 = vmul.f32 1.442695, %v2863_v46  ;;  %4057 = vmatprep.mubr.bf16.mxu1 %v3360_v18  ;;  %4099 = vmatpush1.bf16.msra.mxu1 %v9542_v24 }
 0x33a   : > { %9855 = vpow2.f32 %v2969_v58  ;;  %v2981_v20 = vmul.f32 1.442695, %v2864_v59  ;;  %v2462_v45 = vpop.f32.mrb[40].mxu1  ;;  %4100 = vmatprep.subr.bf16.mxu1 %v9547_v19 }
 0x33b   : > { %v9846_v27 = vpop.eup %9845  ;;  %9857 = vpow2.f32 %v2979_v56  ;;  %v12936_v5 = vadd.f32 %v2462_v45, %v12303_v51  ;;  %v2464_v42 = vpop.f32.mrb[41].mxu1 }
 0x33c   : > { %v9848_v36 = vpop.eup %9847  ;;  %v7663_v18 = vadd.f32 -1.0, %v9846_v27  ;;  %9859 = vpow2.f32 %v2981_v20  ;;  %v12940_v12 = vadd.f32 %v2464_v42, %v12303_v51  ;;  %v2466_v60 = vpop.f32.mrb[42].mxu1 }
 0x33d   : > { %v9850_v15 = vpop.eup %9849  ;;  %v7664_v62 = vadd.f32 -1.0, %v9848_v36  ;;  %v2869_v53 = vmin.f32 %v12936_v5, 0.0  ;;  %v12945_v31 = vadd.f32 %v2466_v60, %v12334_v2  ;;  %v2468_v57 = vpop.f32.mrb[43].mxu1  ;;  %4101 = vmatpush1.bf16.msra.mxu1 %v9545_v39  ;;  %v9554_v60 = vld [vmem:[%s15250_s3 + $0x1e0] ss:$8 sps:$4 sm:$0xff]   ;;  %vm2773_vm8 = vcmp.gt.f32.partialorder %v12936_v5, 0.0 }
 0x33e   : > { %v9852_v63 = vpop.eup %9851  ;;  %v7669_v3 = vadd.f32 -1.0, %v9850_v15  ;;  %v2870_v33 = vmin.f32 %v12940_v12, 0.0  ;;  %4102 = vmatprep.subr.bf16.mxu1 %v9550_v14  ;;  %v12959_v25 = vsel %vm2749_vm6, %v12868_v43, %v7663_v18  ;;  %v12966_v46 = vadd.f32 %v2468_v57, %v12334_v2 }
 0x33f   : > { %v7670_v48 = vadd.f32 -1.0, %v9852_v63  ;;  %v2991_v24 = vmul.f32 1.442695, %v2869_v53  ;;  %v2875_v13 = vmin.f32 %v12945_v31, 0.0  ;;  %v3230_v43 = vsel %vm2750_vm10, %v12871_v47, %v7664_v62  ;;  %v9556_v47 = vld [vmem:[%s15250_s3 + $0x1e4] ss:$8 sps:$4 sm:$0xff]  }
 0x340   : > { %v12963_v19 = vsel %vm2755_vm15, %v12875_v22, %v7669_v3  ;;  %v2993_v52 = vmul.f32 1.442695, %v2870_v33  ;;  %4058 = vmatmul.mubr.bf16.gmra.mrb[120].mxu1 %v3359_v6  ;;  %v9551_v22 = vld [vmem:[%s15250_s3 + $0x1d0] ss:$8 sps:$4 sm:$0xff]   ;;  %v2876_v54 = vmin.f32 %v12966_v46, 0.0  ;;  %vm2779_vm13 = vcmp.gt.f32.partialorder %v12945_v31, 0.0 }
 0x341   : > { %v3325_v58 = vpack.c.bf16 %v12963_v19, %v12959_v25  ;;  %9861 = vpow2.f32 %v2991_v24  ;;  %v3003_v59 = vmul.f32 1.442695, %v2875_v13  ;;  %4067 = vmatprep.mubr.bf16.mxu1 %v3366_v7  ;;  %4103 = vmatpush1.bf16.msra.mxu1 %v9548_v38  ;;  %v3236_v8 = vsel %vm2756_vm11, %v12882_v37, %v7670_v48  ;;  %v9559_v38 = vld [vmem:[%s15250_s3 + $0x1f4] ss:$8 sps:$4 sm:$0xff]  }
 0x342   : > { %9863 = vpow2.f32 %v2993_v52  ;;  %v2472_v6 = vpop.f32.mrb[44].mxu1  ;;  %4104 = vmatprep.subr.bf16.mxu1 %v9553_v1  ;;  %v3326_v34 = vpack.c.bf16 %v3236_v8, %v3230_v43  ;;  %v3005_v37 = vmul.f32 1.442695, %v2876_v54  ;;  %v9557_v52 = vld [vmem:[%s15250_s3 + $0x1f0] ss:$8 sps:$4 sm:$0xff]   ;;  %vm2774_vm6 = vcmp.gt.f32.partialorder %v12940_v12, 0.0 }
 0x343   : > { %v9854_v17 = vpop.eup %9853  ;;  %9865 = vpow2.f32 %v3003_v59  ;;  %v12990_v7 = vadd.f32 %v2472_v6, %v12349_v32  ;;  %v2474_v56 = vpop.f32.mrb[45].mxu1  ;;  %vm2780_vm10 = vcmp.gt.f32.partialorder %v12966_v46, 0.0 }
 0x344   : > { %v9856_v39 = vpop.eup %9855  ;;  %v12994_v20 = vadd.f32 %v2474_v56, %v12349_v32  ;;  %v2476_v45 = vpop.f32.mrb[46].mxu1  ;;  %v7675_v62 = vadd.f32 -1.0, %v9854_v17  ;;  %9867 = vpow2.f32 %v3005_v37 }
 0x345   : > { %v9858_v14 = vpop.eup %9857  ;;  %v7676_v27 = vadd.f32 -1.0, %v9856_v39  ;;  %v2881_v42 = vmin.f32 %v12990_v7, 0.0  ;;  %v12999_v36 = vadd.f32 %v2476_v45, %v12368_v11  ;;  %v2478_v18 = vpop.f32.mrb[47].mxu1  ;;  %4105 = vmatpush1.bf16.msra.mxu1 %v9551_v22  ;;  %v9562_v22 = vld [vmem:[%s15250_s3 + $0x204] ss:$8 sps:$4 sm:$0xff]   ;;  %vm2785_vm11 = vcmp.gt.f32.partialorder %v12990_v7, 0.0 }
 0x346   : > { %v9860_v15 = vpop.eup %9859  ;;  %v7681_v53 = vadd.f32 -1.0, %v9858_v14  ;;  %v2882_v57 = vmin.f32 %v12994_v20, 0.0  ;;  %4106 = vmatprep.subr.bf16.mxu1 %v9556_v47  ;;  %v13012_v48 = vadd.f32 %v2478_v18, %v12368_v11  ;;  %v9560_v14 = vld [vmem:[%s15250_s3 + $0x200] ss:$8 sps:$4 sm:$0xff]   ;;  %v9565_v18 = vld [vmem:[%s15250_s3 + $0x214] ss:$8 sps:$4 sm:$0xff]  }
 0x347   : > { %v7682_v63 = vadd.f32 -1.0, %v9860_v15  ;;  %v3015_v3 = vmul.f32 1.442695, %v2881_v42  ;;  %v2887_v33 = vmin.f32 %v12999_v36, 0.0  ;;  %v3242_v24 = vsel %vm2762_vm12, %v12905_v28, %v7676_v27 }
 0x348   : > { %v3017_v1 = vmul.f32 1.442695, %v2882_v57  ;;  %4068 = vmatmul.mubr.bf16.gmra.mrb[124].mxu1 %v3365_v29  ;;  %v13025_v59 = vsel %vm2767_vm7, %v12909_v61, %v7681_v53  ;;  %v2888_v49 = vmin.f32 %v13012_v48, 0.0  ;;  %v13031_v28 = vsel %vm2761_vm9, %v12902_v26, %v7675_v62 }
 0x349   : > { %9869 = vpow2.f32 %v3015_v3  ;;  %v3027_v13 = vmul.f32 1.442695, %v2887_v33  ;;  %4107 = vmatpush1.bf16.msra.mxu1 %v9554_v60  ;;  %4110 = vmatprep.mubr.bf16.mxu1 %v3326_v34  ;;  %v3248_v43 = vsel %vm2768_vm14, %v12916_v4, %v7682_v63  ;;  %v3331_v54 = vpack.c.bf16 %v13025_v59, %v13031_v28 }
 0x34a   : > { %9871 = vpow2.f32 %v3017_v1  ;;  %v2482_v10 = vpop.f32.mrb[48].mxu1  ;;  %4108 = vmatprep.subr.bf16.mxu1 %v9559_v38  ;;  %v3332_v29 = vpack.c.bf16 %v3248_v43, %v3242_v24  ;;  %v3029_v47 = vmul.f32 1.442695, %v2888_v49  ;;  %v9563_v24 = vld [vmem:[%s15250_s3 + $0x210] ss:$8 sps:$4 sm:$0xff]   ;;  %vm2791_vm15 = vcmp.gt.f32.partialorder %v12999_v36, 0.0 }
 0x34b   : > { %v9862_v8 = vpop.eup %9861  ;;  %9873 = vpow2.f32 %v3027_v13  ;;  %v13037_v61 = vadd.f32 %v2482_v10, %v12434_v40  ;;  %v2484_v4 = vpop.f32.mrb[49].mxu1  ;;  %vm2786_vm9 = vcmp.gt.f32.partialorder %v12994_v20, 0.0  ;;  %vm2792_vm12 = vcmp.gt.f32.partialorder %v13012_v48, 0.0 }
 0x34c   : > { %v9864_v6 = vpop.eup %9863  ;;  %v13042_v34 = vadd.f32 %v2484_v4, %v12434_v40  ;;  %v2486_v26 = vpop.f32.mrb[50].mxu1  ;;  %v7687_v56 = vadd.f32 -1.0, %v9862_v8  ;;  %9875 = vpow2.f32 %v3029_v47 }
 0x34d   : > { %v9866_v17 = vpop.eup %9865  ;;  %v2893_v39 = vmin.f32 %v13037_v61, 0.0  ;;  %v13046_v37 = vadd.f32 %v2486_v26, %v12444_v16  ;;  %v2488_v45 = vpop.f32.mrb[51].mxu1  ;;  %4109 = vmatpush1.bf16.msra.mxu1 %v9557_v52  ;;  %v7688_v60 = vadd.f32 -1.0, %v9864_v6  ;;  %vm2797_vm14 = vcmp.gt.f32.partialorder %v13037_v61, 0.0 }
 0x34e   : > { %v7693_v27 = vadd.f32 -1.0, %v9866_v17  ;;  %v2894_v42 = vmin.f32 %v13042_v34, 0.0  ;;  %4191 = vmatprep.subr.bf16.mxu1 %v9562_v22  ;;  %v13058_v53 = vadd.f32 %v2488_v45, %v12444_v16  ;;  %v9868_v57 = vpop.eup %9867  ;;  %v13069_v1 = vsel %vm2773_vm8, %v12936_v5, %v7687_v56  ;;  %v9568_v5 = vld [vmem:[%s15250_s3 + $0x224] ss:$8 sps:$4 sm:$0xff]   ;;  %v9571_v45 = vld [vmem:[%s15250_s3 + $0x234] ss:$8 sps:$4 sm:$0xff]  }
 0x34f   : > { %v3039_v15 = vmul.f32 1.442695, %v2893_v39  ;;  %v2899_v62 = vmin.f32 %v13046_v37, 0.0  ;;  %v7694_v3 = vadd.f32 -1.0, %v9868_v57  ;;  %v3254_v43 = vsel %vm2774_vm6, %v12940_v12, %v7688_v60  ;;  %v9566_v12 = vld [vmem:[%s15250_s3 + $0x220] ss:$8 sps:$4 sm:$0xff]  }
 0x350   : > { %v3041_v38 = vmul.f32 1.442695, %v2894_v42  ;;  %4111 = vmatmul.mubr.bf16.vlgmr.msra.gmra.mrb[96].mxu1 %v3325_v58  ;;  %v13066_v63 = vsel %vm2779_vm13, %v12945_v31, %v7693_v27  ;;  %v2900_v25 = vmin.f32 %v13058_v53, 0.0  ;;  %vm2803_vm7 = vcmp.gt.f32.partialorder %v13046_v37, 0.0 }
 0x351   : > { %9877 = vpow2.f32 %v3039_v15  ;;  %v3051_v33 = vmul.f32 1.442695, %v2899_v62  ;;  %4120 = vmatprep.mubr.bf16.mxu1 %v3332_v29  ;;  %4192 = vmatpush1.bf16.msra.mxu1 %v9560_v14  ;;  %v3337_v31 = vpack.c.bf16 %v13066_v63, %v13069_v1  ;;  %v3260_v49 = vsel %vm2780_vm10, %v12966_v46, %v7694_v3 }
 0x352   : > { %9879 = vpow2.f32 %v3041_v38  ;;  %v2492_v19 = vpop.f32.mrb[52].mxu1  ;;  %4193 = vmatprep.subr.bf16.mxu1 %v9565_v18  ;;  %v3053_v29 = vmul.f32 1.442695, %v2900_v25  ;;  %v3338_v4 = vpack.c.bf16 %v3260_v49, %v3254_v43  ;;  %vm2798_vm13 = vcmp.gt.f32.partialorder %v13042_v34, 0.0 }
 0x353   : > { %v9870_v58 = vpop.eup %9869  ;;  %9881 = vpow2.f32 %v3051_v33  ;;  %v13082_v13 = vadd.f32 %v2492_v19, %v12516_v41  ;;  %v2494_v52 = vpop.f32.mrb[53].mxu1  ;;  %v9569_v33 = vld [vmem:[%s15250_s3 + $0x230] ss:$8 sps:$4 sm:$0xff]   ;;  %vm2804_vm8 = vcmp.gt.f32.partialorder %v13058_v53, 0.0 }
 0x354   : > { %v9872_v10 = vpop.eup %9871  ;;  %v13089_v22 = vadd.f32 %v2494_v52, %v12516_v41  ;;  %v2496_v8 = vpop.f32.mrb[54].mxu1  ;;  %v7699_v47 = vadd.f32 -1.0, %v9870_v58  ;;  %9883 = vpow2.f32 %v3053_v29 }
 0x355   : > { %v9874_v6 = vpop.eup %9873  ;;  %v2905_v26 = vmin.f32 %v13082_v13, 0.0  ;;  %v13093_v17 = vadd.f32 %v2496_v8, %v12524_v55  ;;  %v2498_v56 = vpop.f32.mrb[55].mxu1  ;;  %4194 = vmatpush1.bf16.msra.mxu1 %v9563_v24  ;;  %v7700_v14 = vadd.f32 -1.0, %v9872_v10  ;;  %vm2809_vm10 = vcmp.gt.f32.partialorder %v13082_v13, 0.0 }
 0x356   : > { %v7705_v46 = vadd.f32 -1.0, %v9874_v6  ;;  %v2906_v39 = vmin.f32 %v13089_v22, 0.0  ;;  %4195 = vmatprep.subr.bf16.mxu1 %v9568_v5  ;;  %v13105_v18 = vadd.f32 %v2498_v56, %v12524_v55  ;;  %v9876_v60 = vpop.eup %9875  ;;  %v13116_v3 = vsel %vm2785_vm11, %v12990_v7, %v7699_v47  ;;  %v9574_v7 = vld [vmem:[%s15250_s3 + $0x244] ss:$8 sps:$4 sm:$0xff]   ;;  %v9577_v56 = vld [vmem:[%s15250_s3 + $0x254] ss:$8 sps:$4 sm:$0xff]  }
 0x357   : > { %v3063_v27 = vmul.f32 1.442695, %v2905_v26  ;;  %v2911_v42 = vmin.f32 %v13093_v17, 0.0  ;;  %v7706_v57 = vadd.f32 -1.0, %v9876_v60  ;;  %v3266_v19 = vsel %vm2786_vm9, %v12994_v20, %v7700_v14  ;;  %v9572_v20 = vld [vmem:[%s15250_s3 + $0x240] ss:$8 sps:$4 sm:$0xff]  }
 0x358   : > { %v3065_v15 = vmul.f32 1.442695, %v2906_v39  ;;  %4121 = vmatmul.mubr.bf16.gmra.mrb[100].mxu1 %v3331_v54  ;;  %v13113_v62 = vsel %vm2791_vm15, %v12999_v36, %v7705_v46  ;;  %v2912_v59 = vmin.f32 %v13105_v18, 0.0  ;;  %vm2815_vm6 = vcmp.gt.f32.partialorder %v13093_v17, 0.0 }
 0x359   : > { %9885 = vpow2.f32 %v3063_v27  ;;  %v3075_v38 = vmul.f32 1.442695, %v2911_v42  ;;  %4130 = vmatprep.mubr.bf16.mxu1 %v3338_v4  ;;  %4196 = vmatpush1.bf16.msra.mxu1 %v9566_v12  ;;  %v3343_v36 = vpack.c.bf16 %v13113_v62, %v13116_v3  ;;  %v3272_v5 = vsel %vm2792_vm12, %v13012_v48, %v7706_v57 }
 0x35a   : > { %9887 = vpow2.f32 %v3065_v15  ;;  %v2502_v28 = vpop.f32.mrb[56].mxu1  ;;  %4197 = vmatprep.subr.bf16.mxu1 %v9571_v45  ;;  %v3077_v52 = vmul.f32 1.442695, %v2912_v59  ;;  %v3344_v10 = vpack.c.bf16 %v3272_v5, %v3266_v19  ;;  %vm2810_vm15 = vcmp.gt.f32.partialorder %v13089_v22, 0.0 }
 0x35b   : > { %v9878_v54 = vpop.eup %9877  ;;  %9889 = vpow2.f32 %v3075_v38  ;;  %v13129_v24 = vadd.f32 %v2502_v28, %v12573_v35  ;;  %v2504_v25 = vpop.f32.mrb[57].mxu1  ;;  %v9575_v38 = vld [vmem:[%s15250_s3 + $0x250] ss:$8 sps:$4 sm:$0xff]   ;;  %vm2816_vm11 = vcmp.gt.f32.partialorder %v13105_v18, 0.0 }
 0x35c   : > { %v9880_v58 = vpop.eup %9879  ;;  %v13136_v43 = vadd.f32 %v2504_v25, %v12573_v35  ;;  %v2506_v49 = vpop.f32.mrb[58].mxu1  ;;  %v7711_v8 = vadd.f32 -1.0, %v9878_v54  ;;  %9891 = vpow2.f32 %v3077_v52 }
 0x35d   : > { %v9882_v29 = vpop.eup %9881  ;;  %v2917_v4 = vmin.f32 %v13129_v24, 0.0  ;;  %v13140_v6 = vadd.f32 %v2506_v49, %v12587_v21  ;;  %v2508_v47 = vpop.f32.mrb[59].mxu1  ;;  %4198 = vmatpush1.bf16.msra.mxu1 %v9569_v33  ;;  %v7712_v12 = vadd.f32 -1.0, %v9880_v58  ;;  %vm2821_vm9 = vcmp.gt.f32.partialorder %v13129_v24, 0.0 }
 0x35e   : > { %v7717_v48 = vadd.f32 -1.0, %v9882_v29  ;;  %v2918_v26 = vmin.f32 %v13136_v43, 0.0  ;;  %4199 = vmatprep.subr.bf16.mxu1 %v9574_v7  ;;  %v13152_v45 = vadd.f32 %v2508_v47, %v12587_v21  ;;  %v9884_v14 = vpop.eup %9883  ;;  %v13163_v57 = vsel %vm2797_vm14, %v13037_v61, %v7711_v8  ;;  %v9580_v61 = vld [vmem:[%s15250_s3 + $0x264] ss:$8 sps:$4 sm:$0xff]   ;;  %v9583_v47 = vld [vmem:[%s15250_s3 + $0x274] ss:$8 sps:$4 sm:$0xff]  }
 0x35f   : > { %v3087_v46 = vmul.f32 1.442695, %v2917_v4  ;;  %v2923_v39 = vmin.f32 %v13140_v6, 0.0  ;;  %v7718_v60 = vadd.f32 -1.0, %v9884_v14  ;;  %v3278_v28 = vsel %vm2798_vm13, %v13042_v34, %v7712_v12  ;;  %v9578_v34 = vld [vmem:[%s15250_s3 + $0x260] ss:$8 sps:$4 sm:$0xff]  }
 0x360   : > { %v3089_v27 = vmul.f32 1.442695, %v2918_v26  ;;  %4131 = vmatmul.mubr.bf16.gmra.mrb[104].mxu1 %v3337_v31  ;;  %v13160_v42 = vsel %vm2803_vm7, %v13046_v37, %v7717_v48  ;;  %v2924_v63 = vmin.f32 %v13152_v45, 0.0  ;;  %vm2827_vm12 = vcmp.gt.f32.partialorder %v13140_v6, 0.0 }
 0x361   : > { %9893 = vpow2.f32 %v3087_v46  ;;  %v3099_v15 = vmul.f32 1.442695, %v2923_v39  ;;  %4140 = vmatprep.mubr.bf16.mxu1 %v3344_v10  ;;  %4200 = vmatpush1.bf16.msra.mxu1 %v9572_v20  ;;  %v3349_v37 = vpack.c.bf16 %v13160_v42, %v13163_v57  ;;  %v3284_v7 = vsel %vm2804_vm8, %v13058_v53, %v7718_v60  ;;  %v9592_v42 = vld [vmem:[%s15250_s3 + $0x2a4] ss:$8 sps:$4 sm:$0xff]  }
 0x362   : > { %9895 = vpow2.f32 %v3089_v27  ;;  %v2512_v1 = vpop.f32.mrb[60].mxu1  ;;  %4201 = vmatprep.subr.bf16.mxu1 %v9577_v56  ;;  %v3101_v25 = vmul.f32 1.442695, %v2924_v63  ;;  %v3350_v58 = vpack.c.bf16 %v3284_v7, %v3278_v28  ;;  %v9584_v28 = vld [vmem:[%s15250_s3 + $0x280] ss:$8 sps:$4 sm:$0xff]   ;;  %vm2822_vm7 = vcmp.gt.f32.partialorder %v13136_v43, 0.0 }
 0x363   : > { %v9886_v31 = vpop.eup %9885  ;;  %9897 = vpow2.f32 %v3099_v15  ;;  %v13176_v33 = vadd.f32 %v2512_v1, %v12645_v9  ;;  %v2514_v59 = vpop.f32.mrb[61].mxu1  ;;  %v9581_v15 = vld [vmem:[%s15250_s3 + $0x270] ss:$8 sps:$4 sm:$0xff]   ;;  %vm2828_vm14 = vcmp.gt.f32.partialorder %v13152_v45, 0.0 }
 0x364   : > { %v9888_v54 = vpop.eup %9887  ;;  %v13183_v19 = vadd.f32 %v2514_v59, %v12645_v9  ;;  %v2516_v5 = vpop.f32.mrb[62].mxu1  ;;  %v7723_v49 = vadd.f32 -1.0, %v9886_v31  ;;  %9899 = vpow2.f32 %v3101_v25 }
 0x365   : > { %v9890_v52 = vpop.eup %9889  ;;  %v2929_v10 = vmin.f32 %v13176_v33, 0.0  ;;  %v13187_v29 = vadd.f32 %v2516_v5, %v12672_v0  ;;  %v2518_v8 = vpop.f32.mrb[63].mxu1  ;;  %4202 = vmatpush1.bf16.msra.mxu1 %v9575_v38  ;;  %v7724_v20 = vadd.f32 -1.0, %v9888_v54  ;;  %v9589_v54 = vld [vmem:[%s15250_s3 + $0x294] ss:$8 sps:$4 sm:$0xff]   ;;  %vm2833_vm13 = vcmp.gt.f32.partialorder %v13176_v33, 0.0 }
 0x366   : > { %v7729_v53 = vadd.f32 -1.0, %v9890_v52  ;;  %v2930_v4 = vmin.f32 %v13183_v19, 0.0  ;;  %4203 = vmatprep.subr.bf16.mxu1 %v9580_v61  ;;  %v13199_v56 = vadd.f32 %v2518_v8, %v12672_v0  ;;  %v9892_v12 = vpop.eup %9891  ;;  %v3289_v60 = vsel %vm2809_vm10, %v13082_v13, %v7723_v49  ;;  %v9587_v49 = vld [vmem:[%s15250_s3 + $0x290] ss:$8 sps:$4 sm:$0xff]  }
 0x367   : > { %v3111_v48 = vmul.f32 1.442695, %v2929_v10  ;;  %v2935_v26 = vmin.f32 %v13187_v29, 0.0  ;;  %v7730_v14 = vadd.f32 -1.0, %v9892_v12  ;;  %v3290_v13 = vsel %vm2810_vm15, %v13089_v22, %v7724_v20 }
 0x368   : > { %v3113_v46 = vmul.f32 1.442695, %v2930_v4  ;;  %4141 = vmatmul.mubr.bf16.gmra.mrb[108].mxu1 %v3343_v36  ;;  %v3295_v39 = vsel %vm2815_vm6, %v13093_v17, %v7729_v53  ;;  %v2936_v38 = vmin.f32 %v13199_v56, 0.0  ;;  %v9586_v17 = vld [vmem:[%s15250_s3 + $0x284] ss:$8 sps:$4 sm:$0xff]   ;;  %vm2839_vm8 = vcmp.gt.f32.partialorder %v13187_v29, 0.0 }
 0x369   : > { %9901 = vpow2.f32 %v3111_v48  ;;  %v3123_v27 = vmul.f32 1.442695, %v2935_v26  ;;  %4150 = vmatprep.mubr.bf16.mxu1 %v3350_v58  ;;  %4204 = vmatpush1.bf16.msra.mxu1 %v9578_v34  ;;  %v3355_v62 = vpack.c.bf16 %v3295_v39, %v3289_v60  ;;  %v3296_v36 = vsel %vm2816_vm11, %v13105_v18, %v7730_v14  ;;  %v9590_v53 = vld [vmem:[%s15250_s3 + $0x2a0] ss:$8 sps:$4 sm:$0xff]   ;;  %v9598_v39 = vld [vmem:[%s15250_s3 + $0x2c4] ss:$8 sps:$4 sm:$0xff]  }
 0x36a   : > { %9903 = vpow2.f32 %v3113_v46  ;;  %4205 = vmatprep.subr.bf16.mxu1 %v9583_v47  ;;  %v3125_v61 = vmul.f32 1.442695, %v2936_v38  ;;  %v3356_v31 = vpack.c.bf16 %v3296_v36, %v3290_v13  ;;  %v9595_v47 = vld [vmem:[%s15250_s3 + $0x2b4] ss:$8 sps:$4 sm:$0xff]   ;;  %v9593_v46 = vld [vmem:[%s15250_s3 + $0x2b0] ss:$8 sps:$4 sm:$0xff]  }
 0x36b   : > { %v9894_v3 = vpop.eup %9893  ;;  %9905 = vpow2.f32 %v3123_v27  ;;  %vm2834_vm6 = vcmp.gt.f32.partialorder %v13183_v19, 0.0  ;;  %vm2840_vm10 = vcmp.gt.f32.partialorder %v13199_v56, 0.0  ;;  %v9596_v27 = vld [vmem:[%s15250_s3 + $0x2c0] ss:$8 sps:$4 sm:$0xff]   ;;  %v9601_v60 = vld [vmem:[%s15250_s3 + $0x2d4] ss:$8 sps:$4 sm:$0xff]  }
 0x36c   : > { %v9896_v63 = vpop.eup %9895  ;;  %v7735_v1 = vadd.f32 -1.0, %v9894_v3  ;;  %9907 = vpow2.f32 %v3125_v61  ;;  %vm3958_vm15 = vcmask 1046528  }
 0x36d   : > { %v9898_v59 = vpop.eup %9897  ;;  %4206 = vmatpush1.bf16.msra.mxu1 %v9581_v15  ;;  %v7736_v22 = vadd.f32 -1.0, %v9896_v63  ;;  %v9604_v15 = vld [vmem:[%s15250_s3 + $0x2e0] ss:$8 sps:$4 sm:$0x7f]  }
 0x36e   : > { %v7741_v7 = vadd.f32 -1.0, %v9898_v59  ;;  %4207 = vmatprep.subr.bf16.mxu1 %v9586_v17  ;;  %v9900_v18 = vpop.eup %9899  ;;  %v3301_v25 = vsel %vm2821_vm9, %v13129_v24, %v7735_v1  ;;  %v3960_v38 = vsel %vm3958_vm15, %v9604_v15, 0  ;;  %vm3933_vm9 = vcmask 900096  }
 0x36f   : > { %v7742_v58 = vadd.f32 -1.0, %v9900_v18 }
 0x370   : > { %4151 = vmatmul.mubr.bf16.gmra.mrb[112].mxu1 %v3349_v37  ;;  %v3307_v5 = vsel %vm2827_vm12, %v13140_v6, %v7741_v7  ;;  %v3302_v6 = vsel %vm2822_vm7, %v13136_v43, %v7736_v22 }
 0x371   : > { %4160 = vmatprep.mubr.bf16.mxu1 %v3356_v31  ;;  %v3361_v52 = vpack.c.bf16 %v3307_v5, %v3301_v25  ;;  %4208 = vmatpush1.bf16.msra.mxu1 %v9584_v28  ;;  %v3308_v57 = vsel %vm2828_vm14, %v13152_v45, %v7742_v58 }
 0x372   : > { %4209 = vmatprep.subr.bf16.mxu1 %v9589_v54  ;;  %v3362_v8 = vpack.c.bf16 %v3308_v57, %v3302_v6 }
 0x373   : > { %v9902_v24 = vpop.eup %9901 }
 0x374   : > { %v9904_v37 = vpop.eup %9903  ;;  %v7747_v10 = vadd.f32 -1.0, %v9902_v24 }
 0x375   : > { %v9906_v34 = vpop.eup %9905  ;;  %4210 = vmatpush1.bf16.msra.mxu1 %v9587_v49  ;;  %v7748_v43 = vadd.f32 -1.0, %v9904_v37 }
 0x376   : > { %v7753_v4 = vadd.f32 -1.0, %v9906_v34  ;;  %4211 = vmatprep.subr.bf16.mxu1 %v9592_v42  ;;  %v9908_v45 = vpop.eup %9907  ;;  %v3313_v20 = vsel %vm2833_vm13, %v13176_v33, %v7747_v10 }
 0x377   : > { %v7754_v26 = vadd.f32 -1.0, %v9908_v45  ;;  %v3314_v33 = vsel %vm2834_vm6, %v13183_v19, %v7748_v43  ;;  %v9599_v19 = vld [vmem:[%s15250_s3 + $0x2d0] ss:$8 sps:$4 sm:$0xff]  }
 0x378   : > { %4161 = vmatmul.mubr.bf16.gmra.mrb[116].mxu1 %v3355_v62  ;;  %v3319_v48 = vsel %vm2839_vm8, %v13187_v29, %v7753_v4 }
 0x379   : > { %4170 = vmatprep.mubr.bf16.mxu1 %v3362_v8  ;;  %v3367_v12 = vpack.c.bf16 %v3319_v48, %v3313_v20  ;;  %4212 = vmatpush1.bf16.msra.mxu1 %v9590_v53  ;;  %v3320_v29 = vsel %vm2840_vm10, %v13199_v56, %v7754_v26  ;;  %v9602_v56 = vld [vmem:[%s15250_s3 + $0x2e4] ss:$8 sps:$4 sm:$0x7f]  }
 0x37a   : > { %4213 = vmatprep.subr.bf16.mxu1 %v9595_v47  ;;  %v3368_v14 = vpack.c.bf16 %v3320_v29, %v3314_v33 }
 0x37d   : > { %4214 = vmatpush1.bf16.msra.mxu1 %v9593_v46 }
 0x37e   : > { %4215 = vmatprep.subr.bf16.mxu1 %v9598_v39 }
 0x380   : > { %4171 = vmatmul.mubr.bf16.gmra.mrb[120].mxu1 %v3361_v52 }
 0x381   : > { %4180 = vmatprep.mubr.bf16.mxu1 %v3368_v14  ;;  %4216 = vmatpush1.bf16.msra.mxu1 %v9596_v27 }
 0x382   : > { %4217 = vmatprep.subr.bf16.mxu1 %v9601_v60 }
 0x385   : > { %4218 = vmatpush1.bf16.msra.mxu1 %v9599_v19 }
 0x386   : > { %7851 = vmatprep.subr.msk.bf16.mxu1 %vm3958_vm15, %v9602_v56 }
 0x388   : > { %4181 = vmatmul.mubr.bf16.gmra.mrb[124].mxu1 %v3367_v12 }
 0x389   : > { %4220 = vmatpush1.bf16.msra.mxu1 %v3960_v38 }
 0x3a3   : > { %v2555_v62 = vpop.f32.mrb[64].mxu1 }
 0x3a4   : > { %v2557_v17 = vpop.f32.mrb[65].mxu1  ;;  %v2556_v36 = vadd.f32 %v2555_v62, %v12248_v30 }
 0x3a5   : > { %v2559_v3 = vpop.f32.mrb[66].mxu1  ;;  %v2558_v63 = vadd.f32 %v2557_v17, %v12248_v30 }
 0x3a6   : > { %v2561_v13 = vpop.f32.mrb[67].mxu1  ;;  %v2560_v61 = vadd.f32 %v2559_v3, %v12268_v50 }
 0x3a7   : > { %v2562_v28 = vadd.f32 %v2561_v13, %v12268_v50 }
 0x3a8   : > { %v2668_v1 = vpop.f32.mrb[0].mxu0 }
 0x3a9   : > { %v13281_v31 = vadd.f32 %v2668_v1, %v2556_v36  ;;  %v2670_v59 = vpop.f32.mrb[1].mxu0 }
 0x3aa   : > { %v13284_v7 = vadd.f32 %v2670_v59, %v2558_v63  ;;  %v2672_v54 = vpop.f32.mrb[2].mxu0 }
 0x3ab   : > { %v2847_v22 = vmin.f32 %v13281_v31, 0.0  ;;  %v13287_v18 = vadd.f32 %v2672_v54, %v2560_v61  ;;  %v2565_v25 = vpop.f32.mrb[68].mxu1  ;;  %v2674_v5 = vpop.f32.mrb[3].mxu0  ;;  %vm2751_vm11 = vcmp.gt.f32.partialorder %v13281_v31, 0.0 }
 0x3ac   : > { %v2848_v58 = vmin.f32 %v13284_v7, 0.0  ;;  %v13290_v30 = vadd.f32 %v2674_v5, %v2562_v28  ;;  %v2567_v52 = vpop.f32.mrb[69].mxu1  ;;  %v2566_v10 = vadd.f32 %v2565_v25, %v12270_v23  ;;  %vm2752_vm12 = vcmp.gt.f32.partialorder %v13284_v7, 0.0 }
 0x3ad   : > { %v2947_v49 = vmul.f32 1.442695, %v2847_v22  ;;  %v2853_v42 = vmin.f32 %v13287_v18, 0.0  ;;  %v2569_v24 = vpop.f32.mrb[70].mxu1  ;;  %v2568_v34 = vadd.f32 %v2567_v52, %v12270_v23  ;;  %vm2757_vm7 = vcmp.gt.f32.partialorder %v13287_v18, 0.0 }
 0x3ae   : > { %v2949_v6 = vmul.f32 1.442695, %v2848_v58  ;;  %v2854_v50 = vmin.f32 %v13290_v30, 0.0  ;;  %v2571_v57 = vpop.f32.mrb[71].mxu1  ;;  %v2570_v4 = vadd.f32 %v2569_v24, %v12305_v44  ;;  %vm2758_vm14 = vcmp.gt.f32.partialorder %v13290_v30, 0.0 }
 0x3af   : > { %9909 = vpow2.f32 %v2947_v49  ;;  %v2959_v37 = vmul.f32 1.442695, %v2853_v42  ;;  %v2572_v45 = vadd.f32 %v2571_v57, %v12305_v44 }
 0x3b0   : > { %9911 = vpow2.f32 %v2949_v6  ;;  %v2961_v8 = vmul.f32 1.442695, %v2854_v50  ;;  %v2678_v53 = vpop.f32.mrb[4].mxu0 }
 0x3b1   : > { %9913 = vpow2.f32 %v2959_v37  ;;  %v13297_v47 = vadd.f32 %v2678_v53, %v2566_v10  ;;  %v2680_v43 = vpop.f32.mrb[5].mxu0 }
 0x3b2   : > { %9915 = vpow2.f32 %v2961_v8  ;;  %v13300_v20 = vadd.f32 %v2680_v43, %v2568_v34  ;;  %v2682_v48 = vpop.f32.mrb[6].mxu0 }
 0x3b3   : > { %v13302_v26 = vadd.f32 %v2682_v48, %v2570_v4  ;;  %v2575_v12 = vpop.f32.mrb[72].mxu1  ;;  %v2684_v46 = vpop.f32.mrb[7].mxu0  ;;  %v2859_v39 = vmin.f32 %v13297_v47, 0.0  ;;  %vm2763_vm13 = vcmp.gt.f32.partialorder %v13297_v47, 0.0 }
 0x3b4   : > { %v2860_v23 = vmin.f32 %v13300_v20, 0.0  ;;  %v13306_v33 = vadd.f32 %v2684_v46, %v2572_v45  ;;  %v2577_v29 = vpop.f32.mrb[73].mxu1  ;;  %v2576_v56 = vadd.f32 %v2575_v12, %v12303_v51  ;;  %vm2764_vm8 = vcmp.gt.f32.partialorder %v13300_v20, 0.0 }
 0x3b5   : > { %v2865_v14 = vmin.f32 %v13302_v26, 0.0  ;;  %v2579_v27 = vpop.f32.mrb[74].mxu1  ;;  %v2971_v15 = vmul.f32 1.442695, %v2859_v39  ;;  %v2578_v62 = vadd.f32 %v2577_v29, %v12303_v51  ;;  %vm2769_vm10 = vcmp.gt.f32.partialorder %v13302_v26, 0.0 }
 0x3b6   : > { %v2973_v60 = vmul.f32 1.442695, %v2860_v23  ;;  %v2866_v44 = vmin.f32 %v13306_v33, 0.0  ;;  %v2581_v19 = vpop.f32.mrb[75].mxu1  ;;  %v2580_v36 = vadd.f32 %v2579_v27, %v12334_v2  ;;  %vm2770_vm6 = vcmp.gt.f32.partialorder %v13306_v33, 0.0 }
 0x3b7   : > { %v2983_v13 = vmul.f32 1.442695, %v2865_v14  ;;  %v2582_v24 = vadd.f32 %v2581_v19, %v12334_v2 }
 0x3b8   : > { %9917 = vpow2.f32 %v2973_v60  ;;  %v2985_v38 = vmul.f32 1.442695, %v2866_v44  ;;  %v2688_v17 = vpop.f32.mrb[8].mxu0 }
 0x3b9   : > { %v9910_v3 = vpop.eup %9909  ;;  %v13315_v63 = vadd.f32 %v2688_v17, %v2576_v56  ;;  %v2690_v1 = vpop.f32.mrb[9].mxu0 }
 0x3ba   : > { %v9912_v61 = vpop.eup %9911  ;;  %v7665_v59 = vadd.f32 -1.0, %v9910_v3  ;;  %9919 = vpow2.f32 %v2985_v38  ;;  %v13318_v28 = vadd.f32 %v2690_v1, %v2578_v62  ;;  %v2692_v54 = vpop.f32.mrb[10].mxu0 }
 0x3bb   : > { %v9914_v22 = vpop.eup %9913  ;;  %v7666_v51 = vadd.f32 -1.0, %v9912_v61  ;;  %v2871_v25 = vmin.f32 %v13315_v63, 0.0  ;;  %v13322_v5 = vadd.f32 %v2692_v54, %v2580_v36  ;;  %v2585_v58 = vpop.f32.mrb[76].mxu1  ;;  %9921 = vpow2.f32 %v2971_v15 }
 0x3bc   : > { %v2694_v52 = vpop.f32.mrb[11].mxu0  ;;  %v9916_v49 = vpop.eup %9915  ;;  %v7671_v42 = vadd.f32 -1.0, %v9914_v22  ;;  %v2872_v6 = vmin.f32 %v13318_v28, 0.0  ;;  %v3231_v57 = vsel %vm2751_vm11, %v13281_v31, %v7665_v59  ;;  %9923 = vpow2.f32 %v2983_v13 }
 0x3bd   : > { %v2587_v50 = vpop.f32.mrb[77].mxu1  ;;  %v7672_v37 = vadd.f32 -1.0, %v9916_v49  ;;  %v2995_v10 = vmul.f32 1.442695, %v2871_v25  ;;  %v3232_v34 = vsel %vm2752_vm12, %v13284_v7, %v7666_v51  ;;  %v2877_v4 = vmin.f32 %v13322_v5, 0.0 }
 0x3be   : > { %v2589_v8 = vpop.f32.mrb[78].mxu1  ;;  %v3237_v53 = vsel %vm2757_vm7, %v13287_v18, %v7671_v42  ;;  %v2997_v2 = vmul.f32 1.442695, %v2872_v6  ;;  %v13339_v48 = vadd.f32 %v2694_v52, %v2582_v24  ;;  %v2586_v7 = vadd.f32 %v2585_v58, %v12349_v32 }
 0x3bf   : > { %v2591_v43 = vpop.f32.mrb[79].mxu1  ;;  %v3327_v45 = vpack.c.bf16 %v3237_v53, %v3231_v57  ;;  %v3238_v31 = vsel %vm2758_vm14, %v13290_v30, %v7672_v37  ;;  %9925 = vpow2.f32 %v2995_v10  ;;  %v2588_v46 = vadd.f32 %v2587_v50, %v12349_v32 }
 0x3c0   : > { %v3328_v12 = vpack.c.bf16 %v3238_v31, %v3232_v34  ;;  %9927 = vpow2.f32 %v2997_v2  ;;  %v2698_v39 = vpop.f32.mrb[12].mxu0  ;;  %v2878_v18 = vmin.f32 %v13339_v48, 0.0  ;;  %v2590_v23 = vadd.f32 %v2589_v8, %v12368_v11 }
 0x3c1   : > { %v2700_v29 = vpop.f32.mrb[13].mxu0  ;;  %v3007_v27 = vmul.f32 1.442695, %v2877_v4  ;;  %v13345_v60 = vadd.f32 %v2698_v39, %v2586_v7  ;;  %v2592_v36 = vadd.f32 %v2591_v43, %v12368_v11  ;;  %vm2776_vm15 = vcmp.gt.f32.partialorder %v13318_v28, 0.0 }
 0x3c2   : > { %v9918_v14 = vpop.eup %9917  ;;  %v13347_v30 = vadd.f32 %v2700_v29, %v2588_v46  ;;  %v2702_v44 = vpop.f32.mrb[14].mxu0  ;;  %7852 = vmatprep.mubr.msk.bf16.mxu1 %vm3933_vm9, %v3328_v12  ;;  %v3009_v56 = vmul.f32 1.442695, %v2878_v18  ;;  %vm2782_vm11 = vcmp.gt.f32.partialorder %v13339_v48, 0.0  ;;  %vm2775_vm12 = vcmp.gt.f32.partialorder %v13315_v63, 0.0 }
 0x3c3   : > { %v7678_v19 = vadd.f32 -1.0, %v9918_v14  ;;  %v13350_v15 = vadd.f32 %v2702_v44, %v2590_v23  ;;  %v2595_v32 = vpop.f32.mrb[80].mxu1  ;;  %v2704_v38 = vpop.f32.mrb[15].mxu0  ;;  %4224 = vmatmul.mubr.bf16.vlgmr.msra.gmra.mrb[96].mxu1 %v3327_v45  ;;  %v2883_v17 = vmin.f32 %v13345_v60, 0.0  ;;  %vm2781_vm7 = vcmp.gt.f32.partialorder %v13322_v5, 0.0 }
 0x3c4   : > { %v9920_v62 = vpop.eup %9919  ;;  %v2597_v3 = vpop.f32.mrb[81].mxu1  ;;  %9929 = vpow2.f32 %v3009_v56  ;;  %v2884_v1 = vmin.f32 %v13347_v30, 0.0  ;;  %v13361_v52 = vadd.f32 %v2704_v38, %v2592_v36  ;;  %v2596_v24 = vadd.f32 %v2595_v32, %v12434_v40 }
 0x3c5   : > { %v7684_v13 = vadd.f32 -1.0, %v9920_v62  ;;  %v2599_v61 = vpop.f32.mrb[82].mxu1  ;;  %v9922_v59 = vpop.eup %9921  ;;  %9931 = vpow2.f32 %v3007_v27  ;;  %v2889_v54 = vmin.f32 %v13350_v15, 0.0  ;;  %v3244_v25 = vsel %vm2764_vm8, %v13300_v20, %v7678_v19 }
 0x3c6   : > { %v2601_v22 = vpop.f32.mrb[83].mxu1  ;;  %v9924_v51 = vpop.eup %9923  ;;  %v3021_v11 = vmul.f32 1.442695, %v2884_v1  ;;  %v3019_v42 = vmul.f32 1.442695, %v2883_v17  ;;  %v2598_v6 = vadd.f32 %v2597_v3, %v12434_v40  ;;  %v2890_v37 = vmin.f32 %v13361_v52, 0.0 }
 0x3c7   : > { %v3250_v58 = vsel %vm2770_vm6, %v13306_v33, %v7684_v13  ;;  %v2600_v20 = vadd.f32 %v2599_v61, %v12444_v16  ;;  %v3031_v8 = vmul.f32 1.442695, %v2889_v54  ;;  %v7677_v40 = vadd.f32 -1.0, %v9922_v59 }
 0x3c8   : > { %v3334_v49 = vpack.c.bf16 %v3250_v58, %v3244_v25  ;;  %v2708_v50 = vpop.f32.mrb[16].mxu0  ;;  %9933 = vpow2.f32 %v3021_v11  ;;  %v7683_v4 = vadd.f32 -1.0, %v9924_v51  ;;  %v3033_v43 = vmul.f32 1.442695, %v2890_v37 }
 0x3c9   : > { %v9926_v57 = vpop.eup %9925  ;;  %v2710_v10 = vpop.f32.mrb[17].mxu0  ;;  %v13369_v34 = vadd.f32 %v2708_v50, %v2596_v24  ;;  %9935 = vpow2.f32 %v3019_v42  ;;  %v2602_v29 = vadd.f32 %v2601_v22, %v12444_v16  ;;  %v3243_v17 = vsel %vm2763_vm13, %v13297_v47, %v7677_v40 }
 0x3ca   : > { %v9928_v33 = vpop.eup %9927  ;;  %v13371_v53 = vadd.f32 %v2710_v10, %v2598_v6  ;;  %v2712_v2 = vpop.f32.mrb[18].mxu0  ;;  %7853 = vmatprep.mubr.msk.bf16.mxu1 %vm3933_vm9, %v3334_v49  ;;  %v7689_v18 = vadd.f32 -1.0, %v9926_v57  ;;  %9937 = vpow2.f32 %v3033_v43  ;;  %v3249_v16 = vsel %vm2769_vm10, %v13302_v26, %v7683_v4 }
 0x3cb   : > { %v13374_v45 = vadd.f32 %v2712_v2, %v2600_v20  ;;  %v2605_v31 = vpop.f32.mrb[84].mxu1  ;;  %v2714_v12 = vpop.f32.mrb[19].mxu0  ;;  %v2895_v7 = vmin.f32 %v13369_v34, 0.0  ;;  %v7690_v23 = vadd.f32 -1.0, %v9928_v33  ;;  %9939 = vpow2.f32 %v3031_v8 }
 0x3cc   : > { %v2896_v46 = vmin.f32 %v13371_v53, 0.0  ;;  %v2607_v39 = vpop.f32.mrb[85].mxu1  ;;  %v2606_v38 = vadd.f32 %v2605_v31, %v12516_v41  ;;  %v13382_v62 = vadd.f32 %v2714_v12, %v2602_v29  ;;  %v3333_v36 = vpack.c.bf16 %v3249_v16, %v3243_v17 }
 0x3cd   : > { %v2609_v14 = vpop.f32.mrb[86].mxu1  ;;  %v3043_v27 = vmul.f32 1.442695, %v2895_v7  ;;  %v2901_v19 = vmin.f32 %v13374_v45, 0.0  ;;  %v2608_v1 = vadd.f32 %v2607_v39, %v12516_v41  ;;  %v3256_v59 = vsel %vm2776_vm15, %v13318_v28, %v7690_v23 }
 0x3ce   : > { %v3045_v44 = vmul.f32 1.442695, %v2896_v46  ;;  %v2611_v56 = vpop.f32.mrb[87].mxu1  ;;  %v9930_v32 = vpop.eup %9929  ;;  %v2902_v54 = vmin.f32 %v13382_v62, 0.0  ;;  %v2610_v47 = vadd.f32 %v2609_v14, %v12524_v55  ;;  %4234 = vmatmul.mubr.bf16.gmra.mrb[100].mxu1 %v3333_v36  ;;  %vm2788_vm14 = vcmp.gt.f32.partialorder %v13347_v30, 0.0 }
 0x3cf   : > { %v9932_v3 = vpop.eup %9931  ;;  %v7696_v13 = vadd.f32 -1.0, %v9930_v32  ;;  %9941 = vpow2.f32 %v3043_v27  ;;  %v3055_v51 = vmul.f32 1.442695, %v2901_v19  ;;  %v2612_v20 = vadd.f32 %v2611_v56, %v12524_v55 }
 0x3d0   : > { %v2718_v61 = vpop.f32.mrb[20].mxu0  ;;  %9943 = vpow2.f32 %v3045_v44  ;;  %v7695_v49 = vadd.f32 -1.0, %v9932_v3  ;;  %v3057_v42 = vmul.f32 1.442695, %v2902_v54  ;;  %vm2794_vm13 = vcmp.gt.f32.partialorder %v13361_v52, 0.0 }
 0x3d1   : > { %v2720_v22 = vpop.f32.mrb[21].mxu0  ;;  %v3262_v26 = vsel %vm2782_vm11, %v13339_v48, %v7696_v13  ;;  %v13399_v25 = vadd.f32 %v2718_v61, %v2606_v38  ;;  %v3255_v55 = vsel %vm2775_vm12, %v13315_v63, %v7689_v18  ;;  %vm2787_vm8 = vcmp.gt.f32.partialorder %v13345_v60, 0.0 }
 0x3d2   : > { %v13401_v41 = vadd.f32 %v2720_v22, %v2608_v1  ;;  %v2722_v58 = vpop.f32.mrb[22].mxu0  ;;  %v9934_v11 = vpop.eup %9933  ;;  %v3340_v28 = vpack.c.bf16 %v3262_v26, %v3256_v59  ;;  %9945 = vpow2.f32 %v3057_v42  ;;  %v3261_v7 = vsel %vm2781_vm7, %v13322_v5, %v7695_v49 }
 0x3d3   : > { %v13403_v24 = vadd.f32 %v2722_v58, %v2610_v47  ;;  %v2615_v6 = vpop.f32.mrb[88].mxu1  ;;  %v2724_v50 = vpop.f32.mrb[23].mxu0  ;;  %v2907_v48 = vmin.f32 %v13399_v25, 0.0  ;;  %v7702_v37 = vadd.f32 -1.0, %v9934_v11  ;;  %9947 = vpow2.f32 %v3055_v51 }
 0x3d4   : > { %v2617_v57 = vpop.f32.mrb[89].mxu1  ;;  %v2908_v10 = vmin.f32 %v13401_v41, 0.0  ;;  %7854 = vmatprep.mubr.msk.bf16.mxu1 %vm3933_vm9, %v3340_v28  ;;  %v9936_v8 = vpop.eup %9935  ;;  %v13414_v12 = vadd.f32 %v2724_v50, %v2612_v20  ;;  %v3339_v29 = vpack.c.bf16 %v3261_v7, %v3255_v55  ;;  %v2616_v44 = vadd.f32 %v2615_v6, %v12573_v35 }
 0x3d5   : > { %v2619_v33 = vpop.f32.mrb[90].mxu1  ;;  %v3067_v2 = vmul.f32 1.442695, %v2907_v48  ;;  %v2913_v40 = vmin.f32 %v13403_v24, 0.0  ;;  %v9938_v43 = vpop.eup %9937  ;;  %v3268_v27 = vsel %vm2788_vm14, %v13347_v30, %v7702_v37  ;;  %v2618_v56 = vadd.f32 %v2617_v57, %v12573_v35 }
 0x3d6   : > { %v2621_v4 = vpop.f32.mrb[91].mxu1  ;;  %v3069_v31 = vmul.f32 1.442695, %v2908_v10  ;;  %v9940_v46 = vpop.eup %9939  ;;  %v7708_v39 = vadd.f32 -1.0, %v9938_v43  ;;  %v2914_v63 = vmin.f32 %v13414_v12, 0.0  ;;  %4244 = vmatmul.mubr.bf16.gmra.mrb[104].mxu1 %v3339_v29  ;;  %v2620_v32 = vadd.f32 %v2619_v33, %v12587_v21 }
 0x3d7   : > { %9949 = vpow2.f32 %v3067_v2  ;;  %v3079_v23 = vmul.f32 1.442695, %v2913_v40  ;;  %vm2793_vm6 = vcmp.gt.f32.partialorder %v13350_v15, 0.0  ;;  %v7707_v1 = vadd.f32 -1.0, %v9940_v46 }
 0x3d8   : > { %v2728_v14 = vpop.f32.mrb[24].mxu0  ;;  %9951 = vpow2.f32 %v3069_v31  ;;  %v3274_v5 = vsel %vm2794_vm13, %v13361_v52, %v7708_v39  ;;  %v3081_v16 = vmul.f32 1.442695, %v2914_v63  ;;  %v7701_v35 = vadd.f32 -1.0, %v9936_v8 }
 0x3d9   : > { %v2730_v18 = vpop.f32.mrb[25].mxu0  ;;  %v9942_v19 = vpop.eup %9941  ;;  %9953 = vpow2.f32 %v3079_v23  ;;  %v3346_v30 = vpack.c.bf16 %v3274_v5, %v3268_v27  ;;  %v13434_v3 = vadd.f32 %v2728_v14, %v2616_v44  ;;  %v2622_v47 = vadd.f32 %v2621_v4, %v12587_v21 }
 0x3da   : > { %v2732_v38 = vpop.f32.mrb[26].mxu0  ;;  %v9944_v17 = vpop.eup %9943  ;;  %v13436_v59 = vadd.f32 %v2730_v18, %v2618_v56  ;;  %9955 = vpow2.f32 %v3081_v16  ;;  %vm2799_vm10 = vcmp.gt.f32.partialorder %v13369_v34, 0.0  ;;  %v7713_v51 = vadd.f32 -1.0, %v9942_v19 }
 0x3db   : > { %v2625_v13 = vpop.f32.mrb[92].mxu1  ;;  %v2734_v36 = vpop.f32.mrb[27].mxu0  ;;  %v7714_v61 = vadd.f32 -1.0, %v9944_v17  ;;  %v13438_v52 = vadd.f32 %v2732_v38, %v2620_v32  ;;  %v2919_v22 = vmin.f32 %v13434_v3, 0.0  ;;  %7855 = vmatprep.mubr.msk.bf16.mxu1 %vm3933_vm9, %v3346_v30  ;;  %vm2800_vm15 = vcmp.gt.f32.partialorder %v13371_v53, 0.0 }
 0x3dc   : > { %v2627_v54 = vpop.f32.mrb[93].mxu1  ;;  %vm2806_vm11 = vcmp.gt.f32.partialorder %v13382_v62, 0.0  ;;  %v2920_v58 = vmin.f32 %v13436_v59, 0.0  ;;  %v9946_v49 = vpop.eup %9945  ;;  %vm2805_vm12 = vcmp.gt.f32.partialorder %v13374_v45, 0.0  ;;  %vm2812_vm7 = vcmp.gt.f32.partialorder %v13401_v41, 0.0 }
 0x3dd   : > { %v2629_v26 = vpop.f32.mrb[94].mxu1  ;;  %v3091_v21 = vmul.f32 1.442695, %v2919_v22  ;;  %v2925_v28 = vmin.f32 %v13438_v52, 0.0  ;;  %v2626_v42 = vadd.f32 %v2625_v13, %v12645_v9  ;;  %v13451_v6 = vadd.f32 %v2734_v36, %v2622_v47  ;;  %v9948_v50 = vpop.eup %9947 }
 0x3de   : > { %v2631_v11 = vpop.f32.mrb[95].mxu1  ;;  %v3280_v48 = vsel %vm2800_vm15, %v13371_v53, %v7714_v61  ;;  %v7720_v57 = vadd.f32 -1.0, %v9946_v49  ;;  %vm2811_vm14 = vcmp.gt.f32.partialorder %v13399_v25, 0.0  ;;  %v3093_v37 = vmul.f32 1.442695, %v2920_v58 }
 0x3df   : > { %v3273_v20 = vsel %vm2793_vm6, %v13350_v15, %v7707_v1  ;;  %9957 = vpow2.f32 %v3091_v21  ;;  %v3103_v33 = vmul.f32 1.442695, %v2925_v28  ;;  %v2926_v8 = vmin.f32 %v13451_v6, 0.0 }
 0x3e0   : > { %v2738_v10 = vpop.f32.mrb[28].mxu0  ;;  %v3267_v2 = vsel %vm2787_vm8, %v13345_v60, %v7701_v35  ;;  %v3286_v53 = vsel %vm2806_vm11, %v13382_v62, %v7720_v57  ;;  %9959 = vpow2.f32 %v3093_v37  ;;  %v2628_v31 = vadd.f32 %v2627_v54, %v12645_v9 }
 0x3e1   : > { %v2740_v40 = vpop.f32.mrb[29].mxu0  ;;  %v9950_v4 = vpop.eup %9949  ;;  %v3345_v43 = vpack.c.bf16 %v3273_v20, %v3267_v2  ;;  %v3352_v7 = vpack.c.bf16 %v3286_v53, %v3280_v48  ;;  %9961 = vpow2.f32 %v3103_v33  ;;  %v3105_v46 = vmul.f32 1.442695, %v2926_v8 }
 0x3e2   : > { %v2742_v15 = vpop.f32.mrb[30].mxu0  ;;  %v9952_v55 = vpop.eup %9951  ;;  %v2630_v39 = vadd.f32 %v2629_v26, %v12672_v0  ;;  %v7719_v60 = vadd.f32 -1.0, %v9948_v50  ;;  %v13467_v27 = vadd.f32 %v2738_v10, %v2626_v42  ;;  %v13469_v44 = vadd.f32 %v2740_v40, %v2628_v31 }
 0x3e3   : > { %v2744_v23 = vpop.f32.mrb[31].mxu0  ;;  %v9954_v29 = vpop.eup %9953  ;;  %v7726_v14 = vadd.f32 -1.0, %v9952_v55  ;;  %4254 = vmatmul.mubr.bf16.gmra.mrb[108].mxu1 %v3345_v43  ;;  %v7725_v62 = vadd.f32 -1.0, %v9950_v4  ;;  %9963 = vpow2.f32 %v3105_v46  ;;  %v2632_v9 = vadd.f32 %v2631_v11, %v12672_v0 }
 0x3e4   : > { %v13472_v63 = vadd.f32 %v2742_v15, %v2630_v39  ;;  %7856 = vmatprep.mubr.msk.bf16.mxu1 %vm3933_vm9, %v3352_v7  ;;  %vm2817_vm13 = vcmp.gt.f32.partialorder %v13403_v24, 0.0  ;;  %v7731_v18 = vadd.f32 -1.0, %v9954_v29  ;;  %vm2818_vm8 = vcmp.gt.f32.partialorder %v13414_v12, 0.0  ;;  %v9956_v5 = vpop.eup %9955 }
 0x3e5   : > { %v2931_v19 = vmin.f32 %v13467_v27, 0.0  ;;  %v2932_v56 = vmin.f32 %v13469_v44, 0.0  ;;  %v2745_v38 = vadd.f32 %v2744_v23, %v2632_v9  ;;  %v3279_v0 = vsel %vm2799_vm10, %v13369_v34, %v7713_v51 }
 0x3e6   : > { %v2937_v32 = vmin.f32 %v13472_v63, 0.0  ;;  %v3292_v17 = vsel %vm2812_vm7, %v13401_v41, %v7726_v14  ;;  %v7732_v30 = vadd.f32 -1.0, %v9956_v5  ;;  %v3285_v13 = vsel %vm2805_vm12, %v13374_v45, %v7719_v60 }
 0x3e7   : > { %v3115_v16 = vmul.f32 1.442695, %v2931_v19  ;;  %v3117_v36 = vmul.f32 1.442695, %v2932_v56  ;;  %v2938_v61 = vmin.f32 %v2745_v38, 0.0  ;;  %v3291_v54 = vsel %vm2811_vm14, %v13399_v25, %v7725_v62 }
 0x3e8   : > { %v3127_v1 = vmul.f32 1.442695, %v2937_v32  ;;  %v3298_v35 = vsel %vm2818_vm8, %v13414_v12, %v7732_v30  ;;  %v3351_v34 = vpack.c.bf16 %v3285_v13, %v3279_v0  ;;  %v3297_v41 = vsel %vm2817_vm13, %v13403_v24, %v7731_v18 }
 0x3e9   : > { %9965 = vpow2.f32 %v3115_v16  ;;  %v9958_v47 = vpop.eup %9957  ;;  %v3358_v22 = vpack.c.bf16 %v3298_v35, %v3292_v17  ;;  %v3129_v26 = vmul.f32 1.442695, %v2938_v61  ;;  %v3357_v45 = vpack.c.bf16 %v3297_v41, %v3291_v54 }
 0x3ea   : > { %9967 = vpow2.f32 %v3117_v36  ;;  %v9960_v51 = vpop.eup %9959  ;;  %v7737_v58 = vadd.f32 -1.0, %v9958_v47  ;;  %vm2823_vm6 = vcmp.gt.f32.partialorder %v13434_v3, 0.0  ;;  %vm2829_vm10 = vcmp.gt.f32.partialorder %v13438_v52, 0.0 }
 0x3eb   : > { %9969 = vpow2.f32 %v3127_v1  ;;  %4264 = vmatmul.mubr.bf16.gmra.mrb[112].mxu1 %v3351_v34  ;;  %v9962_v11 = vpop.eup %9961  ;;  %v7738_v25 = vadd.f32 -1.0, %v9960_v51  ;;  %vm2824_vm15 = vcmp.gt.f32.partialorder %v13436_v59, 0.0  ;;  %vm2830_vm11 = vcmp.gt.f32.partialorder %v13451_v6, 0.0 }
 0x3ec   : > { %9971 = vpow2.f32 %v3129_v26  ;;  %7857 = vmatprep.mubr.msk.bf16.mxu1 %vm3933_vm9, %v3358_v22  ;;  %v7743_v12 = vadd.f32 -1.0, %v9962_v11  ;;  %v3303_v21 = vsel %vm2823_vm6, %v13434_v3, %v7737_v58  ;;  %vm2835_vm12 = vcmp.gt.f32.partialorder %v13467_v27, 0.0 }
 0x3ed   : > { %v9964_v49 = vpop.eup %9963  ;;  %v3304_v50 = vsel %vm2824_vm15, %v13436_v59, %v7738_v25  ;;  %vm2841_vm7 = vcmp.gt.f32.partialorder %v13472_v63, 0.0  ;;  %vm2836_vm14 = vcmp.gt.f32.partialorder %v13469_v44, 0.0  ;;  %vm2842_vm13 = vcmp.gt.f32.partialorder %v2745_v38, 0.0 }
 0x3ee   : > { %v7744_v24 = vadd.f32 -1.0, %v9964_v49  ;;  %v3309_v28 = vsel %vm2829_vm10, %v13438_v52, %v7743_v12  ;;  %v9607_v12 = vld [vmem:[%s15251_s4 + $0x4] ss:$60 sps:$4 sm:$0xff]   ;;  %vm15773_vm6 = vcmask 982016  }
 0x3ef   : > { %v3363_v42 = vpack.c.bf16 %v3309_v28, %v3303_v21  ;;  %5998 = vmatprep.mubr.bf16.mxu0 %v9607_v12  ;;  %vm15774_vm10 = vmmov %vm15773_vm6 }
 0x3f0   : > { %v3310_v48 = vsel %vm2830_vm11, %v13451_v6, %v7744_v24  ;;  %vm15775_vm15 = vmmov %vm15773_vm6 }
 0x3f1   : > { %v3364_v57 = vpack.c.bf16 %v3310_v48, %v3304_v50  ;;  %vm15777_vm11 = vmmov %vm15773_vm6 }
 0x3f3   : > { %v9966_v37 = vpop.eup %9965  ;;  %4274 = vmatmul.mubr.bf16.gmra.mrb[116].mxu1 %v3357_v45 }
 0x3f4   : > { %v9968_v20 = vpop.eup %9967  ;;  %v7749_v10 = vadd.f32 -1.0, %v9966_v37  ;;  %7858 = vmatprep.mubr.msk.bf16.mxu1 %vm3933_vm9, %v3364_v57 }
 0x3f5   : > { %v9970_v33 = vpop.eup %9969  ;;  %v7750_v3 = vadd.f32 -1.0, %v9968_v20 }
 0x3f6   : > { %v9972_v8 = vpop.eup %9971  ;;  %v7755_v52 = vadd.f32 -1.0, %v9970_v33  ;;  %v3315_v59 = vsel %vm2835_vm12, %v13467_v27, %v7749_v10  ;;  %vm15778_vm12 = vmmov %vm15773_vm6 }
 0x3f7   : > { %v7756_v2 = vadd.f32 -1.0, %v9972_v8  ;;  %v3316_v40 = vsel %vm2836_vm14, %v13469_v44, %v7750_v3  ;;  %vm15780_vm14 = vmmov %vm15773_vm6 }
 0x3f8   : > { %v3321_v6 = vsel %vm2841_vm7, %v13472_v63, %v7755_v52  ;;  %vm15779_vm7 = vmmov %vm15773_vm6 }
 0x3f9   : > { %v3322_v4 = vsel %vm2842_vm13, %v2745_v38, %v7756_v2  ;;  %v3369_v53 = vpack.c.bf16 %v3321_v6, %v3315_v59  ;;  %vm15781_vm13 = vmmov %vm15773_vm6 }
 0x3fa   : > { %v3370_v43 = vpack.c.bf16 %v3322_v4, %v3316_v40 }
 0x3fb   : > { %4284 = vmatmul.mubr.bf16.gmra.mrb[120].mxu1 %v3363_v42 }
 0x3fc   : > { %7859 = vmatprep.mubr.msk.bf16.mxu1 %vm3933_vm9, %v3370_v43 }
 0x403   : > { %4294 = vmatmul.mubr.bf16.gmra.mrb[124].mxu1 %v3369_v53 }
 0x496   : > { %v4225_v31 = vpop.f32.mrb[96].mxu1 }
 0x497   : > { %v4227_v15 = vpop.f32.mrb[97].mxu1 }
 0x498   : > { %v4229_v55 = vpop.f32.mrb[98].mxu1 }
 0x499   : > { %v13513_v7 = vpack.c.bf16 %v4229_v55, %v4225_v31  ;;  %v4231_v46 = vpop.f32.mrb[99].mxu1 }
 0x49a   : > { %v13515_v39 = vpack.c.bf16 %v4231_v46, %v4227_v15 }
 0x49b   : > { %4336 = vrot.lane.b32.xlu0 %v13513_v7, %s10097_s12 }
 0x49c   : > { %4338 = vrot.lane.b32.xlu1 %v13515_v39, %s10097_s12  ;;  %5966 = vmatprep.subr.bf16.mxu0 %v13515_v39 }
 0x49d   : > { %5967 = vmatpush1.bf16.msra.mxu0 %v13513_v7 }
 0x4a1   : > { %v4235_v23 = vpop.f32.mrb[100].mxu1 }
 0x4a2   : > { %v4237_v29 = vpop.f32.mrb[101].mxu1 }
 0x4a3   : > { %v4239_v60 = vpop.f32.mrb[102].mxu1 }
 0x4a4   : > { %v13523_v14 = vpack.c.bf16 %v4239_v60, %v4235_v23  ;;  %v4241_v27 = vpop.f32.mrb[103].mxu1 }
 0x4a5   : > { %v13525_v44 = vpack.c.bf16 %v4241_v27, %v4237_v29 }
 0x4a6   : > { %4340 = vrot.lane.b32.xlu0 %v13523_v14, %s10097_s12 }
 0x4a7   : > { %4342 = vrot.lane.b32.xlu1 %v13525_v44, %s10097_s12  ;;  %5968 = vmatprep.subr.bf16.mxu0 %v13525_v44 }
 0x4a8   : > { %5969 = vmatpush1.bf16.msra.mxu0 %v13523_v14 }
 0x4a9   : > { %v4245_v62 = vpop.f32.mrb[104].mxu1 }
 0x4aa   : > { %v4247_v9 = vpop.f32.mrb[105].mxu1 }
 0x4ab   : > { %v4249_v63 = vpop.f32.mrb[106].mxu1 }
 0x4ac   : > { %v13533_v18 = vpack.c.bf16 %v4249_v63, %v4245_v62  ;;  %v4251_v19 = vpop.f32.mrb[107].mxu1 }
 0x4ad   : > { %v13535_v5 = vpack.c.bf16 %v4251_v19, %v4247_v9  ;;  %v9605_v9 = vld [vmem:[%s15251_s4] ss:$60 sps:$4 sm:$0xff]  }
 0x4ae   : > { %4344 = vrot.lane.b32.xlu0 %v13533_v18, %s10097_s12  ;;  %v9608_v19 = vld [vmem:[%s15251_s4 + $0x7c] ss:$60 sps:$4 sm:$0xff]  }
 0x4af   : > { %4346 = vrot.lane.b32.xlu1 %v13535_v5, %s10097_s12  ;;  %5970 = vmatprep.subr.bf16.mxu0 %v13535_v5 }
 0x4b0   : > { %5971 = vmatpush1.bf16.msra.mxu0 %v13533_v18 }
 0x4b6   : > { %v4255_v56 = vpop.f32.mrb[108].mxu1 }
 0x4b7   : > { %v4257_v32 = vpop.f32.mrb[109].mxu1 }
 0x4b8   : > { %v4259_v38 = vpop.f32.mrb[110].mxu1 }
 0x4b9   : > { %v13543_v0 = vpack.c.bf16 %v4259_v38, %v4255_v56  ;;  %v4261_v17 = vpop.f32.mrb[111].mxu1 }
 0x4ba   : > { %v13545_v30 = vpack.c.bf16 %v4261_v17, %v4257_v32 }
 0x4bb   : > { %4348 = vrot.lane.b32.xlu0 %v13543_v0, %s10097_s12 }
 0x4bc   : > { %4350 = vrot.lane.b32.xlu1 %v13545_v30, %s10097_s12  ;;  %5972 = vmatprep.subr.bf16.mxu0 %v13545_v30 }
 0x4bd   : > { %5973 = vmatpush1.bf16.msra.mxu0 %v13543_v0 }
 0x4be   : > { %v4265_v16 = vpop.f32.mrb[112].mxu1 }
 0x4bf   : > { %v4267_v13 = vpop.f32.mrb[113].mxu1 }
 0x4c0   : > { %v4269_v36 = vpop.f32.mrb[114].mxu1 }
 0x4c1   : > { %v13553_v1 = vpack.c.bf16 %v4269_v36, %v4265_v16  ;;  %v4271_v61 = vpop.f32.mrb[115].mxu1 }
 0x4c2   : > { %v13555_v54 = vpack.c.bf16 %v4271_v61, %v4267_v13  ;;  %v9610_v13 = vld [vmem:[%s15251_s4 + $0x78] ss:$60 sps:$4 sm:$0xff]  }
 0x4c3   : > { %4352 = vrot.lane.b32.xlu0 %v13553_v1, %s10097_s12  ;;  %v9611_v61 = vld [vmem:[%s15251_s4 + $0xf4] ss:$60 sps:$4 sm:$0xff]  }
 0x4c4   : > { %4354 = vrot.lane.b32.xlu1 %v13555_v54, %s10097_s12  ;;  %5974 = vmatprep.subr.bf16.mxu0 %v13555_v54 }
 0x4c5   : > { %5975 = vmatpush1.bf16.msra.mxu0 %v13553_v1 }
 0x4c6   : > { %v4275_v35 = vpop.f32.mrb[116].mxu1 }
 0x4c7   : > { %v4277_v34 = vpop.f32.mrb[117].mxu1 }
 0x4c8   : > { %v4279_v41 = vpop.f32.mrb[118].mxu1 }
 0x4c9   : > { %v13563_v47 = vpack.c.bf16 %v4279_v41, %v4275_v35  ;;  %v4281_v22 = vpop.f32.mrb[119].mxu1 }
 0x4ca   : > { %v13565_v26 = vpack.c.bf16 %v4281_v22, %v4277_v34 }
 0x4cb   : > { %4356 = vrot.lane.b32.xlu0 %v13563_v47, %s10097_s12 }
 0x4cc   : > { %4358 = vrot.lane.b32.xlu1 %v13565_v26, %s10097_s12  ;;  %5976 = vmatprep.subr.bf16.mxu0 %v13565_v26 }
 0x4cd   : > { %5977 = vmatpush1.bf16.msra.mxu0 %v13563_v47 }
 0x4ce   : > { %v4285_v45 = vpop.f32.mrb[120].mxu1 }
 0x4cf   : > { %v4287_v51 = vpop.f32.mrb[121].mxu1 }
 0x4d0   : > { %v4289_v58 = vpop.f32.mrb[122].mxu1 }
 0x4d1   : > { %v13573_v11 = vpack.c.bf16 %v4289_v58, %v4285_v45  ;;  %v4291_v25 = vpop.f32.mrb[123].mxu1 }
 0x4d2   : > { %v13578_v49 = vpack.c.bf16 %v4291_v25, %v4287_v51  ;;  %v9613_v51 = vld [vmem:[%s15251_s4 + $0xf0] ss:$60 sps:$4 sm:$0xff]  }
 0x4d3   : > { %4360 = vrot.lane.b32.xlu0 %v13573_v11, %s10097_s12  ;;  %v9614_v25 = vld [vmem:[%s15251_s4 + $0x16c] ss:$60 sps:$4 sm:$0xff]  }
 0x4d4   : > { %4362 = vrot.lane.b32.xlu1 %v13578_v49, %s10097_s12  ;;  %5978 = vmatprep.subr.bf16.mxu0 %v13578_v49 }
 0x4d5   : > { %5979 = vmatpush1.bf16.msra.mxu0 %v13573_v11 }
 0x4d6   : > { %v4295_v24 = vpop.f32.mrb[124].mxu1 }
 0x4d7   : > { %v4297_v21 = vpop.f32.mrb[125].mxu1 }
 0x4d8   : > { %v4299_v28 = vpop.f32.mrb[126].mxu1 }
 0x4d9   : > { %v13586_v42 = vpack.c.bf16 %v4299_v28, %v4295_v24  ;;  %v4301_v50 = vpop.f32.mrb[127].mxu1 }
 0x4da   : > { %v13588_v48 = vpack.c.bf16 %v4301_v50, %v4297_v21 }
 0x4db   : > { %4364 = vrot.lane.b32.xlu0 %v13586_v42, %s10097_s12 }
 0x4dc   : > { %4366 = vrot.lane.b32.xlu1 %v13588_v48, %s10097_s12  ;;  %5980 = vmatprep.subr.bf16.mxu0 %v13588_v48  ;;  %s15785_s12 = smov 115  }
 0x4dd   : > { %5981 = vmatpush1.bf16.msra.mxu0 %v13586_v42 }
 0x4df   : > { %4393 = vrot.lane.b32.xlu0 %v13513_v7, %s10096_s11 }
 0x4e0   : > { %4395 = vrot.lane.b32.xlu1 %v13515_v39, %s10096_s11 }
 0x4e3   : > { %4397 = vrot.lane.b32.xlu0 %v13523_v14, %s10096_s11 }
 0x4e4   : > { %4399 = vrot.lane.b32.xlu1 %v13525_v44, %s10096_s11 }
 0x4e7   : > { %4401 = vrot.lane.b32.xlu0 %v13533_v18, %s10096_s11 }
 0x4e8   : > { %4403 = vrot.lane.b32.xlu1 %v13535_v5, %s10096_s11 }
 0x4eb   : > { %4405 = vrot.lane.b32.xlu0 %v13543_v0, %s10096_s11 }
 0x4ec   : > { %4407 = vrot.lane.b32.xlu1 %v13545_v30, %s10096_s11 }
 0x4ef   : > { %4409 = vrot.lane.b32.xlu0 %v13553_v1, %s10096_s11 }
 0x4f0   : > { %4411 = vrot.lane.b32.xlu1 %v13555_v54, %s10096_s11 }
 0x4f3   : > { %4413 = vrot.lane.b32.xlu0 %v13563_v47, %s10096_s11 }
 0x4f4   : > { %4415 = vrot.lane.b32.xlu1 %v13565_v26, %s10096_s11 }
 0x4f7   : > { %4417 = vrot.lane.b32.xlu0 %v13573_v11, %s10096_s11 }
 0x4f8   : > { %4419 = vrot.lane.b32.xlu1 %v13578_v49, %s10096_s11 }
 0x4fb   : > { %4421 = vrot.lane.b32.xlu0 %v13586_v42, %s10096_s11 }
 0x4fc   : > { %4423 = vrot.lane.b32.xlu1 %v13588_v48, %s10096_s11 }
 0x4ff   : > { %4450 = vrot.lane.b32.xlu0 %v13513_v7, %s10098_s13 }
 0x500   : > { %4452 = vrot.lane.b32.xlu1 %v13515_v39, %s10098_s13 }
 0x503   : > { %4454 = vrot.lane.b32.xlu0 %v13523_v14, %s10098_s13 }
 0x504   : > { %4456 = vrot.lane.b32.xlu1 %v13525_v44, %s10098_s13 }
 0x507   : > { %4458 = vrot.lane.b32.xlu0 %v13533_v18, %s10098_s13 }
 0x508   : > { %4460 = vrot.lane.b32.xlu1 %v13535_v5, %s10098_s13 }
 0x50b   : > { %4462 = vrot.lane.b32.xlu0 %v13543_v0, %s10098_s13 }
 0x50c   : > { %4464 = vrot.lane.b32.xlu1 %v13545_v30, %s10098_s13 }
 0x50d   : > { %v4337_v57 = vpop.permute.xlu0 %4336 }
 0x50e   : > { %v4339_v37 = vpop.permute.xlu1 %4338 }
 0x50f   : > { %5982 = vmatprep.subr.bf16.mxu0 %v4339_v37  ;;  %v4369_v20 = vsel %vm330_vm0, %v4337_v57, %v4339_v37  ;;  %4466 = vrot.lane.b32.xlu0 %v13553_v1, %s10098_s13  ;;  %v9616_v57 = vld [vmem:[%s15251_s4 + $0x168] ss:$60 sps:$4 sm:$0xff]  }
 0x510   : > { %5983 = vmatpush1.bf16.msra.mxu0 %v4369_v20  ;;  %4468 = vrot.lane.b32.xlu1 %v13555_v54, %s10098_s13  ;;  %v9617_v20 = vld [vmem:[%s15251_s4 + $0x1e4] ss:$60 sps:$4 sm:$0xff]  }
 0x513   : > { %4470 = vrot.lane.b32.xlu0 %v13563_v47, %s10098_s13 }
 0x514   : > { %4472 = vrot.lane.b32.xlu1 %v13565_v26, %s10098_s13 }
 0x517   : > { %4474 = vrot.lane.b32.xlu0 %v13573_v11, %s10098_s13 }
 0x518   : > { %4476 = vrot.lane.b32.xlu1 %v13578_v49, %s10098_s13  ;;  %v4341_v10 = vpop.permute.xlu0 %4340 }
 0x519   : > { %v4343_v33 = vpop.permute.xlu1 %4342 }
 0x51a   : > { %5984 = vmatprep.subr.bf16.mxu0 %v4343_v33  ;;  %v4370_v3 = vsel %vm330_vm0, %v4341_v10, %v4343_v33 }
 0x51b   : > { %4478 = vrot.lane.b32.xlu0 %v13586_v42, %s10098_s13  ;;  %5985 = vmatpush1.bf16.msra.mxu0 %v4370_v3 }
 0x51c   : > { %4480 = vrot.lane.b32.xlu1 %v13588_v48, %s10098_s13 }
 0x51f   : > { %4507 = vrot.lane.b32.xlu0 %v13513_v7, %s10099_s14 }
 0x520   : > { %4509 = vrot.lane.b32.xlu1 %v13515_v39, %s10099_s14  ;;  %v4345_v8 = vpop.permute.xlu0 %4344 }
 0x521   : > { %v4347_v52 = vpop.permute.xlu1 %4346 }
 0x522   : > { %5986 = vmatprep.subr.bf16.mxu0 %v4347_v52  ;;  %v4371_v2 = vsel %vm330_vm0, %v4345_v8, %v4347_v52 }
 0x523   : > { %4511 = vrot.lane.b32.xlu0 %v13523_v14, %s10099_s14  ;;  %5987 = vmatpush1.bf16.msra.mxu0 %v4371_v2  ;;  %v9619_v2 = vld [vmem:[%s15251_s4 + $0x1e0] ss:$60 sps:$4 sm:$0xff]  }
 0x524   : > { %4513 = vrot.lane.b32.xlu1 %v13525_v44, %s10099_s14 }
 0x527   : > { %4515 = vrot.lane.b32.xlu0 %v13533_v18, %s10099_s14 }
 0x528   : > { %4517 = vrot.lane.b32.xlu1 %v13535_v5, %s10099_s14 }
 0x52b   : > { %4519 = vrot.lane.b32.xlu0 %v13543_v0, %s10099_s14 }
 0x52c   : > { %4521 = vrot.lane.b32.xlu1 %v13545_v30, %s10099_s14 }
 0x52d   : > { %v4349_v59 = vpop.permute.xlu0 %4348 }
 0x52e   : > { %v4351_v6 = vpop.permute.xlu1 %4350 }
 0x52f   : > { %4523 = vrot.lane.b32.xlu0 %v13553_v1, %s10099_s14  ;;  %5988 = vmatprep.subr.bf16.mxu0 %v4351_v6  ;;  %v4372_v40 = vsel %vm330_vm0, %v4349_v59, %v4351_v6  ;;  %v9620_v6 = vld [vmem:[%s15251_s4 + $0x25c] ss:$60 sps:$4 sm:$0xff]  }
 0x530   : > { %4525 = vrot.lane.b32.xlu1 %v13555_v54, %s10099_s14  ;;  %5989 = vmatpush1.bf16.msra.mxu0 %v4372_v40 }
 0x533   : > { %4527 = vrot.lane.b32.xlu0 %v13563_v47, %s10099_s14 }
 0x534   : > { %4529 = vrot.lane.b32.xlu1 %v13565_v26, %s10099_s14 }
 0x535   : > { %v4353_v4 = vpop.permute.xlu0 %4352 }
 0x536   : > { %v4355_v53 = vpop.permute.xlu1 %4354 }
 0x537   : > { %4531 = vrot.lane.b32.xlu0 %v13573_v11, %s10099_s14  ;;  %5990 = vmatprep.subr.bf16.mxu0 %v4355_v53  ;;  %v4373_v43 = vsel %vm330_vm0, %v4353_v4, %v4355_v53 }
 0x538   : > { %4533 = vrot.lane.b32.xlu1 %v13578_v49, %s10099_s14  ;;  %5991 = vmatpush1.bf16.msra.mxu0 %v4373_v43 }
 0x53b   : > { %4535 = vrot.lane.b32.xlu0 %v13586_v42, %s10099_s14 }
 0x53c   : > { %4537 = vrot.lane.b32.xlu1 %v13588_v48, %s10099_s14  ;;  %s15776_s14 = smov 116  }
 0x53d   : > { %v4357_v31 = vpop.permute.xlu0 %4356 }
 0x53e   : > { %v4359_v15 = vpop.permute.xlu1 %4358 }
 0x53f   : > { %4564 = vrot.lane.b32.xlu0 %v13513_v7, %s10100_s15  ;;  %5992 = vmatprep.subr.bf16.mxu0 %v4359_v15  ;;  %v4374_v55 = vsel %vm330_vm0, %v4357_v31, %v4359_v15  ;;  %v9622_v15 = vld [vmem:[%s15251_s4 + $0x258] ss:$60 sps:$4 sm:$0xff]  }
 0x540   : > { %4566 = vrot.lane.b32.xlu1 %v13515_v39, %s10100_s15  ;;  %5993 = vmatpush1.bf16.msra.mxu0 %v4374_v55 }
 0x543   : > { %4568 = vrot.lane.b32.xlu0 %v13523_v14, %s10100_s15 }
 0x544   : > { %4570 = vrot.lane.b32.xlu1 %v13525_v44, %s10100_s15 }
 0x545   : > { %v4361_v46 = vpop.permute.xlu0 %4360 }
 0x546   : > { %v4363_v23 = vpop.permute.xlu1 %4362 }
 0x547   : > { %4572 = vrot.lane.b32.xlu0 %v13533_v18, %s10100_s15  ;;  %5994 = vmatprep.subr.bf16.mxu0 %v4363_v23  ;;  %v4375_v29 = vsel %vm330_vm0, %v4361_v46, %v4363_v23  ;;  %v9623_v46 = vld [vmem:[%s15251_s4 + $0x2d4] ss:$60 sps:$4 sm:$0xff]  }
 0x548   : > { %4574 = vrot.lane.b32.xlu1 %v13535_v5, %s10100_s15  ;;  %5995 = vmatpush1.bf16.msra.mxu0 %v4375_v29 }
 0x54b   : > { %4576 = vrot.lane.b32.xlu0 %v13543_v0, %s10100_s15 }
 0x54c   : > { %4578 = vrot.lane.b32.xlu1 %v13545_v30, %s10100_s15 }
 0x54d   : > { %v4365_v60 = vpop.permute.xlu0 %4364 }
 0x54e   : > { %v4367_v27 = vpop.permute.xlu1 %4366 }
 0x54f   : > { %4580 = vrot.lane.b32.xlu0 %v13553_v1, %s10100_s15  ;;  %5996 = vmatprep.subr.bf16.mxu0 %v4367_v27  ;;  %v4376_v62 = vsel %vm330_vm0, %v4365_v60, %v4367_v27  ;;  %vm15764_vm0 = vcmask 990208  }
 0x550   : > { %4582 = vrot.lane.b32.xlu1 %v13555_v54, %s10100_s15  ;;  %5997 = vmatpush1.bf16.msra.mxu0 %v4376_v62  ;;  %vm15771_vm9 = vmmov %vm15764_vm0 }
 0x551   : > { %v4394_v63 = vpop.permute.xlu0 %4393  ;;  %vm15772_vm8 = vmmov %vm15764_vm0 }
 0x552   : > { %v4396_v56 = vpop.permute.xlu1 %4395 }
 0x553   : > { %4584 = vrot.lane.b32.xlu0 %v13563_v47, %s10100_s15  ;;  %5999 = vmatmul.mubr.bf16.vlgmr.msra.gmra.mrb[32].mxu0 %v9605_v9  ;;  %v4426_v32 = vsel %vm354_vm1, %v4394_v63, %v4396_v56  ;;  %v9625_v9 = vld [vmem:[%s15251_s4 + $0x2d0] ss:$60 sps:$4 sm:$0xff]  }
 0x554   : > { %6079 = vmatprep.subr.bf16.mxu0 %v4396_v56  ;;  %4586 = vrot.lane.b32.xlu1 %v13565_v26, %s10100_s15 }
 0x555   : > { %6080 = vmatpush1.bf16.msra.mxu0 %v4426_v32  ;;  %v4398_v38 = vpop.permute.xlu0 %4397  ;;  %6008 = vmatprep.mubr.bf16.mxu0 %v9608_v19  ;;  %v9626_v19 = vld [vmem:[%s15251_s4 + $0x34c] ss:$60 sps:$4 sm:$0xff]  }
 0x556   : > { %v4400_v17 = vpop.permute.xlu1 %4399 }
 0x557   : > { %4588 = vrot.lane.b32.xlu0 %v13573_v11, %s10100_s15  ;;  %6081 = vmatprep.subr.bf16.mxu0 %v4400_v17  ;;  %v4427_v16 = vsel %vm354_vm1, %v4398_v38, %v4400_v17 }
 0x558   : > { %4590 = vrot.lane.b32.xlu1 %v13578_v49, %s10100_s15 }
 0x559   : > { %6082 = vmatpush1.bf16.msra.mxu0 %v4427_v16  ;;  %v4402_v36 = vpop.permute.xlu0 %4401 }
 0x55a   : > { %v4404_v35 = vpop.permute.xlu1 %4403 }
 0x55b   : > { %4592 = vrot.lane.b32.xlu0 %v13586_v42, %s10100_s15  ;;  %6009 = vmatmul.mubr.bf16.gmra.mrb[36].mxu0 %v9610_v13  ;;  %v4428_v34 = vsel %vm354_vm1, %v4402_v36, %v4404_v35  ;;  %v9628_v13 = vld [vmem:[%s15251_s4 + $0x348] ss:$60 sps:$4 sm:$0xff]  }
 0x55c   : > { %6083 = vmatprep.subr.bf16.mxu0 %v4404_v35  ;;  %4594 = vrot.lane.b32.xlu1 %v13588_v48, %s10100_s15 }
 0x55d   : > { %6084 = vmatpush1.bf16.msra.mxu0 %v4428_v34  ;;  %v4406_v41 = vpop.permute.xlu0 %4405  ;;  %6018 = vmatprep.mubr.bf16.mxu0 %v9611_v61  ;;  %v9631_v61 = vld [vmem:[%s15251_s4 + $0xc] ss:$60 sps:$4 sm:$0xff]  }
 0x55e   : > { %v4408_v22 = vpop.permute.xlu1 %4407 }
 0x55f   : > { %4621 = vrot.lane.b32.xlu0 %v13513_v7, %s10101_s16  ;;  %6085 = vmatprep.subr.bf16.mxu0 %v4408_v22  ;;  %v4429_v45 = vsel %vm354_vm1, %v4406_v41, %v4408_v22 }
 0x560   : > { %4623 = vrot.lane.b32.xlu1 %v13515_v39, %s10101_s16 }
 0x561   : > { %6086 = vmatpush1.bf16.msra.mxu0 %v4429_v45  ;;  %v4410_v58 = vpop.permute.xlu0 %4409 }
 0x562   : > { %v4412_v12 = vpop.permute.xlu1 %4411 }
 0x563   : > { %4625 = vrot.lane.b32.xlu0 %v13523_v14, %s10101_s16  ;;  %6019 = vmatmul.mubr.bf16.gmra.mrb[40].mxu0 %v9613_v51  ;;  %v4430_v24 = vsel %vm354_vm1, %v4410_v58, %v4412_v12  ;;  %v9629_v51 = vld [vmem:[%s15251_s4 + $0x8] ss:$60 sps:$4 sm:$0xff]  }
 0x564   : > { %6087 = vmatprep.subr.bf16.mxu0 %v4412_v12  ;;  %4627 = vrot.lane.b32.xlu1 %v13525_v44, %s10101_s16 }
 0x565   : > { %6088 = vmatpush1.bf16.msra.mxu0 %v4430_v24  ;;  %v4414_v21 = vpop.permute.xlu0 %4413  ;;  %6028 = vmatprep.mubr.bf16.mxu0 %v9614_v25  ;;  %v9632_v25 = vld [vmem:[%s15251_s4 + $0x84] ss:$60 sps:$4 sm:$0xff]  }
 0x566   : > { %v4416_v28 = vpop.permute.xlu1 %4415 }
 0x567   : > { %4629 = vrot.lane.b32.xlu0 %v13533_v18, %s10101_s16  ;;  %6089 = vmatprep.subr.bf16.mxu0 %v4416_v28  ;;  %v4431_v50 = vsel %vm354_vm1, %v4414_v21, %v4416_v28 }
 0x568   : > { %4631 = vrot.lane.b32.xlu1 %v13535_v5, %s10101_s16 }
 0x569   : > { %6090 = vmatpush1.bf16.msra.mxu0 %v4431_v50  ;;  %v4418_v37 = vpop.permute.xlu0 %4417 }
 0x56a   : > { %v4420_v10 = vpop.permute.xlu1 %4419 }
 0x56b   : > { %4633 = vrot.lane.b32.xlu0 %v13543_v0, %s10101_s16  ;;  %6029 = vmatmul.mubr.bf16.gmra.mrb[44].mxu0 %v9616_v57  ;;  %v4432_v33 = vsel %vm354_vm1, %v4418_v37, %v4420_v10  ;;  %v9634_v57 = vld [vmem:[%s15251_s4 + $0x80] ss:$60 sps:$4 sm:$0xff]  }
 0x56c   : > { %6091 = vmatprep.subr.bf16.mxu0 %v4420_v10  ;;  %4635 = vrot.lane.b32.xlu1 %v13545_v30, %s10101_s16 }
 0x56d   : > { %6092 = vmatpush1.bf16.msra.mxu0 %v4432_v33  ;;  %v4422_v3 = vpop.permute.xlu0 %4421  ;;  %6038 = vmatprep.mubr.bf16.mxu0 %v9617_v20  ;;  %v9635_v20 = vld [vmem:[%s15251_s4 + $0xfc] ss:$60 sps:$4 sm:$0xff]  }
 0x56e   : > { %v4424_v8 = vpop.permute.xlu1 %4423 }
 0x56f   : > { %4637 = vrot.lane.b32.xlu0 %v13553_v1, %s10101_s16  ;;  %6093 = vmatprep.subr.bf16.mxu0 %v4424_v8  ;;  %v4433_v52 = vsel %vm354_vm1, %v4422_v3, %v4424_v8  ;;  %vm15765_vm1 = vmmov %vm15764_vm0 }
 0x570   : > { %4639 = vrot.lane.b32.xlu1 %v13555_v54, %s10101_s16 }
 0x571   : > { %6094 = vmatpush1.bf16.msra.mxu0 %v4433_v52  ;;  %v4451_v59 = vpop.permute.xlu0 %4450 }
 0x572   : > { %v4453_v40 = vpop.permute.xlu1 %4452 }
 0x573   : > { %4641 = vrot.lane.b32.xlu0 %v13563_v47, %s10101_s16  ;;  %6039 = vmatmul.mubr.bf16.gmra.mrb[48].mxu0 %v9619_v2  ;;  %v4483_v4 = vsel %vm378_vm2, %v4451_v59, %v4453_v40  ;;  %v9637_v2 = vld [vmem:[%s15251_s4 + $0xf8] ss:$60 sps:$4 sm:$0xff]  }
 0x574   : > { %6095 = vmatprep.subr.bf16.mxu0 %v4453_v40  ;;  %4643 = vrot.lane.b32.xlu1 %v13565_v26, %s10101_s16 }
 0x575   : > { %6096 = vmatpush1.bf16.msra.mxu0 %v4483_v4  ;;  %v4455_v53 = vpop.permute.xlu0 %4454  ;;  %6048 = vmatprep.mubr.bf16.mxu0 %v9620_v6  ;;  %v9638_v6 = vld [vmem:[%s15251_s4 + $0x174] ss:$60 sps:$4 sm:$0xff]  }
 0x576   : > { %v4457_v43 = vpop.permute.xlu1 %4456 }
 0x577   : > { %4645 = vrot.lane.b32.xlu0 %v13573_v11, %s10101_s16  ;;  %6097 = vmatprep.subr.bf16.mxu0 %v4457_v43  ;;  %v4484_v31 = vsel %vm378_vm2, %v4455_v53, %v4457_v43 }
 0x578   : > { %4647 = vrot.lane.b32.xlu1 %v13578_v49, %s10101_s16 }
 0x579   : > { %6098 = vmatpush1.bf16.msra.mxu0 %v4484_v31  ;;  %v4459_v55 = vpop.permute.xlu0 %4458 }
 0x57a   : > { %v4461_v23 = vpop.permute.xlu1 %4460 }
 0x57b   : > { %4649 = vrot.lane.b32.xlu0 %v13586_v42, %s10101_s16  ;;  %6049 = vmatmul.mubr.bf16.gmra.mrb[52].mxu0 %v9622_v15  ;;  %v4485_v29 = vsel %vm378_vm2, %v4459_v55, %v4461_v23  ;;  %v9640_v15 = vld [vmem:[%s15251_s4 + $0x170] ss:$60 sps:$4 sm:$0xff]  }
 0x57c   : > { %6099 = vmatprep.subr.bf16.mxu0 %v4461_v23  ;;  %4651 = vrot.lane.b32.xlu1 %v13588_v48, %s10101_s16 }
 0x57d   : > { %6100 = vmatpush1.bf16.msra.mxu0 %v4485_v29  ;;  %v4463_v60 = vpop.permute.xlu0 %4462  ;;  %6058 = vmatprep.mubr.bf16.mxu0 %v9623_v46  ;;  %v9641_v46 = vld [vmem:[%s15251_s4 + $0x1ec] ss:$60 sps:$4 sm:$0xff]  }
 0x57e   : > { %v4465_v27 = vpop.permute.xlu1 %4464 }
 0x57f   : > { %4678 = vrot.lane.b32.xlu0 %v13513_v7, %s10102_s17  ;;  %6101 = vmatprep.subr.bf16.mxu0 %v4465_v27  ;;  %v4486_v62 = vsel %vm378_vm2, %v4463_v60, %v4465_v27 }
 0x580   : > { %4680 = vrot.lane.b32.xlu1 %v13515_v39, %s10102_s17 }
 0x581   : > { %6102 = vmatpush1.bf16.msra.mxu0 %v4486_v62  ;;  %v4467_v63 = vpop.permute.xlu0 %4466 }
 0x582   : > { %v4469_v56 = vpop.permute.xlu1 %4468 }
 0x583   : > { %4682 = vrot.lane.b32.xlu0 %v13523_v14, %s10102_s17  ;;  %6059 = vmatmul.mubr.bf16.gmra.mrb[56].mxu0 %v9625_v9  ;;  %v4487_v32 = vsel %vm378_vm2, %v4467_v63, %v4469_v56  ;;  %v9643_v9 = vld [vmem:[%s15251_s4 + $0x1e8] ss:$60 sps:$4 sm:$0xff]  }
 0x584   : > { %6103 = vmatprep.subr.bf16.mxu0 %v4469_v56  ;;  %4684 = vrot.lane.b32.xlu1 %v13525_v44, %s10102_s17 }
 0x585   : > { %6104 = vmatpush1.bf16.msra.mxu0 %v4487_v32  ;;  %v4471_v38 = vpop.permute.xlu0 %4470  ;;  %6068 = vmatprep.mubr.bf16.mxu0 %v9626_v19  ;;  %v9644_v19 = vld [vmem:[%s15251_s4 + $0x264] ss:$60 sps:$4 sm:$0xff]  }
 0x586   : > { %v4473_v17 = vpop.permute.xlu1 %4472 }
 0x587   : > { %4686 = vrot.lane.b32.xlu0 %v13533_v18, %s10102_s17  ;;  %6105 = vmatprep.subr.bf16.mxu0 %v4473_v17  ;;  %v4488_v16 = vsel %vm378_vm2, %v4471_v38, %v4473_v17 }
 0x588   : > { %4688 = vrot.lane.b32.xlu1 %v13535_v5, %s10102_s17 }
 0x589   : > { %6106 = vmatpush1.bf16.msra.mxu0 %v4488_v16  ;;  %v4475_v36 = vpop.permute.xlu0 %4474 }
 0x58a   : > { %v4477_v35 = vpop.permute.xlu1 %4476 }
 0x58b   : > { %4690 = vrot.lane.b32.xlu0 %v13543_v0, %s10102_s17  ;;  %6069 = vmatmul.mubr.bf16.gmra.mrb[60].mxu0 %v9628_v13  ;;  %v4489_v34 = vsel %vm378_vm2, %v4475_v36, %v4477_v35  ;;  %v9646_v13 = vld [vmem:[%s15251_s4 + $0x260] ss:$60 sps:$4 sm:$0xff]  }
 0x58c   : > { %6107 = vmatprep.subr.bf16.mxu0 %v4477_v35  ;;  %4692 = vrot.lane.b32.xlu1 %v13545_v30, %s10102_s17 }
 0x58d   : > { %6108 = vmatpush1.bf16.msra.mxu0 %v4489_v34  ;;  %v4479_v41 = vpop.permute.xlu0 %4478  ;;  %6111 = vmatprep.mubr.bf16.mxu0 %v9631_v61  ;;  %v9647_v61 = vld [vmem:[%s15251_s4 + $0x2dc] ss:$60 sps:$4 sm:$0xff]  }
 0x58e   : > { %v4481_v22 = vpop.permute.xlu1 %4480 }
 0x58f   : > { %4694 = vrot.lane.b32.xlu0 %v13553_v1, %s10102_s17  ;;  %6109 = vmatprep.subr.bf16.mxu0 %v4481_v22  ;;  %v4490_v45 = vsel %vm378_vm2, %v4479_v41, %v4481_v22  ;;  %vm15766_vm2 = vmmov %vm15764_vm0 }
 0x590   : > { %4696 = vrot.lane.b32.xlu1 %v13555_v54, %s10102_s17 }
 0x591   : > { %6110 = vmatpush1.bf16.msra.mxu0 %v4490_v45  ;;  %v4508_v58 = vpop.permute.xlu0 %4507 }
 0x592   : > { %v4510_v12 = vpop.permute.xlu1 %4509 }
 0x593   : > { %4698 = vrot.lane.b32.xlu0 %v13563_v47, %s10102_s17  ;;  %6192 = vmatprep.subr.bf16.mxu0 %v4510_v12  ;;  %v4540_v24 = vsel %vm402_vm3, %v4508_v58, %v4510_v12 }
 0x594   : > { %6112 = vmatmul.mubr.bf16.vlgmr.msra.gmra.mrb[32].mxu0 %v9629_v51  ;;  %4700 = vrot.lane.b32.xlu1 %v13565_v26, %s10102_s17  ;;  %v9649_v51 = vld [vmem:[%s15251_s4 + $0x2d8] ss:$60 sps:$4 sm:$0xff]  }
 0x595   : > { %6193 = vmatpush1.bf16.msra.mxu0 %v4540_v24  ;;  %v4512_v21 = vpop.permute.xlu0 %4511  ;;  %6121 = vmatprep.mubr.bf16.mxu0 %v9632_v25  ;;  %v9650_v25 = vld [vmem:[%s15251_s4 + $0x354] ss:$60 sps:$4 sm:$0xff]  }
 0x596   : > { %v4514_v28 = vpop.permute.xlu1 %4513 }
 0x597   : > { %4702 = vrot.lane.b32.xlu0 %v13573_v11, %s10102_s17  ;;  %6194 = vmatprep.subr.bf16.mxu0 %v4514_v28  ;;  %v4541_v50 = vsel %vm402_vm3, %v4512_v21, %v4514_v28 }
 0x598   : > { %4704 = vrot.lane.b32.xlu1 %v13578_v49, %s10102_s17 }
 0x599   : > { %6195 = vmatpush1.bf16.msra.mxu0 %v4541_v50  ;;  %v4516_v37 = vpop.permute.xlu0 %4515 }
 0x59a   : > { %v4518_v10 = vpop.permute.xlu1 %4517 }
 0x59b   : > { %4706 = vrot.lane.b32.xlu0 %v13586_v42, %s10102_s17  ;;  %6196 = vmatprep.subr.bf16.mxu0 %v4518_v10  ;;  %v4542_v33 = vsel %vm402_vm3, %v4516_v37, %v4518_v10 }
 0x59c   : > { %6122 = vmatmul.mubr.bf16.gmra.mrb[36].mxu0 %v9634_v57  ;;  %4708 = vrot.lane.b32.xlu1 %v13588_v48, %s10102_s17  ;;  %v9652_v57 = vld [vmem:[%s15251_s4 + $0x350] ss:$60 sps:$4 sm:$0xff]  }
 0x59d   : > { %6197 = vmatpush1.bf16.msra.mxu0 %v4542_v33  ;;  %v4520_v3 = vpop.permute.xlu0 %4519  ;;  %6131 = vmatprep.mubr.bf16.mxu0 %v9635_v20  ;;  %v9655_v20 = vld [vmem:[%s15251_s4 + $0x14] ss:$60 sps:$4 sm:$0xff]  }
 0x59e   : > { %v4522_v8 = vpop.permute.xlu1 %4521 }
 0x59f   : > { %4735 = vrot.lane.b32.xlu0 %v13513_v7, %s10103_s18  ;;  %6198 = vmatprep.subr.bf16.mxu0 %v4522_v8  ;;  %v4543_v52 = vsel %vm402_vm3, %v4520_v3, %v4522_v8 }
 0x5a0   : > { %4737 = vrot.lane.b32.xlu1 %v13515_v39, %s10103_s18 }
 0x5a1   : > { %6199 = vmatpush1.bf16.msra.mxu0 %v4543_v52  ;;  %v4524_v59 = vpop.permute.xlu0 %4523 }
 0x5a2   : > { %v4526_v40 = vpop.permute.xlu1 %4525 }
 0x5a3   : > { %4739 = vrot.lane.b32.xlu0 %v13523_v14, %s10103_s18  ;;  %6200 = vmatprep.subr.bf16.mxu0 %v4526_v40  ;;  %v4544_v4 = vsel %vm402_vm3, %v4524_v59, %v4526_v40 }
 0x5a4   : > { %6132 = vmatmul.mubr.bf16.gmra.mrb[40].mxu0 %v9637_v2  ;;  %4741 = vrot.lane.b32.xlu1 %v13525_v44, %s10103_s18  ;;  %v9653_v2 = vld [vmem:[%s15251_s4 + $0x10] ss:$60 sps:$4 sm:$0xff]  }
 0x5a5   : > { %6201 = vmatpush1.bf16.msra.mxu0 %v4544_v4  ;;  %v4528_v53 = vpop.permute.xlu0 %4527  ;;  %6141 = vmatprep.mubr.bf16.mxu0 %v9638_v6  ;;  %v9656_v6 = vld [vmem:[%s15251_s4 + $0x8c] ss:$60 sps:$4 sm:$0xff]  }
 0x5a6   : > { %v4530_v43 = vpop.permute.xlu1 %4529 }
 0x5a7   : > { %4743 = vrot.lane.b32.xlu0 %v13533_v18, %s10103_s18  ;;  %6202 = vmatprep.subr.bf16.mxu0 %v4530_v43  ;;  %v4545_v31 = vsel %vm402_vm3, %v4528_v53, %v4530_v43 }
 0x5a8   : > { %4745 = vrot.lane.b32.xlu1 %v13535_v5, %s10103_s18 }
 0x5a9   : > { %6203 = vmatpush1.bf16.msra.mxu0 %v4545_v31  ;;  %v4532_v55 = vpop.permute.xlu0 %4531 }
 0x5aa   : > { %v4534_v23 = vpop.permute.xlu1 %4533 }
 0x5ab   : > { %4747 = vrot.lane.b32.xlu0 %v13543_v0, %s10103_s18  ;;  %6204 = vmatprep.subr.bf16.mxu0 %v4534_v23  ;;  %v4546_v29 = vsel %vm402_vm3, %v4532_v55, %v4534_v23 }
 0x5ac   : > { %6142 = vmatmul.mubr.bf16.gmra.mrb[44].mxu0 %v9640_v15  ;;  %4749 = vrot.lane.b32.xlu1 %v13545_v30, %s10103_s18  ;;  %v9658_v15 = vld [vmem:[%s15251_s4 + $0x88] ss:$60 sps:$4 sm:$0xff]  }
 0x5ad   : > { %6205 = vmatpush1.bf16.msra.mxu0 %v4546_v29  ;;  %v4536_v60 = vpop.permute.xlu0 %4535  ;;  %6151 = vmatprep.mubr.bf16.mxu0 %v9641_v46  ;;  %v9659_v46 = vld [vmem:[%s15251_s4 + $0x104] ss:$60 sps:$4 sm:$0xff]  }
 0x5ae   : > { %v4538_v27 = vpop.permute.xlu1 %4537 }
 0x5af   : > { %4751 = vrot.lane.b32.xlu0 %v13553_v1, %s10103_s18  ;;  %6206 = vmatprep.subr.bf16.mxu0 %v4538_v27  ;;  %v4547_v62 = vsel %vm402_vm3, %v4536_v60, %v4538_v27  ;;  %vm15768_vm3 = vmmov %vm15764_vm0 }
 0x5b0   : > { %4753 = vrot.lane.b32.xlu1 %v13555_v54, %s10103_s18 }
 0x5b1   : > { %6207 = vmatpush1.bf16.msra.mxu0 %v4547_v62  ;;  %v4565_v63 = vpop.permute.xlu0 %4564 }
 0x5b2   : > { %v4567_v56 = vpop.permute.xlu1 %4566 }
 0x5b3   : > { %4755 = vrot.lane.b32.xlu0 %v13563_v47, %s10103_s18  ;;  %6208 = vmatprep.subr.bf16.mxu0 %v4567_v56  ;;  %v4597_v32 = vsel %vm426_vm4, %v4565_v63, %v4567_v56 }
 0x5b4   : > { %6152 = vmatmul.mubr.bf16.gmra.mrb[48].mxu0 %v9643_v9  ;;  %4757 = vrot.lane.b32.xlu1 %v13565_v26, %s10103_s18  ;;  %v9661_v9 = vld [vmem:[%s15251_s4 + $0x100] ss:$60 sps:$4 sm:$0xff]  }
 0x5b5   : > { %6209 = vmatpush1.bf16.msra.mxu0 %v4597_v32  ;;  %v4569_v38 = vpop.permute.xlu0 %4568  ;;  %6161 = vmatprep.mubr.bf16.mxu0 %v9644_v19  ;;  %v9662_v19 = vld [vmem:[%s15251_s4 + $0x17c] ss:$60 sps:$4 sm:$0xff]  }
 0x5b6   : > { %v4571_v17 = vpop.permute.xlu1 %4570 }
 0x5b7   : > { %4759 = vrot.lane.b32.xlu0 %v13573_v11, %s10103_s18  ;;  %6210 = vmatprep.subr.bf16.mxu0 %v4571_v17  ;;  %v4598_v16 = vsel %vm426_vm4, %v4569_v38, %v4571_v17 }
 0x5b8   : > { %4761 = vrot.lane.b32.xlu1 %v13578_v49, %s10103_s18 }
 0x5b9   : > { %6211 = vmatpush1.bf16.msra.mxu0 %v4598_v16  ;;  %v4573_v36 = vpop.permute.xlu0 %4572 }
 0x5ba   : > { %v4575_v35 = vpop.permute.xlu1 %4574 }
 0x5bb   : > { %4763 = vrot.lane.b32.xlu0 %v13586_v42, %s10103_s18  ;;  %6212 = vmatprep.subr.bf16.mxu0 %v4575_v35  ;;  %v4599_v34 = vsel %vm426_vm4, %v4573_v36, %v4575_v35 }
 0x5bc   : > { %6162 = vmatmul.mubr.bf16.gmra.mrb[52].mxu0 %v9646_v13  ;;  %4765 = vrot.lane.b32.xlu1 %v13588_v48, %s10103_s18  ;;  %v9664_v13 = vld [vmem:[%s15251_s4 + $0x178] ss:$60 sps:$4 sm:$0xff]  }
 0x5bd   : > { %6213 = vmatpush1.bf16.msra.mxu0 %v4599_v34  ;;  %v4577_v41 = vpop.permute.xlu0 %4576  ;;  %6171 = vmatprep.mubr.bf16.mxu0 %v9647_v61  ;;  %v9665_v61 = vld [vmem:[%s15251_s4 + $0x1f4] ss:$60 sps:$4 sm:$0xff]  }
 0x5be   : > { %v4579_v22 = vpop.permute.xlu1 %4578 }
 0x5bf   : > { %4792 = vrot.lane.b32.xlu0 %v13513_v7, %s15763_s22  ;;  %6214 = vmatprep.subr.bf16.mxu0 %v4579_v22  ;;  %v4600_v45 = vsel %vm426_vm4, %v4577_v41, %v4579_v22 }
 0x5c0   : > { %4794 = vrot.lane.b32.xlu1 %v13515_v39, %s15763_s22 }
 0x5c1   : > { %6215 = vmatpush1.bf16.msra.mxu0 %v4600_v45  ;;  %v4581_v58 = vpop.permute.xlu0 %4580 }
 0x5c2   : > { %v4583_v12 = vpop.permute.xlu1 %4582 }
 0x5c3   : > { %4796 = vrot.lane.b32.xlu0 %v13523_v14, %s15763_s22  ;;  %6216 = vmatprep.subr.bf16.mxu0 %v4583_v12  ;;  %v4601_v24 = vsel %vm426_vm4, %v4581_v58, %v4583_v12 }
 0x5c4   : > { %6172 = vmatmul.mubr.bf16.gmra.mrb[56].mxu0 %v9649_v51  ;;  %4798 = vrot.lane.b32.xlu1 %v13525_v44, %s15763_s22  ;;  %v9667_v51 = vld [vmem:[%s15251_s4 + $0x1f0] ss:$60 sps:$4 sm:$0xff]  }
 0x5c5   : > { %6217 = vmatpush1.bf16.msra.mxu0 %v4601_v24  ;;  %v4585_v21 = vpop.permute.xlu0 %4584  ;;  %6181 = vmatprep.mubr.bf16.mxu0 %v9650_v25  ;;  %v9668_v25 = vld [vmem:[%s15251_s4 + $0x26c] ss:$60 sps:$4 sm:$0xff]  }
 0x5c6   : > { %v4587_v28 = vpop.permute.xlu1 %4586 }
 0x5c7   : > { %4800 = vrot.lane.b32.xlu0 %v13533_v18, %s15763_s22  ;;  %6218 = vmatprep.subr.bf16.mxu0 %v4587_v28  ;;  %v4602_v50 = vsel %vm426_vm4, %v4585_v21, %v4587_v28 }
 0x5c8   : > { %4802 = vrot.lane.b32.xlu1 %v13535_v5, %s15763_s22 }
 0x5c9   : > { %6219 = vmatpush1.bf16.msra.mxu0 %v4602_v50  ;;  %v4589_v37 = vpop.permute.xlu0 %4588 }
 0x5ca   : > { %v4591_v10 = vpop.permute.xlu1 %4590 }
 0x5cb   : > { %4804 = vrot.lane.b32.xlu0 %v13543_v0, %s15763_s22  ;;  %6220 = vmatprep.subr.bf16.mxu0 %v4591_v10  ;;  %v4603_v33 = vsel %vm426_vm4, %v4589_v37, %v4591_v10 }
 0x5cc   : > { %6182 = vmatmul.mubr.bf16.gmra.mrb[60].mxu0 %v9652_v57  ;;  %4806 = vrot.lane.b32.xlu1 %v13545_v30, %s15763_s22  ;;  %v9670_v57 = vld [vmem:[%s15251_s4 + $0x268] ss:$60 sps:$4 sm:$0xff]  }
 0x5cd   : > { %6221 = vmatpush1.bf16.msra.mxu0 %v4603_v33  ;;  %v4593_v3 = vpop.permute.xlu0 %4592  ;;  %6224 = vmatprep.mubr.bf16.mxu0 %v9655_v20  ;;  %v9671_v20 = vld [vmem:[%s15251_s4 + $0x2e4] ss:$60 sps:$4 sm:$0xff]  }
 0x5ce   : > { %v4595_v8 = vpop.permute.xlu1 %4594 }
 0x5cf   : > { %4808 = vrot.lane.b32.xlu0 %v13553_v1, %s15763_s22  ;;  %6222 = vmatprep.subr.bf16.mxu0 %v4595_v8  ;;  %v4604_v52 = vsel %vm426_vm4, %v4593_v3, %v4595_v8  ;;  %vm15769_vm4 = vmmov %vm15764_vm0 }
 0x5d0   : > { %4810 = vrot.lane.b32.xlu1 %v13555_v54, %s15763_s22 }
 0x5d1   : > { %6223 = vmatpush1.bf16.msra.mxu0 %v4604_v52  ;;  %v4622_v59 = vpop.permute.xlu0 %4621 }
 0x5d2   : > { %v4624_v40 = vpop.permute.xlu1 %4623 }
 0x5d3   : > { %4812 = vrot.lane.b32.xlu0 %v13563_v47, %s15763_s22  ;;  %6305 = vmatprep.subr.bf16.mxu0 %v4624_v40  ;;  %v4654_v4 = vsel %vm450_vm5, %v4622_v59, %v4624_v40 }
 0x5d4   : > { %6225 = vmatmul.mubr.bf16.vlgmr.msra.gmra.mrb[32].mxu0 %v9653_v2  ;;  %4814 = vrot.lane.b32.xlu1 %v13565_v26, %s15763_s22  ;;  %v9673_v2 = vld [vmem:[%s15251_s4 + $0x2e0] ss:$60 sps:$4 sm:$0xff]  }
 0x5d5   : > { %6306 = vmatpush1.bf16.msra.mxu0 %v4654_v4  ;;  %v4626_v53 = vpop.permute.xlu0 %4625  ;;  %6234 = vmatprep.mubr.bf16.mxu0 %v9656_v6  ;;  %v9674_v6 = vld [vmem:[%s15251_s4 + $0x35c] ss:$60 sps:$4 sm:$0xff]  }
 0x5d6   : > { %v4628_v43 = vpop.permute.xlu1 %4627 }
 0x5d7   : > { %4816 = vrot.lane.b32.xlu0 %v13573_v11, %s15763_s22  ;;  %6307 = vmatprep.subr.bf16.mxu0 %v4628_v43  ;;  %v4655_v31 = vsel %vm450_vm5, %v4626_v53, %v4628_v43 }
 0x5d8   : > { %4818 = vrot.lane.b32.xlu1 %v13578_v49, %s15763_s22 }
 0x5d9   : > { %6308 = vmatpush1.bf16.msra.mxu0 %v4655_v31  ;;  %v4630_v55 = vpop.permute.xlu0 %4629 }
 0x5da   : > { %v4632_v23 = vpop.permute.xlu1 %4631 }
 0x5db   : > { %4820 = vrot.lane.b32.xlu0 %v13586_v42, %s15763_s22  ;;  %6309 = vmatprep.subr.bf16.mxu0 %v4632_v23  ;;  %v4656_v29 = vsel %vm450_vm5, %v4630_v55, %v4632_v23 }
 0x5dc   : > { %6235 = vmatmul.mubr.bf16.gmra.mrb[36].mxu0 %v9658_v15  ;;  %4822 = vrot.lane.b32.xlu1 %v13588_v48, %s15763_s22  ;;  %v9676_v15 = vld [vmem:[%s15251_s4 + $0x358] ss:$60 sps:$4 sm:$0xff]  }
 0x5dd   : > { %6310 = vmatpush1.bf16.msra.mxu0 %v4656_v29  ;;  %v4634_v60 = vpop.permute.xlu0 %4633  ;;  %6244 = vmatprep.mubr.bf16.mxu0 %v9659_v46  ;;  %v9679_v46 = vld [vmem:[%s15251_s4 + $0x1c] ss:$60 sps:$4 sm:$0xff]  }
 0x5de   : > { %v4636_v27 = vpop.permute.xlu1 %4635 }
 0x5df   : > { %4849 = vrot.lane.b32.xlu0 %v13513_v7, %s15544_s24  ;;  %6311 = vmatprep.subr.bf16.mxu0 %v4636_v27  ;;  %v4657_v62 = vsel %vm450_vm5, %v4634_v60, %v4636_v27 }
 0x5e0   : > { %4851 = vrot.lane.b32.xlu1 %v13515_v39, %s15544_s24 }
 0x5e1   : > { %6312 = vmatpush1.bf16.msra.mxu0 %v4657_v62  ;;  %v4638_v63 = vpop.permute.xlu0 %4637 }
 0x5e2   : > { %v4640_v56 = vpop.permute.xlu1 %4639 }
 0x5e3   : > { %4853 = vrot.lane.b32.xlu0 %v13523_v14, %s15544_s24  ;;  %6313 = vmatprep.subr.bf16.mxu0 %v4640_v56  ;;  %v4658_v32 = vsel %vm450_vm5, %v4638_v63, %v4640_v56 }
 0x5e4   : > { %6245 = vmatmul.mubr.bf16.gmra.mrb[40].mxu0 %v9661_v9  ;;  %4855 = vrot.lane.b32.xlu1 %v13525_v44, %s15544_s24  ;;  %v9677_v9 = vld [vmem:[%s15251_s4 + $0x18] ss:$60 sps:$4 sm:$0xff]  }
 0x5e5   : > { %6314 = vmatpush1.bf16.msra.mxu0 %v4658_v32  ;;  %v4642_v38 = vpop.permute.xlu0 %4641  ;;  %6254 = vmatprep.mubr.bf16.mxu0 %v9662_v19  ;;  %v9680_v19 = vld [vmem:[%s15251_s4 + $0x94] ss:$60 sps:$4 sm:$0xff]  }
 0x5e6   : > { %v4644_v17 = vpop.permute.xlu1 %4643 }
 0x5e7   : > { %4857 = vrot.lane.b32.xlu0 %v13533_v18, %s15544_s24  ;;  %6315 = vmatprep.subr.bf16.mxu0 %v4644_v17  ;;  %v4659_v16 = vsel %vm450_vm5, %v4642_v38, %v4644_v17 }
 0x5e8   : > { %4859 = vrot.lane.b32.xlu1 %v13535_v5, %s15544_s24 }
 0x5e9   : > { %6316 = vmatpush1.bf16.msra.mxu0 %v4659_v16  ;;  %v4646_v36 = vpop.permute.xlu0 %4645 }
 0x5ea   : > { %v4648_v35 = vpop.permute.xlu1 %4647 }
 0x5eb   : > { %4861 = vrot.lane.b32.xlu0 %v13543_v0, %s15544_s24  ;;  %6317 = vmatprep.subr.bf16.mxu0 %v4648_v35  ;;  %v4660_v34 = vsel %vm450_vm5, %v4646_v36, %v4648_v35 }
 0x5ec   : > { %6255 = vmatmul.mubr.bf16.gmra.mrb[44].mxu0 %v9664_v13  ;;  %4863 = vrot.lane.b32.xlu1 %v13545_v30, %s15544_s24  ;;  %v9682_v13 = vld [vmem:[%s15251_s4 + $0x90] ss:$60 sps:$4 sm:$0xff]  }
 0x5ed   : > { %6318 = vmatpush1.bf16.msra.mxu0 %v4660_v34  ;;  %v4650_v41 = vpop.permute.xlu0 %4649  ;;  %6264 = vmatprep.mubr.bf16.mxu0 %v9665_v61  ;;  %v9683_v61 = vld [vmem:[%s15251_s4 + $0x10c] ss:$60 sps:$4 sm:$0xff]  }
 0x5ee   : > { %v4652_v22 = vpop.permute.xlu1 %4651 }
 0x5ef   : > { %4865 = vrot.lane.b32.xlu0 %v13553_v1, %s15544_s24  ;;  %6319 = vmatprep.subr.bf16.mxu0 %v4652_v22  ;;  %v4661_v45 = vsel %vm450_vm5, %v4650_v41, %v4652_v22  ;;  %vm15770_vm5 = vmmov %vm15764_vm0 }
 0x5f0   : > { %4867 = vrot.lane.b32.xlu1 %v13555_v54, %s15544_s24 }
 0x5f1   : > { %6320 = vmatpush1.bf16.msra.mxu0 %v4661_v45  ;;  %v4679_v58 = vpop.permute.xlu0 %4678 }
 0x5f2   : > { %v4681_v12 = vpop.permute.xlu1 %4680 }
 0x5f3   : > { %4869 = vrot.lane.b32.xlu0 %v13563_v47, %s15544_s24  ;;  %6321 = vmatprep.subr.bf16.mxu0 %v4681_v12  ;;  %v4711_v24 = vsel %vm15764_vm0, %v4679_v58, %v4681_v12  ;;  %vm15782_vm0 = vcmask 973824  }
 0x5f4   : > { %6265 = vmatmul.mubr.bf16.gmra.mrb[48].mxu0 %v9667_v51  ;;  %4871 = vrot.lane.b32.xlu1 %v13565_v26, %s15544_s24  ;;  %v9685_v51 = vld [vmem:[%s15251_s4 + $0x108] ss:$60 sps:$4 sm:$0xff]  }
 0x5f5   : > { %6322 = vmatpush1.bf16.msra.mxu0 %v4711_v24  ;;  %v4683_v21 = vpop.permute.xlu0 %4682  ;;  %6274 = vmatprep.mubr.bf16.mxu0 %v9668_v25  ;;  %v9686_v25 = vld [vmem:[%s15251_s4 + $0x184] ss:$60 sps:$4 sm:$0xff]  }
 0x5f6   : > { %v4685_v28 = vpop.permute.xlu1 %4684 }
 0x5f7   : > { %4873 = vrot.lane.b32.xlu0 %v13573_v11, %s15544_s24  ;;  %6323 = vmatprep.subr.bf16.mxu0 %v4685_v28  ;;  %v4712_v50 = vsel %vm15765_vm1, %v4683_v21, %v4685_v28  ;;  %vm15783_vm1 = vmmov %vm15782_vm0 }
 0x5f8   : > { %4875 = vrot.lane.b32.xlu1 %v13578_v49, %s15544_s24 }
 0x5f9   : > { %6324 = vmatpush1.bf16.msra.mxu0 %v4712_v50  ;;  %v4687_v37 = vpop.permute.xlu0 %4686 }
 0x5fa   : > { %v4689_v10 = vpop.permute.xlu1 %4688 }
 0x5fb   : > { %4877 = vrot.lane.b32.xlu0 %v13586_v42, %s15544_s24  ;;  %6325 = vmatprep.subr.bf16.mxu0 %v4689_v10  ;;  %v4713_v33 = vsel %vm15766_vm2, %v4687_v37, %v4689_v10  ;;  %vm15784_vm2 = vmmov %vm15782_vm0 }
 0x5fc   : > { %6275 = vmatmul.mubr.bf16.gmra.mrb[52].mxu0 %v9670_v57  ;;  %4879 = vrot.lane.b32.xlu1 %v13588_v48, %s15544_s24  ;;  %v9688_v57 = vld [vmem:[%s15251_s4 + $0x180] ss:$60 sps:$4 sm:$0xff]  }
 0x5fd   : > { %6326 = vmatpush1.bf16.msra.mxu0 %v4713_v33  ;;  %v4691_v3 = vpop.permute.xlu0 %4690  ;;  %6284 = vmatprep.mubr.bf16.mxu0 %v9671_v20  ;;  %v9689_v20 = vld [vmem:[%s15251_s4 + $0x1fc] ss:$60 sps:$4 sm:$0xff]  }
 0x5fe   : > { %v4693_v8 = vpop.permute.xlu1 %4692 }
 0x5ff   : > { %4906 = vrot.lane.b32.xlu0 %v13513_v7, %s15767_s10  ;;  %6327 = vmatprep.subr.bf16.mxu0 %v4693_v8  ;;  %v4714_v52 = vsel %vm15768_vm3, %v4691_v3, %v4693_v8  ;;  %vm15786_vm3 = vmmov %vm15782_vm0 }
 0x600   : > { %4908 = vrot.lane.b32.xlu1 %v13515_v39, %s15767_s10 }
 0x601   : > { %6328 = vmatpush1.bf16.msra.mxu0 %v4714_v52  ;;  %v4695_v59 = vpop.permute.xlu0 %4694 }
 0x602   : > { %v4697_v40 = vpop.permute.xlu1 %4696 }
 0x603   : > { %4910 = vrot.lane.b32.xlu0 %v13523_v14, %s15767_s10  ;;  %6329 = vmatprep.subr.bf16.mxu0 %v4697_v40  ;;  %v4715_v4 = vsel %vm15769_vm4, %v4695_v59, %v4697_v40  ;;  %vm15787_vm4 = vmmov %vm15782_vm0 }
 0x604   : > { %6285 = vmatmul.mubr.bf16.gmra.mrb[56].mxu0 %v9673_v2  ;;  %4912 = vrot.lane.b32.xlu1 %v13525_v44, %s15767_s10  ;;  %v9691_v2 = vld [vmem:[%s15251_s4 + $0x1f8] ss:$60 sps:$4 sm:$0xff]  }
 0x605   : > { %6330 = vmatpush1.bf16.msra.mxu0 %v4715_v4  ;;  %v4699_v53 = vpop.permute.xlu0 %4698  ;;  %6294 = vmatprep.mubr.bf16.mxu0 %v9674_v6  ;;  %v9692_v6 = vld [vmem:[%s15251_s4 + $0x274] ss:$60 sps:$4 sm:$0xff]  }
 0x606   : > { %v4701_v43 = vpop.permute.xlu1 %4700 }
 0x607   : > { %4914 = vrot.lane.b32.xlu0 %v13533_v18, %s15767_s10  ;;  %6331 = vmatprep.subr.bf16.mxu0 %v4701_v43  ;;  %v4716_v31 = vsel %vm15770_vm5, %v4699_v53, %v4701_v43  ;;  %vm15788_vm5 = vmmov %vm15782_vm0 }
 0x608   : > { %4916 = vrot.lane.b32.xlu1 %v13535_v5, %s15767_s10 }
 0x609   : > { %6332 = vmatpush1.bf16.msra.mxu0 %v4716_v31  ;;  %v4703_v55 = vpop.permute.xlu0 %4702 }
 0x60a   : > { %v4705_v23 = vpop.permute.xlu1 %4704 }
 0x60b   : > { %4918 = vrot.lane.b32.xlu0 %v13543_v0, %s15767_s10  ;;  %6333 = vmatprep.subr.bf16.mxu0 %v4705_v23  ;;  %v4717_v29 = vsel %vm15771_vm9, %v4703_v55, %v4705_v23  ;;  %vm15789_vm9 = vmmov %vm15782_vm0 }
 0x60c   : > { %6295 = vmatmul.mubr.bf16.gmra.mrb[60].mxu0 %v9676_v15  ;;  %4920 = vrot.lane.b32.xlu1 %v13545_v30, %s15767_s10  ;;  %v9694_v15 = vld [vmem:[%s15251_s4 + $0x270] ss:$60 sps:$4 sm:$0xff]  }
 0x60d   : > { %6334 = vmatpush1.bf16.msra.mxu0 %v4717_v29  ;;  %v4707_v60 = vpop.permute.xlu0 %4706  ;;  %6337 = vmatprep.mubr.bf16.mxu0 %v9679_v46  ;;  %v9695_v46 = vld [vmem:[%s15251_s4 + $0x2ec] ss:$60 sps:$4 sm:$0xff]  }
 0x60e   : > { %v4709_v27 = vpop.permute.xlu1 %4708 }
 0x60f   : > { %4922 = vrot.lane.b32.xlu0 %v13553_v1, %s15767_s10  ;;  %6335 = vmatprep.subr.bf16.mxu0 %v4709_v27  ;;  %v4718_v62 = vsel %vm15772_vm8, %v4707_v60, %v4709_v27  ;;  %vm15790_vm8 = vmmov %vm15782_vm0 }
 0x610   : > { %4924 = vrot.lane.b32.xlu1 %v13555_v54, %s15767_s10 }
 0x611   : > { %6336 = vmatpush1.bf16.msra.mxu0 %v4718_v62  ;;  %v4736_v63 = vpop.permute.xlu0 %4735 }
 0x612   : > { %v4738_v56 = vpop.permute.xlu1 %4737 }
 0x613   : > { %4926 = vrot.lane.b32.xlu0 %v13563_v47, %s15767_s10  ;;  %6418 = vmatprep.subr.bf16.mxu0 %v4738_v56  ;;  %v4768_v32 = vsel %vm15773_vm6, %v4736_v63, %v4738_v56  ;;  %vm15791_vm6 = vcmask 965632  }
 0x614   : > { %6338 = vmatmul.mubr.bf16.vlgmr.msra.gmra.mrb[32].mxu0 %v9677_v9  ;;  %4928 = vrot.lane.b32.xlu1 %v13565_v26, %s15767_s10  ;;  %v9697_v9 = vld [vmem:[%s15251_s4 + $0x2e8] ss:$60 sps:$4 sm:$0xff]  }
 0x615   : > { %6419 = vmatpush1.bf16.msra.mxu0 %v4768_v32  ;;  %v4740_v38 = vpop.permute.xlu0 %4739  ;;  %6347 = vmatprep.mubr.bf16.mxu0 %v9680_v19  ;;  %v9698_v19 = vld [vmem:[%s15251_s4 + $0x364] ss:$60 sps:$4 sm:$0xff]  }
 0x616   : > { %v4742_v17 = vpop.permute.xlu1 %4741 }
 0x617   : > { %4930 = vrot.lane.b32.xlu0 %v13573_v11, %s15767_s10  ;;  %6420 = vmatprep.subr.bf16.mxu0 %v4742_v17  ;;  %v4769_v16 = vsel %vm15774_vm10, %v4740_v38, %v4742_v17  ;;  %vm15792_vm10 = vmmov %vm15791_vm6 }
 0x618   : > { %4932 = vrot.lane.b32.xlu1 %v13578_v49, %s15767_s10 }
 0x619   : > { %6421 = vmatpush1.bf16.msra.mxu0 %v4769_v16  ;;  %v4744_v36 = vpop.permute.xlu0 %4743 }
 0x61a   : > { %v4746_v35 = vpop.permute.xlu1 %4745 }
 0x61b   : > { %4934 = vrot.lane.b32.xlu0 %v13586_v42, %s15767_s10  ;;  %6422 = vmatprep.subr.bf16.mxu0 %v4746_v35  ;;  %v4770_v34 = vsel %vm15775_vm15, %v4744_v36, %v4746_v35  ;;  %vm15793_vm15 = vmmov %vm15791_vm6 }
 0x61c   : > { %6348 = vmatmul.mubr.bf16.gmra.mrb[36].mxu0 %v9682_v13  ;;  %4936 = vrot.lane.b32.xlu1 %v13588_v48, %s15767_s10  ;;  %v9700_v13 = vld [vmem:[%s15251_s4 + $0x360] ss:$60 sps:$4 sm:$0xff]   ;;  %s303_s10 = scalar_lea.vmem %s15255_s8, %s7601_s9 }
 0x61d   : > { %6423 = vmatpush1.bf16.msra.mxu0 %v4770_v34  ;;  %v4748_v41 = vpop.permute.xlu0 %4747  ;;  %6357 = vmatprep.mubr.bf16.mxu0 %v9683_v61  ;;  %v9703_v61 = vld [vmem:[%s15251_s4 + $0x24] ss:$60 sps:$4 sm:$0xff]  }
 0x61e   : > { %v4750_v22 = vpop.permute.xlu1 %4749 }
 0x61f   : > { %4963 = vrot.lane.b32.xlu0 %v13513_v7, %s15776_s14  ;;  %6424 = vmatprep.subr.bf16.mxu0 %v4750_v22  ;;  %v4771_v45 = vsel %vm15777_vm11, %v4748_v41, %v4750_v22  ;;  %vm15794_vm11 = vmmov %vm15791_vm6 }
 0x620   : > { %4965 = vrot.lane.b32.xlu1 %v13515_v39, %s15776_s14 }
 0x621   : > { %6425 = vmatpush1.bf16.msra.mxu0 %v4771_v45  ;;  %v4752_v58 = vpop.permute.xlu0 %4751 }
 0x622   : > { %v4754_v12 = vpop.permute.xlu1 %4753 }
 0x623   : > { %4967 = vrot.lane.b32.xlu0 %v13523_v14, %s15776_s14  ;;  %6426 = vmatprep.subr.bf16.mxu0 %v4754_v12  ;;  %v4772_v24 = vsel %vm15778_vm12, %v4752_v58, %v4754_v12  ;;  %vm15795_vm12 = vmmov %vm15791_vm6 }
 0x624   : > { %6358 = vmatmul.mubr.bf16.gmra.mrb[40].mxu0 %v9685_v51  ;;  %4969 = vrot.lane.b32.xlu1 %v13525_v44, %s15776_s14  ;;  %v9701_v51 = vld [vmem:[%s15251_s4 + $0x20] ss:$60 sps:$4 sm:$0xff]  }
 0x625   : > { %6427 = vmatpush1.bf16.msra.mxu0 %v4772_v24  ;;  %v4756_v21 = vpop.permute.xlu0 %4755  ;;  %6367 = vmatprep.mubr.bf16.mxu0 %v9686_v25  ;;  %v9704_v25 = vld [vmem:[%s15251_s4 + $0x9c] ss:$60 sps:$4 sm:$0xff]   ;;  %v9751_v24 = vld [vmem:[%s15251_s4 + $0x304] ss:$60 sps:$4 sm:$0xff]  }
 0x626   : > { %v4758_v28 = vpop.permute.xlu1 %4757  ;;  %6736 = vmatprep.mubr.bf16.mxu1 %v9751_v24 }
 0x627   : > { %4971 = vrot.lane.b32.xlu0 %v13533_v18, %s15776_s14  ;;  %6428 = vmatprep.subr.bf16.mxu0 %v4758_v28  ;;  %v4773_v50 = vsel %vm15779_vm7, %v4756_v21, %v4758_v28  ;;  %vm15796_vm7 = vmmov %vm15791_vm6 }
 0x628   : > { %4973 = vrot.lane.b32.xlu1 %v13535_v5, %s15776_s14 }
 0x629   : > { %6429 = vmatpush1.bf16.msra.mxu0 %v4773_v50  ;;  %v4760_v37 = vpop.permute.xlu0 %4759 }
 0x62a   : > { %v4762_v10 = vpop.permute.xlu1 %4761 }
 0x62b   : > { %4975 = vrot.lane.b32.xlu0 %v13543_v0, %s15776_s14  ;;  %6430 = vmatprep.subr.bf16.mxu0 %v4762_v10  ;;  %v4774_v33 = vsel %vm15780_vm14, %v4760_v37, %v4762_v10  ;;  %v9706_v37 = vld [vmem:[%s15251_s4 + $0x98] ss:$60 sps:$4 sm:$0xff]   ;;  %vm15797_vm14 = vmmov %vm15791_vm6 }
 0x62c   : > { %6368 = vmatmul.mubr.bf16.gmra.mrb[44].mxu0 %v9688_v57  ;;  %4977 = vrot.lane.b32.xlu1 %v13545_v30, %s15776_s14  ;;  %v9707_v10 = vld [vmem:[%s15251_s4 + $0x114] ss:$60 sps:$4 sm:$0xff]  }
 0x62d   : > { %6431 = vmatpush1.bf16.msra.mxu0 %v4774_v33  ;;  %v4764_v3 = vpop.permute.xlu0 %4763  ;;  %6377 = vmatprep.mubr.bf16.mxu0 %v9689_v20 }
 0x62e   : > { %v4766_v8 = vpop.permute.xlu1 %4765 }
 0x62f   : > { %4979 = vrot.lane.b32.xlu0 %v13553_v1, %s15776_s14  ;;  %6432 = vmatprep.subr.bf16.mxu0 %v4766_v8  ;;  %v4775_v52 = vsel %vm15781_vm13, %v4764_v3, %v4766_v8  ;;  %vm15798_vm13 = vmmov %vm15791_vm6 }
 0x630   : > { %4981 = vrot.lane.b32.xlu1 %v13555_v54, %s15776_s14 }
 0x631   : > { %6433 = vmatpush1.bf16.msra.mxu0 %v4775_v52  ;;  %v4793_v59 = vpop.permute.xlu0 %4792 }
 0x632   : > { %v4795_v40 = vpop.permute.xlu1 %4794 }
 0x633   : > { %4983 = vrot.lane.b32.xlu0 %v13563_v47, %s15776_s14  ;;  %6434 = vmatprep.subr.bf16.mxu0 %v4795_v40  ;;  %v4825_v4 = vsel %vm15782_vm0, %v4793_v59, %v4795_v40  ;;  %v9709_v59 = vld [vmem:[%s15251_s4 + $0x110] ss:$60 sps:$4 sm:$0xff]   ;;  %vm15799_vm0 = vcmask 957440  }
 0x634   : > { %6378 = vmatmul.mubr.bf16.gmra.mrb[48].mxu0 %v9691_v2  ;;  %4985 = vrot.lane.b32.xlu1 %v13565_v26, %s15776_s14  ;;  %v9710_v40 = vld [vmem:[%s15251_s4 + $0x18c] ss:$60 sps:$4 sm:$0xff]  }
 0x635   : > { %6435 = vmatpush1.bf16.msra.mxu0 %v4825_v4  ;;  %v4797_v53 = vpop.permute.xlu0 %4796  ;;  %6387 = vmatprep.mubr.bf16.mxu0 %v9692_v6 }
 0x636   : > { %v4799_v43 = vpop.permute.xlu1 %4798 }
 0x637   : > { %4987 = vrot.lane.b32.xlu0 %v13573_v11, %s15776_s14  ;;  %6436 = vmatprep.subr.bf16.mxu0 %v4799_v43  ;;  %v4826_v31 = vsel %vm15783_vm1, %v4797_v53, %v4799_v43  ;;  %vm15800_vm1 = vmmov %vm15799_vm0 }
 0x638   : > { %4989 = vrot.lane.b32.xlu1 %v13578_v49, %s15776_s14 }
 0x639   : > { %6437 = vmatpush1.bf16.msra.mxu0 %v4826_v31  ;;  %v4801_v55 = vpop.permute.xlu0 %4800 }
 0x63a   : > { %v4803_v23 = vpop.permute.xlu1 %4802 }
 0x63b   : > { %4991 = vrot.lane.b32.xlu0 %v13586_v42, %s15776_s14  ;;  %6438 = vmatprep.subr.bf16.mxu0 %v4803_v23  ;;  %v4827_v29 = vsel %vm15784_vm2, %v4801_v55, %v4803_v23  ;;  %vm15801_vm2 = vmmov %vm15799_vm0 }
 0x63c   : > { %6388 = vmatmul.mubr.bf16.gmra.mrb[52].mxu0 %v9694_v15  ;;  %4993 = vrot.lane.b32.xlu1 %v13588_v48, %s15776_s14 }
 0x63d   : > { %6439 = vmatpush1.bf16.msra.mxu0 %v4827_v29  ;;  %v4805_v60 = vpop.permute.xlu0 %4804  ;;  %6397 = vmatprep.mubr.bf16.mxu0 %v9695_v46 }
 0x63e   : > { %v4807_v27 = vpop.permute.xlu1 %4806 }
 0x63f   : > { %5020 = vrot.lane.b32.xlu0 %v13513_v7, %s15785_s12  ;;  %6440 = vmatprep.subr.bf16.mxu0 %v4807_v27  ;;  %v4828_v62 = vsel %vm15786_vm3, %v4805_v60, %v4807_v27  ;;  %vm15802_vm3 = vmmov %vm15799_vm0 }
 0x640   : > { %5022 = vrot.lane.b32.xlu1 %v13515_v39, %s15785_s12 }
 0x641   : > { %6441 = vmatpush1.bf16.msra.mxu0 %v4828_v62  ;;  %v4809_v63 = vpop.permute.xlu0 %4808 }
 0x642   : > { %v4811_v56 = vpop.permute.xlu1 %4810 }
 0x643   : > { %5024 = vrot.lane.b32.xlu0 %v13523_v14, %s15785_s12  ;;  %6442 = vmatprep.subr.bf16.mxu0 %v4811_v56  ;;  %v4829_v32 = vsel %vm15787_vm4, %v4809_v63, %v4811_v56  ;;  %vm15803_vm4 = vmmov %vm15799_vm0 }
 0x644   : > { %6398 = vmatmul.mubr.bf16.gmra.mrb[56].mxu0 %v9697_v9  ;;  %5026 = vrot.lane.b32.xlu1 %v13525_v44, %s15785_s12 }
 0x645   : > { %6443 = vmatpush1.bf16.msra.mxu0 %v4829_v32  ;;  %v4813_v38 = vpop.permute.xlu0 %4812  ;;  %6407 = vmatprep.mubr.bf16.mxu0 %v9698_v19  ;;  %v5275_v19 = vld [vmem:[%s15252_s5 + $0x68] sm:$0xff] }
 0x646   : > { %v4815_v17 = vpop.permute.xlu1 %4814  ;;  %v9721_v32 = vld [vmem:[%s15251_s4 + $0x2f0] ss:$60 sps:$4 sm:$0xff]  }
 0x647   : > { %5028 = vrot.lane.b32.xlu0 %v13533_v18, %s15785_s12  ;;  %6444 = vmatprep.subr.bf16.mxu0 %v4815_v17  ;;  %v4830_v16 = vsel %vm15788_vm5, %v4813_v38, %v4815_v17  ;;  %v5262_v17 = vld [vmem:[%s15252_s5] sm:$0xff]  ;;  %vm15804_vm5 = vmmov %vm15799_vm0 }
 0x648   : > { %5030 = vrot.lane.b32.xlu1 %v13535_v5, %s15785_s12 }
 0x649   : > { %6445 = vmatpush1.bf16.msra.mxu0 %v4830_v16  ;;  %v4817_v36 = vpop.permute.xlu0 %4816  ;;  %v9722_v16 = vld [vmem:[%s15251_s4 + $0x36c] ss:$60 sps:$4 sm:$0xff]  }
 0x64a   : > { %v4819_v35 = vpop.permute.xlu1 %4818 }
 0x64b   : > { %5032 = vrot.lane.b32.xlu0 %v13543_v0, %s15785_s12  ;;  %6446 = vmatprep.subr.bf16.mxu0 %v4819_v35  ;;  %v4831_v34 = vsel %vm15789_vm9, %v4817_v36, %v4819_v35  ;;  %vm15805_vm9 = vmmov %vm15799_vm0 }
 0x64c   : > { %6408 = vmatmul.mubr.bf16.gmra.mrb[60].mxu0 %v9700_v13  ;;  %5034 = vrot.lane.b32.xlu1 %v13545_v30, %s15785_s12 }
 0x64d   : > { %6447 = vmatpush1.bf16.msra.mxu0 %v4831_v34  ;;  %v4821_v41 = vpop.permute.xlu0 %4820  ;;  %6450 = vmatprep.mubr.bf16.mxu0 %v9703_v61  ;;  %v5263_v61 = vld [vmem:[%s15252_s5 + $0x8] sm:$0xff]  ;;  %v5266_v34 = vld [vmem:[%s15252_s5 + $0x20] sm:$0xff] }
 0x64e   : > { %v4823_v22 = vpop.permute.xlu1 %4822 }
 0x64f   : > { %5036 = vrot.lane.b32.xlu0 %v13553_v1, %s15785_s12  ;;  %6448 = vmatprep.subr.bf16.mxu0 %v4823_v22  ;;  %v4832_v45 = vsel %vm15790_vm8, %v4821_v41, %v4823_v22  ;;  %vm15806_vm8 = vmmov %vm15799_vm0 }
 0x650   : > { %5038 = vrot.lane.b32.xlu1 %v13555_v54, %s15785_s12 }
 0x651   : > { %6449 = vmatpush1.bf16.msra.mxu0 %v4832_v45  ;;  %v4850_v58 = vpop.permute.xlu0 %4849  ;;  %v5267_v45 = vld [vmem:[%s15252_s5 + $0x28] sm:$0xff] }
 0x652   : > { %v4852_v12 = vpop.permute.xlu1 %4851 }
 0x653   : > { %5040 = vrot.lane.b32.xlu0 %v13563_v47, %s15785_s12  ;;  %6531 = vmatprep.subr.bf16.mxu0 %v4852_v12  ;;  %v4882_v21 = vsel %vm15791_vm6, %v4850_v58, %v4852_v12  ;;  %v9727_v12 = vld [vmem:[%s15251_s4 + $0x2c] ss:$60 sps:$4 sm:$0xff]   ;;  %vm15807_vm6 = vcmask 949248  }
 0x654   : > { %6451 = vmatmul.mubr.bf16.vlgmr.msra.gmra.mrb[32].mxu0 %v9701_v51  ;;  %5042 = vrot.lane.b32.xlu1 %v13565_v26, %s15785_s12  ;;  %v9724_v51 = vld [vmem:[%s15251_s4 + $0x368] ss:$60 sps:$4 sm:$0xff]  }
 0x655   : > { %6532 = vmatpush1.bf16.msra.mxu0 %v4882_v21  ;;  %v4854_v28 = vpop.permute.xlu0 %4853  ;;  %6460 = vmatprep.mubr.bf16.mxu0 %v9704_v25  ;;  %v5277_v25 = vld [vmem:[%s15252_s5 + $0x78] sm:$0xff] }
 0x656   : > { %v4856_v50 = vpop.permute.xlu1 %4855 }
 0x657   : > { %5044 = vrot.lane.b32.xlu0 %v13573_v11, %s15785_s12  ;;  %6533 = vmatprep.subr.bf16.mxu0 %v4856_v50  ;;  %v4883_v57 = vsel %vm15792_vm10, %v4854_v28, %v4856_v50  ;;  %v5264_v28 = vld [vmem:[%s15252_s5 + $0x10] sm:$0xff]  ;;  %vm15808_vm10 = vmmov %vm15807_vm6 }
 0x658   : > { %5046 = vrot.lane.b32.xlu1 %v13578_v49, %s15785_s12 }
 0x659   : > { %6534 = vmatpush1.bf16.msra.mxu0 %v4883_v57  ;;  %v4858_v20 = vpop.permute.xlu0 %4857  ;;  %v5268_v57 = vld [vmem:[%s15252_s5 + $0x30] sm:$0xff] }
 0x65a   : > { %v4860_v33 = vpop.permute.xlu1 %4859 }
 0x65b   : > { %5048 = vrot.lane.b32.xlu0 %v13586_v42, %s15785_s12  ;;  %6535 = vmatprep.subr.bf16.mxu0 %v4860_v33  ;;  %v4884_v3 = vsel %vm15793_vm15, %v4858_v20, %v4860_v33  ;;  %v5270_v33 = vld [vmem:[%s15252_s5 + $0x40] sm:$0xff]  ;;  %vm15809_vm15 = vmmov %vm15807_vm6 }
 0x65c   : > { %6461 = vmatmul.mubr.bf16.gmra.mrb[36].mxu0 %v9706_v37  ;;  %5050 = vrot.lane.b32.xlu1 %v13588_v48, %s15785_s12 }
 0x65d   : > { %6536 = vmatpush1.bf16.msra.mxu0 %v4884_v3  ;;  %v4862_v8 = vpop.permute.xlu0 %4861  ;;  %6470 = vmatprep.mubr.bf16.mxu0 %v9707_v10  ;;  %v9725_v10 = vld [vmem:[%s15251_s4 + $0x28] ss:$60 sps:$4 sm:$0xff]  }
 0x65e   : > { %v4864_v52 = vpop.permute.xlu1 %4863 }
 0x65f   : > { %5077 = vrot.lane.b32.xlu0 %v13513_v7, %s15554_s25  ;;  %6537 = vmatprep.subr.bf16.mxu0 %v4864_v52  ;;  %v4885_v2 = vsel %vm15794_vm11, %v4862_v8, %v4864_v52  ;;  %v5271_v52 = vld [vmem:[%s15252_s5 + $0x48] sm:$0xff]  ;;  %vm15810_vm11 = vmmov %vm15807_vm6 }
 0x660   : > { %5079 = vrot.lane.b32.xlu1 %v13515_v39, %s15554_s25 }
 0x661   : > { %6538 = vmatpush1.bf16.msra.mxu0 %v4885_v2  ;;  %v4866_v6 = vpop.permute.xlu0 %4865  ;;  %v9728_v2 = vld [vmem:[%s15251_s4 + $0xa4] ss:$60 sps:$4 sm:$0xff]  }
 0x662   : > { %v4868_v4 = vpop.permute.xlu1 %4867 }
 0x663   : > { %5081 = vrot.lane.b32.xlu0 %v13523_v14, %s15554_s25  ;;  %6539 = vmatprep.subr.bf16.mxu0 %v4868_v4  ;;  %v4886_v7 = vsel %vm15795_vm12, %v4866_v6, %v4868_v4  ;;  %v9712_v14 = vld [vmem:[%s15251_s4 + $0x188] ss:$60 sps:$4 sm:$0xff]   ;;  %v5265_v6 = vld [vmem:[%s15252_s5 + $0x18] sm:$0xff]  ;;  %vm15811_vm12 = vmmov %vm15807_vm6 }
 0x664   : > { %6471 = vmatmul.mubr.bf16.gmra.mrb[40].mxu0 %v9709_v59  ;;  %5083 = vrot.lane.b32.xlu1 %v13525_v44, %s15554_s25  ;;  %v9713_v44 = vld [vmem:[%s15251_s4 + $0x204] ss:$60 sps:$4 sm:$0xff]  }
 0x665   : > { %6540 = vmatpush1.bf16.msra.mxu0 %v4886_v7  ;;  %v4870_v39 = vpop.permute.xlu0 %4869  ;;  %6480 = vmatprep.mubr.bf16.mxu0 %v9710_v40  ;;  %v5269_v7 = vld [vmem:[%s15252_s5 + $0x38] sm:$0xff] }
 0x666   : > { %v4872_v53 = vpop.permute.xlu1 %4871 }
 0x667   : > { %5085 = vrot.lane.b32.xlu0 %v13533_v18, %s15554_s25  ;;  %6541 = vmatprep.subr.bf16.mxu0 %v4872_v53  ;;  %v4887_v43 = vsel %vm15796_vm7, %v4870_v39, %v4872_v53  ;;  %v5272_v53 = vld [vmem:[%s15252_s5 + $0x50] sm:$0xff]  ;;  %vm15812_vm7 = vmmov %vm15807_vm6 }
 0x668   : > { %5087 = vrot.lane.b32.xlu1 %v13535_v5, %s15554_s25 }
 0x669   : > { %6542 = vmatpush1.bf16.msra.mxu0 %v4887_v43  ;;  %v4874_v31 = vpop.permute.xlu0 %4873  ;;  %v9730_v43 = vld [vmem:[%s15251_s4 + $0xa0] ss:$60 sps:$4 sm:$0xff]  }
 0x66a   : > { %v4876_v15 = vpop.permute.xlu1 %4875 }
 0x66b   : > { %5089 = vrot.lane.b32.xlu0 %v13543_v0, %s15554_s25  ;;  %6543 = vmatprep.subr.bf16.mxu0 %v4876_v15  ;;  %v4888_v18 = vsel %vm15797_vm14, %v4874_v31, %v4876_v15  ;;  %v9715_v0 = vld [vmem:[%s15251_s4 + $0x200] ss:$60 sps:$4 sm:$0xff]   ;;  %vm15813_vm14 = vmmov %vm15807_vm6 }
 0x66c   : > { %6481 = vmatmul.mubr.bf16.gmra.mrb[44].mxu0 %v9712_v14  ;;  %5091 = vrot.lane.b32.xlu1 %v13545_v30, %s15554_s25  ;;  %v9716_v30 = vld [vmem:[%s15251_s4 + $0x27c] ss:$60 sps:$4 sm:$0xff]  }
 0x66d   : > { %6544 = vmatpush1.bf16.msra.mxu0 %v4888_v18  ;;  %v4878_v5 = vpop.permute.xlu0 %4877  ;;  %6490 = vmatprep.mubr.bf16.mxu0 %v9713_v44  ;;  %v5273_v44 = vld [vmem:[%s15252_s5 + $0x58] sm:$0xff] }
 0x66e   : > { %v4880_v55 = vpop.permute.xlu1 %4879  ;;  %v9731_v15 = vld [vmem:[%s15251_s4 + $0x11c] ss:$60 sps:$4 sm:$0xff]  }
 0x66f   : > { %5093 = vrot.lane.b32.xlu0 %v13553_v1, %s15554_s25  ;;  %6545 = vmatprep.subr.bf16.mxu0 %v4880_v55  ;;  %v4889_v46 = vsel %vm15798_vm13, %v4878_v5, %v4880_v55  ;;  %vm15814_vm13 = vmmov %vm15807_vm6 }
 0x670   : > { %5095 = vrot.lane.b32.xlu1 %v13555_v54, %s15554_s25 }
 0x671   : > { %6546 = vmatpush1.bf16.msra.mxu0 %v4889_v46  ;;  %v4907_v23 = vpop.permute.xlu0 %4906 }
 0x672   : > { %v4909_v29 = vpop.permute.xlu1 %4908 }
 0x673   : > { %5097 = vrot.lane.b32.xlu0 %v13563_v47, %s15554_s25  ;;  %6547 = vmatprep.subr.bf16.mxu0 %v4909_v29  ;;  %v4939_v1 = vsel %vm15799_vm0, %v4907_v23, %v4909_v29  ;;  %v9718_v47 = vld [vmem:[%s15251_s4 + $0x278] ss:$60 sps:$4 sm:$0xff]   ;;  %vm15815_vm0 = vcmask 941056  }
 0x674   : > { %6491 = vmatmul.mubr.bf16.gmra.mrb[48].mxu0 %v9715_v0  ;;  %5099 = vrot.lane.b32.xlu1 %v13565_v26, %s15554_s25  ;;  %v9719_v26 = vld [vmem:[%s15251_s4 + $0x2f4] ss:$60 sps:$4 sm:$0xff]  }
 0x675   : > { %6548 = vmatpush1.bf16.msra.mxu0 %v4939_v1  ;;  %v4911_v54 = vpop.permute.xlu0 %4910  ;;  %6500 = vmatprep.mubr.bf16.mxu0 %v9716_v30  ;;  %v9733_v0 = vld [vmem:[%s15251_s4 + $0x118] ss:$60 sps:$4 sm:$0xff]  }
 0x676   : > { %v4913_v60 = vpop.permute.xlu1 %4912  ;;  %v9734_v30 = vld [vmem:[%s15251_s4 + $0x194] ss:$60 sps:$4 sm:$0xff]  }
 0x677   : > { %5101 = vrot.lane.b32.xlu0 %v13573_v11, %s15554_s25  ;;  %6549 = vmatprep.subr.bf16.mxu0 %v4913_v60  ;;  %v4940_v27 = vsel %vm15800_vm1, %v4911_v54, %v4913_v60  ;;  %vm15816_vm1 = vmmov %vm15815_vm0 }
 0x678   : > { %5103 = vrot.lane.b32.xlu1 %v13578_v49, %s15554_s25  ;;  %v5274_v49 = vld [vmem:[%s15252_s5 + $0x60] sm:$0xff] }
 0x679   : > { %6550 = vmatpush1.bf16.msra.mxu0 %v4940_v27  ;;  %v4915_v62 = vpop.permute.xlu0 %4914 }
 0x67a   : > { %v4917_v9 = vpop.permute.xlu1 %4916 }
 0x67b   : > { %5105 = vrot.lane.b32.xlu0 %v13586_v42, %s15554_s25  ;;  %6551 = vmatprep.subr.bf16.mxu0 %v4917_v9  ;;  %v4941_v11 = vsel %vm15801_vm2, %v4915_v62, %v4917_v9  ;;  %vm15817_vm2 = vmmov %vm15815_vm0 }
 0x67c   : > { %6501 = vmatmul.mubr.bf16.gmra.mrb[52].mxu0 %v9718_v47  ;;  %5107 = vrot.lane.b32.xlu1 %v13588_v48, %s15554_s25  ;;  %v5276_v48 = vld [vmem:[%s15252_s5 + $0x70] sm:$0xff] }
 0x67d   : > { %6552 = vmatpush1.bf16.msra.mxu0 %v4941_v11  ;;  %v4919_v63 = vpop.permute.xlu0 %4918  ;;  %6510 = vmatprep.mubr.bf16.mxu0 %v9719_v26  ;;  %v9736_v47 = vld [vmem:[%s15251_s4 + $0x190] ss:$60 sps:$4 sm:$0xff]  }
 0x67e   : > { %v4921_v56 = vpop.permute.xlu1 %4920  ;;  %v9737_v26 = vld [vmem:[%s15251_s4 + $0x20c] ss:$60 sps:$4 sm:$0xff]  }
 0x67f   : > { %5340 = vperm.xlu0 %9415, %v5274_v49   ;;  %6553 = vmatprep.subr.bf16.mxu0 %v4921_v56  ;;  %v4942_v42 = vsel %vm15802_vm3, %v4919_v63, %v4921_v56  ;;  %v9739_v56 = vld [vmem:[%s15251_s4 + $0x208] ss:$60 sps:$4 sm:$0xff]   ;;  %vm15818_vm3 = vmmov %vm15815_vm0 }
 0x680   : > { %5345 = vperm.xlu1 %9414, %v5275_v19  }
 0x681   : > { %6554 = vmatpush1.bf16.msra.mxu0 %v4942_v42  ;;  %v4923_v38 = vpop.permute.xlu0 %4922 }
 0x682   : > { %v4925_v13 = vpop.permute.xlu1 %4924 }
 0x683   : > { %5350 = vperm.xlu0 %9415, %v5276_v48   ;;  %6555 = vmatprep.subr.bf16.mxu0 %v4925_v13  ;;  %v4943_v36 = vsel %vm15803_vm4, %v4923_v38, %v4925_v13  ;;  %v9740_v48 = vld [vmem:[%s15251_s4 + $0x284] ss:$60 sps:$4 sm:$0xff]   ;;  %vm15819_vm4 = vmmov %vm15815_vm0 }
 0x684   : > { %6511 = vmatmul.mubr.bf16.gmra.mrb[56].mxu0 %v9721_v32  ;;  %5280 = vperm.xlu1 %9414, %v5262_v17  }
 0x685   : > { %6556 = vmatpush1.bf16.msra.mxu0 %v4943_v36  ;;  %v4927_v35 = vpop.permute.xlu0 %4926  ;;  %6520 = vmatprep.mubr.bf16.mxu0 %v9722_v16  ;;  %v9742_v36 = vld [vmem:[%s15251_s4 + $0x280] ss:$60 sps:$4 sm:$0xff]  }
 0x686   : > { %v4929_v41 = vpop.permute.xlu1 %4928 }
 0x687   : > { %5285 = vperm.xlu0 %9415, %v5263_v61   ;;  %6557 = vmatprep.subr.bf16.mxu0 %v4929_v41  ;;  %v4944_v22 = vsel %vm15804_vm5, %v4927_v35, %v4929_v41  ;;  %v9743_v35 = vld [vmem:[%s15251_s4 + $0x2fc] ss:$60 sps:$4 sm:$0xff]   ;;  %vm15820_vm5 = vmmov %vm15815_vm0 }
 0x688   : > { %5300 = vperm.xlu1 %9414, %v5266_v34  }
 0x689   : > { %6558 = vmatpush1.bf16.msra.mxu0 %v4944_v22  ;;  %v4931_v58 = vpop.permute.xlu0 %4930 }
 0x68a   : > { %v4933_v24 = vpop.permute.xlu1 %4932 }
 0x68b   : > { %5305 = vperm.xlu0 %9415, %v5267_v45   ;;  %6559 = vmatprep.subr.bf16.mxu0 %v4933_v24  ;;  %v4945_v21 = vsel %vm15805_vm9, %v4931_v58, %v4933_v24  ;;  %v9745_v58 = vld [vmem:[%s15251_s4 + $0x2f8] ss:$60 sps:$4 sm:$0xff]   ;;  %vm15821_vm9 = vmmov %vm15815_vm0 }
 0x68c   : > { %6521 = vmatmul.mubr.bf16.gmra.mrb[60].mxu0 %v9724_v51  ;;  %5355 = vperm.xlu1 %9414, %v5277_v25  }
 0x68d   : > { %6560 = vmatpush1.bf16.msra.mxu0 %v4945_v21  ;;  %v4935_v50 = vpop.permute.xlu0 %4934  ;;  %6563 = vmatprep.mubr.bf16.mxu0 %v9727_v12  ;;  %v9746_v12 = vld [vmem:[%s15251_s4 + $0x374] ss:$60 sps:$4 sm:$0xff]  }
 0x68e   : > { %v4937_v37 = vpop.permute.xlu1 %4936 }
 0x68f   : > { %v4946_v20 = vsel %vm15806_vm8, %v4935_v50, %v4937_v37  ;;  %5290 = vperm.xlu0 %9415, %v5264_v28   ;;  %6561 = vmatprep.subr.bf16.mxu0 %v4937_v37  ;;  %v9748_v37 = vld [vmem:[%s15251_s4 + $0x370] ss:$60 sps:$4 sm:$0xff]   ;;  %vm15822_vm8 = vmmov %vm15815_vm0 }
 0x690   : > { %5310 = vperm.xlu1 %9414, %v5268_v57  }
 0x691   : > { %6562 = vmatpush1.bf16.msra.mxu0 %v4946_v20  ;;  %v4964_v3 = vpop.permute.xlu0 %4963 }
 0x692   : > { %v4966_v8 = vpop.permute.xlu1 %4965 }
 0x693   : > { %5320 = vperm.xlu0 %9415, %v5270_v33   ;;  %6644 = vmatprep.subr.bf16.mxu0 %v4966_v8  ;;  %v4996_v59 = vsel %vm15807_vm6, %v4964_v3, %v4966_v8  ;;  %vm15823_vm6 = vcmask 932864  }
 0x694   : > { %6564 = vmatmul.mubr.bf16.vlgmr.msra.gmra.mrb[32].mxu0 %v9725_v10  ;;  %8047 = vmatprep.subr.bf16.mxu1 %v4966_v8  ;;  %v9754_v10 = vld [vmem:[%s15251_s4 + $0x34] ss:$60 sps:$4 sm:$0xff]  }
 0x695   : > { %5325 = vperm.xlu1 %9414, %v5271_v52   ;;  %6645 = vmatpush1.bf16.msra.mxu0 %v4996_v59  ;;  %v4968_v40 = vpop.permute.xlu0 %4967 }
 0x696   : > { %8063 = vmatpush1.bf16.msra.mxu1 %v4996_v59  ;;  %v4970_v4 = vpop.permute.xlu1 %4969  ;;  %6573 = vmatprep.mubr.bf16.mxu0 %v9728_v2  ;;  %v9752_v59 = vld [vmem:[%s15251_s4 + $0x30] ss:$60 sps:$4 sm:$0xff]  }
 0x697   : > { %5295 = vperm.xlu0 %9415, %v5265_v6   ;;  %6646 = vmatprep.subr.bf16.mxu0 %v4970_v4  ;;  %v4997_v39 = vsel %vm15808_vm10, %v4968_v40, %v4970_v4  ;;  %v9749_v40 = vld [vmem:[%s15251_s4 + $0x300] ss:$60 sps:$4 sm:$0xff]   ;;  %vm15824_vm10 = vmmov %vm15823_vm6 }
 0x698   : > { %8048 = vmatprep.subr.bf16.mxu1 %v4970_v4 }
 0x699   : > { %5315 = vperm.xlu1 %9414, %v5269_v7   ;;  %6647 = vmatpush1.bf16.msra.mxu0 %v4997_v39  ;;  %v4972_v14 = vpop.permute.xlu0 %4971  ;;  %v9755_v7 = vld [vmem:[%s15251_s4 + $0x37c] ss:$60 sps:$4 sm:$0xff]  }
 0x69a   : > { %8064 = vmatpush1.bf16.msra.mxu1 %v4997_v39  ;;  %v4974_v31 = vpop.permute.xlu1 %4973  ;;  %v9757_v39 = vld [vmem:[%s15251_s4 + $0xac] ss:$60 sps:$4 sm:$0xff]  }
 0x69b   : > { %5330 = vperm.xlu0 %9415, %v5272_v53   ;;  %6648 = vmatprep.subr.bf16.mxu0 %v4974_v31  ;;  %v4998_v18 = vsel %vm15809_vm15, %v4972_v14, %v4974_v31  ;;  %vm15825_vm15 = vmmov %vm15823_vm6 }
 0x69c   : > { %6574 = vmatmul.mubr.bf16.gmra.mrb[36].mxu0 %v9730_v43  ;;  %8049 = vmatprep.subr.bf16.mxu1 %v4974_v31 }
 0x69d   : > { %5335 = vperm.xlu1 %9414, %v5273_v44   ;;  %6649 = vmatpush1.bf16.msra.mxu0 %v4998_v18  ;;  %v4976_v5 = vpop.permute.xlu0 %4975  ;;  %v9759_v44 = vld [vmem:[%s15251_s4 + $0xa8] ss:$60 sps:$4 sm:$0xff]  }
 0x69e   : > { %8065 = vmatpush1.bf16.msra.mxu1 %v4998_v18  ;;  %v4978_v55 = vpop.permute.xlu1 %4977  ;;  %6583 = vmatprep.mubr.bf16.mxu0 %v9731_v15  ;;  %v9760_v18 = vld [vmem:[%s15251_s4 + $0x378] ss:$60 sps:$4 sm:$0xff]  }
 0x69f   : > { %6650 = vmatprep.subr.bf16.mxu0 %v4978_v55  ;;  %8050 = vmatprep.subr.bf16.mxu1 %v4978_v55  ;;  %v4999_v46 = vsel %vm15810_vm11, %v4976_v5, %v4978_v55  ;;  %v9761_v55 = vld [vmem:[%s15251_s4 + $0x124] ss:$60 sps:$4 sm:$0xff]   ;;  %vm15826_vm11 = vmmov %vm15823_vm6 }
 0x6a1   : > { %6651 = vmatpush1.bf16.msra.mxu0 %v4999_v46  ;;  %v4980_v23 = vpop.permute.xlu0 %4979 }
 0x6a2   : > { %8066 = vmatpush1.bf16.msra.mxu1 %v4999_v46  ;;  %v4982_v29 = vpop.permute.xlu1 %4981 }
 0x6a3   : > { %6652 = vmatprep.subr.bf16.mxu0 %v4982_v29  ;;  %8051 = vmatprep.subr.bf16.mxu1 %v4982_v29  ;;  %v5000_v1 = vsel %vm15811_vm12, %v4980_v23, %v4982_v29  ;;  %v9763_v29 = vld [vmem:[%s15251_s4 + $0x120] ss:$60 sps:$4 sm:$0xff]   ;;  %vm15827_vm12 = vmmov %vm15823_vm6 }
 0x6a4   : > { %6584 = vmatmul.mubr.bf16.gmra.mrb[40].mxu0 %v9733_v0 }
 0x6a5   : > { %6653 = vmatpush1.bf16.msra.mxu0 %v5000_v1  ;;  %v4984_v54 = vpop.permute.xlu0 %4983  ;;  %6593 = vmatprep.mubr.bf16.mxu0 %v9734_v30 }
 0x6a6   : > { %8067 = vmatpush1.bf16.msra.mxu1 %v5000_v1  ;;  %v4986_v60 = vpop.permute.xlu1 %4985 }
 0x6a7   : > { %6654 = vmatprep.subr.bf16.mxu0 %v4986_v60  ;;  %8052 = vmatprep.subr.bf16.mxu1 %v4986_v60  ;;  %v5001_v27 = vsel %vm15812_vm7, %v4984_v54, %v4986_v60  ;;  %v9764_v54 = vld [vmem:[%s15251_s4 + $0x19c] ss:$60 sps:$4 sm:$0xff]   ;;  %vm15828_vm7 = vmmov %vm15823_vm6 }
 0x6a9   : > { %6655 = vmatpush1.bf16.msra.mxu0 %v5001_v27  ;;  %v4988_v62 = vpop.permute.xlu0 %4987 }
 0x6aa   : > { %8068 = vmatpush1.bf16.msra.mxu1 %v5001_v27  ;;  %v4990_v9 = vpop.permute.xlu1 %4989 }
 0x6ab   : > { %6656 = vmatprep.subr.bf16.mxu0 %v4990_v9  ;;  %8053 = vmatprep.subr.bf16.mxu1 %v4990_v9  ;;  %v5002_v11 = vsel %vm15813_vm14, %v4988_v62, %v4990_v9  ;;  %v9766_v9 = vld [vmem:[%s15251_s4 + $0x198] ss:$60 sps:$4 sm:$0xff]   ;;  %vm15829_vm14 = vmmov %vm15823_vm6 }
 0x6ac   : > { %6594 = vmatmul.mubr.bf16.gmra.mrb[44].mxu0 %v9736_v47 }
 0x6ad   : > { %6657 = vmatpush1.bf16.msra.mxu0 %v5002_v11  ;;  %v4992_v49 = vpop.permute.xlu0 %4991  ;;  %6603 = vmatprep.mubr.bf16.mxu0 %v9737_v26 }
 0x6ae   : > { %8069 = vmatpush1.bf16.msra.mxu1 %v5002_v11  ;;  %v4994_v63 = vpop.permute.xlu1 %4993 }
 0x6af   : > { %6658 = vmatprep.subr.bf16.mxu0 %v4994_v63  ;;  %8054 = vmatprep.subr.bf16.mxu1 %v4994_v63  ;;  %v5003_v19 = vsel %vm15814_vm13, %v4992_v49, %v4994_v63  ;;  %v9767_v49 = vld [vmem:[%s15251_s4 + $0x214] ss:$60 sps:$4 sm:$0xff]   ;;  %vm15830_vm13 = vmmov %vm15823_vm6 }
 0x6b1   : > { %6659 = vmatpush1.bf16.msra.mxu0 %v5003_v19  ;;  %v5021_v42 = vpop.permute.xlu0 %5020 }
 0x6b2   : > { %8070 = vmatpush1.bf16.msra.mxu1 %v5003_v19  ;;  %v5023_v32 = vpop.permute.xlu1 %5022 }
 0x6b3   : > { %6660 = vmatprep.subr.bf16.mxu0 %v5023_v32  ;;  %8055 = vmatprep.subr.bf16.mxu1 %v5023_v32  ;;  %v5053_v38 = vsel %vm15815_vm0, %v5021_v42, %v5023_v32  ;;  %v9769_v32 = vld [vmem:[%s15251_s4 + $0x210] ss:$60 sps:$4 sm:$0xff]  }
 0x6b4   : > { %6604 = vmatmul.mubr.bf16.gmra.mrb[48].mxu0 %v9739_v56 }
 0x6b5   : > { %6661 = vmatpush1.bf16.msra.mxu0 %v5053_v38  ;;  %v5025_v17 = vpop.permute.xlu0 %5024  ;;  %6613 = vmatprep.mubr.bf16.mxu0 %v9740_v48 }
 0x6b6   : > { %8071 = vmatpush1.bf16.msra.mxu1 %v5053_v38  ;;  %v5027_v16 = vpop.permute.xlu1 %5026  ;;  %v9770_v38 = vld [vmem:[%s15251_s4 + $0x28c] ss:$60 sps:$4 sm:$0xff]  }
 0x6b7   : > { %6662 = vmatprep.subr.bf16.mxu0 %v5027_v16  ;;  %8056 = vmatprep.subr.bf16.mxu1 %v5027_v16  ;;  %v5054_v13 = vsel %vm15816_vm1, %v5025_v17, %v5027_v16  ;;  %v9772_v17 = vld [vmem:[%s15251_s4 + $0x288] ss:$60 sps:$4 sm:$0xff]   ;;  %v15831_v16 = vmov 0   ;;  %vm7126_vm1 = vcmask 482304  }
 0x6b9   : > { %6663 = vmatpush1.bf16.msra.mxu0 %v5054_v13  ;;  %v5029_v61 = vpop.permute.xlu0 %5028 }
 0x6ba   : > { %8072 = vmatpush1.bf16.msra.mxu1 %v5054_v13  ;;  %v5031_v34 = vpop.permute.xlu1 %5030  ;;  %v9773_v13 = vld [vmem:[%s15251_s4 + $0x38] ss:$60 sps:$4 sm:$0xff]  }
 0x6bb   : > { %6664 = vmatprep.subr.bf16.mxu0 %v5031_v34  ;;  %8057 = vmatprep.subr.bf16.mxu1 %v5031_v34  ;;  %v5055_v41 = vsel %vm15817_vm2, %v5029_v61, %v5031_v34  ;;  %v9775_v61 = vld [vmem:[%s15251_s4 + $0x128] ss:$60 sps:$4 sm:$0xff]   ;;  %v9777_v34 = vld [vmem:[%s15251_s4 + $0x218] ss:$60 sps:$4 sm:$0xff]  }
 0x6bc   : > { %6614 = vmatmul.mubr.bf16.gmra.mrb[52].mxu0 %v9742_v36  ;;  %v9774_v36 = vld [vmem:[%s15251_s4 + $0xb0] ss:$60 sps:$4 sm:$0xff]  }
 0x6bd   : > { %6665 = vmatpush1.bf16.msra.mxu0 %v5055_v41  ;;  %v5033_v22 = vpop.permute.xlu0 %5032  ;;  %6623 = vmatprep.mubr.bf16.mxu0 %v9743_v35  ;;  %v9776_v35 = vld [vmem:[%s15251_s4 + $0x1a0] ss:$60 sps:$4 sm:$0xff]  }
 0x6be   : > { %8073 = vmatpush1.bf16.msra.mxu1 %v5055_v41  ;;  %v5035_v45 = vpop.permute.xlu1 %5034  ;;  %v9778_v41 = vld [vmem:[%s15251_s4 + $0x290] ss:$60 sps:$4 sm:$0xff]  }
 0x6bf   : > { %6666 = vmatprep.subr.bf16.mxu0 %v5035_v45  ;;  %8058 = vmatprep.subr.bf16.mxu1 %v5035_v45  ;;  %v5056_v51 = vsel %vm15818_vm3, %v5033_v22, %v5035_v45  ;;  %v9779_v22 = vld [vmem:[%s15251_s4 + $0x308] ss:$60 sps:$4 sm:$0xff]   ;;  %v9780_v45 = vld [vmem:[%s15251_s4 + $0x380] ss:$60 sps:$4 sm:$0xff]  }
 0x6c1   : > { %6667 = vmatpush1.bf16.msra.mxu0 %v5056_v51  ;;  %v5037_v25 = vpop.permute.xlu0 %5036 }
 0x6c2   : > { %8074 = vmatpush1.bf16.msra.mxu1 %v5056_v51  ;;  %v5039_v24 = vpop.permute.xlu1 %5038 }
 0x6c3   : > { %6668 = vmatprep.subr.bf16.mxu0 %v5039_v24  ;;  %8059 = vmatprep.subr.bf16.mxu1 %v5039_v24  ;;  %v5057_v21 = vsel %vm15819_vm4, %v5037_v25, %v5039_v24 }
 0x6c4   : > { %6624 = vmatmul.mubr.bf16.gmra.mrb[56].mxu0 %v9745_v58 }
 0x6c5   : > { %6669 = vmatpush1.bf16.msra.mxu0 %v5057_v21  ;;  %v5041_v28 = vpop.permute.xlu0 %5040  ;;  %6633 = vmatprep.mubr.bf16.mxu0 %v9746_v12 }
 0x6c6   : > { %8075 = vmatpush1.bf16.msra.mxu1 %v5057_v21  ;;  %v5043_v50 = vpop.permute.xlu1 %5042 }
 0x6c7   : > { %6670 = vmatprep.subr.bf16.mxu0 %v5043_v50  ;;  %8060 = vmatprep.subr.bf16.mxu1 %v5043_v50  ;;  %v5058_v57 = vsel %vm15820_vm5, %v5041_v28, %v5043_v50 }
 0x6c9   : > { %6671 = vmatpush1.bf16.msra.mxu0 %v5058_v57  ;;  %v5045_v20 = vpop.permute.xlu0 %5044 }
 0x6ca   : > { %8076 = vmatpush1.bf16.msra.mxu1 %v5058_v57  ;;  %v5047_v33 = vpop.permute.xlu1 %5046 }
 0x6cb   : > { %6672 = vmatprep.subr.bf16.mxu0 %v5047_v33  ;;  %8061 = vmatprep.subr.bf16.mxu1 %v5047_v33  ;;  %v5059_v3 = vsel %vm15821_vm9, %v5045_v20, %v5047_v33 }
 0x6cc   : > { %6634 = vmatmul.mubr.bf16.gmra.mrb[60].mxu0 %v9748_v37 }
 0x6cd   : > { %6673 = vmatpush1.bf16.msra.mxu0 %v5059_v3  ;;  %v5049_v8 = vpop.permute.xlu0 %5048  ;;  %6676 = vmatprep.mubr.bf16.mxu0 %v9754_v10 }
 0x6ce   : > { %8077 = vmatpush1.bf16.msra.mxu1 %v5059_v3  ;;  %v5051_v52 = vpop.permute.xlu1 %5050 }
 0x6cf   : > { %6674 = vmatprep.subr.bf16.mxu0 %v5051_v52  ;;  %8062 = vmatprep.subr.bf16.mxu1 %v5051_v52  ;;  %v5060_v2 = vsel %vm15822_vm8, %v5049_v8, %v5051_v52 }
 0x6d1   : > { %6675 = vmatpush1.bf16.msra.mxu0 %v5060_v2  ;;  %v5078_v6 = vpop.permute.xlu0 %5077 }
 0x6d2   : > { %8078 = vmatpush1.bf16.msra.mxu1 %v5060_v2  ;;  %v5080_v4 = vpop.permute.xlu1 %5079 }
 0x6d3   : > { %v5110_v53 = vsel %vm15823_vm6, %v5078_v6, %v5080_v4  ;;  %6757 = vmatprep.subr.bf16.mxu0 %v5080_v4 }
 0x6d4   : > { %6677 = vmatmul.mubr.bf16.vlgmr.msra.gmra.mrb[32].mxu0 %v9752_v59 }
 0x6d5   : > { %6737 = vmatmul.mubr.bf16.vlgmr.msra.gmra.mrb[128].mxu1 %v9749_v40  ;;  %6758 = vmatpush1.bf16.msra.mxu0 %v5110_v53  ;;  %v5082_v43 = vpop.permute.xlu0 %5081 }
 0x6d6   : > { %v5084_v14 = vpop.permute.xlu1 %5083  ;;  %6746 = vmatprep.mubr.bf16.mxu1 %v9755_v7  ;;  %6686 = vmatprep.mubr.bf16.mxu0 %v9757_v39 }
 0x6d7   : > { %v5111_v31 = vsel %vm15824_vm10, %v5082_v43, %v5084_v14  ;;  %6759 = vmatprep.subr.bf16.mxu0 %v5084_v14 }
 0x6d9   : > { %6760 = vmatpush1.bf16.msra.mxu0 %v5111_v31  ;;  %v5086_v15 = vpop.permute.xlu0 %5085 }
 0x6da   : > { %v5088_v5 = vpop.permute.xlu1 %5087 }
 0x6db   : > { %v5112_v46 = vsel %vm15825_vm15, %v5086_v15, %v5088_v5  ;;  %6761 = vmatprep.subr.bf16.mxu0 %v5088_v5 }
 0x6dc   : > { %6687 = vmatmul.mubr.bf16.gmra.mrb[36].mxu0 %v9759_v44 }
 0x6dd   : > { %6747 = vmatmul.mubr.bf16.gmra.mrb[132].mxu1 %v9760_v18  ;;  %6762 = vmatpush1.bf16.msra.mxu0 %v5112_v46  ;;  %v5090_v0 = vpop.permute.xlu0 %5089 }
 0x6de   : > { %v5092_v23 = vpop.permute.xlu1 %5091  ;;  %6696 = vmatprep.mubr.bf16.mxu0 %v9761_v55 }
 0x6df   : > { %v5113_v30 = vsel %vm15826_vm11, %v5090_v0, %v5092_v23  ;;  %6763 = vmatprep.subr.bf16.mxu0 %v5092_v23 }
 0x6e1   : > { %6764 = vmatpush1.bf16.msra.mxu0 %v5113_v30  ;;  %v5094_v1 = vpop.permute.xlu0 %5093 }
 0x6e2   : > { %v5096_v60 = vpop.permute.xlu1 %5095 }
 0x6e3   : > { %v5114_v27 = vsel %vm15827_vm12, %v5094_v1, %v5096_v60  ;;  %6765 = vmatprep.subr.bf16.mxu0 %v5096_v60 }
 0x6e4   : > { %6697 = vmatmul.mubr.bf16.gmra.mrb[40].mxu0 %v9763_v29 }
 0x6e5   : > { %6766 = vmatpush1.bf16.msra.mxu0 %v5114_v27  ;;  %v5098_v47 = vpop.permute.xlu0 %5097  ;;  %6706 = vmatprep.mubr.bf16.mxu0 %v9764_v54 }
 0x6e6   : > { %v5100_v62 = vpop.permute.xlu1 %5099 }
 0x6e7   : > { %v5115_v26 = vsel %vm15828_vm7, %v5098_v47, %v5100_v62  ;;  %6767 = vmatprep.subr.bf16.mxu0 %v5100_v62 }
 0x6e9   : > { %6768 = vmatpush1.bf16.msra.mxu0 %v5115_v26  ;;  %v5102_v11 = vpop.permute.xlu0 %5101 }
 0x6ea   : > { %v5104_v63 = vpop.permute.xlu1 %5103 }
 0x6eb   : > { %v5116_v19 = vsel %vm15829_vm14, %v5102_v11, %v5104_v63  ;;  %6769 = vmatprep.subr.bf16.mxu0 %v5104_v63 }
 0x6ec   : > { %6707 = vmatmul.mubr.bf16.gmra.mrb[44].mxu0 %v9766_v9 }
 0x6ed   : > { %6770 = vmatpush1.bf16.msra.mxu0 %v5116_v19  ;;  %v5106_v56 = vpop.permute.xlu0 %5105  ;;  %6716 = vmatprep.mubr.bf16.mxu0 %v9767_v49 }
 0x6ee   : > { %v5108_v42 = vpop.permute.xlu1 %5107 }
 0x6ef   : > { %v5117_v48 = vsel %vm15830_vm13, %v5106_v56, %v5108_v42  ;;  %6771 = vmatprep.subr.bf16.mxu0 %v5108_v42 }
 0x6f1   : > { %6772 = vmatpush1.bf16.msra.mxu0 %v5117_v48 }
 0x6f4   : > { %6717 = vmatmul.mubr.bf16.gmra.mrb[48].mxu0 %v9769_v32 }
 0x6f5   : > { %6726 = vmatprep.mubr.bf16.mxu0 %v9770_v38 }
 0x6fc   : > { %6727 = vmatmul.mubr.bf16.gmra.mrb[52].mxu0 %v9772_v17 }
 0x6fd   : > { %6789 = vmatprep.mubr.bf16.mxu0 %v15831_v16 }
 0x6fe   : > { %v5341_v20 = vpop.permute.xlu0 %5340 }
 0x6ff   : > { %v5346_v24 = vpop.permute.xlu1 %5345 }
 0x702   : > { %v5351_v43 = vpop.permute.xlu0 %5350 }
 0x703   : > { %v5281_v37 = vpop.permute.xlu1 %5280 }
 0x704   : > { %6790 = vmatmul.mubr.bf16.vlgmr.msra.gmra.mrb[32].mxu0 %v9773_v13 }
 0x705   : > { %6799 = vmatprep.mubr.bf16.mxu0 %v15831_v16 }
 0x706   : > { %v5286_v54 = vpop.permute.xlu0 %5285 }
 0x707   : > { %v14539_v59 = vpop.permute.xlu1 %5300 }
 0x70a   : > { %v14555_v60 = vpop.permute.xlu0 %5305 }
 0x70b   : > { %v5356_v31 = vpop.permute.xlu1 %5355 }
 0x70c   : > { %6800 = vmatmul.mubr.bf16.gmra.mrb[36].mxu0 %v9774_v36 }
 0x70d   : > { %6809 = vmatprep.mubr.bf16.mxu0 %v15831_v16 }
 0x70e   : > { %v5291_v27 = vpop.permute.xlu0 %5290 }
 0x712   : > { %v14562_v56 = vpop.permute.xlu0 %5320 }
 0x714   : > { %6810 = vmatmul.mubr.bf16.gmra.mrb[40].mxu0 %v9775_v61 }
 0x715   : > { %6819 = vmatprep.mubr.bf16.mxu0 %v15831_v16 }
 0x71c   : > { %6820 = vmatmul.mubr.bf16.gmra.mrb[44].mxu0 %v9776_v35 }
 0x71d   : > { %6829 = vmatprep.mubr.bf16.mxu0 %v15831_v16 }
 0x724   : > { %6830 = vmatmul.mubr.bf16.gmra.mrb[48].mxu0 %v9777_v34 }
 0x725   : > { %6839 = vmatprep.mubr.bf16.mxu0 %v15831_v16 }
 0x72c   : > { %6840 = vmatmul.mubr.bf16.gmra.mrb[52].mxu0 %v9778_v41  ;;  %v5296_v41 = vpop.permute.xlu0 %5295 }
 0x72d   : > { %6849 = vmatprep.mubr.bf16.mxu0 %v15831_v16 }
 0x734   : > { %6850 = vmatmul.mubr.bf16.gmra.mrb[64].mxu0 %v9779_v22 }
 0x735   : > { %6859 = vmatprep.mubr.bf16.mxu0 %v15831_v16 }
 0x73c   : > { %6860 = vmatmul.mubr.bf16.gmra.mrb[68].mxu0 %v9780_v45 }
 0x797   : > { %v6625_v51 = vpop.f32.mrb[56].mxu0 }
 0x798   : > { %v6627_v58 = vpop.f32.mrb[57].mxu0  ;;  %v8231_v10 = vadd.f32 %v6625_v51, %v5341_v20 }
 0x799   : > { %v6629_v25 = vpop.f32.mrb[58].mxu0  ;;  %v8234_v33 = vadd.f32 %v6627_v58, %v5341_v20 }
 0x79a   : > { %v6631_v12 = vpop.f32.mrb[59].mxu0  ;;  %v8237_v8 = vadd.f32 %v6629_v25, %v5346_v24 }
 0x79b   : > { %v8240_v6 = vadd.f32 %v6631_v12, %v5346_v24 }
 0x79f   : > { %v6635_v21 = vpop.f32.mrb[60].mxu0 }
 0x7a0   : > { %v6637_v28 = vpop.f32.mrb[61].mxu0  ;;  %v8243_v14 = vadd.f32 %v6635_v21, %v5351_v43 }
 0x7a1   : > { %v6639_v50 = vpop.f32.mrb[62].mxu0  ;;  %v8246_v44 = vadd.f32 %v6637_v28, %v5351_v43 }
 0x7a2   : > { %v6641_v57 = vpop.f32.mrb[63].mxu0  ;;  %v8249_v18 = vadd.f32 %v6639_v50, %v5356_v31 }
 0x7a3   : > { %v8252_v46 = vadd.f32 %v6641_v57, %v5356_v31 }
 0x7a8   : > { %v6738_v3 = vpop.f32.mrb[128].mxu1 }
 0x7a9   : > { %v14537_v52 = vadd.f32 %v8231_v10, %v6738_v3  ;;  %v6740_v2 = vpop.f32.mrb[129].mxu1 }
 0x7aa   : > { %v14541_v40 = vadd.f32 %v8234_v33, %v6740_v2  ;;  %v6742_v4 = vpop.f32.mrb[130].mxu1 }
 0x7ab   : > { %v14543_v7 = vadd.f32 %v8237_v8, %v6742_v4  ;;  %v6744_v39 = vpop.f32.mrb[131].mxu1  ;;  %v5311_v8 = vpop.permute.xlu1 %5310 }
 0x7ac   : > { %v14545_v53 = vadd.f32 %v8240_v6, %v6744_v39 }
 0x7b0   : > { %v6748_v15 = vpop.f32.mrb[132].mxu1 }
 0x7b1   : > { %v14547_v5 = vadd.f32 %v8243_v14, %v6748_v15  ;;  %v6750_v55 = vpop.f32.mrb[133].mxu1 }
 0x7b2   : > { %v14549_v0 = vadd.f32 %v8246_v44, %v6750_v55  ;;  %v6752_v23 = vpop.f32.mrb[134].mxu1 }
 0x7b3   : > { %v14551_v30 = vadd.f32 %v8249_v18, %v6752_v23  ;;  %v6754_v29 = vpop.f32.mrb[135].mxu1 }
 0x7b4   : > { %v14553_v1 = vadd.f32 %v8252_v46, %v6754_v29 }
 0x7d7   : > { %v6791_v47 = vpop.f32.mrb[32].mxu0 }
 0x7d8   : > { %v14557_v62 = vadd.f32 %v6791_v47, %v5281_v37  ;;  %v6793_v26 = vpop.f32.mrb[33].mxu0 }
 0x7d9   : > { %v8208_v9 = vadd.f32 %v6793_v26, %v5281_v37  ;;  %v6795_v11 = vpop.f32.mrb[34].mxu0  ;;  %v14597_v26 = vpop.permute.xlu1 %5325 }
 0x7da   : > { %v6902_v49 = vmin.f32 %v14557_v62, 0.0  ;;  %v14560_v63 = vadd.f32 %v6795_v11, %v5286_v54  ;;  %v6797_v19 = vpop.f32.mrb[35].mxu0  ;;  %vm6870_vm2 = vcmp.gt.f32.partialorder %v14557_v62, 0.0 }
 0x7db   : > { %v6903_v42 = vmin.f32 %v8208_v9, 0.0  ;;  %v14564_v48 = vadd.f32 %v6797_v19, %v5286_v54  ;;  %vm6871_vm0 = vcmp.gt.f32.partialorder %v8208_v9, 0.0 }
 0x7dc   : > { %v6934_v32 = vmul.f32 1.442695, %v6902_v49  ;;  %v6904_v38 = vmin.f32 %v14560_v63, 0.0  ;;  %vm6872_vm4 = vcmp.gt.f32.partialorder %v14560_v63, 0.0 }
 0x7dd   : > { %v6936_v17 = vmul.f32 1.442695, %v6903_v42  ;;  %v6905_v16 = vmin.f32 %v14564_v48, 0.0  ;;  %vm6873_vm3 = vcmp.gt.f32.partialorder %v14564_v48, 0.0 }
 0x7de   : > { %v6938_v61 = vmul.f32 1.442695, %v6904_v38 }
 0x7df   : > { %9973 = vpow2.f32 %v6936_v17  ;;  %v6940_v13 = vmul.f32 1.442695, %v6905_v16  ;;  %v6801_v36 = vpop.f32.mrb[36].mxu0 }
 0x7e0   : > { %9975 = vpow2.f32 %v6934_v32  ;;  %v14568_v35 = vadd.f32 %v6801_v36, %v5291_v27  ;;  %v6803_v34 = vpop.f32.mrb[37].mxu0 }
 0x7e1   : > { %9977 = vpow2.f32 %v6940_v13  ;;  %v14570_v22 = vadd.f32 %v6803_v34, %v5291_v27  ;;  %v6805_v45 = vpop.f32.mrb[38].mxu0 }
 0x7e2   : > { %v6906_v51 = vmin.f32 %v14568_v35, 0.0  ;;  %v14573_v58 = vadd.f32 %v6805_v45, %v5296_v41  ;;  %v6807_v25 = vpop.f32.mrb[39].mxu0  ;;  %9979 = vpow2.f32 %v6938_v61  ;;  %v7065_v61 = vld [vmem:[%s15253_s6 + $0x18] sm:$0xff]  ;;  %v8012_v45 = vld [vmem:[%s15253_s6 + $0x100] sm:$0xff]  ;;  %vm6874_vm5 = vcmp.gt.f32.partialorder %v14568_v35, 0.0 }
 0x7e3   : > { %v6907_v12 = vmin.f32 %v14570_v22, 0.0  ;;  %v14576_v24 = vadd.f32 %v6807_v25, %v5296_v41  ;;  %vm6875_vm9 = vcmp.gt.f32.partialorder %v14570_v22, 0.0 }
 0x7e4   : > { %v6942_v21 = vmul.f32 1.442695, %v6906_v51  ;;  %v6908_v57 = vmin.f32 %v14573_v58, 0.0  ;;  %vm6876_vm6 = vcmp.gt.f32.partialorder %v14573_v58, 0.0 }
 0x7e5   : > { %v6909_v28 = vmin.f32 %v14576_v24, 0.0  ;;  %v6944_v50 = vmul.f32 1.442695, %v6907_v12  ;;  %vm6877_vm8 = vcmp.gt.f32.partialorder %v14576_v24, 0.0 }
 0x7e6   : > { %9981 = vpow2.f32 %v6942_v21  ;;  %v6946_v43 = vmul.f32 1.442695, %v6908_v57 }
 0x7e7   : > { %v6811_v37 = vpop.f32.mrb[40].mxu0  ;;  %v6948_v20 = vmul.f32 1.442695, %v6909_v28  ;;  %9983 = vpow2.f32 %v6944_v50  ;;  %v5316_v50 = vpop.permute.xlu1 %5315 }
 0x7e8   : > { %v14581_v10 = vadd.f32 %v6811_v37, %v14539_v59  ;;  %v6813_v33 = vpop.f32.mrb[41].mxu0 }
 0x7e9   : > { %v9974_v3 = vpop.eup %9973  ;;  %v14584_v2 = vadd.f32 %v6813_v33, %v14539_v59  ;;  %v6815_v6 = vpop.f32.mrb[42].mxu0  ;;  %9985 = vpow2.f32 %v6948_v20  ;;  %v8013_v59 = vld [vmem:[%s15253_s6 + $0x108] sm:$0xff]  ;;  %v8015_v20 = vld [vmem:[%s15253_s6 + $0x118] sm:$0xff] }
 0x7ea   : > { %v9976_v4 = vpop.eup %9975  ;;  %v7981_v39 = vadd.f32 -1.0, %v9974_v3  ;;  %v6910_v14 = vmin.f32 %v14581_v10, 0.0  ;;  %v6817_v31 = vpop.f32.mrb[43].mxu0  ;;  %v14589_v18 = vadd.f32 %v6815_v6, %v14555_v60  ;;  %9987 = vpow2.f32 %v6946_v43  ;;  %v7062_v3 = vld [vmem:[%s15253_s6] sm:$0xff] }
 0x7eb   : > { %v9978_v44 = vpop.eup %9977  ;;  %v6911_v15 = vmin.f32 %v14584_v2, 0.0  ;;  %v7980_v54 = vadd.f32 -1.0, %v9976_v4  ;;  %v14595_v47 = vadd.f32 %v6817_v31, %v14555_v60  ;;  %v7063_v60 = vld [vmem:[%s15253_s6 + $0x8] sm:$0xff]  ;;  %vm6878_vm10 = vcmp.gt.f32.partialorder %v14581_v10, 0.0 }
 0x7ec   : > { %v6950_v55 = vmul.f32 1.442695, %v6910_v14  ;;  %v7031_v46 = vsel %vm6871_vm0, %v8208_v9, %v7981_v39  ;;  %v9980_v29 = vpop.eup %9979  ;;  %v7983_v27 = vadd.f32 -1.0, %v9978_v44  ;;  %v6912_v11 = vmin.f32 %v14589_v18, 0.0 }
 0x7ed   : > { %v6952_v23 = vmul.f32 1.442695, %v6911_v15  ;;  %v7336_v9 = vmul.f32 %v8013_v59, %v7031_v46  ;;  %v6913_v19 = vmin.f32 %v14595_v47, 0.0  ;;  %v7982_v38 = vadd.f32 -1.0, %v9980_v29 }
 0x7ee   : > { %9989 = vpow2.f32 %v6950_v55  ;;  %v7030_v13 = vsel %vm6870_vm2, %v14557_v62, %v7980_v54  ;;  %v7033_v36 = vsel %vm6873_vm3, %v14564_v48, %v7983_v27  ;;  %v6954_v62 = vmul.f32 1.442695, %v6912_v11 }
 0x7ef   : > { %v6821_v49 = vpop.f32.mrb[44].mxu0  ;;  %9991 = vpow2.f32 %v6952_v23  ;;  %v6956_v34 = vmul.f32 1.442695, %v6913_v19  ;;  %v7095_v48 = vmul.f32 %v7063_v60, %v7031_v46  ;;  %v7367_v28 = vsel %vm7126_vm1, %v7336_v9, 0.0  ;;  %v8014_v19 = vld [vmem:[%s15253_s6 + $0x110] sm:$0xff] }
 0x7f0   : > { %v14601_v42 = vadd.f32 %v6821_v49, %v5311_v8  ;;  %v6823_v32 = vpop.f32.mrb[45].mxu0  ;;  %v9982_v51 = vpop.eup %9981  ;;  %v7032_v57 = vsel %vm6872_vm4, %v14560_v63, %v7982_v38  ;;  %v7097_v37 = vmul.f32 %v7065_v61, %v7033_v36  ;;  %v7335_v33 = vmul.f32 %v8012_v45, %v7030_v13  ;;  %v7064_v63 = vld [vmem:[%s15253_s6 + $0x10] sm:$0xff]  ;;  %v7067_v45 = vld [vmem:[%s15253_s6 + $0x28] sm:$0xff] }
 0x7f1   : > { %v14608_v17 = vadd.f32 %v6823_v32, %v5311_v8  ;;  %v6825_v16 = vpop.f32.mrb[46].mxu0  ;;  %v9984_v12 = vpop.eup %9983  ;;  %9993 = vpow2.f32 %v6956_v34  ;;  %v7984_v14 = vadd.f32 -1.0, %v9982_v51  ;;  %v7338_v46 = vmul.f32 %v8015_v20, %v7033_v36 }
 0x7f2   : > { %v6827_v41 = vpop.f32.mrb[47].mxu0  ;;  %v6914_v25 = vmin.f32 %v14601_v42, 0.0  ;;  %v14634_v39 = vadd.f32 %v6825_v16, %v5316_v50  ;;  %v7985_v31 = vadd.f32 -1.0, %v9984_v12  ;;  %9995 = vpow2.f32 %v6954_v62 }
 0x7f3   : > { %v6915_v21 = vmin.f32 %v14608_v17, 0.0  ;;  %v9986_v8 = vpop.eup %9985  ;;  %v14636_v43 = vadd.f32 %v6827_v41, %v5316_v50  ;;  %v7368_v44 = vadd.f32 %v7367_v28, %v7335_v33  ;;  %v7094_v23 = vmul.f32 %v7062_v3, %v7030_v13  ;;  %v8017_v50 = vld [vmem:[%s15253_s6 + $0x128] sm:$0xff] }
 0x7f4   : > { %v6958_v6 = vmul.f32 1.442695, %v6914_v25  ;;  %v9988_v55 = vpop.eup %9987  ;;  %v6916_v59 = vmin.f32 %v14634_v39, 0.0  ;;  %v7987_v27 = vadd.f32 -1.0, %v9986_v8  ;;  %v7127_v49 = vsel %vm7126_vm1, %v7095_v48, 0.0 }
 0x7f5   : > { %v6960_v4 = vmul.f32 1.442695, %v6915_v21  ;;  %v6917_v11 = vmin.f32 %v14636_v43, 0.0  ;;  %7369 = vadd.xlane.f32.xlu1 %v7368_v44  ;;  %v7096_v9 = vmul.f32 %v7064_v63, %v7032_v57  ;;  %vm6879_vm15 = vcmp.gt.f32.partialorder %v14584_v2, 0.0 }
 0x7f6   : > { %v7128_v38 = vadd.f32 %v7127_v49, %v7094_v23  ;;  %v7131_v16 = vsel %vm7126_vm1, %v7097_v37, 0.0  ;;  %v14654_v36 = vsel %vm6874_vm5, %v14568_v35, %v7984_v14  ;;  %v7035_v61 = vsel %vm6875_vm9, %v14570_v22, %v7985_v31  ;;  %v8019_v22 = vld [vmem:[%s15253_s6 + $0x138] sm:$0xff]  ;;  %v8018_v23 = vld [vmem:[%s15253_s6 + $0x130] sm:$0xff] }
 0x7f7   : > { %v6831_v15 = vpop.f32.mrb[48].mxu0  ;;  %9997 = vpow2.f32 %v6960_v4  ;;  %v6964_v34 = vmul.f32 1.442695, %v6917_v11  ;;  %v7132_v41 = vadd.f32 %v7131_v16, %v7096_v9  ;;  %v6962_v51 = vmul.f32 1.442695, %v6916_v59  ;;  %v7066_v4 = vld [vmem:[%s15253_s6 + $0x20] sm:$0xff] }
 0x7f8   : > { %v6833_v29 = vpop.f32.mrb[49].mxu0  ;;  %v9990_v54 = vpop.eup %9989  ;;  %9999 = vpow2.f32 %v6958_v6  ;;  %7129 = vadd.xlane.f32.xlu0 %v7128_v38  ;;  %v7337_v62 = vmul.f32 %v8014_v19, %v7032_v57  ;;  %v7371_v25 = vsel %vm7126_vm1, %v7338_v46, 0.0  ;;  %v14664_v12 = vadd.f32 %v6831_v15, %v14562_v56  ;;  %v7069_v57 = vld [vmem:[%s15253_s6 + $0x38] sm:$0xff]  ;;  %v7071_v19 = vld [vmem:[%s15253_s6 + $0x48] sm:$0xff] }
 0x7f9   : > { %v6835_v32 = vpop.f32.mrb[50].mxu0  ;;  %v9992_v60 = vpop.eup %9991  ;;  %v7986_v35 = vadd.f32 -1.0, %v9988_v55  ;;  %v7037_v48 = vsel %vm6877_vm8, %v14576_v24, %v7987_v27  ;;  %v7988_v21 = vadd.f32 -1.0, %v9990_v54  ;;  %vm6881_vm11 = vcmp.gt.f32.partialorder %v14595_v47, 0.0  ;;  %7133 = vadd.xlane.f32.xlu1 %v7132_v41 }
 0x7fa   : > { %v6837_v13 = vpop.f32.mrb[51].mxu0  ;;  %v7989_v28 = vadd.f32 -1.0, %v9992_v60  ;;  %10001 = vpow2.f32 %v6964_v34  ;;  %v7372_v37 = vadd.f32 %v7371_v25, %v7337_v62  ;;  %v6918_v24 = vmin.f32 %v14664_v12, 0.0  ;;  %v8016_v34 = vld [vmem:[%s15253_s6 + $0x120] sm:$0xff]  ;;  %v5331_v62 = vpop.permute.xlu0 %5330 }
 0x7fb   : > { %v14681_v20 = vadd.f32 %v6833_v29, %v14562_v56  ;;  %v9994_v33 = vpop.eup %9993  ;;  %v7099_v3 = vmul.f32 %v7067_v45, %v7035_v61  ;;  %vm6883_vm12 = vcmp.gt.f32.partialorder %v14608_v17, 0.0  ;;  %v14685_v8 = vadd.f32 %v6835_v32, %v14597_v26 }
 0x7fc   : > { %v14688_v6 = vadd.f32 %v6837_v13, %v14597_v26  ;;  %v7342_v14 = vmul.f32 %v8019_v22, %v7037_v48  ;;  %vm6880_vm7 = vcmp.gt.f32.partialorder %v14589_v18, 0.0  ;;  %10003 = vpow2.f32 %v6962_v51  ;;  %7373 = vadd.xlane.f32.xlu0 %v7372_v37  ;;  %v9996_v15 = vpop.eup %9995 }
 0x7fd   : > { %v6966_v56 = vmul.f32 1.442695, %v6918_v24  ;;  %v6919_v31 = vmin.f32 %v14681_v20, 0.0  ;;  %v7340_v55 = vmul.f32 %v8017_v50, %v7035_v61  ;;  %v14698_v26 = vsel %vm6876_vm6, %v14573_v58, %v7986_v35  ;;  %v8021_v35 = vld [vmem:[%s15253_s6 + $0x148] sm:$0xff]  ;;  %v8023_v50 = vld [vmem:[%s15253_s6 + $0x158] sm:$0xff] }
 0x7fe   : > { %v14700_v46 = vmul.f32 %v7069_v57, %v7037_v48  ;;  %v6920_v59 = vmin.f32 %v14685_v8, 0.0  ;;  %v14709_v27 = vsel %vm6878_vm10, %v14581_v10, %v7988_v21  ;;  %v7039_v58 = vsel %vm6879_vm15, %v14584_v2, %v7989_v28  ;;  %v5336_v21 = vpop.permute.xlu1 %5335  ;;  %v7073_v28 = vld [vmem:[%s15253_s6 + $0x58] sm:$0xff] }
 0x7ff   : > { %v6841_v63 = vpop.f32.mrb[52].mxu0  ;;  %v7991_v11 = vadd.f32 -1.0, %v9994_v33  ;;  %vm6882_vm14 = vcmp.gt.f32.partialorder %v14601_v42, 0.0  ;;  %v7098_v49 = vmul.f32 %v7066_v4, %v14654_v36  ;;  %10005 = vpow2.f32 %v6966_v56  ;;  %v7075_v4 = vld [vmem:[%s15253_s6 + $0x68] sm:$0xff] }
 0x800   : > { %v6843_v44 = vpop.f32.mrb[53].mxu0  ;;  %v6968_v32 = vmul.f32 1.442695, %v6919_v31  ;;  %v6970_v60 = vmul.f32 1.442695, %v6920_v59  ;;  %v6921_v10 = vmin.f32 %v14688_v6, 0.0  ;;  %v7341_v2 = vmul.f32 %v8018_v23, %v14698_v26 }
 0x801   : > { %v6845_v29 = vpop.f32.mrb[54].mxu0  ;;  %v9998_v54 = vpop.eup %9997  ;;  %v7135_v13 = vsel %vm7126_vm1, %v7099_v3, 0.0  ;;  %v7379_v61 = vsel %vm7126_vm1, %v7342_v14, 0.0  ;;  %v7990_v41 = vadd.f32 -1.0, %v9996_v15  ;;  %v14726_v25 = vmul.f32 %v7071_v19, %v7039_v58 }
 0x802   : > { %v6847_v9 = vpop.f32.mrb[55].mxu0  ;;  %v10000_v38 = vpop.eup %9999  ;;  %v7993_v16 = vadd.f32 -1.0, %v9998_v54  ;;  %10007 = vpow2.f32 %v6968_v32  ;;  %v6972_v45 = vmul.f32 1.442695, %v6921_v10  ;;  %v7136_v51 = vadd.f32 %v7135_v13, %v7098_v49 }
 0x803   : > { %v7041_v48 = vsel %vm6881_vm11, %v14595_v47, %v7991_v11  ;;  %vm6885_vm13 = vcmp.gt.f32.partialorder %v14636_v43, 0.0  ;;  %10009 = vpow2.f32 %v6970_v60  ;;  %v7380_v22 = vadd.f32 %v7379_v61, %v7341_v2 }
 0x804   : > { %v7992_v57 = vadd.f32 -1.0, %v10000_v38  ;;  %10011 = vpow2.f32 %v6972_v45  ;;  %7137 = vadd.xlane.f32.xlu1 %v7136_v51  ;;  %v7339_v37 = vmul.f32 %v8016_v34, %v14654_v36  ;;  %v7375_v47 = vsel %vm7126_vm1, %v7340_v55, 0.0  ;;  %v10002_v33 = vpop.eup %10001 }
 0x805   : > { %v14748_v3 = vsel %vm6883_vm12, %v14608_v17, %v7993_v16  ;;  %7381 = vadd.xlane.f32.xlu0 %v7380_v22  ;;  %v14753_v14 = vadd.f32 %v6841_v63, %v5331_v62  ;;  %v14755_v56 = vadd.f32 %v6843_v44, %v5331_v62  ;;  %v14757_v36 = vadd.f32 %v6845_v29, %v5336_v21  ;;  %v7068_v63 = vld [vmem:[%s15253_s6 + $0x30] sm:$0xff] }
 0x806   : > { %v7344_v15 = vmul.f32 %v8021_v35, %v7039_v58  ;;  %v14764_v55 = vsel %vm6880_vm7, %v14589_v18, %v7990_v41  ;;  %vm6884_vm0 = vcmp.gt.f32.partialorder %v14634_v39, 0.0  ;;  %v7376_v17 = vadd.f32 %v7375_v47, %v7339_v37  ;;  %v10004_v23 = vpop.eup %10003  ;;  %v7070_v58 = vld [vmem:[%s15253_s6 + $0x40] sm:$0xff] }
 0x807   : > { %v14743_v24 = vpop.f32.mrb[64].mxu0  ;;  %v14767_v59 = vadd.f32 %v6847_v9, %v5336_v21  ;;  %v7105_v29 = vmul.f32 %v7073_v28, %v7041_v48  ;;  %v14774_v54 = vmul.f32 %v8023_v50, %v7041_v48  ;;  %vm6887_vm2 = vcmp.gt.f32.partialorder %v14681_v20, 0.0  ;;  %v8025_v48 = vld [vmem:[%s15253_s6 + $0x168] sm:$0xff] }
 0x808   : > { %v14759_v31 = vpop.f32.mrb[65].mxu0  ;;  %v6922_v18 = vmin.f32 %v14753_v14, 0.0  ;;  %v14786_v49 = vsel %vm6882_vm14, %v14601_v42, %v7992_v57  ;;  %v14789_v9 = vmul.f32 %v7075_v4, %v14748_v3  ;;  %v7995_v19 = vadd.f32 -1.0, %v10002_v33  ;;  %7377 = vadd.xlane.f32.xlu1 %v7376_v17  ;;  %v8020_v42 = vld [vmem:[%s15253_s6 + $0x140] sm:$0xff]  ;;  %v7077_v57 = vld [vmem:[%s15253_s6 + $0x78] sm:$0xff] }
 0x809   : > { %v14772_v44 = vpop.f32.mrb[66].mxu0  ;;  %v6923_v32 = vmin.f32 %v14755_v56, 0.0  ;;  %vm6886_vm3 = vcmp.gt.f32.partialorder %v14664_v12, 0.0  ;;  %v6924_v10 = vmin.f32 %v14757_v36, 0.0  ;;  %v6925_v38 = vmin.f32 %v14767_v59, 0.0  ;;  %v10006_v13 = vpop.eup %10005 }
 0x80a   : > { %v14781_v11 = vpop.f32.mrb[67].mxu0  ;;  %v6974_v60 = vmul.f32 1.442695, %v6922_v18  ;;  %v7100_v16 = vmul.f32 %v7068_v63, %v14698_v26  ;;  %v7994_v2 = vadd.f32 -1.0, %v10004_v23  ;;  %v7139_v34 = vsel %vm7126_vm1, %v14700_v46, 0.0  ;;  %v7072_v26 = vld [vmem:[%s15253_s6 + $0x50] sm:$0xff] }
 0x80b   : > { %v6976_v61 = vmul.f32 1.442695, %v6923_v32  ;;  %v7102_v41 = vmul.f32 %v7070_v58, %v14709_v27  ;;  %vm6888_vm4 = vcmp.gt.f32.partialorder %v14685_v8, 0.0  ;;  %v6978_v45 = vmul.f32 1.442695, %v6924_v10 }
 0x80c   : > { %10013 = vpow2.f32 %v6974_v60  ;;  %v6980_v51 = vmul.f32 1.442695, %v6925_v38  ;;  %v7140_v62 = vadd.f32 %v7139_v34, %v7100_v16  ;;  %v10008_v35 = vpop.eup %10007  ;;  %v7045_v46 = vsel %vm6885_vm13, %v14636_v43, %v7995_v19 }
 0x80d   : > { %vm6889_vm5 = vcmp.gt.f32.partialorder %v14688_v6, 0.0  ;;  %10015 = vpow2.f32 %v6976_v61  ;;  %v7143_v22 = vsel %vm7126_vm1, %v14726_v25, 0.0  ;;  %v7343_v21 = vmul.f32 %v8020_v42, %v14709_v27  ;;  %v10010_v50 = vpop.eup %10009  ;;  %v8027_v27 = vld [vmem:[%s15253_s6 + $0x178] sm:$0xff]  ;;  %v8022_v42 = vld [vmem:[%s15253_s6 + $0x150] sm:$0xff] }
 0x80e   : > { %v7997_v37 = vadd.f32 -1.0, %v10008_v35  ;;  %10017 = vpow2.f32 %v6978_v45  ;;  %7141 = vadd.xlane.f32.xlu1 %v7140_v62  ;;  %v7144_v47 = vadd.f32 %v7143_v22, %v7102_v41  ;;  %v7383_v43 = vsel %vm7126_vm1, %v7344_v15, 0.0  ;;  %v10012_v4 = vpop.eup %10011  ;;  %v8026_v41 = vld [vmem:[%s15253_s6 + $0x170] sm:$0xff] }
 0x80f   : > { %v14816_v28 = vpop.f32.mrb[68].mxu0  ;;  %v7996_v25 = vadd.f32 -1.0, %v10006_v13  ;;  %10019 = vpow2.f32 %v6980_v51  ;;  %v7384_v17 = vadd.f32 %v7383_v43, %v7343_v21  ;;  %v7104_v63 = vmul.f32 %v7072_v26, %v14764_v55 }
 0x810   : > { %v14822_v33 = vpop.f32.mrb[69].mxu0  ;;  %v14831_v18 = vmul.f32 %v8025_v48, %v14748_v3  ;;  %v14836_v15 = vsel %vm6884_vm0, %v14634_v39, %v7994_v2  ;;  %7145 = vadd.xlane.f32.xlu0 %v7144_v47  ;;  %v7147_v58 = vsel %vm7126_vm1, %v7105_v29, 0.0  ;;  %v14841_v19 = vadd.f32 %v14537_v52, %v14743_v24  ;;  %v7079_v39 = vld [vmem:[%s15253_s6 + $0x88] sm:$0xff] }
 0x811   : > { %v14828_v23 = vpop.f32.mrb[70].mxu0  ;;  %v14845_v60 = vmul.f32 %v7077_v57, %v7045_v46  ;;  %v7047_v3 = vsel %vm6887_vm2, %v14681_v20, %v7997_v37  ;;  %v8029_v29 = vld [vmem:[%s15253_s6 + $0x188] sm:$0xff]  ;;  %v7998_v10 = vadd.f32 -1.0, %v10010_v50  ;;  %vm6891_vm9 = vcmp.gt.f32.partialorder %v14755_v56, 0.0  ;;  %v8031_v50 = vld [vmem:[%s15253_s6 + $0x198] sm:$0xff] }
 0x812   : > { %v14843_v32 = vpop.f32.mrb[71].mxu0  ;;  %v7148_v52 = vadd.f32 %v7147_v58, %v7104_v63  ;;  %v7350_v24 = vmul.f32 %v8027_v27, %v7045_v46  ;;  %v7999_v38 = vadd.f32 -1.0, %v10012_v4  ;;  %7385 = vadd.xlane.f32.xlu1 %v7384_v17  ;;  %v6926_v16 = vmin.f32 %v14841_v19, 0.0  ;;  %v7083_v17 = vld [vmem:[%s15253_s6 + $0xa8] sm:$0xff] }
 0x813   : > { %v14860_v20 = vadd.f32 %v14541_v40, %v14759_v31  ;;  %v14868_v13 = vsel %vm6886_vm3, %v14664_v12, %v7996_v25  ;;  %vm6893_vm8 = vcmp.gt.f32.partialorder %v14767_v59, 0.0  ;;  %v14873_v2 = vadd.f32 %v14543_v7, %v14772_v44  ;;  %v8033_v63 = vld [vmem:[%s15253_s6 + $0x1a8] sm:$0xff] }
 0x814   : > { %v14877_v61 = vadd.f32 %v14545_v53, %v14781_v11  ;;  %v14879_v40 = vmul.f32 %v7079_v39, %v7047_v3  ;;  %v14881_v31 = vmul.f32 %v8029_v29, %v7047_v3  ;;  %vm6890_vm6 = vcmp.gt.f32.partialorder %v14753_v14, 0.0  ;;  %7149 = vadd.xlane.f32.xlu0 %v7148_v52 }
 0x815   : > { %v6982_v34 = vmul.f32 1.442695, %v6926_v16  ;;  %v6927_v12 = vmin.f32 %v14860_v20, 0.0  ;;  %v14891_v7 = vsel %vm6888_vm4, %v14685_v8, %v7998_v10  ;;  %vm6892_vm10 = vcmp.gt.f32.partialorder %v14757_v36, 0.0  ;;  %v7074_v8 = vld [vmem:[%s15253_s6 + $0x60] sm:$0xff] }
 0x816   : > { %v6928_v53 = vmin.f32 %v14873_v2, 0.0  ;;  %v6929_v44 = vmin.f32 %v14877_v61, 0.0  ;;  %v7345_v11 = vmul.f32 %v8022_v42, %v14764_v55  ;;  %v10014_v45 = vpop.eup %10013  ;;  %v7049_v51 = vsel %vm6889_vm5, %v14688_v6, %v7999_v38  ;;  %v7081_v6 = vld [vmem:[%s15253_s6 + $0x98] sm:$0xff] }
 0x817   : > { %10021 = vpow2.f32 %v6982_v34  ;;  %v6984_v62 = vmul.f32 1.442695, %v6927_v12  ;;  %v7387_v26 = vsel %vm7126_vm1, %v14774_v54, 0.0  ;;  %v10016_v35 = vpop.eup %10015  ;;  %v7349_v55 = vmul.f32 %v8026_v41, %v14836_v15 }
 0x818   : > { %v6986_v48 = vmul.f32 1.442695, %v6928_v53  ;;  %v6988_v46 = vmul.f32 1.442695, %v6929_v44  ;;  %v7388_v22 = vadd.f32 %v7387_v26, %v7345_v11  ;;  %v10018_v21 = vpop.eup %10017  ;;  %v8000_v54 = vadd.f32 -1.0, %v10014_v45 }
 0x819   : > { %v8001_v57 = vadd.f32 -1.0, %v10016_v35  ;;  %10023 = vpow2.f32 %v6984_v62  ;;  %v7395_v37 = vsel %vm7126_vm1, %v7350_v24, 0.0  ;;  %v10020_v47 = vpop.eup %10019  ;;  %v8002_v43 = vadd.f32 -1.0, %v10018_v21 }
 0x81a   : > { %10025 = vpow2.f32 %v6986_v48  ;;  %7389 = vadd.xlane.f32.xlu0 %v7388_v22  ;;  %v7396_v4 = vadd.f32 %v7395_v37, %v7349_v55  ;;  %v7106_v27 = vmul.f32 %v7074_v8, %v14786_v49  ;;  %v8003_v58 = vadd.f32 -1.0, %v10020_v47  ;;  %v7076_v48 = vld [vmem:[%s15253_s6 + $0x70] sm:$0xff] }
 0x81b   : > { %v7051_v25 = vsel %vm6891_vm9, %v14755_v56, %v8001_v57  ;;  %10027 = vpow2.f32 %v6988_v46  ;;  %v7151_v3 = vsel %vm7126_vm1, %v14789_v9, 0.0  ;;  %v14925_v39 = vmul.f32 %v7081_v6, %v7049_v51  ;;  %v7085_v56 = vld [vmem:[%s15253_s6 + $0xb8] sm:$0xff]  ;;  %v7080_v47 = vld [vmem:[%s15253_s6 + $0x90] sm:$0xff] }
 0x81c   : > { %v14927_v29 = vmul.f32 %v8031_v50, %v7049_v51  ;;  %vm6894_vm15 = vcmp.gt.f32.partialorder %v14841_v19, 0.0  ;;  %7397 = vadd.xlane.f32.xlu1 %v7396_v4  ;;  %v7152_v10 = vadd.f32 %v7151_v3, %v7106_v27  ;;  %v7053_v52 = vsel %vm6893_vm8, %v14767_v59, %v8003_v58  ;;  %v8035_v9 = vld [vmem:[%s15253_s6 + $0x1b8] sm:$0xff]  ;;  %v7078_v59 = vld [vmem:[%s15253_s6 + $0x80] sm:$0xff]  ;;  %v7087_v50 = vld [vmem:[%s15253_s6 + $0xc8] sm:$0xff] }
 0x81d   : > { %vm6895_vm11 = vcmp.gt.f32.partialorder %v14860_v20, 0.0  ;;  %v14942_v24 = vadd.f32 %v14547_v5, %v14816_v28  ;;  %v14946_v38 = vadd.f32 %v14549_v0, %v14822_v33  ;;  %v14950_v16 = vadd.f32 %v14551_v30, %v14828_v23  ;;  %v8024_v30 = vld [vmem:[%s15253_s6 + $0x160] sm:$0xff]  ;;  %v7089_v27 = vld [vmem:[%s15253_s6 + $0xd8] sm:$0xff] }
 0x81e   : > { %v14958_v42 = vsel %vm6890_vm6, %v14753_v14, %v8000_v54  ;;  %v14960_v34 = vmul.f32 %v7083_v17, %v7051_v25  ;;  %v14962_v5 = vmul.f32 %v8033_v63, %v7051_v25  ;;  %vm6896_vm12 = vcmp.gt.f32.partialorder %v14873_v2, 0.0  ;;  %7153 = vadd.xlane.f32.xlu0 %v7152_v10  ;;  %v8037_v54 = vld [vmem:[%s15253_s6 + $0x1c8] sm:$0xff]  ;;  %v7084_v17 = vld [vmem:[%s15253_s6 + $0xb0] sm:$0xff] }
 0x81f   : > { %v14967_v0 = vadd.f32 %v14553_v1, %v14843_v32  ;;  %v14975_v14 = vsel %vm6892_vm10, %v14757_v36, %v8002_v43  ;;  %v14977_v28 = vmul.f32 %v7085_v56, %v7053_v52  ;;  %vm6897_vm7 = vcmp.gt.f32.partialorder %v14877_v61, 0.0  ;;  %v8028_v36 = vld [vmem:[%s15253_s6 + $0x180] sm:$0xff]  ;;  %v8030_v56 = vld [vmem:[%s15253_s6 + $0x190] sm:$0xff] }
 0x820   : > { %v6930_v33 = vmin.f32 %v14942_v24, 0.0  ;;  %v6931_v23 = vmin.f32 %v14946_v38, 0.0  ;;  %v14982_v12 = vmul.f32 %v8035_v9, %v7053_v52  ;;  %v6932_v1 = vmin.f32 %v14950_v16, 0.0  ;;  %v8034_v9 = vld [vmem:[%s15253_s6 + $0x1b0] sm:$0xff] }
 0x821   : > { %v6933_v32 = vmin.f32 %v14967_v0, 0.0  ;;  %v7110_v41 = vmul.f32 %v7078_v59, %v14868_v13  ;;  %v10022_v53 = vpop.eup %10021  ;;  %v7159_v45 = vsel %vm7126_vm1, %v14879_v40, 0.0  ;;  %v7347_v51 = vmul.f32 %v8024_v30, %v14786_v49 }
 0x822   : > { %v6990_v44 = vmul.f32 1.442695, %v6930_v33  ;;  %v6992_v11 = vmul.f32 1.442695, %v6931_v23  ;;  %v8004_v62 = vadd.f32 -1.0, %v10022_v53  ;;  %v7391_v22 = vsel %vm7126_vm1, %v14831_v18, 0.0 }
 0x823   : > { %v6994_v26 = vmul.f32 1.442695, %v6932_v1  ;;  %v6996_v8 = vmul.f32 1.442695, %v6933_v32  ;;  %v7160_v35 = vadd.f32 %v7159_v45, %v7110_v41  ;;  %v10024_v46 = vpop.eup %10023  ;;  %v7351_v55 = vmul.f32 %v8028_v36, %v14868_v13  ;;  %v8032_v23 = vld [vmem:[%s15253_s6 + $0x1a0] sm:$0xff] }
 0x824   : > { %10029 = vpow2.f32 %v6990_v44  ;;  %v7399_v40 = vsel %vm7126_vm1, %v14881_v31, 0.0  ;;  %v10026_v21 = vpop.eup %10025  ;;  %v7054_v49 = vsel %vm6894_vm15, %v14841_v19, %v8004_v62  ;;  %v8005_v6 = vadd.f32 -1.0, %v10024_v46  ;;  %v7082_v19 = vld [vmem:[%s15253_s6 + $0xa0] sm:$0xff] }
 0x825   : > { %10031 = vpow2.f32 %v6992_v11  ;;  %7161 = vadd.xlane.f32.xlu1 %v7160_v35  ;;  %v7392_v18 = vadd.f32 %v7391_v22, %v7347_v51  ;;  %v10028_v13 = vpop.eup %10027  ;;  %v8006_v57 = vadd.f32 -1.0, %v10026_v21  ;;  %v7400_v31 = vadd.f32 %v7399_v40, %v7351_v55  ;;  %v7088_v51 = vld [vmem:[%s15253_s6 + $0xd0] sm:$0xff] }
 0x826   : > { %10033 = vpow2.f32 %v6994_v26  ;;  %v7108_v37 = vmul.f32 %v7076_v48, %v14836_v15  ;;  %v7055_v43 = vsel %vm6895_vm11, %v14860_v20, %v8005_v6  ;;  %v8007_v4 = vadd.f32 -1.0, %v10028_v13  ;;  %v8039_v15 = vld [vmem:[%s15253_s6 + $0x1d8] sm:$0xff]  ;;  %v7091_v6 = vld [vmem:[%s15253_s6 + $0xe8] sm:$0xff] }
 0x827   : > { %10035 = vpow2.f32 %v6996_v8  ;;  %7393 = vadd.xlane.f32.xlu0 %v7392_v18  ;;  %v7155_v25 = vsel %vm7126_vm1, %v14845_v60, 0.0  ;;  %v7119_v63 = vmul.f32 %v7087_v50, %v7055_v43  ;;  %v7360_v20 = vmul.f32 %v8037_v54, %v7055_v43  ;;  %v8041_v50 = vld [vmem:[%s15253_s6 + $0x1e8] sm:$0xff]  ;;  %v8040_v43 = vld [vmem:[%s15253_s6 + $0x1e0] sm:$0xff] }
 0x828   : > { %v7056_v58 = vsel %vm6896_vm12, %v14873_v2, %v8006_v57  ;;  %vm6898_vm14 = vcmp.gt.f32.partialorder %v14942_v24, 0.0  ;;  %v7156_v3 = vadd.f32 %v7155_v25, %v7108_v37  ;;  %v7057_v60 = vsel %vm6897_vm7, %v14877_v61, %v8007_v4 }
 0x829   : > { %vm6899_vm13 = vcmp.gt.f32.partialorder %v14946_v38, 0.0  ;;  %7401 = vadd.xlane.f32.xlu1 %v7400_v31  ;;  %v7114_v10 = vmul.f32 %v7082_v19, %v14958_v42  ;;  %v7167_v52 = vsel %vm7126_vm1, %v14960_v34, 0.0  ;;  %v7112_v2 = vmul.f32 %v7080_v47, %v14891_v7  ;;  %v8036_v34 = vld [vmem:[%s15253_s6 + $0x1c0] sm:$0xff] }
 0x82a   : > { %v7121_v59 = vmul.f32 %v7089_v27, %v7057_v60  ;;  %v7362_v30 = vmul.f32 %v8039_v15, %v7057_v60  ;;  %v7163_v33 = vsel %vm7126_vm1, %v14925_v39, 0.0  ;;  %v7116_v61 = vmul.f32 %v7084_v17, %v14975_v14  ;;  %v7086_v39 = vld [vmem:[%s15253_s6 + $0xc0] sm:$0xff]  ;;  %v7093_v27 = vld [vmem:[%s15253_s6 + $0xf8] sm:$0xff] }
 0x82b   : > { %7157 = vadd.xlane.f32.xlu0 %v7156_v3  ;;  %v7168_v1 = vadd.f32 %v7167_v52, %v7114_v10  ;;  %v7164_v32 = vadd.f32 %v7163_v33, %v7112_v2  ;;  %v7171_v41 = vsel %vm7126_vm1, %v14977_v28, 0.0  ;;  %v7353_v36 = vmul.f32 %v8030_v56, %v14891_v7  ;;  %v7090_v47 = vld [vmem:[%s15253_s6 + $0xe0] sm:$0xff]  ;;  %v8043_v15 = vld [vmem:[%s15253_s6 + $0x1f8] sm:$0xff] }
 0x82c   : > { %v7172_v53 = vadd.f32 %v7171_v41, %v7116_v61  ;;  %v7403_v44 = vsel %vm7126_vm1, %v14927_v29, 0.0  ;;  %v7357_v11 = vmul.f32 %v8034_v9, %v14975_v14  ;;  %v7411_v45 = vsel %vm7126_vm1, %v14982_v12, 0.0  ;;  %v8038_v29 = vld [vmem:[%s15253_s6 + $0x1d0] sm:$0xff] }
 0x82d   : > { %7169 = vadd.xlane.f32.xlu1 %v7168_v1  ;;  %v7404_v28 = vadd.f32 %v7403_v44, %v7353_v36  ;;  %v7355_v7 = vmul.f32 %v8032_v23, %v14958_v42  ;;  %v7407_v62 = vsel %vm7126_vm1, %v14962_v5, 0.0  ;;  %v7359_v26 = vmul.f32 %v8036_v34, %v7054_v49 }
 0x82e   : > { %v10030_v14 = vpop.eup %10029  ;;  %v7412_v8 = vadd.f32 %v7411_v45, %v7357_v11  ;;  %v7415_v12 = vsel %vm7126_vm1, %v7360_v20, 0.0  ;;  %v7118_v35 = vmul.f32 %v7086_v39, %v7054_v49  ;;  %v7175_v48 = vsel %vm7126_vm1, %v7119_v63, 0.0 }
 0x82f   : > { %v10032_v46 = vpop.eup %10031  ;;  %v8008_v22 = vadd.f32 -1.0, %v10030_v14  ;;  %7165 = vadd.xlane.f32.xlu0 %v7164_v32  ;;  %v7408_v55 = vadd.f32 %v7407_v62, %v7355_v7  ;;  %v7416_v42 = vadd.f32 %v7415_v12, %v7359_v26  ;;  %v7120_v40 = vmul.f32 %v7088_v51, %v7056_v58 }
 0x830   : > { %v10034_v21 = vpop.eup %10033  ;;  %v8009_v5 = vadd.f32 -1.0, %v10032_v46  ;;  %v7176_v54 = vadd.f32 %v7175_v48, %v7118_v35  ;;  %v7179_v49 = vsel %vm7126_vm1, %v7121_v59, 0.0  ;;  %v7361_v18 = vmul.f32 %v8038_v29, %v7056_v58  ;;  %v8042_v58 = vld [vmem:[%s15253_s6 + $0x1f0] sm:$0xff] }
 0x831   : > { %v10036_v13 = vpop.eup %10035  ;;  %v7058_v57 = vsel %vm6898_vm14, %v14942_v24, %v8008_v22  ;;  %v8010_v31 = vadd.f32 -1.0, %v10034_v21  ;;  %7173 = vadd.xlane.f32.xlu1 %v7172_v53  ;;  %v7180_v37 = vadd.f32 %v7179_v49, %v7120_v40  ;;  %v7419_v19 = vsel %vm7126_vm1, %v7362_v30, 0.0 }
 0x832   : > { %v7059_v4 = vsel %vm6899_vm13, %v14946_v38, %v8009_v5  ;;  %vm6900_vm0 = vcmp.gt.f32.partialorder %v14950_v16, 0.0  ;;  %v8011_v24 = vadd.f32 -1.0, %v10036_v13  ;;  %v7420_v25 = vadd.f32 %v7419_v19, %v7361_v18  ;;  %v7092_v38 = vld [vmem:[%s15253_s6 + $0xf0] sm:$0xff] }
 0x833   : > { %v7123_v17 = vmul.f32 %v7091_v6, %v7059_v4  ;;  %v7364_v63 = vmul.f32 %v8041_v50, %v7059_v4  ;;  %v7060_v20 = vsel %vm6900_vm0, %v14950_v16, %v8010_v31  ;;  %vm6901_vm2 = vcmp.gt.f32.partialorder %v14967_v0, 0.0  ;;  %7405 = vadd.xlane.f32.xlu0 %v7404_v28 }
 0x834   : > { %v7061_v3 = vsel %vm6901_vm2, %v14967_v0, %v8011_v24  ;;  %v7122_v56 = vmul.f32 %v7090_v47, %v7058_v57  ;;  %v7363_v60 = vmul.f32 %v8040_v43, %v7058_v57  ;;  %v7124_v9 = vmul.f32 %v7092_v38, %v7060_v20 }
 0x835   : > { %v7125_v10 = vmul.f32 %v7093_v27, %v7061_v3  ;;  %v7366_v52 = vmul.f32 %v8043_v15, %v7061_v3  ;;  %7413 = vadd.xlane.f32.xlu1 %v7412_v8  ;;  %v7183_v16 = vsel %vm7126_vm1, %v7123_v17, 0.0  ;;  %v7423_v2 = vsel %vm7126_vm1, %v7364_v63, 0.0 }
 0x836   : > { %v7184_v59 = vadd.f32 %v7183_v16, %v7122_v56  ;;  %v7424_v30 = vadd.f32 %v7423_v2, %v7363_v60  ;;  %v7365_v33 = vmul.f32 %v8042_v58, %v7060_v20  ;;  %v7207_v35 = vlaneseq }
 0x837   : > { %7409 = vadd.xlane.f32.xlu0 %v7408_v55  ;;  %v7187_v61 = vsel %vm7126_vm1, %v7125_v10, 0.0  ;;  %v7427_v23 = vsel %vm7126_vm1, %v7366_v52, 0.0  ;;  %vm7218_vm1 = vcmask 130112   ;;  %vm7225_vm3 = vcmask 195712  }
 0x838   : > { %v7188_v34 = vadd.f32 %v7187_v61, %v7124_v9  ;;  %v7428_v0 = vadd.f32 %v7427_v23, %v7365_v33  ;;  %v7208_v22 = vand.u32 127, %v7207_v35  ;;  %v7210_v21 = vshrl.u32 %v7207_v35, 7 }
 0x839   : > { %7417 = vadd.xlane.f32.xlu1 %v7416_v42  ;;  %vm7232_vm4 = vcmask 261312   ;;  %vm7291_vm5 = vcmask 1041409   ;;  %vm7293_vm9 = vcmask 1042434   ;;  %vm7295_vm8 = vcmask 1043459  }
 0x83a   : > { %v7213_v42 = vadd.s32 4294967288, %v7208_v22  ;;  %v7220_v6 = vadd.s32 4294967280, %v7208_v22  ;;  %v7227_v49 = vadd.s32 4294967272, %v7208_v22  ;;  %v15150_v18 = vsub.s32 %v7208_v22, %v7210_v21 }
 0x83b   : > { %7177 = vadd.xlane.f32.xlu0 %v7176_v54  ;;  %vm7298_vm6 = vcmask 257024   ;;  %vm7530_vm10 = vcmask 7168   ;;  %vm7540_vm15 = vcmask 11264  }
 0x83c   : > { %v15146_v50 = vsub.s32 %v7213_v42, %v7210_v21  ;;  %v15154_v57 = vsub.s32 %v7220_v6, %v7210_v21  ;;  %v15157_v19 = vsub.s32 %v7227_v49, %v7210_v21 }
 0x83d   : > { %7181 = vadd.xlane.f32.xlu1 %v7180_v37 }
 0x83f   : > { %7421 = vadd.xlane.f32.xlu0 %v7420_v25 }
 0x841   : > { %7189 = vadd.xlane.f32.xlu1 %v7188_v34 }
 0x843   : > { %7185 = vadd.xlane.f32.xlu0 %v7184_v59 }
 0x847   : > { %7425 = vadd.xlane.f32.xlu0 %v7424_v30 }
 0x84b   : > { %7429 = vadd.xlane.f32.xlu0 %v7428_v0 }
 0x882   : > { %v15120_v1 = vpop.xlane.xlu1 %7369 }
 0x883   : > { %v7450_v20 = vrot.slane %v15120_v1, %v15150_v18 }
 0x885   : > { %v7130_v32 = vpop.xlane.xlu0 %7129 }
 0x886   : > { %v7134_v41 = vpop.xlane.xlu1 %7133  ;;  %v7212_v4 = vrot.slane %v7130_v32, %v15150_v18 }
 0x887   : > { %v7217_v31 = vrot.slane %v7134_v41, %v15146_v50 }
 0x889   : > { %v15122_v36 = vpop.xlane.xlu0 %7373  ;;  %v7219_v38 = vsel %vm7218_vm1, %v7217_v31, %v7212_v4 }
 0x88a   : > { %v7454_v56 = vrot.slane %v15122_v36, %v15146_v50 }
 0x891   : > { %v15124_v39 = vpop.xlane.xlu1 %7137 }
 0x892   : > { %v15126_v53 = vpop.xlane.xlu0 %7381  ;;  %v7224_v15 = vrot.slane %v15124_v39, %v15154_v57 }
 0x893   : > { %v7464_v31 = vrot.slane %v15126_v53, %v15157_v19 }
 0x894   : > { %v7226_v33 = vsel %vm7225_vm3, %v7224_v15, %v7219_v38 }
 0x895   : > { %v15128_v44 = vpop.xlane.xlu1 %7377 }
 0x896   : > { %v7459_v39 = vrot.slane %v15128_v44, %v15154_v57 }
 0x89b   : > { %v15130_v51 = vpop.xlane.xlu1 %7141 }
 0x89c   : > { %v7231_v16 = vrot.slane %v15130_v51, %v15157_v19 }
 0x89d   : > { %v7146_v11 = vpop.xlane.xlu0 %7145 }
 0x89e   : > { %v7237_v25 = vrot.slane %v7146_v11, %v15150_v18 }
 0x89f   : > { %v15134_v7 = vpop.xlane.xlu1 %7385 }
 0x8a0   : > { %v7469_v61 = vrot.slane %v15134_v7, %v15150_v18 }
 0x8a1   : > { %v7150_v45 = vpop.xlane.xlu0 %7149 }
 0x8a2   : > { %v7241_v47 = vrot.slane %v7150_v45, %v15146_v50 }
 0x8a4   : > { %v7242_v60 = vsel %vm7218_vm1, %v7241_v47, %v7237_v25  ;;  %v8044_v25 = vld [vmem:[%s15254_s7] ss:$0 sm:$0xff] }
 0x8a7   : > { %v15132_v28 = vpop.xlane.xlu0 %7389 }
 0x8a8   : > { %v7473_v2 = vrot.slane %v15132_v28, %v15146_v50  ;;  %v7233_v28 = vsel %vm7232_vm4, %v7231_v16, %v7226_v33 }
 0x8a9   : > { %v15136_v62 = vpop.xlane.xlu1 %7397 }
 0x8aa   : > { %v7474_v7 = vsel %vm7218_vm1, %v7473_v2, %v7469_v61  ;;  %v7483_v42 = vrot.slane %v15136_v62, %v15157_v19 }
 0x8ab   : > { %v7154_v26 = vpop.xlane.xlu0 %7153 }
 0x8ac   : > { %v7246_v24 = vrot.slane %v7154_v26, %v15154_v57 }
 0x8ae   : > { %v7247_v9 = vsel %vm7225_vm3, %v7246_v24, %v7242_v60 }
 0x8b2   : > { %v7162_v29 = vpop.xlane.xlu1 %7161 }
 0x8b3   : > { %v7256_v17 = vrot.slane %v7162_v29, %v15150_v18 }
 0x8b4   : > { %v15138_v14 = vpop.xlane.xlu0 %7393 }
 0x8b5   : > { %v7478_v23 = vrot.slane %v15138_v14, %v15154_v57  ;;  %v7455_v14 = vsel %vm7218_vm1, %v7454_v56, %v7450_v20 }
 0x8b6   : > { %v15140_v8 = vpop.xlane.xlu1 %7401 }
 0x8b7   : > { %v7488_v26 = vrot.slane %v15140_v8, %v15150_v18  ;;  %v7479_v44 = vsel %vm7225_vm3, %v7478_v23, %v7474_v7 }
 0x8b8   : > { %v7158_v12 = vpop.xlane.xlu0 %7157 }
 0x8b9   : > { %v7251_v63 = vrot.slane %v7158_v12, %v15157_v19 }
 0x8ba   : > { %v7170_v48 = vpop.xlane.xlu1 %7169 }
 0x8bb   : > { %v7265_v58 = vrot.slane %v7170_v48, %v15154_v57  ;;  %v7252_v34 = vsel %vm7232_vm4, %v7251_v63, %v7247_v9 }
 0x8bc   : > { %v7166_v46 = vpop.xlane.xlu0 %7165  ;;  %v7292_v35 = vsel %vm7291_vm5, %v7252_v34, %v7233_v28 }
 0x8bd   : > { %v7260_v43 = vrot.slane %v7166_v46, %v15146_v50 }
 0x8be   : > { %v7174_v55 = vpop.xlane.xlu1 %7173 }
 0x8bf   : > { %v7261_v10 = vsel %vm7218_vm1, %v7260_v43, %v7256_v17  ;;  %v7270_v52 = vrot.slane %v7174_v55, %v15157_v19 }
 0x8c0   : > { %v15142_v40 = vpop.xlane.xlu0 %7405  ;;  %v7266_v0 = vsel %vm7225_vm3, %v7265_v58, %v7261_v10 }
 0x8c1   : > { %v7492_v1 = vrot.slane %v15142_v40, %v15146_v50  ;;  %v7271_v11 = vsel %vm7232_vm4, %v7270_v52, %v7266_v0 }
 0x8c2   : > { %v15144_v5 = vpop.xlane.xlu1 %7413  ;;  %v7294_v8 = vsel %vm7293_vm9, %v7271_v11, %v7292_v35 }
 0x8c3   : > { %v7493_v48 = vsel %vm7218_vm1, %v7492_v1, %v7488_v26  ;;  %v7502_v46 = vrot.slane %v15144_v5, %v15157_v19 }
 0x8c4   : > { %v15148_v54 = vpop.xlane.xlu0 %7409 }
 0x8c5   : > { %v7497_v45 = vrot.slane %v15148_v54, %v15154_v57  ;;  %v7460_v54 = vsel %vm7225_vm3, %v7459_v39, %v7455_v14 }
 0x8c6   : > { %v15152_v13 = vpop.xlane.xlu1 %7417  ;;  %v7465_v43 = vsel %vm7232_vm4, %v7464_v31, %v7460_v54 }
 0x8c7   : > { %v7498_v40 = vsel %vm7225_vm3, %v7497_v45, %v7493_v48  ;;  %v7507_v62 = vrot.slane %v15152_v13, %v15150_v18 }
 0x8c8   : > { %v7178_v37 = vpop.xlane.xlu0 %7177 }
 0x8c9   : > { %v7275_v32 = vrot.slane %v7178_v37, %v15150_v18  ;;  %v7484_v37 = vsel %vm7232_vm4, %v7483_v42, %v7479_v44 }
 0x8ca   : > { %v7182_v27 = vpop.xlane.xlu1 %7181  ;;  %v7523_v53 = vsel %vm7291_vm5, %v7484_v37, %v7465_v43 }
 0x8cb   : > { %v7279_v59 = vrot.slane %v7182_v27, %v15146_v50 }
 0x8cc   : > { %v7422_v3 = vpop.xlane.xlu0 %7421 }
 0x8cd   : > { %v7280_v29 = vsel %vm7218_vm1, %v7279_v59, %v7275_v32  ;;  %v7511_v21 = vrot.slane %v7422_v3, %v15146_v50  ;;  %v7503_v50 = vsel %vm7232_vm4, %v7502_v46, %v7498_v40 }
 0x8ce   : > { %v7190_v30 = vpop.xlane.xlu1 %7189  ;;  %v7524_v15 = vsel %vm7293_vm9, %v7503_v50, %v7523_v53 }
 0x8cf   : > { %v7289_v41 = vrot.slane %v7190_v30, %v15157_v19  ;;  %v7512_v4 = vsel %vm7218_vm1, %v7511_v21, %v7507_v62 }
 0x8d0   : > { %v7186_v36 = vpop.xlane.xlu0 %7185 }
 0x8d1   : > { %v7284_v51 = vrot.slane %v7186_v36, %v15154_v57 }
 0x8d3   : > { %v7285_v12 = vsel %vm7225_vm3, %v7284_v51, %v7280_v29 }
 0x8d4   : > { %v7426_v22 = vpop.xlane.xlu0 %7425  ;;  %v7290_v55 = vsel %vm7232_vm4, %v7289_v41, %v7285_v12 }
 0x8d5   : > { %v7296_v6 = vsel %vm7295_vm8, %v7290_v55, %v7294_v8  ;;  %v7516_v49 = vrot.slane %v7426_v22, %v15154_v57 }
 0x8d6   : > { %v7299_v5 = vsel %vm7298_vm6, %v7296_v6, 0.0 }
 0x8d7   : > { %7300 = vadd.xlane.f32.xlu1 %v7299_v5  ;;  %v7517_v24 = vsel %vm7225_vm3, %v7516_v49, %v7512_v4 }
 0x8d8   : > { %v7430_v47 = vpop.xlane.xlu0 %7429 }
 0x8d9   : > { %v7521_v57 = vrot.slane %v7430_v47, %v15157_v19 }
 0x8db   : > { %v7522_v27 = vsel %vm7232_vm4, %v7521_v57, %v7517_v24 }
 0x8dc   : > { %v7525_v18 = vsel %vm7295_vm8, %v7522_v27, %v7524_v15 }
 0x8dd   : > { %v7527_v13 = vsel %vm7298_vm6, %v7525_v18, 0.0 }
 0x8de   : > { %7528 = vadd.xlane.f32.xlu0 %v7527_v13 }
 0x964   : > { %v7301_v19 = vpop.xlane.xlu1 %7300 }
 0x96b   : > { %v7529_v17 = vpop.xlane.xlu0 %7528 }
 0x96c   : > { %v7531_v63 = vsel %vm7530_vm10, %v7301_v19, %v7529_v17 }
 0x96d   : > { %v7539_v20 = vadd.f32 %v8044_v25, %v7531_v63 }
 0x96f   : > { %7541 = vst.msk [vmem:[%s303_s10] sm:$0xf] %vm7540_vm15, %v7539_v20 }
 0x970 PF: > { %s18_s27 = sadd.s32 1, %s10094_s27  }
 0x971   : > { %p15_p4 = scmp.ge.s32.totalorder %s18_s27, 4  }
 0x973   :  { %17 = sbr.rel (!%p15_p4) target bundleno = 1 (0x1), region = 83 }

</bundles_post_ra>
